<compile_context>
chip_gen: v7x
topology: tpu7x:2x2x1
jax: 0.10.0
libtpu: 0.0.40
codegen_flags: <defaults>
</compile_context>

<pallas_src>
import functools

import jax
import jax.numpy as jnp
from jax.experimental import pallas as pl
from jax.experimental.pallas import tpu as pltpu

N_HEADS = 8
NUM_LAYERS = 6
NORM_EPS = 1e-8
NEG_BIG = -10000000000.0   # masked_fill value used in the PyTorch code


def _norm(x):
    """PyTorch `Norm` with gamma=1, beta=0 (torch.var is unbiased: /(H-1))."""
    h = x.shape[-1]
    mu = jnp.mean(x, axis=-1, keepdims=True)
    var = jnp.sum((x - mu) ** 2, axis=-1, keepdims=True) * (1.0 / (h - 1))
    return (x - mu) * jax.lax.rsqrt(var + NORM_EPS)


def encoder_fused_kernel(x_ref, kmask_ref, npad_ref,
                         wqkv_ref, bqkv_ref, wo_ref, bo_ref,
                         w1_ref, b1_ref, w2_ref, b2_ref,
                         out_ref, *, num_layers, n_heads, bb, seq):
    """All `num_layers` Encoder_layers (+ outer residual) for one batch block."""
    L = seq
    H = x_ref.shape[-1]
    H3p = wqkv_ref.shape[-1]
    Hp = H3p // 3
    hd = Hp // n_heads
    R = bb * L

    s = x_ref[...].reshape(R, H)            # running residual stream
    npad = npad_ref[...].reshape(R, 1)      # 1.0 on real tokens, 0.0 on padding
    kmask = kmask_ref[...]                  # (bb, 1, L) additive key-pad mask

    out = s
    for li in range(num_layers):            # statically unrolled, weights resident
        # ---- fused Q|K|V projection: one (R,H) @ (H,3Hp) matmul --------------
        # (Q columns/bias are pre-scaled by 1/sqrt(d_k) at init time.)
        qkv = jnp.dot(s, wqkv_ref[li],
                      preferred_element_type=jnp.float32) + bqkv_ref[li]

        # ---- multi-head self-attention: all heads in one batched einsum ------
        a_rows = []
        for b in range(bb):                  # bb is tiny and static
            blk = qkv[b * L:(b + 1) * L]                     # (L, 3Hp)
            t = blk.T.reshape(3 * n_heads, hd, L)            # head-major
            t = jnp.swapaxes(t, 1, 2)                        # (3NH, L, hd)
            qh = t[:n_heads]                                 # (NH, L, hd)
            kh = t[n_heads:2 * n_heads]
            vh = t[2 * n_heads:]
            e = jnp.einsum('nqd,nkd->nqk', qh, kh,
                           preferred_element_type=jnp.float32)   # (NH, L, L)
            # additive -1e10 on padded keys == masked_fill(mask, -1e10) here,
            # since every row has at least one valid key.
            e = e + kmask[b]
            e = e - jnp.max(e, axis=-1, keepdims=True)
            p = jnp.exp(e)
            alpha = p * pl.reciprocal(jnp.sum(p, axis=-1, keepdims=True),
                                      approx=True)
            o = jnp.einsum('nqk,nkd->nqd', alpha, vh,
                           preferred_element_type=jnp.float32)   # (NH, L, hd)
            # concat heads along features == torch.cat(head3[0..7], dim=2)
            a_rows.append(jnp.swapaxes(o, 1, 2).reshape(Hp, L).T)  # (L, Hp)
        a = a_rows[0] if bb == 1 else jnp.concatenate(a_rows, axis=0)  # (R, Hp)

        attn = jnp.dot(a, wo_ref[li],
                       preferred_element_type=jnp.float32) + bo_ref[li]
        attn = _norm(attn + s)               # Norm(result + de)
        attn = attn * npad                   # masked_fill(non_pad_mask == 0, 0)

        # ---- position-wise FFN ------------------------------------------------
        h1 = jnp.dot(attn, w1_ref[li],
                     preferred_element_type=jnp.float32) + b1_ref[li]
        h1 = jnp.maximum(h1, 0.0)            # ReLU
        f2 = jnp.dot(h1, w2_ref[li],
                     preferred_element_type=jnp.float32) + b2_ref[li]
        out = _norm(f2 + attn) * npad        # Norm(output + x), mask again

        s = s + out                          # outer Encoder residual

    out_ref[...] = out.reshape(bb, L, H)


def encoder_fused(s0, kmask_add, npad, p):
    """Single pallas_call running the full 6-layer encoder on (B, L, H)."""
    B, L, H = s0.shape
    NL, _, H3p = p["wqkv"].shape
    Hp = H3p // 3
    H4 = p["w1"].shape[-1]

    # Two batch blocks so the two TensorCores of a v7x chip each take half;
    # on v5e/v6e the second step reuses the resident weights (constant maps).
    nsplit = 2 if (B >= 2 and B % 2 == 0) else 1
    bb = B // nsplit

    def res(shape):                          # grid-invariant (weight) blocks
        return pl.BlockSpec(shape, lambda i: (0, 0, 0))

    in_specs = [
        pl.BlockSpec((bb, L, H), lambda i: (i, 0, 0)),     # residual stream x
        pl.BlockSpec((bb, 1, L), lambda i: (i, 0, 0)),     # additive key mask
        pl.BlockSpec((bb, L, 1), lambda i: (i, 0, 0)),     # non-pad mask
        res((NL, H, H3p)), res((NL, 1, H3p)),              # fused Wqkv / bqkv
        res((NL, Hp, H)),  res((NL, 1, H)),                # Wo / bo
        res((NL, H, H4)),  res((NL, 1, H4)),               # W1 / b1
        res((NL, H4, H)),  res((NL, 1, H)),                # W2 / b2
    ]
    out_spec = pl.BlockSpec((bb, L, H), lambda i: (i, 0, 0))

    kernel = functools.partial(encoder_fused_kernel, num_layers=NL,
                               n_heads=N_HEADS, bb=bb, seq=L)
    return pl.pallas_call(
        kernel,
        out_shape=jax.ShapeDtypeStruct((B, L, H), jnp.float32),
        grid_spec=pltpu.PrefetchScalarGridSpec(
            num_scalar_prefetch=0,
            grid=(nsplit,),
            in_specs=in_specs,
            out_specs=out_spec,
        ),
        compiler_params=pltpu.CompilerParams(
            dimension_semantics=("parallel",),
            vmem_limit_bytes=32 * 1024 * 1024,
        ),
    )(s0, kmask_add, npad,
      p["wqkv"], p["bqkv"], p["wo"], p["bo"],
      p["w1"], p["b1"], p["w2"], p["b2"])


def init_params(key, H, Hp, n_layers=NUM_LAYERS):
    """Random params mimicking the torch inits, pre-packed for the fused kernel.

    * weights stored transposed: (in_features, out_features)
    * Q/K/V columns permuted so each head is contiguous (torch .view(..,-1,8))
    * Q weight/bias pre-scaled by 1/sqrt(H) (folds the / sqrt(d_k) of scores)
    * per-layer weights stacked along a leading layer axis; Q|K|V fused.
    """
    hd = Hp // N_HEADS
    # our column h*hd+i  <->  torch linear output column 8*i+h
    perm = jnp.asarray([8 * i + h for h in range(N_HEADS) for i in range(hd)],
                       dtype=jnp.int32)
    inv_sqrt_dk = 1.0 / float(H) ** 0.5      # torch uses sqrt(de.shape[-1]) == sqrt(H)
    std_qkv = (2.0 / H) ** 0.5
    std_o = (2.0 / (H + Hp)) ** 0.5
    std_f = (2.0 / (H + 4 * H)) ** 0.5
    acc = {k: [] for k in ("wqkv", "bqkv", "wo", "bo", "w1", "b1", "w2", "b2")}
    for _ in range(n_layers):
        key, *ks = jax.random.split(key, 13)
        wq = jax.random.normal(ks[0], (H, Hp), jnp.float32) * std_qkv
        wk = jax.random.normal(ks[1], (H, Hp), jnp.float32) * std_qkv
        wv = jax.random.normal(ks[2], (H, Hp), jnp.float32) * std_qkv
        bq = jax.random.normal(ks[3], (1, Hp), jnp.float32) * 0.02
        bk = jax.random.normal(ks[4], (1, Hp), jnp.float32) * 0.02
        bv = jax.random.normal(ks[5], (1, Hp), jnp.float32) * 0.02
        wo = jax.random.normal(ks[6], (Hp, H), jnp.float32) * std_o
        bo = jax.random.normal(ks[7], (1, H), jnp.float32) * 0.02
        w1 = jax.random.normal(ks[8], (H, 4 * H), jnp.float32) * std_f
        b1 = jax.random.normal(ks[9], (1, 4 * H), jnp.float32) * 0.02
        w2 = jax.random.normal(ks[10], (4 * H, H), jnp.float32) * std_f
        b2 = jax.random.normal(ks[11], (1, H), jnp.float32) * 0.02
        acc["wqkv"].append(jnp.concatenate(
            [wq[:, perm] * inv_sqrt_dk, wk[:, perm], wv[:, perm]], axis=1))
        acc["bqkv"].append(jnp.concatenate(
            [bq[:, perm] * inv_sqrt_dk, bk[:, perm], bv[:, perm]], axis=1))
        acc["wo"].append(wo); acc["bo"].append(bo)
        acc["w1"].append(w1); acc["b1"].append(b1)
        acc["w2"].append(w2); acc["b2"].append(b2)
    return {k: jnp.stack(v) for k, v in acc.items()}


def encoder_forward(tokens, table_x, emb, params):
    """Encoder.forward (dropout=False).  Returns (x8, mask_d)."""
    valid = (tokens != 0).astype(jnp.float32)         # (B, L)
    npad = valid[:, :, None]                          # (B, L, 1) non-pad mask
    kmask_add = (1.0 - valid)[:, None, :] * NEG_BIG   # (B, 1, L) additive key mask
    mask_d = tokens == 0

    x1 = jnp.take(emb, tokens, axis=0) * npad         # masked_fill(non_pad==0, 0)
    x2 = (x1 + table_x) * npad
    s0 = x2 + x1                                      # running residual input
    out = encoder_fused(s0, kmask_add, npad, params)
    return out, mask_d


if __name__ == "__main__":
    key = jax.random.PRNGKey(0)
    B, L, H, Hp, VOCAB = 2, 8, 128, 128, 12     # small shapes: hidden=128, hidden_=128

    k_emb, k_tab, k_tok, k_par = jax.random.split(key, 4)
    # TODO(synk): original `embedded_matrix` concatenates external GloVe-style
    # embeddings; replaced by a deterministic random embedding table.
    emb = jax.random.normal(k_emb, (VOCAB, H), jnp.float32)
    table_x = jax.random.normal(k_tab, (B, L, H), jnp.float32)   # positional table
    tokens = jax.random.randint(k_tok, (B, L), 0, VOCAB)
    tokens = tokens.at[:, -2:].set(0)                            # force some padding
    tokens = tokens.at[:, 0].set(jnp.maximum(tokens[:, 0], 1))   # ensure real tokens

    params = init_params(k_par, H, Hp)

    fwd = jax.jit(encoder_forward)
    x8, mask_d = fwd(tokens, table_x, emb, params)
    jax.block_until_ready(x8)

    assert x8.shape == (B, L, H) and x8.dtype == jnp.float32
    assert mask_d.shape == (B, L)
    assert bool(jnp.all(jnp.isfinite(x8)))
    print("KERNEL_OK")
</pallas_src>

<mosaic_0001>
module attributes {stable_mosaic.version = 11 : i64} {
  func.func @encoder_fused_kernel(%arg0: i32, %arg1: memref<1x8x128xf32, #tpu.memory_space<vmem>>, %arg2: memref<1x1x8xf32, #tpu.memory_space<vmem>>, %arg3: memref<1x8x1xf32, #tpu.memory_space<vmem>>, %arg4: memref<6x128x384xf32, #tpu.memory_space<vmem>>, %arg5: memref<6x1x384xf32, #tpu.memory_space<vmem>>, %arg6: memref<6x128x128xf32, #tpu.memory_space<vmem>>, %arg7: memref<6x1x128xf32, #tpu.memory_space<vmem>>, %arg8: memref<6x128x512xf32, #tpu.memory_space<vmem>>, %arg9: memref<6x1x512xf32, #tpu.memory_space<vmem>>, %arg10: memref<6x512x128xf32, #tpu.memory_space<vmem>>, %arg11: memref<6x1x128xf32, #tpu.memory_space<vmem>>, %arg12: memref<1x8x128xf32, #tpu.memory_space<vmem>>) attributes {dimension_semantics = [#tpu.dimension_semantics<parallel>], iteration_bounds = array<i64: 2>, scalar_prefetch = 0 : i64, scratch_operands = 0 : i64, tpu.core_type = #tpu.core_type<tc>, window_params = [{transform_indices = @transform_0, window_bounds = array<i64: 1, 8, 128>}, {transform_indices = @transform_1, window_bounds = array<i64: 1, 1, 8>}, {transform_indices = @transform_2, window_bounds = array<i64: 1, 8, 1>}, {pipeline_mode = #tpu.pipeline_mode<synchronous>, transform_indices = @transform_3, window_bounds = array<i64: 6, 128, 384>}, {pipeline_mode = #tpu.pipeline_mode<synchronous>, transform_indices = @transform_4, window_bounds = array<i64: 6, 1, 384>}, {pipeline_mode = #tpu.pipeline_mode<synchronous>, transform_indices = @transform_5, window_bounds = array<i64: 6, 128, 128>}, {pipeline_mode = #tpu.pipeline_mode<synchronous>, transform_indices = @transform_6, window_bounds = array<i64: 6, 1, 128>}, {pipeline_mode = #tpu.pipeline_mode<synchronous>, transform_indices = @transform_7, window_bounds = array<i64: 6, 128, 512>}, {pipeline_mode = #tpu.pipeline_mode<synchronous>, transform_indices = @transform_8, window_bounds = array<i64: 6, 1, 512>}, {pipeline_mode = #tpu.pipeline_mode<synchronous>, transform_indices = @transform_9, window_bounds = array<i64: 6, 512, 128>}, {pipeline_mode = #tpu.pipeline_mode<synchronous>, transform_indices = @transform_10, window_bounds = array<i64: 6, 1, 128>}, {transform_indices = @transform_11, window_bounds = array<i64: 1, 8, 128>}]} {
    %c0 = arith.constant 0 : index
    %c0_0 = arith.constant 0 : index
    %c0_1 = arith.constant 0 : index
    %0 = vector.load %arg1[%c0, %c0_0, %c0_1] : memref<1x8x128xf32, #tpu.memory_space<vmem>>, vector<1x8x128xf32>
    %1 = vector.shape_cast %0 : vector<1x8x128xf32> to vector<8x128xf32>
    %c0_2 = arith.constant 0 : index
    %c0_3 = arith.constant 0 : index
    %c0_4 = arith.constant 0 : index
    %2 = vector.load %arg3[%c0_2, %c0_3, %c0_4] : memref<1x8x1xf32, #tpu.memory_space<vmem>>, vector<1x8x1xf32>
    %3 = vector.shape_cast %2 : vector<1x8x1xf32> to vector<8x1xf32>
    %c0_5 = arith.constant 0 : index
    %c0_6 = arith.constant 0 : index
    %c0_7 = arith.constant 0 : index
    %4 = vector.load %arg2[%c0_5, %c0_6, %c0_7] : memref<1x1x8xf32, #tpu.memory_space<vmem>>, vector<1x1x8xf32>
    %c0_8 = arith.constant 0 : index
    %c0_9 = arith.constant 0 : index
    %c0_10 = arith.constant 0 : index
    %5 = vector.load %arg4[%c0_8, %c0_9, %c0_10] : memref<6x128x384xf32, #tpu.memory_space<vmem>>, vector<1x128x384xf32>
    %6 = vector.shape_cast %5 : vector<1x128x384xf32> to vector<128x384xf32>
    %cst = arith.constant dense<0.000000e+00> : vector<8x384xf32>
    %7 = tpu.matmul %1, %6, %cst {dimension_numbers = #tpu.dot_dimension_numbers<[1], [0], [0], [1], [0, 0, 1, 1], [], []>} : vector<8x128xf32>, vector<128x384xf32>, vector<8x384xf32> -> vector<8x384xf32>
    %c0_11 = arith.constant 0 : index
    %c0_12 = arith.constant 0 : index
    %c0_13 = arith.constant 0 : index
    %8 = vector.load %arg5[%c0_11, %c0_12, %c0_13] : memref<6x1x384xf32, #tpu.memory_space<vmem>>, vector<1x1x384xf32>
    %9 = vector.shape_cast %8 : vector<1x1x384xf32> to vector<1x384xf32>
    %10 = vector.broadcast %9 : vector<1x384xf32> to vector<8x384xf32>
    %11 = arith.addf %7, %10 : vector<8x384xf32>
    %12 = tpu.transpose %11, [1, 0] : vector<8x384xf32> -> vector<384x8xf32>
    %13 = vector.shape_cast %12 : vector<384x8xf32> to vector<24x16x8xf32>
    %14 = tpu.transpose %13, [0, 2, 1] : vector<24x16x8xf32> -> vector<24x8x16xf32>
    %15 = vector.extract_strided_slice %14 {offsets = [0, 0, 0], sizes = [8, 8, 16], strides = [1, 1, 1]} : vector<24x8x16xf32> to vector<8x8x16xf32>
    %16 = vector.extract_strided_slice %14 {offsets = [8, 0, 0], sizes = [8, 8, 16], strides = [1, 1, 1]} : vector<24x8x16xf32> to vector<8x8x16xf32>
    %17 = vector.extract_strided_slice %14 {offsets = [16, 0, 0], sizes = [8, 8, 16], strides = [1, 1, 1]} : vector<24x8x16xf32> to vector<8x8x16xf32>
    "tpu.trace_start"() <{level = 10 : i32, message = "nqd,nkd->nqk"}> : () -> ()
    %cst_14 = arith.constant dense<0.000000e+00> : vector<8x8x8xf32>
    %18 = tpu.matmul %15, %16, %cst_14 {dimension_numbers = #tpu.dot_dimension_numbers<[2], [2], [1], [1], [0, 0, 0, 1, 1, 1], [0], [0]>} : vector<8x8x16xf32>, vector<8x8x16xf32>, vector<8x8x8xf32> -> vector<8x8x8xf32>
    "tpu.trace_stop"() : () -> ()
    %19 = vector.shape_cast %4 : vector<1x1x8xf32> to vector<1x8xf32>
    %20 = vector.shape_cast %19 : vector<1x8xf32> to vector<1x1x8xf32>
    %21 = vector.broadcast %20 : vector<1x1x8xf32> to vector<8x8x8xf32>
    %22 = arith.addf %18, %21 : vector<8x8x8xf32>
    %cst_15 = arith.constant dense<0xFF800000> : vector<8x8xf32>
    %23 = vector.multi_reduction <maximumf>, %22, %cst_15 [2] : vector<8x8x8xf32> to vector<8x8xf32>
    %24 = vector.shape_cast %23 : vector<8x8xf32> to vector<8x8x1xf32>
    %25 = vector.broadcast %24 : vector<8x8x1xf32> to vector<8x8x8xf32>
    %26 = arith.subf %22, %25 : vector<8x8x8xf32>
    %27 = math.exp %26 : vector<8x8x8xf32>
    %cst_16 = arith.constant dense<0.000000e+00> : vector<8x8xf32>
    %28 = vector.multi_reduction <add>, %27, %cst_16 [2] : vector<8x8x8xf32> to vector<8x8xf32>
    %29 = vector.shape_cast %28 : vector<8x8xf32> to vector<8x8x1xf32>
    %30 = tpu.reciprocal %29 {approx = true} : vector<8x8x1xf32> -> vector<8x8x1xf32>
    %31 = vector.broadcast %30 : vector<8x8x1xf32> to vector<8x8x8xf32>
    %32 = arith.mulf %27, %31 : vector<8x8x8xf32>
    "tpu.trace_start"() <{level = 10 : i32, message = "nqk,nkd->nqd"}> : () -> ()
    %cst_17 = arith.constant dense<0.000000e+00> : vector<8x8x16xf32>
    %33 = tpu.matmul %32, %17, %cst_17 {dimension_numbers = #tpu.dot_dimension_numbers<[2], [1], [1], [2], [0, 0, 0, 1, 1, 2], [0], [0]>} : vector<8x8x8xf32>, vector<8x8x16xf32>, vector<8x8x16xf32> -> vector<8x8x16xf32>
    "tpu.trace_stop"() : () -> ()
    %34 = tpu.transpose %33, [0, 2, 1] : vector<8x8x16xf32> -> vector<8x16x8xf32>
    %35 = vector.shape_cast %34 : vector<8x16x8xf32> to vector<128x8xf32>
    %36 = tpu.transpose %35, [1, 0] : vector<128x8xf32> -> vector<8x128xf32>
    %c0_18 = arith.constant 0 : index
    %c0_19 = arith.constant 0 : index
    %c0_20 = arith.constant 0 : index
    %37 = vector.load %arg6[%c0_18, %c0_19, %c0_20] : memref<6x128x128xf32, #tpu.memory_space<vmem>>, vector<1x128x128xf32>
    %38 = vector.shape_cast %37 : vector<1x128x128xf32> to vector<128x128xf32>
    %cst_21 = arith.constant dense<0.000000e+00> : vector<8x128xf32>
    %39 = tpu.matmul %36, %38, %cst_21 {dimension_numbers = #tpu.dot_dimension_numbers<[1], [0], [0], [1], [0, 0, 1, 1], [], []>} : vector<8x128xf32>, vector<128x128xf32>, vector<8x128xf32> -> vector<8x128xf32>
    %c0_22 = arith.constant 0 : index
    %c0_23 = arith.constant 0 : index
    %c0_24 = arith.constant 0 : index
    %40 = vector.load %arg7[%c0_22, %c0_23, %c0_24] : memref<6x1x128xf32, #tpu.memory_space<vmem>>, vector<1x1x128xf32>
    %41 = vector.shape_cast %40 : vector<1x1x128xf32> to vector<1x128xf32>
    %42 = vector.broadcast %41 : vector<1x128xf32> to vector<8x128xf32>
    %43 = arith.addf %39, %42 : vector<8x128xf32>
    %44 = arith.addf %43, %1 : vector<8x128xf32>
    %cst_25 = arith.constant dense<0.000000e+00> : vector<8xf32>
    %45 = vector.multi_reduction <add>, %44, %cst_25 [1] : vector<8x128xf32> to vector<8xf32>
    %46 = vector.shape_cast %45 : vector<8xf32> to vector<8x1xf32>
    %cst_26 = arith.constant 1.280000e+02 : f32
    %47 = vector.broadcast %cst_26 : f32 to vector<8x1xf32>
    %48 = arith.divf %46, %47 : vector<8x1xf32>
    %49 = vector.broadcast %48 : vector<8x1xf32> to vector<8x128xf32>
    %50 = arith.subf %44, %49 : vector<8x128xf32>
    %51 = arith.mulf %50, %50 : vector<8x128xf32>
    %cst_27 = arith.constant dense<0.000000e+00> : vector<8xf32>
    %52 = vector.multi_reduction <add>, %51, %cst_27 [1] : vector<8x128xf32> to vector<8xf32>
    %53 = vector.shape_cast %52 : vector<8xf32> to vector<8x1xf32>
    %cst_28 = arith.constant 0.00787401571 : f32
    %54 = vector.broadcast %cst_28 : f32 to vector<8x1xf32>
    %55 = arith.mulf %53, %54 : vector<8x1xf32>
    %56 = vector.broadcast %48 : vector<8x1xf32> to vector<8x128xf32>
    %57 = arith.subf %44, %56 : vector<8x128xf32>
    %cst_29 = arith.constant 9.99999993E-9 : f32
    %58 = vector.broadcast %cst_29 : f32 to vector<8x1xf32>
    %59 = arith.addf %55, %58 : vector<8x1xf32>
    %60 = math.rsqrt %59 : vector<8x1xf32>
    %61 = vector.broadcast %60 : vector<8x1xf32> to vector<8x128xf32>
    %62 = arith.mulf %57, %61 : vector<8x128xf32>
    %63 = vector.broadcast %3 : vector<8x1xf32> to vector<8x128xf32>
    %64 = arith.mulf %62, %63 : vector<8x128xf32>
    %c0_30 = arith.constant 0 : index
    %c0_31 = arith.constant 0 : index
    %c0_32 = arith.constant 0 : index
    %65 = vector.load %arg8[%c0_30, %c0_31, %c0_32] : memref<6x128x512xf32, #tpu.memory_space<vmem>>, vector<1x128x512xf32>
    %66 = vector.shape_cast %65 : vector<1x128x512xf32> to vector<128x512xf32>
    %cst_33 = arith.constant dense<0.000000e+00> : vector<8x512xf32>
    %67 = tpu.matmul %64, %66, %cst_33 {dimension_numbers = #tpu.dot_dimension_numbers<[1], [0], [0], [1], [0, 0, 1, 1], [], []>} : vector<8x128xf32>, vector<128x512xf32>, vector<8x512xf32> -> vector<8x512xf32>
    %c0_34 = arith.constant 0 : index
    %c0_35 = arith.constant 0 : index
    %c0_36 = arith.constant 0 : index
    %68 = vector.load %arg9[%c0_34, %c0_35, %c0_36] : memref<6x1x512xf32, #tpu.memory_space<vmem>>, vector<1x1x512xf32>
    %69 = vector.shape_cast %68 : vector<1x1x512xf32> to vector<1x512xf32>
    %70 = vector.broadcast %69 : vector<1x512xf32> to vector<8x512xf32>
    %71 = arith.addf %67, %70 : vector<8x512xf32>
    %cst_37 = arith.constant 0.000000e+00 : f32
    %72 = vector.broadcast %cst_37 : f32 to vector<8x512xf32>
    %73 = arith.maximumf %71, %72 : vector<8x512xf32>
    %c0_38 = arith.constant 0 : index
    %c0_39 = arith.constant 0 : index
    %c0_40 = arith.constant 0 : index
    %74 = vector.load %arg10[%c0_38, %c0_39, %c0_40] : memref<6x512x128xf32, #tpu.memory_space<vmem>>, vector<1x512x128xf32>
    %75 = vector.shape_cast %74 : vector<1x512x128xf32> to vector<512x128xf32>
    %cst_41 = arith.constant dense<0.000000e+00> : vector<8x128xf32>
    %76 = tpu.matmul %73, %75, %cst_41 {dimension_numbers = #tpu.dot_dimension_numbers<[1], [0], [0], [1], [0, 0, 1, 1], [], []>} : vector<8x512xf32>, vector<512x128xf32>, vector<8x128xf32> -> vector<8x128xf32>
    %c0_42 = arith.constant 0 : index
    %c0_43 = arith.constant 0 : index
    %c0_44 = arith.constant 0 : index
    %77 = vector.load %arg11[%c0_42, %c0_43, %c0_44] : memref<6x1x128xf32, #tpu.memory_space<vmem>>, vector<1x1x128xf32>
    %78 = vector.shape_cast %77 : vector<1x1x128xf32> to vector<1x128xf32>
    %79 = vector.broadcast %78 : vector<1x128xf32> to vector<8x128xf32>
    %80 = arith.addf %76, %79 : vector<8x128xf32>
    %81 = arith.addf %80, %64 : vector<8x128xf32>
    %cst_45 = arith.constant dense<0.000000e+00> : vector<8xf32>
    %82 = vector.multi_reduction <add>, %81, %cst_45 [1] : vector<8x128xf32> to vector<8xf32>
    %83 = vector.shape_cast %82 : vector<8xf32> to vector<8x1xf32>
    %cst_46 = arith.constant 1.280000e+02 : f32
    %84 = vector.broadcast %cst_46 : f32 to vector<8x1xf32>
    %85 = arith.divf %83, %84 : vector<8x1xf32>
    %86 = vector.broadcast %85 : vector<8x1xf32> to vector<8x128xf32>
    %87 = arith.subf %81, %86 : vector<8x128xf32>
    %88 = arith.mulf %87, %87 : vector<8x128xf32>
    %cst_47 = arith.constant dense<0.000000e+00> : vector<8xf32>
    %89 = vector.multi_reduction <add>, %88, %cst_47 [1] : vector<8x128xf32> to vector<8xf32>
    %90 = vector.shape_cast %89 : vector<8xf32> to vector<8x1xf32>
    %cst_48 = arith.constant 0.00787401571 : f32
    %91 = vector.broadcast %cst_48 : f32 to vector<8x1xf32>
    %92 = arith.mulf %90, %91 : vector<8x1xf32>
    %93 = vector.broadcast %85 : vector<8x1xf32> to vector<8x128xf32>
    %94 = arith.subf %81, %93 : vector<8x128xf32>
    %cst_49 = arith.constant 9.99999993E-9 : f32
    %95 = vector.broadcast %cst_49 : f32 to vector<8x1xf32>
    %96 = arith.addf %92, %95 : vector<8x1xf32>
    %97 = math.rsqrt %96 : vector<8x1xf32>
    %98 = vector.broadcast %97 : vector<8x1xf32> to vector<8x128xf32>
    %99 = arith.mulf %94, %98 : vector<8x128xf32>
    %100 = vector.broadcast %3 : vector<8x1xf32> to vector<8x128xf32>
    %101 = arith.mulf %99, %100 : vector<8x128xf32>
    %102 = arith.addf %1, %101 : vector<8x128xf32>
    %c1 = arith.constant 1 : index
    %c0_50 = arith.constant 0 : index
    %c0_51 = arith.constant 0 : index
    %103 = vector.load %arg4[%c1, %c0_50, %c0_51] : memref<6x128x384xf32, #tpu.memory_space<vmem>>, vector<1x128x384xf32>
    %104 = vector.shape_cast %103 : vector<1x128x384xf32> to vector<128x384xf32>
    %cst_52 = arith.constant dense<0.000000e+00> : vector<8x384xf32>
    %105 = tpu.matmul %102, %104, %cst_52 {dimension_numbers = #tpu.dot_dimension_numbers<[1], [0], [0], [1], [0, 0, 1, 1], [], []>} : vector<8x128xf32>, vector<128x384xf32>, vector<8x384xf32> -> vector<8x384xf32>
    %c1_53 = arith.constant 1 : index
    %c0_54 = arith.constant 0 : index
    %c0_55 = arith.constant 0 : index
    %106 = vector.load %arg5[%c1_53, %c0_54, %c0_55] : memref<6x1x384xf32, #tpu.memory_space<vmem>>, vector<1x1x384xf32>
    %107 = vector.shape_cast %106 : vector<1x1x384xf32> to vector<1x384xf32>
    %108 = vector.broadcast %107 : vector<1x384xf32> to vector<8x384xf32>
    %109 = arith.addf %105, %108 : vector<8x384xf32>
    %110 = tpu.transpose %109, [1, 0] : vector<8x384xf32> -> vector<384x8xf32>
    %111 = vector.shape_cast %110 : vector<384x8xf32> to vector<24x16x8xf32>
    %112 = tpu.transpose %111, [0, 2, 1] : vector<24x16x8xf32> -> vector<24x8x16xf32>
    %113 = vector.extract_strided_slice %112 {offsets = [0, 0, 0], sizes = [8, 8, 16], strides = [1, 1, 1]} : vector<24x8x16xf32> to vector<8x8x16xf32>
    %114 = vector.extract_strided_slice %112 {offsets = [8, 0, 0], sizes = [8, 8, 16], strides = [1, 1, 1]} : vector<24x8x16xf32> to vector<8x8x16xf32>
    %115 = vector.extract_strided_slice %112 {offsets = [16, 0, 0], sizes = [8, 8, 16], strides = [1, 1, 1]} : vector<24x8x16xf32> to vector<8x8x16xf32>
    "tpu.trace_start"() <{level = 10 : i32, message = "nqd,nkd->nqk"}> : () -> ()
    %cst_56 = arith.constant dense<0.000000e+00> : vector<8x8x8xf32>
    %116 = tpu.matmul %113, %114, %cst_56 {dimension_numbers = #tpu.dot_dimension_numbers<[2], [2], [1], [1], [0, 0, 0, 1, 1, 1], [0], [0]>} : vector<8x8x16xf32>, vector<8x8x16xf32>, vector<8x8x8xf32> -> vector<8x8x8xf32>
    "tpu.trace_stop"() : () -> ()
    %117 = vector.shape_cast %4 : vector<1x1x8xf32> to vector<1x8xf32>
    %118 = vector.shape_cast %117 : vector<1x8xf32> to vector<1x1x8xf32>
    %119 = vector.broadcast %118 : vector<1x1x8xf32> to vector<8x8x8xf32>
    %120 = arith.addf %116, %119 : vector<8x8x8xf32>
    %cst_57 = arith.constant dense<0xFF800000> : vector<8x8xf32>
    %121 = vector.multi_reduction <maximumf>, %120, %cst_57 [2] : vector<8x8x8xf32> to vector<8x8xf32>
    %122 = vector.shape_cast %121 : vector<8x8xf32> to vector<8x8x1xf32>
    %123 = vector.broadcast %122 : vector<8x8x1xf32> to vector<8x8x8xf32>
    %124 = arith.subf %120, %123 : vector<8x8x8xf32>
    %125 = math.exp %124 : vector<8x8x8xf32>
    %cst_58 = arith.constant dense<0.000000e+00> : vector<8x8xf32>
    %126 = vector.multi_reduction <add>, %125, %cst_58 [2] : vector<8x8x8xf32> to vector<8x8xf32>
    %127 = vector.shape_cast %126 : vector<8x8xf32> to vector<8x8x1xf32>
    %128 = tpu.reciprocal %127 {approx = true} : vector<8x8x1xf32> -> vector<8x8x1xf32>
    %129 = vector.broadcast %128 : vector<8x8x1xf32> to vector<8x8x8xf32>
    %130 = arith.mulf %125, %129 : vector<8x8x8xf32>
    "tpu.trace_start"() <{level = 10 : i32, message = "nqk,nkd->nqd"}> : () -> ()
    %cst_59 = arith.constant dense<0.000000e+00> : vector<8x8x16xf32>
    %131 = tpu.matmul %130, %115, %cst_59 {dimension_numbers = #tpu.dot_dimension_numbers<[2], [1], [1], [2], [0, 0, 0, 1, 1, 2], [0], [0]>} : vector<8x8x8xf32>, vector<8x8x16xf32>, vector<8x8x16xf32> -> vector<8x8x16xf32>
    "tpu.trace_stop"() : () -> ()
    %132 = tpu.transpose %131, [0, 2, 1] : vector<8x8x16xf32> -> vector<8x16x8xf32>
    %133 = vector.shape_cast %132 : vector<8x16x8xf32> to vector<128x8xf32>
    %134 = tpu.transpose %133, [1, 0] : vector<128x8xf32> -> vector<8x128xf32>
    %c1_60 = arith.constant 1 : index
    %c0_61 = arith.constant 0 : index
    %c0_62 = arith.constant 0 : index
    %135 = vector.load %arg6[%c1_60, %c0_61, %c0_62] : memref<6x128x128xf32, #tpu.memory_space<vmem>>, vector<1x128x128xf32>
    %136 = vector.shape_cast %135 : vector<1x128x128xf32> to vector<128x128xf32>
    %cst_63 = arith.constant dense<0.000000e+00> : vector<8x128xf32>
    %137 = tpu.matmul %134, %136, %cst_63 {dimension_numbers = #tpu.dot_dimension_numbers<[1], [0], [0], [1], [0, 0, 1, 1], [], []>} : vector<8x128xf32>, vector<128x128xf32>, vector<8x128xf32> -> vector<8x128xf32>
    %c1_64 = arith.constant 1 : index
    %c0_65 = arith.constant 0 : index
    %c0_66 = arith.constant 0 : index
    %138 = vector.load %arg7[%c1_64, %c0_65, %c0_66] : memref<6x1x128xf32, #tpu.memory_space<vmem>>, vector<1x1x128xf32>
    %139 = vector.shape_cast %138 : vector<1x1x128xf32> to vector<1x128xf32>
    %140 = vector.broadcast %139 : vector<1x128xf32> to vector<8x128xf32>
    %141 = arith.addf %137, %140 : vector<8x128xf32>
    %142 = arith.addf %141, %102 : vector<8x128xf32>
    %cst_67 = arith.constant dense<0.000000e+00> : vector<8xf32>
    %143 = vector.multi_reduction <add>, %142, %cst_67 [1] : vector<8x128xf32> to vector<8xf32>
    %144 = vector.shape_cast %143 : vector<8xf32> to vector<8x1xf32>
    %cst_68 = arith.constant 1.280000e+02 : f32
    %145 = vector.broadcast %cst_68 : f32 to vector<8x1xf32>
    %146 = arith.divf %144, %145 : vector<8x1xf32>
    %147 = vector.broadcast %146 : vector<8x1xf32> to vector<8x128xf32>
    %148 = arith.subf %142, %147 : vector<8x128xf32>
    %149 = arith.mulf %148, %148 : vector<8x128xf32>
    %cst_69 = arith.constant dense<0.000000e+00> : vector<8xf32>
    %150 = vector.multi_reduction <add>, %149, %cst_69 [1] : vector<8x128xf32> to vector<8xf32>
    %151 = vector.shape_cast %150 : vector<8xf32> to vector<8x1xf32>
    %cst_70 = arith.constant 0.00787401571 : f32
    %152 = vector.broadcast %cst_70 : f32 to vector<8x1xf32>
    %153 = arith.mulf %151, %152 : vector<8x1xf32>
    %154 = vector.broadcast %146 : vector<8x1xf32> to vector<8x128xf32>
    %155 = arith.subf %142, %154 : vector<8x128xf32>
    %cst_71 = arith.constant 9.99999993E-9 : f32
    %156 = vector.broadcast %cst_71 : f32 to vector<8x1xf32>
    %157 = arith.addf %153, %156 : vector<8x1xf32>
    %158 = math.rsqrt %157 : vector<8x1xf32>
    %159 = vector.broadcast %158 : vector<8x1xf32> to vector<8x128xf32>
    %160 = arith.mulf %155, %159 : vector<8x128xf32>
    %161 = vector.broadcast %3 : vector<8x1xf32> to vector<8x128xf32>
    %162 = arith.mulf %160, %161 : vector<8x128xf32>
    %c1_72 = arith.constant 1 : index
    %c0_73 = arith.constant 0 : index
    %c0_74 = arith.constant 0 : index
    %163 = vector.load %arg8[%c1_72, %c0_73, %c0_74] : memref<6x128x512xf32, #tpu.memory_space<vmem>>, vector<1x128x512xf32>
    %164 = vector.shape_cast %163 : vector<1x128x512xf32> to vector<128x512xf32>
    %cst_75 = arith.constant dense<0.000000e+00> : vector<8x512xf32>
    %165 = tpu.matmul %162, %164, %cst_75 {dimension_numbers = #tpu.dot_dimension_numbers<[1], [0], [0], [1], [0, 0, 1, 1], [], []>} : vector<8x128xf32>, vector<128x512xf32>, vector<8x512xf32> -> vector<8x512xf32>
    %c1_76 = arith.constant 1 : index
    %c0_77 = arith.constant 0 : index
    %c0_78 = arith.constant 0 : index
    %166 = vector.load %arg9[%c1_76, %c0_77, %c0_78] : memref<6x1x512xf32, #tpu.memory_space<vmem>>, vector<1x1x512xf32>
    %167 = vector.shape_cast %166 : vector<1x1x512xf32> to vector<1x512xf32>
    %168 = vector.broadcast %167 : vector<1x512xf32> to vector<8x512xf32>
    %169 = arith.addf %165, %168 : vector<8x512xf32>
    %cst_79 = arith.constant 0.000000e+00 : f32
    %170 = vector.broadcast %cst_79 : f32 to vector<8x512xf32>
    %171 = arith.maximumf %169, %170 : vector<8x512xf32>
    %c1_80 = arith.constant 1 : index
    %c0_81 = arith.constant 0 : index
    %c0_82 = arith.constant 0 : index
    %172 = vector.load %arg10[%c1_80, %c0_81, %c0_82] : memref<6x512x128xf32, #tpu.memory_space<vmem>>, vector<1x512x128xf32>
    %173 = vector.shape_cast %172 : vector<1x512x128xf32> to vector<512x128xf32>
    %cst_83 = arith.constant dense<0.000000e+00> : vector<8x128xf32>
    %174 = tpu.matmul %171, %173, %cst_83 {dimension_numbers = #tpu.dot_dimension_numbers<[1], [0], [0], [1], [0, 0, 1, 1], [], []>} : vector<8x512xf32>, vector<512x128xf32>, vector<8x128xf32> -> vector<8x128xf32>
    %c1_84 = arith.constant 1 : index
    %c0_85 = arith.constant 0 : index
    %c0_86 = arith.constant 0 : index
    %175 = vector.load %arg11[%c1_84, %c0_85, %c0_86] : memref<6x1x128xf32, #tpu.memory_space<vmem>>, vector<1x1x128xf32>
    %176 = vector.shape_cast %175 : vector<1x1x128xf32> to vector<1x128xf32>
    %177 = vector.broadcast %176 : vector<1x128xf32> to vector<8x128xf32>
    %178 = arith.addf %174, %177 : vector<8x128xf32>
    %179 = arith.addf %178, %162 : vector<8x128xf32>
    %cst_87 = arith.constant dense<0.000000e+00> : vector<8xf32>
    %180 = vector.multi_reduction <add>, %179, %cst_87 [1] : vector<8x128xf32> to vector<8xf32>
    %181 = vector.shape_cast %180 : vector<8xf32> to vector<8x1xf32>
    %cst_88 = arith.constant 1.280000e+02 : f32
    %182 = vector.broadcast %cst_88 : f32 to vector<8x1xf32>
    %183 = arith.divf %181, %182 : vector<8x1xf32>
    %184 = vector.broadcast %183 : vector<8x1xf32> to vector<8x128xf32>
    %185 = arith.subf %179, %184 : vector<8x128xf32>
    %186 = arith.mulf %185, %185 : vector<8x128xf32>
    %cst_89 = arith.constant dense<0.000000e+00> : vector<8xf32>
    %187 = vector.multi_reduction <add>, %186, %cst_89 [1] : vector<8x128xf32> to vector<8xf32>
    %188 = vector.shape_cast %187 : vector<8xf32> to vector<8x1xf32>
    %cst_90 = arith.constant 0.00787401571 : f32
    %189 = vector.broadcast %cst_90 : f32 to vector<8x1xf32>
    %190 = arith.mulf %188, %189 : vector<8x1xf32>
    %191 = vector.broadcast %183 : vector<8x1xf32> to vector<8x128xf32>
    %192 = arith.subf %179, %191 : vector<8x128xf32>
    %cst_91 = arith.constant 9.99999993E-9 : f32
    %193 = vector.broadcast %cst_91 : f32 to vector<8x1xf32>
    %194 = arith.addf %190, %193 : vector<8x1xf32>
    %195 = math.rsqrt %194 : vector<8x1xf32>
    %196 = vector.broadcast %195 : vector<8x1xf32> to vector<8x128xf32>
    %197 = arith.mulf %192, %196 : vector<8x128xf32>
    %198 = vector.broadcast %3 : vector<8x1xf32> to vector<8x128xf32>
    %199 = arith.mulf %197, %198 : vector<8x128xf32>
    %200 = arith.addf %102, %199 : vector<8x128xf32>
    %c2 = arith.constant 2 : index
    %c0_92 = arith.constant 0 : index
    %c0_93 = arith.constant 0 : index
    %201 = vector.load %arg4[%c2, %c0_92, %c0_93] : memref<6x128x384xf32, #tpu.memory_space<vmem>>, vector<1x128x384xf32>
    %202 = vector.shape_cast %201 : vector<1x128x384xf32> to vector<128x384xf32>
    %cst_94 = arith.constant dense<0.000000e+00> : vector<8x384xf32>
    %203 = tpu.matmul %200, %202, %cst_94 {dimension_numbers = #tpu.dot_dimension_numbers<[1], [0], [0], [1], [0, 0, 1, 1], [], []>} : vector<8x128xf32>, vector<128x384xf32>, vector<8x384xf32> -> vector<8x384xf32>
    %c2_95 = arith.constant 2 : index
    %c0_96 = arith.constant 0 : index
    %c0_97 = arith.constant 0 : index
    %204 = vector.load %arg5[%c2_95, %c0_96, %c0_97] : memref<6x1x384xf32, #tpu.memory_space<vmem>>, vector<1x1x384xf32>
    %205 = vector.shape_cast %204 : vector<1x1x384xf32> to vector<1x384xf32>
    %206 = vector.broadcast %205 : vector<1x384xf32> to vector<8x384xf32>
    %207 = arith.addf %203, %206 : vector<8x384xf32>
    %208 = tpu.transpose %207, [1, 0] : vector<8x384xf32> -> vector<384x8xf32>
    %209 = vector.shape_cast %208 : vector<384x8xf32> to vector<24x16x8xf32>
    %210 = tpu.transpose %209, [0, 2, 1] : vector<24x16x8xf32> -> vector<24x8x16xf32>
    %211 = vector.extract_strided_slice %210 {offsets = [0, 0, 0], sizes = [8, 8, 16], strides = [1, 1, 1]} : vector<24x8x16xf32> to vector<8x8x16xf32>
    %212 = vector.extract_strided_slice %210 {offsets = [8, 0, 0], sizes = [8, 8, 16], strides = [1, 1, 1]} : vector<24x8x16xf32> to vector<8x8x16xf32>
    %213 = vector.extract_strided_slice %210 {offsets = [16, 0, 0], sizes = [8, 8, 16], strides = [1, 1, 1]} : vector<24x8x16xf32> to vector<8x8x16xf32>
    "tpu.trace_start"() <{level = 10 : i32, message = "nqd,nkd->nqk"}> : () -> ()
    %cst_98 = arith.constant dense<0.000000e+00> : vector<8x8x8xf32>
    %214 = tpu.matmul %211, %212, %cst_98 {dimension_numbers = #tpu.dot_dimension_numbers<[2], [2], [1], [1], [0, 0, 0, 1, 1, 1], [0], [0]>} : vector<8x8x16xf32>, vector<8x8x16xf32>, vector<8x8x8xf32> -> vector<8x8x8xf32>
    "tpu.trace_stop"() : () -> ()
    %215 = vector.shape_cast %4 : vector<1x1x8xf32> to vector<1x8xf32>
    %216 = vector.shape_cast %215 : vector<1x8xf32> to vector<1x1x8xf32>
    %217 = vector.broadcast %216 : vector<1x1x8xf32> to vector<8x8x8xf32>
    %218 = arith.addf %214, %217 : vector<8x8x8xf32>
    %cst_99 = arith.constant dense<0xFF800000> : vector<8x8xf32>
    %219 = vector.multi_reduction <maximumf>, %218, %cst_99 [2] : vector<8x8x8xf32> to vector<8x8xf32>
    %220 = vector.shape_cast %219 : vector<8x8xf32> to vector<8x8x1xf32>
    %221 = vector.broadcast %220 : vector<8x8x1xf32> to vector<8x8x8xf32>
    %222 = arith.subf %218, %221 : vector<8x8x8xf32>
    %223 = math.exp %222 : vector<8x8x8xf32>
    %cst_100 = arith.constant dense<0.000000e+00> : vector<8x8xf32>
    %224 = vector.multi_reduction <add>, %223, %cst_100 [2] : vector<8x8x8xf32> to vector<8x8xf32>
    %225 = vector.shape_cast %224 : vector<8x8xf32> to vector<8x8x1xf32>
    %226 = tpu.reciprocal %225 {approx = true} : vector<8x8x1xf32> -> vector<8x8x1xf32>
    %227 = vector.broadcast %226 : vector<8x8x1xf32> to vector<8x8x8xf32>
    %228 = arith.mulf %223, %227 : vector<8x8x8xf32>
    "tpu.trace_start"() <{level = 10 : i32, message = "nqk,nkd->nqd"}> : () -> ()
    %cst_101 = arith.constant dense<0.000000e+00> : vector<8x8x16xf32>
    %229 = tpu.matmul %228, %213, %cst_101 {dimension_numbers = #tpu.dot_dimension_numbers<[2], [1], [1], [2], [0, 0, 0, 1, 1, 2], [0], [0]>} : vector<8x8x8xf32>, vector<8x8x16xf32>, vector<8x8x16xf32> -> vector<8x8x16xf32>
    "tpu.trace_stop"() : () -> ()
    %230 = tpu.transpose %229, [0, 2, 1] : vector<8x8x16xf32> -> vector<8x16x8xf32>
    %231 = vector.shape_cast %230 : vector<8x16x8xf32> to vector<128x8xf32>
    %232 = tpu.transpose %231, [1, 0] : vector<128x8xf32> -> vector<8x128xf32>
    %c2_102 = arith.constant 2 : index
    %c0_103 = arith.constant 0 : index
    %c0_104 = arith.constant 0 : index
    %233 = vector.load %arg6[%c2_102, %c0_103, %c0_104] : memref<6x128x128xf32, #tpu.memory_space<vmem>>, vector<1x128x128xf32>
    %234 = vector.shape_cast %233 : vector<1x128x128xf32> to vector<128x128xf32>
    %cst_105 = arith.constant dense<0.000000e+00> : vector<8x128xf32>
    %235 = tpu.matmul %232, %234, %cst_105 {dimension_numbers = #tpu.dot_dimension_numbers<[1], [0], [0], [1], [0, 0, 1, 1], [], []>} : vector<8x128xf32>, vector<128x128xf32>, vector<8x128xf32> -> vector<8x128xf32>
    %c2_106 = arith.constant 2 : index
    %c0_107 = arith.constant 0 : index
    %c0_108 = arith.constant 0 : index
    %236 = vector.load %arg7[%c2_106, %c0_107, %c0_108] : memref<6x1x128xf32, #tpu.memory_space<vmem>>, vector<1x1x128xf32>
    %237 = vector.shape_cast %236 : vector<1x1x128xf32> to vector<1x128xf32>
    %238 = vector.broadcast %237 : vector<1x128xf32> to vector<8x128xf32>
    %239 = arith.addf %235, %238 : vector<8x128xf32>
    %240 = arith.addf %239, %200 : vector<8x128xf32>
    %cst_109 = arith.constant dense<0.000000e+00> : vector<8xf32>
    %241 = vector.multi_reduction <add>, %240, %cst_109 [1] : vector<8x128xf32> to vector<8xf32>
    %242 = vector.shape_cast %241 : vector<8xf32> to vector<8x1xf32>
    %cst_110 = arith.constant 1.280000e+02 : f32
    %243 = vector.broadcast %cst_110 : f32 to vector<8x1xf32>
    %244 = arith.divf %242, %243 : vector<8x1xf32>
    %245 = vector.broadcast %244 : vector<8x1xf32> to vector<8x128xf32>
    %246 = arith.subf %240, %245 : vector<8x128xf32>
    %247 = arith.mulf %246, %246 : vector<8x128xf32>
    %cst_111 = arith.constant dense<0.000000e+00> : vector<8xf32>
    %248 = vector.multi_reduction <add>, %247, %cst_111 [1] : vector<8x128xf32> to vector<8xf32>
    %249 = vector.shape_cast %248 : vector<8xf32> to vector<8x1xf32>
    %cst_112 = arith.constant 0.00787401571 : f32
    %250 = vector.broadcast %cst_112 : f32 to vector<8x1xf32>
    %251 = arith.mulf %249, %250 : vector<8x1xf32>
    %252 = vector.broadcast %244 : vector<8x1xf32> to vector<8x128xf32>
    %253 = arith.subf %240, %252 : vector<8x128xf32>
    %cst_113 = arith.constant 9.99999993E-9 : f32
    %254 = vector.broadcast %cst_113 : f32 to vector<8x1xf32>
    %255 = arith.addf %251, %254 : vector<8x1xf32>
    %256 = math.rsqrt %255 : vector<8x1xf32>
    %257 = vector.broadcast %256 : vector<8x1xf32> to vector<8x128xf32>
    %258 = arith.mulf %253, %257 : vector<8x128xf32>
    %259 = vector.broadcast %3 : vector<8x1xf32> to vector<8x128xf32>
    %260 = arith.mulf %258, %259 : vector<8x128xf32>
    %c2_114 = arith.constant 2 : index
    %c0_115 = arith.constant 0 : index
    %c0_116 = arith.constant 0 : index
    %261 = vector.load %arg8[%c2_114, %c0_115, %c0_116] : memref<6x128x512xf32, #tpu.memory_space<vmem>>, vector<1x128x512xf32>
    %262 = vector.shape_cast %261 : vector<1x128x512xf32> to vector<128x512xf32>
    %cst_117 = arith.constant dense<0.000000e+00> : vector<8x512xf32>
    %263 = tpu.matmul %260, %262, %cst_117 {dimension_numbers = #tpu.dot_dimension_numbers<[1], [0], [0], [1], [0, 0, 1, 1], [], []>} : vector<8x128xf32>, vector<128x512xf32>, vector<8x512xf32> -> vector<8x512xf32>
    %c2_118 = arith.constant 2 : index
    %c0_119 = arith.constant 0 : index
    %c0_120 = arith.constant 0 : index
    %264 = vector.load %arg9[%c2_118, %c0_119, %c0_120] : memref<6x1x512xf32, #tpu.memory_space<vmem>>, vector<1x1x512xf32>
    %265 = vector.shape_cast %264 : vector<1x1x512xf32> to vector<1x512xf32>
    %266 = vector.broadcast %265 : vector<1x512xf32> to vector<8x512xf32>
    %267 = arith.addf %263, %266 : vector<8x512xf32>
    %cst_121 = arith.constant 0.000000e+00 : f32
    %268 = vector.broadcast %cst_121 : f32 to vector<8x512xf32>
    %269 = arith.maximumf %267, %268 : vector<8x512xf32>
    %c2_122 = arith.constant 2 : index
    %c0_123 = arith.constant 0 : index
    %c0_124 = arith.constant 0 : index
    %270 = vector.load %arg10[%c2_122, %c0_123, %c0_124] : memref<6x512x128xf32, #tpu.memory_space<vmem>>, vector<1x512x128xf32>
    %271 = vector.shape_cast %270 : vector<1x512x128xf32> to vector<512x128xf32>
    %cst_125 = arith.constant dense<0.000000e+00> : vector<8x128xf32>
    %272 = tpu.matmul %269, %271, %cst_125 {dimension_numbers = #tpu.dot_dimension_numbers<[1], [0], [0], [1], [0, 0, 1, 1], [], []>} : vector<8x512xf32>, vector<512x128xf32>, vector<8x128xf32> -> vector<8x128xf32>
    %c2_126 = arith.constant 2 : index
    %c0_127 = arith.constant 0 : index
    %c0_128 = arith.constant 0 : index
    %273 = vector.load %arg11[%c2_126, %c0_127, %c0_128] : memref<6x1x128xf32, #tpu.memory_space<vmem>>, vector<1x1x128xf32>
    %274 = vector.shape_cast %273 : vector<1x1x128xf32> to vector<1x128xf32>
    %275 = vector.broadcast %274 : vector<1x128xf32> to vector<8x128xf32>
    %276 = arith.addf %272, %275 : vector<8x128xf32>
    %277 = arith.addf %276, %260 : vector<8x128xf32>
    %cst_129 = arith.constant dense<0.000000e+00> : vector<8xf32>
    %278 = vector.multi_reduction <add>, %277, %cst_129 [1] : vector<8x128xf32> to vector<8xf32>
    %279 = vector.shape_cast %278 : vector<8xf32> to vector<8x1xf32>
    %cst_130 = arith.constant 1.280000e+02 : f32
    %280 = vector.broadcast %cst_130 : f32 to vector<8x1xf32>
    %281 = arith.divf %279, %280 : vector<8x1xf32>
    %282 = vector.broadcast %281 : vector<8x1xf32> to vector<8x128xf32>
    %283 = arith.subf %277, %282 : vector<8x128xf32>
    %284 = arith.mulf %283, %283 : vector<8x128xf32>
    %cst_131 = arith.constant dense<0.000000e+00> : vector<8xf32>
    %285 = vector.multi_reduction <add>, %284, %cst_131 [1] : vector<8x128xf32> to vector<8xf32>
    %286 = vector.shape_cast %285 : vector<8xf32> to vector<8x1xf32>
    %cst_132 = arith.constant 0.00787401571 : f32
    %287 = vector.broadcast %cst_132 : f32 to vector<8x1xf32>
    %288 = arith.mulf %286, %287 : vector<8x1xf32>
    %289 = vector.broadcast %281 : vector<8x1xf32> to vector<8x128xf32>
    %290 = arith.subf %277, %289 : vector<8x128xf32>
    %cst_133 = arith.constant 9.99999993E-9 : f32
    %291 = vector.broadcast %cst_133 : f32 to vector<8x1xf32>
    %292 = arith.addf %288, %291 : vector<8x1xf32>
    %293 = math.rsqrt %292 : vector<8x1xf32>
    %294 = vector.broadcast %293 : vector<8x1xf32> to vector<8x128xf32>
    %295 = arith.mulf %290, %294 : vector<8x128xf32>
    %296 = vector.broadcast %3 : vector<8x1xf32> to vector<8x128xf32>
    %297 = arith.mulf %295, %296 : vector<8x128xf32>
    %298 = arith.addf %200, %297 : vector<8x128xf32>
    %c3 = arith.constant 3 : index
    %c0_134 = arith.constant 0 : index
    %c0_135 = arith.constant 0 : index
    %299 = vector.load %arg4[%c3, %c0_134, %c0_135] : memref<6x128x384xf32, #tpu.memory_space<vmem>>, vector<1x128x384xf32>
    %300 = vector.shape_cast %299 : vector<1x128x384xf32> to vector<128x384xf32>
    %cst_136 = arith.constant dense<0.000000e+00> : vector<8x384xf32>
    %301 = tpu.matmul %298, %300, %cst_136 {dimension_numbers = #tpu.dot_dimension_numbers<[1], [0], [0], [1], [0, 0, 1, 1], [], []>} : vector<8x128xf32>, vector<128x384xf32>, vector<8x384xf32> -> vector<8x384xf32>
    %c3_137 = arith.constant 3 : index
    %c0_138 = arith.constant 0 : index
    %c0_139 = arith.constant 0 : index
    %302 = vector.load %arg5[%c3_137, %c0_138, %c0_139] : memref<6x1x384xf32, #tpu.memory_space<vmem>>, vector<1x1x384xf32>
    %303 = vector.shape_cast %302 : vector<1x1x384xf32> to vector<1x384xf32>
    %304 = vector.broadcast %303 : vector<1x384xf32> to vector<8x384xf32>
    %305 = arith.addf %301, %304 : vector<8x384xf32>
    %306 = tpu.transpose %305, [1, 0] : vector<8x384xf32> -> vector<384x8xf32>
    %307 = vector.shape_cast %306 : vector<384x8xf32> to vector<24x16x8xf32>
    %308 = tpu.transpose %307, [0, 2, 1] : vector<24x16x8xf32> -> vector<24x8x16xf32>
    %309 = vector.extract_strided_slice %308 {offsets = [0, 0, 0], sizes = [8, 8, 16], strides = [1, 1, 1]} : vector<24x8x16xf32> to vector<8x8x16xf32>
    %310 = vector.extract_strided_slice %308 {offsets = [8, 0, 0], sizes = [8, 8, 16], strides = [1, 1, 1]} : vector<24x8x16xf32> to vector<8x8x16xf32>
    %311 = vector.extract_strided_slice %308 {offsets = [16, 0, 0], sizes = [8, 8, 16], strides = [1, 1, 1]} : vector<24x8x16xf32> to vector<8x8x16xf32>
    "tpu.trace_start"() <{level = 10 : i32, message = "nqd,nkd->nqk"}> : () -> ()
    %cst_140 = arith.constant dense<0.000000e+00> : vector<8x8x8xf32>
    %312 = tpu.matmul %309, %310, %cst_140 {dimension_numbers = #tpu.dot_dimension_numbers<[2], [2], [1], [1], [0, 0, 0, 1, 1, 1], [0], [0]>} : vector<8x8x16xf32>, vector<8x8x16xf32>, vector<8x8x8xf32> -> vector<8x8x8xf32>
    "tpu.trace_stop"() : () -> ()
    %313 = vector.shape_cast %4 : vector<1x1x8xf32> to vector<1x8xf32>
    %314 = vector.shape_cast %313 : vector<1x8xf32> to vector<1x1x8xf32>
    %315 = vector.broadcast %314 : vector<1x1x8xf32> to vector<8x8x8xf32>
    %316 = arith.addf %312, %315 : vector<8x8x8xf32>
    %cst_141 = arith.constant dense<0xFF800000> : vector<8x8xf32>
    %317 = vector.multi_reduction <maximumf>, %316, %cst_141 [2] : vector<8x8x8xf32> to vector<8x8xf32>
    %318 = vector.shape_cast %317 : vector<8x8xf32> to vector<8x8x1xf32>
    %319 = vector.broadcast %318 : vector<8x8x1xf32> to vector<8x8x8xf32>
    %320 = arith.subf %316, %319 : vector<8x8x8xf32>
    %321 = math.exp %320 : vector<8x8x8xf32>
    %cst_142 = arith.constant dense<0.000000e+00> : vector<8x8xf32>
    %322 = vector.multi_reduction <add>, %321, %cst_142 [2] : vector<8x8x8xf32> to vector<8x8xf32>
    %323 = vector.shape_cast %322 : vector<8x8xf32> to vector<8x8x1xf32>
    %324 = tpu.reciprocal %323 {approx = true} : vector<8x8x1xf32> -> vector<8x8x1xf32>
    %325 = vector.broadcast %324 : vector<8x8x1xf32> to vector<8x8x8xf32>
    %326 = arith.mulf %321, %325 : vector<8x8x8xf32>
    "tpu.trace_start"() <{level = 10 : i32, message = "nqk,nkd->nqd"}> : () -> ()
    %cst_143 = arith.constant dense<0.000000e+00> : vector<8x8x16xf32>
    %327 = tpu.matmul %326, %311, %cst_143 {dimension_numbers = #tpu.dot_dimension_numbers<[2], [1], [1], [2], [0, 0, 0, 1, 1, 2], [0], [0]>} : vector<8x8x8xf32>, vector<8x8x16xf32>, vector<8x8x16xf32> -> vector<8x8x16xf32>
    "tpu.trace_stop"() : () -> ()
    %328 = tpu.transpose %327, [0, 2, 1] : vector<8x8x16xf32> -> vector<8x16x8xf32>
    %329 = vector.shape_cast %328 : vector<8x16x8xf32> to vector<128x8xf32>
    %330 = tpu.transpose %329, [1, 0] : vector<128x8xf32> -> vector<8x128xf32>
    %c3_144 = arith.constant 3 : index
    %c0_145 = arith.constant 0 : index
    %c0_146 = arith.constant 0 : index
    %331 = vector.load %arg6[%c3_144, %c0_145, %c0_146] : memref<6x128x128xf32, #tpu.memory_space<vmem>>, vector<1x128x128xf32>
    %332 = vector.shape_cast %331 : vector<1x128x128xf32> to vector<128x128xf32>
    %cst_147 = arith.constant dense<0.000000e+00> : vector<8x128xf32>
    %333 = tpu.matmul %330, %332, %cst_147 {dimension_numbers = #tpu.dot_dimension_numbers<[1], [0], [0], [1], [0, 0, 1, 1], [], []>} : vector<8x128xf32>, vector<128x128xf32>, vector<8x128xf32> -> vector<8x128xf32>
    %c3_148 = arith.constant 3 : index
    %c0_149 = arith.constant 0 : index
    %c0_150 = arith.constant 0 : index
    %334 = vector.load %arg7[%c3_148, %c0_149, %c0_150] : memref<6x1x128xf32, #tpu.memory_space<vmem>>, vector<1x1x128xf32>
    %335 = vector.shape_cast %334 : vector<1x1x128xf32> to vector<1x128xf32>
    %336 = vector.broadcast %335 : vector<1x128xf32> to vector<8x128xf32>
    %337 = arith.addf %333, %336 : vector<8x128xf32>
    %338 = arith.addf %337, %298 : vector<8x128xf32>
    %cst_151 = arith.constant dense<0.000000e+00> : vector<8xf32>
    %339 = vector.multi_reduction <add>, %338, %cst_151 [1] : vector<8x128xf32> to vector<8xf32>
    %340 = vector.shape_cast %339 : vector<8xf32> to vector<8x1xf32>
    %cst_152 = arith.constant 1.280000e+02 : f32
    %341 = vector.broadcast %cst_152 : f32 to vector<8x1xf32>
    %342 = arith.divf %340, %341 : vector<8x1xf32>
    %343 = vector.broadcast %342 : vector<8x1xf32> to vector<8x128xf32>
    %344 = arith.subf %338, %343 : vector<8x128xf32>
    %345 = arith.mulf %344, %344 : vector<8x128xf32>
    %cst_153 = arith.constant dense<0.000000e+00> : vector<8xf32>
    %346 = vector.multi_reduction <add>, %345, %cst_153 [1] : vector<8x128xf32> to vector<8xf32>
    %347 = vector.shape_cast %346 : vector<8xf32> to vector<8x1xf32>
    %cst_154 = arith.constant 0.00787401571 : f32
    %348 = vector.broadcast %cst_154 : f32 to vector<8x1xf32>
    %349 = arith.mulf %347, %348 : vector<8x1xf32>
    %350 = vector.broadcast %342 : vector<8x1xf32> to vector<8x128xf32>
    %351 = arith.subf %338, %350 : vector<8x128xf32>
    %cst_155 = arith.constant 9.99999993E-9 : f32
    %352 = vector.broadcast %cst_155 : f32 to vector<8x1xf32>
    %353 = arith.addf %349, %352 : vector<8x1xf32>
    %354 = math.rsqrt %353 : vector<8x1xf32>
    %355 = vector.broadcast %354 : vector<8x1xf32> to vector<8x128xf32>
    %356 = arith.mulf %351, %355 : vector<8x128xf32>
    %357 = vector.broadcast %3 : vector<8x1xf32> to vector<8x128xf32>
    %358 = arith.mulf %356, %357 : vector<8x128xf32>
    %c3_156 = arith.constant 3 : index
    %c0_157 = arith.constant 0 : index
    %c0_158 = arith.constant 0 : index
    %359 = vector.load %arg8[%c3_156, %c0_157, %c0_158] : memref<6x128x512xf32, #tpu.memory_space<vmem>>, vector<1x128x512xf32>
    %360 = vector.shape_cast %359 : vector<1x128x512xf32> to vector<128x512xf32>
    %cst_159 = arith.constant dense<0.000000e+00> : vector<8x512xf32>
    %361 = tpu.matmul %358, %360, %cst_159 {dimension_numbers = #tpu.dot_dimension_numbers<[1], [0], [0], [1], [0, 0, 1, 1], [], []>} : vector<8x128xf32>, vector<128x512xf32>, vector<8x512xf32> -> vector<8x512xf32>
    %c3_160 = arith.constant 3 : index
    %c0_161 = arith.constant 0 : index
    %c0_162 = arith.constant 0 : index
    %362 = vector.load %arg9[%c3_160, %c0_161, %c0_162] : memref<6x1x512xf32, #tpu.memory_space<vmem>>, vector<1x1x512xf32>
    %363 = vector.shape_cast %362 : vector<1x1x512xf32> to vector<1x512xf32>
    %364 = vector.broadcast %363 : vector<1x512xf32> to vector<8x512xf32>
    %365 = arith.addf %361, %364 : vector<8x512xf32>
    %cst_163 = arith.constant 0.000000e+00 : f32
    %366 = vector.broadcast %cst_163 : f32 to vector<8x512xf32>
    %367 = arith.maximumf %365, %366 : vector<8x512xf32>
    %c3_164 = arith.constant 3 : index
    %c0_165 = arith.constant 0 : index
    %c0_166 = arith.constant 0 : index
    %368 = vector.load %arg10[%c3_164, %c0_165, %c0_166] : memref<6x512x128xf32, #tpu.memory_space<vmem>>, vector<1x512x128xf32>
    %369 = vector.shape_cast %368 : vector<1x512x128xf32> to vector<512x128xf32>
    %cst_167 = arith.constant dense<0.000000e+00> : vector<8x128xf32>
    %370 = tpu.matmul %367, %369, %cst_167 {dimension_numbers = #tpu.dot_dimension_numbers<[1], [0], [0], [1], [0, 0, 1, 1], [], []>} : vector<8x512xf32>, vector<512x128xf32>, vector<8x128xf32> -> vector<8x128xf32>
    %c3_168 = arith.constant 3 : index
    %c0_169 = arith.constant 0 : index
    %c0_170 = arith.constant 0 : index
    %371 = vector.load %arg11[%c3_168, %c0_169, %c0_170] : memref<6x1x128xf32, #tpu.memory_space<vmem>>, vector<1x1x128xf32>
    %372 = vector.shape_cast %371 : vector<1x1x128xf32> to vector<1x128xf32>
    %373 = vector.broadcast %372 : vector<1x128xf32> to vector<8x128xf32>
    %374 = arith.addf %370, %373 : vector<8x128xf32>
    %375 = arith.addf %374, %358 : vector<8x128xf32>
    %cst_171 = arith.constant dense<0.000000e+00> : vector<8xf32>
    %376 = vector.multi_reduction <add>, %375, %cst_171 [1] : vector<8x128xf32> to vector<8xf32>
    %377 = vector.shape_cast %376 : vector<8xf32> to vector<8x1xf32>
    %cst_172 = arith.constant 1.280000e+02 : f32
    %378 = vector.broadcast %cst_172 : f32 to vector<8x1xf32>
    %379 = arith.divf %377, %378 : vector<8x1xf32>
    %380 = vector.broadcast %379 : vector<8x1xf32> to vector<8x128xf32>
    %381 = arith.subf %375, %380 : vector<8x128xf32>
    %382 = arith.mulf %381, %381 : vector<8x128xf32>
    %cst_173 = arith.constant dense<0.000000e+00> : vector<8xf32>
    %383 = vector.multi_reduction <add>, %382, %cst_173 [1] : vector<8x128xf32> to vector<8xf32>
    %384 = vector.shape_cast %383 : vector<8xf32> to vector<8x1xf32>
    %cst_174 = arith.constant 0.00787401571 : f32
    %385 = vector.broadcast %cst_174 : f32 to vector<8x1xf32>
    %386 = arith.mulf %384, %385 : vector<8x1xf32>
    %387 = vector.broadcast %379 : vector<8x1xf32> to vector<8x128xf32>
    %388 = arith.subf %375, %387 : vector<8x128xf32>
    %cst_175 = arith.constant 9.99999993E-9 : f32
    %389 = vector.broadcast %cst_175 : f32 to vector<8x1xf32>
    %390 = arith.addf %386, %389 : vector<8x1xf32>
    %391 = math.rsqrt %390 : vector<8x1xf32>
    %392 = vector.broadcast %391 : vector<8x1xf32> to vector<8x128xf32>
    %393 = arith.mulf %388, %392 : vector<8x128xf32>
    %394 = vector.broadcast %3 : vector<8x1xf32> to vector<8x128xf32>
    %395 = arith.mulf %393, %394 : vector<8x128xf32>
    %396 = arith.addf %298, %395 : vector<8x128xf32>
    %c4 = arith.constant 4 : index
    %c0_176 = arith.constant 0 : index
    %c0_177 = arith.constant 0 : index
    %397 = vector.load %arg4[%c4, %c0_176, %c0_177] : memref<6x128x384xf32, #tpu.memory_space<vmem>>, vector<1x128x384xf32>
    %398 = vector.shape_cast %397 : vector<1x128x384xf32> to vector<128x384xf32>
    %cst_178 = arith.constant dense<0.000000e+00> : vector<8x384xf32>
    %399 = tpu.matmul %396, %398, %cst_178 {dimension_numbers = #tpu.dot_dimension_numbers<[1], [0], [0], [1], [0, 0, 1, 1], [], []>} : vector<8x128xf32>, vector<128x384xf32>, vector<8x384xf32> -> vector<8x384xf32>
    %c4_179 = arith.constant 4 : index
    %c0_180 = arith.constant 0 : index
    %c0_181 = arith.constant 0 : index
    %400 = vector.load %arg5[%c4_179, %c0_180, %c0_181] : memref<6x1x384xf32, #tpu.memory_space<vmem>>, vector<1x1x384xf32>
    %401 = vector.shape_cast %400 : vector<1x1x384xf32> to vector<1x384xf32>
    %402 = vector.broadcast %401 : vector<1x384xf32> to vector<8x384xf32>
    %403 = arith.addf %399, %402 : vector<8x384xf32>
    %404 = tpu.transpose %403, [1, 0] : vector<8x384xf32> -> vector<384x8xf32>
    %405 = vector.shape_cast %404 : vector<384x8xf32> to vector<24x16x8xf32>
    %406 = tpu.transpose %405, [0, 2, 1] : vector<24x16x8xf32> -> vector<24x8x16xf32>
    %407 = vector.extract_strided_slice %406 {offsets = [0, 0, 0], sizes = [8, 8, 16], strides = [1, 1, 1]} : vector<24x8x16xf32> to vector<8x8x16xf32>
    %408 = vector.extract_strided_slice %406 {offsets = [8, 0, 0], sizes = [8, 8, 16], strides = [1, 1, 1]} : vector<24x8x16xf32> to vector<8x8x16xf32>
    %409 = vector.extract_strided_slice %406 {offsets = [16, 0, 0], sizes = [8, 8, 16], strides = [1, 1, 1]} : vector<24x8x16xf32> to vector<8x8x16xf32>
    "tpu.trace_start"() <{level = 10 : i32, message = "nqd,nkd->nqk"}> : () -> ()
    %cst_182 = arith.constant dense<0.000000e+00> : vector<8x8x8xf32>
    %410 = tpu.matmul %407, %408, %cst_182 {dimension_numbers = #tpu.dot_dimension_numbers<[2], [2], [1], [1], [0, 0, 0, 1, 1, 1], [0], [0]>} : vector<8x8x16xf32>, vector<8x8x16xf32>, vector<8x8x8xf32> -> vector<8x8x8xf32>
    "tpu.trace_stop"() : () -> ()
    %411 = vector.shape_cast %4 : vector<1x1x8xf32> to vector<1x8xf32>
    %412 = vector.shape_cast %411 : vector<1x8xf32> to vector<1x1x8xf32>
    %413 = vector.broadcast %412 : vector<1x1x8xf32> to vector<8x8x8xf32>
    %414 = arith.addf %410, %413 : vector<8x8x8xf32>
    %cst_183 = arith.constant dense<0xFF800000> : vector<8x8xf32>
    %415 = vector.multi_reduction <maximumf>, %414, %cst_183 [2] : vector<8x8x8xf32> to vector<8x8xf32>
    %416 = vector.shape_cast %415 : vector<8x8xf32> to vector<8x8x1xf32>
    %417 = vector.broadcast %416 : vector<8x8x1xf32> to vector<8x8x8xf32>
    %418 = arith.subf %414, %417 : vector<8x8x8xf32>
    %419 = math.exp %418 : vector<8x8x8xf32>
    %cst_184 = arith.constant dense<0.000000e+00> : vector<8x8xf32>
    %420 = vector.multi_reduction <add>, %419, %cst_184 [2] : vector<8x8x8xf32> to vector<8x8xf32>
    %421 = vector.shape_cast %420 : vector<8x8xf32> to vector<8x8x1xf32>
    %422 = tpu.reciprocal %421 {approx = true} : vector<8x8x1xf32> -> vector<8x8x1xf32>
    %423 = vector.broadcast %422 : vector<8x8x1xf32> to vector<8x8x8xf32>
    %424 = arith.mulf %419, %423 : vector<8x8x8xf32>
    "tpu.trace_start"() <{level = 10 : i32, message = "nqk,nkd->nqd"}> : () -> ()
    %cst_185 = arith.constant dense<0.000000e+00> : vector<8x8x16xf32>
    %425 = tpu.matmul %424, %409, %cst_185 {dimension_numbers = #tpu.dot_dimension_numbers<[2], [1], [1], [2], [0, 0, 0, 1, 1, 2], [0], [0]>} : vector<8x8x8xf32>, vector<8x8x16xf32>, vector<8x8x16xf32> -> vector<8x8x16xf32>
    "tpu.trace_stop"() : () -> ()
    %426 = tpu.transpose %425, [0, 2, 1] : vector<8x8x16xf32> -> vector<8x16x8xf32>
    %427 = vector.shape_cast %426 : vector<8x16x8xf32> to vector<128x8xf32>
    %428 = tpu.transpose %427, [1, 0] : vector<128x8xf32> -> vector<8x128xf32>
    %c4_186 = arith.constant 4 : index
    %c0_187 = arith.constant 0 : index
    %c0_188 = arith.constant 0 : index
    %429 = vector.load %arg6[%c4_186, %c0_187, %c0_188] : memref<6x128x128xf32, #tpu.memory_space<vmem>>, vector<1x128x128xf32>
    %430 = vector.shape_cast %429 : vector<1x128x128xf32> to vector<128x128xf32>
    %cst_189 = arith.constant dense<0.000000e+00> : vector<8x128xf32>
    %431 = tpu.matmul %428, %430, %cst_189 {dimension_numbers = #tpu.dot_dimension_numbers<[1], [0], [0], [1], [0, 0, 1, 1], [], []>} : vector<8x128xf32>, vector<128x128xf32>, vector<8x128xf32> -> vector<8x128xf32>
    %c4_190 = arith.constant 4 : index
    %c0_191 = arith.constant 0 : index
    %c0_192 = arith.constant 0 : index
    %432 = vector.load %arg7[%c4_190, %c0_191, %c0_192] : memref<6x1x128xf32, #tpu.memory_space<vmem>>, vector<1x1x128xf32>
    %433 = vector.shape_cast %432 : vector<1x1x128xf32> to vector<1x128xf32>
    %434 = vector.broadcast %433 : vector<1x128xf32> to vector<8x128xf32>
    %435 = arith.addf %431, %434 : vector<8x128xf32>
    %436 = arith.addf %435, %396 : vector<8x128xf32>
    %cst_193 = arith.constant dense<0.000000e+00> : vector<8xf32>
    %437 = vector.multi_reduction <add>, %436, %cst_193 [1] : vector<8x128xf32> to vector<8xf32>
    %438 = vector.shape_cast %437 : vector<8xf32> to vector<8x1xf32>
    %cst_194 = arith.constant 1.280000e+02 : f32
    %439 = vector.broadcast %cst_194 : f32 to vector<8x1xf32>
    %440 = arith.divf %438, %439 : vector<8x1xf32>
    %441 = vector.broadcast %440 : vector<8x1xf32> to vector<8x128xf32>
    %442 = arith.subf %436, %441 : vector<8x128xf32>
    %443 = arith.mulf %442, %442 : vector<8x128xf32>
    %cst_195 = arith.constant dense<0.000000e+00> : vector<8xf32>
    %444 = vector.multi_reduction <add>, %443, %cst_195 [1] : vector<8x128xf32> to vector<8xf32>
    %445 = vector.shape_cast %444 : vector<8xf32> to vector<8x1xf32>
    %cst_196 = arith.constant 0.00787401571 : f32
    %446 = vector.broadcast %cst_196 : f32 to vector<8x1xf32>
    %447 = arith.mulf %445, %446 : vector<8x1xf32>
    %448 = vector.broadcast %440 : vector<8x1xf32> to vector<8x128xf32>
    %449 = arith.subf %436, %448 : vector<8x128xf32>
    %cst_197 = arith.constant 9.99999993E-9 : f32
    %450 = vector.broadcast %cst_197 : f32 to vector<8x1xf32>
    %451 = arith.addf %447, %450 : vector<8x1xf32>
    %452 = math.rsqrt %451 : vector<8x1xf32>
    %453 = vector.broadcast %452 : vector<8x1xf32> to vector<8x128xf32>
    %454 = arith.mulf %449, %453 : vector<8x128xf32>
    %455 = vector.broadcast %3 : vector<8x1xf32> to vector<8x128xf32>
    %456 = arith.mulf %454, %455 : vector<8x128xf32>
    %c4_198 = arith.constant 4 : index
    %c0_199 = arith.constant 0 : index
    %c0_200 = arith.constant 0 : index
    %457 = vector.load %arg8[%c4_198, %c0_199, %c0_200] : memref<6x128x512xf32, #tpu.memory_space<vmem>>, vector<1x128x512xf32>
    %458 = vector.shape_cast %457 : vector<1x128x512xf32> to vector<128x512xf32>
    %cst_201 = arith.constant dense<0.000000e+00> : vector<8x512xf32>
    %459 = tpu.matmul %456, %458, %cst_201 {dimension_numbers = #tpu.dot_dimension_numbers<[1], [0], [0], [1], [0, 0, 1, 1], [], []>} : vector<8x128xf32>, vector<128x512xf32>, vector<8x512xf32> -> vector<8x512xf32>
    %c4_202 = arith.constant 4 : index
    %c0_203 = arith.constant 0 : index
    %c0_204 = arith.constant 0 : index
    %460 = vector.load %arg9[%c4_202, %c0_203, %c0_204] : memref<6x1x512xf32, #tpu.memory_space<vmem>>, vector<1x1x512xf32>
    %461 = vector.shape_cast %460 : vector<1x1x512xf32> to vector<1x512xf32>
    %462 = vector.broadcast %461 : vector<1x512xf32> to vector<8x512xf32>
    %463 = arith.addf %459, %462 : vector<8x512xf32>
    %cst_205 = arith.constant 0.000000e+00 : f32
    %464 = vector.broadcast %cst_205 : f32 to vector<8x512xf32>
    %465 = arith.maximumf %463, %464 : vector<8x512xf32>
    %c4_206 = arith.constant 4 : index
    %c0_207 = arith.constant 0 : index
    %c0_208 = arith.constant 0 : index
    %466 = vector.load %arg10[%c4_206, %c0_207, %c0_208] : memref<6x512x128xf32, #tpu.memory_space<vmem>>, vector<1x512x128xf32>
    %467 = vector.shape_cast %466 : vector<1x512x128xf32> to vector<512x128xf32>
    %cst_209 = arith.constant dense<0.000000e+00> : vector<8x128xf32>
    %468 = tpu.matmul %465, %467, %cst_209 {dimension_numbers = #tpu.dot_dimension_numbers<[1], [0], [0], [1], [0, 0, 1, 1], [], []>} : vector<8x512xf32>, vector<512x128xf32>, vector<8x128xf32> -> vector<8x128xf32>
    %c4_210 = arith.constant 4 : index
    %c0_211 = arith.constant 0 : index
    %c0_212 = arith.constant 0 : index
    %469 = vector.load %arg11[%c4_210, %c0_211, %c0_212] : memref<6x1x128xf32, #tpu.memory_space<vmem>>, vector<1x1x128xf32>
    %470 = vector.shape_cast %469 : vector<1x1x128xf32> to vector<1x128xf32>
    %471 = vector.broadcast %470 : vector<1x128xf32> to vector<8x128xf32>
    %472 = arith.addf %468, %471 : vector<8x128xf32>
    %473 = arith.addf %472, %456 : vector<8x128xf32>
    %cst_213 = arith.constant dense<0.000000e+00> : vector<8xf32>
    %474 = vector.multi_reduction <add>, %473, %cst_213 [1] : vector<8x128xf32> to vector<8xf32>
    %475 = vector.shape_cast %474 : vector<8xf32> to vector<8x1xf32>
    %cst_214 = arith.constant 1.280000e+02 : f32
    %476 = vector.broadcast %cst_214 : f32 to vector<8x1xf32>
    %477 = arith.divf %475, %476 : vector<8x1xf32>
    %478 = vector.broadcast %477 : vector<8x1xf32> to vector<8x128xf32>
    %479 = arith.subf %473, %478 : vector<8x128xf32>
    %480 = arith.mulf %479, %479 : vector<8x128xf32>
    %cst_215 = arith.constant dense<0.000000e+00> : vector<8xf32>
    %481 = vector.multi_reduction <add>, %480, %cst_215 [1] : vector<8x128xf32> to vector<8xf32>
    %482 = vector.shape_cast %481 : vector<8xf32> to vector<8x1xf32>
    %cst_216 = arith.constant 0.00787401571 : f32
    %483 = vector.broadcast %cst_216 : f32 to vector<8x1xf32>
    %484 = arith.mulf %482, %483 : vector<8x1xf32>
    %485 = vector.broadcast %477 : vector<8x1xf32> to vector<8x128xf32>
    %486 = arith.subf %473, %485 : vector<8x128xf32>
    %cst_217 = arith.constant 9.99999993E-9 : f32
    %487 = vector.broadcast %cst_217 : f32 to vector<8x1xf32>
    %488 = arith.addf %484, %487 : vector<8x1xf32>
    %489 = math.rsqrt %488 : vector<8x1xf32>
    %490 = vector.broadcast %489 : vector<8x1xf32> to vector<8x128xf32>
    %491 = arith.mulf %486, %490 : vector<8x128xf32>
    %492 = vector.broadcast %3 : vector<8x1xf32> to vector<8x128xf32>
    %493 = arith.mulf %491, %492 : vector<8x128xf32>
    %494 = arith.addf %396, %493 : vector<8x128xf32>
    %c5 = arith.constant 5 : index
    %c0_218 = arith.constant 0 : index
    %c0_219 = arith.constant 0 : index
    %495 = vector.load %arg4[%c5, %c0_218, %c0_219] : memref<6x128x384xf32, #tpu.memory_space<vmem>>, vector<1x128x384xf32>
    %496 = vector.shape_cast %495 : vector<1x128x384xf32> to vector<128x384xf32>
    %cst_220 = arith.constant dense<0.000000e+00> : vector<8x384xf32>
    %497 = tpu.matmul %494, %496, %cst_220 {dimension_numbers = #tpu.dot_dimension_numbers<[1], [0], [0], [1], [0, 0, 1, 1], [], []>} : vector<8x128xf32>, vector<128x384xf32>, vector<8x384xf32> -> vector<8x384xf32>
    %c5_221 = arith.constant 5 : index
    %c0_222 = arith.constant 0 : index
    %c0_223 = arith.constant 0 : index
    %498 = vector.load %arg5[%c5_221, %c0_222, %c0_223] : memref<6x1x384xf32, #tpu.memory_space<vmem>>, vector<1x1x384xf32>
    %499 = vector.shape_cast %498 : vector<1x1x384xf32> to vector<1x384xf32>
    %500 = vector.broadcast %499 : vector<1x384xf32> to vector<8x384xf32>
    %501 = arith.addf %497, %500 : vector<8x384xf32>
    %502 = tpu.transpose %501, [1, 0] : vector<8x384xf32> -> vector<384x8xf32>
    %503 = vector.shape_cast %502 : vector<384x8xf32> to vector<24x16x8xf32>
    %504 = tpu.transpose %503, [0, 2, 1] : vector<24x16x8xf32> -> vector<24x8x16xf32>
    %505 = vector.extract_strided_slice %504 {offsets = [0, 0, 0], sizes = [8, 8, 16], strides = [1, 1, 1]} : vector<24x8x16xf32> to vector<8x8x16xf32>
    %506 = vector.extract_strided_slice %504 {offsets = [8, 0, 0], sizes = [8, 8, 16], strides = [1, 1, 1]} : vector<24x8x16xf32> to vector<8x8x16xf32>
    %507 = vector.extract_strided_slice %504 {offsets = [16, 0, 0], sizes = [8, 8, 16], strides = [1, 1, 1]} : vector<24x8x16xf32> to vector<8x8x16xf32>
    "tpu.trace_start"() <{level = 10 : i32, message = "nqd,nkd->nqk"}> : () -> ()
    %cst_224 = arith.constant dense<0.000000e+00> : vector<8x8x8xf32>
    %508 = tpu.matmul %505, %506, %cst_224 {dimension_numbers = #tpu.dot_dimension_numbers<[2], [2], [1], [1], [0, 0, 0, 1, 1, 1], [0], [0]>} : vector<8x8x16xf32>, vector<8x8x16xf32>, vector<8x8x8xf32> -> vector<8x8x8xf32>
    "tpu.trace_stop"() : () -> ()
    %509 = vector.shape_cast %4 : vector<1x1x8xf32> to vector<1x8xf32>
    %510 = vector.shape_cast %509 : vector<1x8xf32> to vector<1x1x8xf32>
    %511 = vector.broadcast %510 : vector<1x1x8xf32> to vector<8x8x8xf32>
    %512 = arith.addf %508, %511 : vector<8x8x8xf32>
    %cst_225 = arith.constant dense<0xFF800000> : vector<8x8xf32>
    %513 = vector.multi_reduction <maximumf>, %512, %cst_225 [2] : vector<8x8x8xf32> to vector<8x8xf32>
    %514 = vector.shape_cast %513 : vector<8x8xf32> to vector<8x8x1xf32>
    %515 = vector.broadcast %514 : vector<8x8x1xf32> to vector<8x8x8xf32>
    %516 = arith.subf %512, %515 : vector<8x8x8xf32>
    %517 = math.exp %516 : vector<8x8x8xf32>
    %cst_226 = arith.constant dense<0.000000e+00> : vector<8x8xf32>
    %518 = vector.multi_reduction <add>, %517, %cst_226 [2] : vector<8x8x8xf32> to vector<8x8xf32>
    %519 = vector.shape_cast %518 : vector<8x8xf32> to vector<8x8x1xf32>
    %520 = tpu.reciprocal %519 {approx = true} : vector<8x8x1xf32> -> vector<8x8x1xf32>
    %521 = vector.broadcast %520 : vector<8x8x1xf32> to vector<8x8x8xf32>
    %522 = arith.mulf %517, %521 : vector<8x8x8xf32>
    "tpu.trace_start"() <{level = 10 : i32, message = "nqk,nkd->nqd"}> : () -> ()
    %cst_227 = arith.constant dense<0.000000e+00> : vector<8x8x16xf32>
    %523 = tpu.matmul %522, %507, %cst_227 {dimension_numbers = #tpu.dot_dimension_numbers<[2], [1], [1], [2], [0, 0, 0, 1, 1, 2], [0], [0]>} : vector<8x8x8xf32>, vector<8x8x16xf32>, vector<8x8x16xf32> -> vector<8x8x16xf32>
    "tpu.trace_stop"() : () -> ()
    %524 = tpu.transpose %523, [0, 2, 1] : vector<8x8x16xf32> -> vector<8x16x8xf32>
    %525 = vector.shape_cast %524 : vector<8x16x8xf32> to vector<128x8xf32>
    %526 = tpu.transpose %525, [1, 0] : vector<128x8xf32> -> vector<8x128xf32>
    %c5_228 = arith.constant 5 : index
    %c0_229 = arith.constant 0 : index
    %c0_230 = arith.constant 0 : index
    %527 = vector.load %arg6[%c5_228, %c0_229, %c0_230] : memref<6x128x128xf32, #tpu.memory_space<vmem>>, vector<1x128x128xf32>
    %528 = vector.shape_cast %527 : vector<1x128x128xf32> to vector<128x128xf32>
    %cst_231 = arith.constant dense<0.000000e+00> : vector<8x128xf32>
    %529 = tpu.matmul %526, %528, %cst_231 {dimension_numbers = #tpu.dot_dimension_numbers<[1], [0], [0], [1], [0, 0, 1, 1], [], []>} : vector<8x128xf32>, vector<128x128xf32>, vector<8x128xf32> -> vector<8x128xf32>
    %c5_232 = arith.constant 5 : index
    %c0_233 = arith.constant 0 : index
    %c0_234 = arith.constant 0 : index
    %530 = vector.load %arg7[%c5_232, %c0_233, %c0_234] : memref<6x1x128xf32, #tpu.memory_space<vmem>>, vector<1x1x128xf32>
    %531 = vector.shape_cast %530 : vector<1x1x128xf32> to vector<1x128xf32>
    %532 = vector.broadcast %531 : vector<1x128xf32> to vector<8x128xf32>
    %533 = arith.addf %529, %532 : vector<8x128xf32>
    %534 = arith.addf %533, %494 : vector<8x128xf32>
    %cst_235 = arith.constant dense<0.000000e+00> : vector<8xf32>
    %535 = vector.multi_reduction <add>, %534, %cst_235 [1] : vector<8x128xf32> to vector<8xf32>
    %536 = vector.shape_cast %535 : vector<8xf32> to vector<8x1xf32>
    %cst_236 = arith.constant 1.280000e+02 : f32
    %537 = vector.broadcast %cst_236 : f32 to vector<8x1xf32>
    %538 = arith.divf %536, %537 : vector<8x1xf32>
    %539 = vector.broadcast %538 : vector<8x1xf32> to vector<8x128xf32>
    %540 = arith.subf %534, %539 : vector<8x128xf32>
    %541 = arith.mulf %540, %540 : vector<8x128xf32>
    %cst_237 = arith.constant dense<0.000000e+00> : vector<8xf32>
    %542 = vector.multi_reduction <add>, %541, %cst_237 [1] : vector<8x128xf32> to vector<8xf32>
    %543 = vector.shape_cast %542 : vector<8xf32> to vector<8x1xf32>
    %cst_238 = arith.constant 0.00787401571 : f32
    %544 = vector.broadcast %cst_238 : f32 to vector<8x1xf32>
    %545 = arith.mulf %543, %544 : vector<8x1xf32>
    %546 = vector.broadcast %538 : vector<8x1xf32> to vector<8x128xf32>
    %547 = arith.subf %534, %546 : vector<8x128xf32>
    %cst_239 = arith.constant 9.99999993E-9 : f32
    %548 = vector.broadcast %cst_239 : f32 to vector<8x1xf32>
    %549 = arith.addf %545, %548 : vector<8x1xf32>
    %550 = math.rsqrt %549 : vector<8x1xf32>
    %551 = vector.broadcast %550 : vector<8x1xf32> to vector<8x128xf32>
    %552 = arith.mulf %547, %551 : vector<8x128xf32>
    %553 = vector.broadcast %3 : vector<8x1xf32> to vector<8x128xf32>
    %554 = arith.mulf %552, %553 : vector<8x128xf32>
    %c5_240 = arith.constant 5 : index
    %c0_241 = arith.constant 0 : index
    %c0_242 = arith.constant 0 : index
    %555 = vector.load %arg8[%c5_240, %c0_241, %c0_242] : memref<6x128x512xf32, #tpu.memory_space<vmem>>, vector<1x128x512xf32>
    %556 = vector.shape_cast %555 : vector<1x128x512xf32> to vector<128x512xf32>
    %cst_243 = arith.constant dense<0.000000e+00> : vector<8x512xf32>
    %557 = tpu.matmul %554, %556, %cst_243 {dimension_numbers = #tpu.dot_dimension_numbers<[1], [0], [0], [1], [0, 0, 1, 1], [], []>} : vector<8x128xf32>, vector<128x512xf32>, vector<8x512xf32> -> vector<8x512xf32>
    %c5_244 = arith.constant 5 : index
    %c0_245 = arith.constant 0 : index
    %c0_246 = arith.constant 0 : index
    %558 = vector.load %arg9[%c5_244, %c0_245, %c0_246] : memref<6x1x512xf32, #tpu.memory_space<vmem>>, vector<1x1x512xf32>
    %559 = vector.shape_cast %558 : vector<1x1x512xf32> to vector<1x512xf32>
    %560 = vector.broadcast %559 : vector<1x512xf32> to vector<8x512xf32>
    %561 = arith.addf %557, %560 : vector<8x512xf32>
    %cst_247 = arith.constant 0.000000e+00 : f32
    %562 = vector.broadcast %cst_247 : f32 to vector<8x512xf32>
    %563 = arith.maximumf %561, %562 : vector<8x512xf32>
    %c5_248 = arith.constant 5 : index
    %c0_249 = arith.constant 0 : index
    %c0_250 = arith.constant 0 : index
    %564 = vector.load %arg10[%c5_248, %c0_249, %c0_250] : memref<6x512x128xf32, #tpu.memory_space<vmem>>, vector<1x512x128xf32>
    %565 = vector.shape_cast %564 : vector<1x512x128xf32> to vector<512x128xf32>
    %cst_251 = arith.constant dense<0.000000e+00> : vector<8x128xf32>
    %566 = tpu.matmul %563, %565, %cst_251 {dimension_numbers = #tpu.dot_dimension_numbers<[1], [0], [0], [1], [0, 0, 1, 1], [], []>} : vector<8x512xf32>, vector<512x128xf32>, vector<8x128xf32> -> vector<8x128xf32>
    %c5_252 = arith.constant 5 : index
    %c0_253 = arith.constant 0 : index
    %c0_254 = arith.constant 0 : index
    %567 = vector.load %arg11[%c5_252, %c0_253, %c0_254] : memref<6x1x128xf32, #tpu.memory_space<vmem>>, vector<1x1x128xf32>
    %568 = vector.shape_cast %567 : vector<1x1x128xf32> to vector<1x128xf32>
    %569 = vector.broadcast %568 : vector<1x128xf32> to vector<8x128xf32>
    %570 = arith.addf %566, %569 : vector<8x128xf32>
    %571 = arith.addf %570, %554 : vector<8x128xf32>
    %cst_255 = arith.constant dense<0.000000e+00> : vector<8xf32>
    %572 = vector.multi_reduction <add>, %571, %cst_255 [1] : vector<8x128xf32> to vector<8xf32>
    %573 = vector.shape_cast %572 : vector<8xf32> to vector<8x1xf32>
    %cst_256 = arith.constant 1.280000e+02 : f32
    %574 = vector.broadcast %cst_256 : f32 to vector<8x1xf32>
    %575 = arith.divf %573, %574 : vector<8x1xf32>
    %576 = vector.broadcast %575 : vector<8x1xf32> to vector<8x128xf32>
    %577 = arith.subf %571, %576 : vector<8x128xf32>
    %578 = arith.mulf %577, %577 : vector<8x128xf32>
    %cst_257 = arith.constant dense<0.000000e+00> : vector<8xf32>
    %579 = vector.multi_reduction <add>, %578, %cst_257 [1] : vector<8x128xf32> to vector<8xf32>
    %580 = vector.shape_cast %579 : vector<8xf32> to vector<8x1xf32>
    %cst_258 = arith.constant 0.00787401571 : f32
    %581 = vector.broadcast %cst_258 : f32 to vector<8x1xf32>
    %582 = arith.mulf %580, %581 : vector<8x1xf32>
    %583 = vector.broadcast %575 : vector<8x1xf32> to vector<8x128xf32>
    %584 = arith.subf %571, %583 : vector<8x128xf32>
    %cst_259 = arith.constant 9.99999993E-9 : f32
    %585 = vector.broadcast %cst_259 : f32 to vector<8x1xf32>
    %586 = arith.addf %582, %585 : vector<8x1xf32>
    %587 = math.rsqrt %586 : vector<8x1xf32>
    %588 = vector.broadcast %587 : vector<8x1xf32> to vector<8x128xf32>
    %589 = arith.mulf %584, %588 : vector<8x128xf32>
    %590 = vector.broadcast %3 : vector<8x1xf32> to vector<8x128xf32>
    %591 = arith.mulf %589, %590 : vector<8x128xf32>
    %592 = vector.shape_cast %591 : vector<8x128xf32> to vector<1x8x128xf32>
    %c0_260 = arith.constant 0 : index
    %c0_261 = arith.constant 0 : index
    %c0_262 = arith.constant 0 : index
    %593 = vector.load %arg12[%c0_260, %c0_261, %c0_262] : memref<1x8x128xf32, #tpu.memory_space<vmem>>, vector<1x8x128xf32>
    tpu.vector_store %arg12[%c0_260, %c0_261, %c0_262], %592 {strides = array<i32>} : memref<1x8x128xf32, #tpu.memory_space<vmem>>, vector<1x8x128xf32>,
    return
  }
  func.func @transform_0(%arg0: i32) -> (i32, i32, i32) {
    %c0_i32 = arith.constant 0 : i32
    %c0_i32_0 = arith.constant 0 : i32
    %c0_i32_1 = arith.constant 0 : i32
    return %arg0, %c0_i32, %c0_i32_0 : i32, i32, i32
  }
  func.func @transform_1(%arg0: i32) -> (i32, i32, i32) {
    %c0_i32 = arith.constant 0 : i32
    %c0_i32_0 = arith.constant 0 : i32
    %c0_i32_1 = arith.constant 0 : i32
    return %arg0, %c0_i32, %c0_i32_0 : i32, i32, i32
  }
  func.func @transform_2(%arg0: i32) -> (i32, i32, i32) {
    %c0_i32 = arith.constant 0 : i32
    %c0_i32_0 = arith.constant 0 : i32
    %c0_i32_1 = arith.constant 0 : i32
    return %arg0, %c0_i32, %c0_i32_0 : i32, i32, i32
  }
  func.func @transform_3(%arg0: i32) -> (i32, i32, i32) {
    %c0_i32 = arith.constant 0 : i32
    %c0_i32_0 = arith.constant 0 : i32
    %c0_i32_1 = arith.constant 0 : i32
    %c0_i32_2 = arith.constant 0 : i32
    return %c0_i32, %c0_i32_0, %c0_i32_1 : i32, i32, i32
  }
  func.func @transform_4(%arg0: i32) -> (i32, i32, i32) {
    %c0_i32 = arith.constant 0 : i32
    %c0_i32_0 = arith.constant 0 : i32
    %c0_i32_1 = arith.constant 0 : i32
    %c0_i32_2 = arith.constant 0 : i32
    return %c0_i32, %c0_i32_0, %c0_i32_1 : i32, i32, i32
  }
  func.func @transform_5(%arg0: i32) -> (i32, i32, i32) {
    %c0_i32 = arith.constant 0 : i32
    %c0_i32_0 = arith.constant 0 : i32
    %c0_i32_1 = arith.constant 0 : i32
    %c0_i32_2 = arith.constant 0 : i32
    return %c0_i32, %c0_i32_0, %c0_i32_1 : i32, i32, i32
  }
  func.func @transform_6(%arg0: i32) -> (i32, i32, i32) {
    %c0_i32 = arith.constant 0 : i32
    %c0_i32_0 = arith.constant 0 : i32
    %c0_i32_1 = arith.constant 0 : i32
    %c0_i32_2 = arith.constant 0 : i32
    return %c0_i32, %c0_i32_0, %c0_i32_1 : i32, i32, i32
  }
  func.func @transform_7(%arg0: i32) -> (i32, i32, i32) {
    %c0_i32 = arith.constant 0 : i32
    %c0_i32_0 = arith.constant 0 : i32
    %c0_i32_1 = arith.constant 0 : i32
    %c0_i32_2 = arith.constant 0 : i32
    return %c0_i32, %c0_i32_0, %c0_i32_1 : i32, i32, i32
  }
  func.func @transform_8(%arg0: i32) -> (i32, i32, i32) {
    %c0_i32 = arith.constant 0 : i32
    %c0_i32_0 = arith.constant 0 : i32
    %c0_i32_1 = arith.constant 0 : i32
    %c0_i32_2 = arith.constant 0 : i32
    return %c0_i32, %c0_i32_0, %c0_i32_1 : i32, i32, i32
  }
  func.func @transform_9(%arg0: i32) -> (i32, i32, i32) {
    %c0_i32 = arith.constant 0 : i32
    %c0_i32_0 = arith.constant 0 : i32
    %c0_i32_1 = arith.constant 0 : i32
    %c0_i32_2 = arith.constant 0 : i32
    return %c0_i32, %c0_i32_0, %c0_i32_1 : i32, i32, i32
  }
  func.func @transform_10(%arg0: i32) -> (i32, i32, i32) {
    %c0_i32 = arith.constant 0 : i32
    %c0_i32_0 = arith.constant 0 : i32
    %c0_i32_1 = arith.constant 0 : i32
    %c0_i32_2 = arith.constant 0 : i32
    return %c0_i32, %c0_i32_0, %c0_i32_1 : i32, i32, i32
  }
  func.func @transform_11(%arg0: i32) -> (i32, i32, i32) {
    %c0_i32 = arith.constant 0 : i32
    %c0_i32_0 = arith.constant 0 : i32
    %c0_i32_1 = arith.constant 0 : i32
    return %arg0, %c0_i32, %c0_i32_0 : i32, i32, i32
  }
}

</mosaic_0001>

<bundles_post_ra>
// kernel: encoder_forward.1
= control target key start
LH: loop header
LB: loop body
LE: loop exit
PB: predicated region body
PF: predicated region fallthrough
CT: control target
= control target key end

     0   :  { %s25415_s0 = inlined_call_operand.vmem [shape: f32[2,8,128], index: 0, kind: input, shape index: {}]   ;;  %s25416_s1 = inlined_call_operand.vmem [shape: f32[2,1,8], index: 1, kind: input, shape index: {}]   ;;  %s25417_s2 = inlined_call_operand.vmem [shape: f32[2,8,1], index: 2, kind: input, shape index: {}]   ;;  %s25418_s3 = inlined_call_operand.hbm [shape: f32[6,128,384], index: 3, kind: input, shape index: {}]   ;;  %s25419_s4 = inlined_call_operand.hbm [shape: f32[6,1,384], index: 4, kind: input, shape index: {}]   ;;  %s25420_s5 = inlined_call_operand.hbm [shape: f32[6,128,128], index: 5, kind: input, shape index: {}]   ;;  %s25421_s6 = inlined_call_operand.hbm [shape: f32[6,1,128], index: 6, kind: input, shape index: {}]   ;;  %s25422_s7 = inlined_call_operand.hbm [shape: f32[6,128,512], index: 7, kind: input, shape index: {}]   ;;  %s25423_s8 = inlined_call_operand.hbm [shape: f32[6,1,512], index: 8, kind: input, shape index: {}]   ;;  %s25424_s9 = inlined_call_operand.hbm [shape: f32[6,512,128], index: 9, kind: input, shape index: {}]   ;;  %s25425_s10 = inlined_call_operand.hbm [shape: f32[6,1,128], index: 10, kind: input, shape index: {}]   ;;  %s25426_s11 = inlined_call_operand.hbm [shape: f32[2,8,128], index: 11, kind: output, shape index: {}]  }
   0x1   :  { %25440 = sst [smem:[#allocation29_spill]] %s25419_s4 }
   0x2   :  { %16 = vsyncpa [#allocation3], 0 }
   0x3   :  { %17 = vsyncpa [#allocation6], 0 }
   0x4   :  { %18 = vsyncpa [#allocation9], 0 }
   0x5   :  { %19 = vsyncpa [#allocation12], 0 }
   0x6   :  { %20 = vsyncpa [#allocation15], 0 }
   0x7   :  { %21 = vsyncpa [#allocation4], 0 }
   0x8   :  { %23 = vsyncpa [#allocation4 + $0x1], 0  ;;  %s23866_s17 = smov 0   ;;  %s23868_s18 = smov 0  }
   0x9   :  { %s23870_s19 = smov 0   ;;  %s23872_s20 = smov 0  }
   0xa LB: > { %25441 = sst [smem:[#allocation23_spill]] %s23767_s17  ;;  %s23887_s21 = sadd.s32 4294967295, %s23779_s20   ;;  %s23779_s20 = sphi %s23872_s20, %s25473_s20   ;;  %s23775_s19 = sphi %s23870_s19, %s25475_s19   ;;  %s23771_s18 = sphi %s23868_s18, %s25477_s18   ;;  %s23767_s17 = sphi %s23866_s17, %s25476_s17  }
   0xb   : > { %25442 = sst [smem:[#allocation24_spill]] %s23775_s19  ;;  %s19966_s22 = sadd.s32 4294967294, %s23779_s20  }
   0xc   : > { %25443 = sst [smem:[#allocation25_spill]] %s23779_s20  ;;  %s23891_s23 = sadd.s32 1, %s23779_s20  }
   0xd   : > { %25444 = sst [smem:[#allocation26_spill]] %s23891_s23  ;;  %s282_s24 = sadd.s32 1, %s23775_s19 }
   0xe   : > { %s279_s25 = ssub.s32 %s23779_s20, %s23891_s23  ;;  %p292_p0 = scmp.ne.s32.totalorder %s23775_s19, %s23771_s18 }
   0xf   : > { %p280_p1 = scmp.eq.s32.totalorder %s279_s25, 0  ;;  %p293_p2 = scmp.eq.s32.totalorder %s23887_s21, 1 }
  0x10   : > { %p298_p3 = scmp.ne.s32.totalorder %s23771_s18, %s23767_s17  ;;  %p299_p4 = scmp.eq.s32.totalorder %s19966_s22, 1 }
  0x11   : > { %s23902_s26 = scalar_select %p280_p1, %s23775_s19, %s282_s24  }
  0x12   : > { %p23904_p5 = por %p293_p2, %p292_p0  ;;  %p23908_p6 = por %p299_p4, %p298_p3 }
  0x13   : > { %25445 = sst [smem:[#allocation27_spill]] %s23902_s26  ;;  %p19967_p7 = scmp.ge.s32.totalorder %s23779_s20, 1 }
  0x14   : > { %s25446_s27 = scalar_select %p23904_p5, 1, 0 }
  0x15   : > { %s25447_s28 = scalar_select %p23908_p6, 1, 0 }
  0x16   : > { %p306_p8 = scmp.lt.s32.totalorder %s23779_s20, 3  ;;  %p25428_p9 = scmp.eq.s32.totalorder %s23887_s21, 0 }
  0x17   : > { %25448 = sst [smem:[#allocation28_spill]] %s25447_s28  ;;  %s23781_s30 = smov [#allocation5]  }
  0x18   : > { %p23915_p10 = pnand %p19967_p7, %p306_p8  ;;  %s331_s12 = sshll.u32 %s23781_s30, 4  ;;  %s332_s12 = int_to_ptr.vmem [resolvable:$true] %s331_s12 }
  0x19   : > { %s23782_s14 = smov [#allocation8]   ;;  %s25451_s4 = sld [smem:[#allocation29_spill]] }
  0x1a   : > { %s25449_s29 = scalar_select %p23915_p10, 1, 0 }
  0x1b   : > { %p23148_p11 = pneg %p23915_p10  ;;  %s357_s15 = sshll.u32 %s23782_s14, 4  ;;  %s23927_s15 = int_to_ptr.vmem [resolvable:$true] %s357_s15 }
  0x1d   : > { %p23923_p12 = pnand %p25428_p9, %p23148_p11 }
  0x1f   : > { %s23473_s24 = scalar_lea.hbm %s25451_s4, 288  ;;  %p23937_p0 = pneg %p23923_p12 }
  0x20   : > { %p23474_p13 = scmp.ne.s32.totalorder %s25451_s4, %s23473_s24  ;;  %p23480_p3 = scmp.lt.u32.totalorder %s23473_s24, %s25451_s4 }
  0x22   : > { %p23476_p1 = pnand %p23937_p0, %p23474_p13 }
  0x24   : > { %p23477_p2 = pneg %p23476_p1 }
  0x26   : > { %p23482_p4 = pnand %p23480_p3, %p23477_p2 }
  0x28   : > { %23485 = shalt.err (!%p23482_p4)
}
  0x29   : > { %s23486_s16 = scalar_lea.vmem %s332_s12, 288  ;;  %p23494_p9 = scmp.lt.s32.totalorder %s332_s12, %s332_s12 }
  0x2a   : > { %p23487_p7 = scmp.ne.s32.totalorder %s332_s12, %s23486_s16  ;;  %p23495_p6 = scmp.lt.s32.totalorder %s23486_s16, %s23486_s16 }
  0x2c   : > { %p23489_p8 = pnand %p23487_p7, %p23937_p0  ;;  %p23496_p5 = por %p23495_p6, %p23494_p9 }
  0x2e   : > { %p23490_p11 = pneg %p23489_p8 }
  0x30   : > { %p23497_p10 = pnand %p23496_p5, %p23490_p11 }
  0x32   : > { %23500 = shalt.err (!%p23497_p10)
}
  0x33   : > { %s23783_s26 = smov 48   ;;  %s23784_s22 = smov 3  }
  0x34   : > { %23154 = dma.hbm_to_vmem [thread:$0]  (!%p23923_p12), %s25451_s4, 288, %s332_s12, [#allocation6], %s23783_s26, %s23783_s26, %s23784_s22  }
  0x35   : > { %s23501_s23 = scalar_lea.hbm %s25421_s6, 96 }
  0x36   : > { %p23502_p13 = scmp.ne.s32.totalorder %s25421_s6, %s23501_s23  ;;  %p23508_p9 = scmp.lt.u32.totalorder %s23501_s23, %s25421_s6 }
  0x38   : > { %p23504_p5 = pnand %p23502_p13, %p23937_p0 }
  0x3a   : > { %p23505_p6 = pneg %p23504_p5 }
  0x3c   : > { %p23510_p10 = pnand %p23508_p9, %p23505_p6 }
  0x3e   : > { %23513 = shalt.err (!%p23510_p10)
}
  0x3f   : > { %s23514_s12 = scalar_lea.vmem %s23927_s15, 96  ;;  %p23522_p4 = scmp.lt.s32.totalorder %s23927_s15, %s23927_s15 }
  0x40   : > { %p23515_p1 = scmp.ne.s32.totalorder %s23927_s15, %s23514_s12  ;;  %p23523_p7 = scmp.lt.s32.totalorder %s23514_s12, %s23514_s12 }
  0x42   : > { %p23517_p2 = pnand %p23515_p1, %p23937_p0  ;;  %p23524_p8 = por %p23523_p7, %p23522_p4 }
  0x44   : > { %p23518_p3 = pneg %p23517_p2 }
  0x46   : > { %p23525_p11 = pnand %p23524_p8, %p23518_p3 }
  0x48   : > { %23528 = shalt.err (!%p23525_p11)
}
  0x49   : > { %s25436_s17 = smov 16   ;;  %s25437_s20 = smov 1  }
  0x4a   : > { %23160 = dma.hbm_to_vmem [thread:$0]  (!%p23923_p12), %s25421_s6, 96, %s23927_s15, [#allocation9], %s25436_s17, %s25436_s17, %s25437_s20  }
  0x4b   : > { %s23787_s26 = smov [#allocation11]   ;;  %s23529_s25 = scalar_lea.hbm %s25423_s8, 384 }
  0x4c   : > { %s383_s22 = sshll.u32 %s23787_s26, 4  ;;  %p23530_p13 = scmp.ne.s32.totalorder %s25423_s8, %s23529_s25  ;;  %s384_s22 = int_to_ptr.vmem [resolvable:$true] %s383_s22 }
  0x4d   : > { %p23536_p9 = scmp.lt.u32.totalorder %s23529_s25, %s25423_s8 }
  0x4e   : > { %p23532_p5 = pnand %p23530_p13, %p23937_p0 }
  0x50   : > { %p23533_p6 = pneg %p23532_p5 }
  0x52   : > { %p23538_p10 = pnand %p23536_p9, %p23533_p6 }
  0x54   : > { %23541 = shalt.err (!%p23538_p10)
}
  0x55   : > { %s23542_s15 = scalar_lea.vmem %s384_s22, 384  ;;  %p23550_p4 = scmp.lt.s32.totalorder %s384_s22, %s384_s22 }
  0x56   : > { %p23543_p1 = scmp.ne.s32.totalorder %s384_s22, %s23542_s15  ;;  %p23551_p7 = scmp.lt.s32.totalorder %s23542_s15, %s23542_s15 }
  0x58   : > { %p23545_p2 = pnand %p23543_p1, %p23937_p0  ;;  %p23552_p8 = por %p23551_p7, %p23550_p4 }
  0x5a   : > { %p23546_p3 = pneg %p23545_p2 }
  0x5c   : > { %p23553_p11 = pnand %p23552_p8, %p23546_p3 }
  0x5e   : > { %23556 = shalt.err (!%p23553_p11)
}
  0x5f   : > { %s23788_s23 = smov 64   ;;  %s23789_s28 = smov 4  }
  0x60   : > { %23166 = dma.hbm_to_vmem [thread:$0]  (!%p23923_p12), %s25423_s8, 384, %s384_s22, [#allocation12], %s23788_s23, %s23788_s23, %s23789_s28  }
  0x61   : > { %s23790_s19 = smov [#allocation2]   ;;  %s23557_s16 = scalar_lea.hbm %s25418_s3, 36864 }
  0x62   : > { %s318_s24 = sshll.u32 %s23790_s19, 4  ;;  %p23558_p13 = scmp.ne.s32.totalorder %s25418_s3, %s23557_s16  ;;  %s319_s24 = int_to_ptr.vmem [resolvable:$true] %s318_s24 }
  0x63   : > { %p23564_p9 = scmp.lt.u32.totalorder %s23557_s16, %s25418_s3 }
  0x64   : > { %p23560_p5 = pnand %p23558_p13, %p23937_p0 }
  0x66   : > { %p23561_p6 = pneg %p23560_p5 }
  0x68   : > { %p23566_p10 = pnand %p23564_p9, %p23561_p6 }
  0x6a   : > { %23569 = shalt.err (!%p23566_p10)
}
  0x6b   : > { %s23570_s22 = scalar_lea.vmem %s319_s24, 36864  ;;  %p23578_p4 = scmp.lt.s32.totalorder %s319_s24, %s319_s24 }
  0x6c   : > { %p23571_p1 = scmp.ne.s32.totalorder %s319_s24, %s23570_s22  ;;  %p23579_p7 = scmp.lt.s32.totalorder %s23570_s22, %s23570_s22 }
  0x6e   : > { %p23573_p2 = pnand %p23571_p1, %p23937_p0  ;;  %p23580_p8 = por %p23579_p7, %p23578_p4 }
  0x70   : > { %p23574_p3 = pneg %p23573_p2 }
  0x72   : > { %p23581_p11 = pnand %p23580_p8, %p23574_p3 }
  0x74   : > { %23584 = shalt.err (!%p23581_p11)
}
  0x75   : > { %s23791_s23 = smov 384   ;;  %s23792_s28 = smov 24  }
  0x76   : > { %23151 = dma.hbm_to_vmem [thread:$0]  (!%p23923_p12), %s25418_s3, 36864, %s319_s24, [#allocation3], %s23791_s23, %s23791_s23, %s23792_s28  }
  0x77   : > { %s23793_s4 = smov [#allocation7]   ;;  %s23585_s14 = scalar_lea.hbm %s25420_s5, 12288 }
  0x78   : > { %s344_s26 = sshll.u32 %s23793_s4, 4  ;;  %p23586_p13 = scmp.ne.s32.totalorder %s25420_s5, %s23585_s14  ;;  %s345_s26 = int_to_ptr.vmem [resolvable:$true] %s344_s26 }
  0x79   : > { %p23592_p9 = scmp.lt.u32.totalorder %s23585_s14, %s25420_s5 }
  0x7a   : > { %p23588_p5 = pnand %p23586_p13, %p23937_p0 }
  0x7c   : > { %p23589_p6 = pneg %p23588_p5 }
  0x7e   : > { %p23594_p10 = pnand %p23592_p9, %p23589_p6 }
  0x80   : > { %23597 = shalt.err (!%p23594_p10)
}
  0x81   : > { %s23598_s24 = scalar_lea.vmem %s345_s26, 12288  ;;  %p23606_p4 = scmp.lt.s32.totalorder %s345_s26, %s345_s26 }
  0x82   : > { %p23599_p1 = scmp.ne.s32.totalorder %s345_s26, %s23598_s24  ;;  %p23607_p7 = scmp.lt.s32.totalorder %s23598_s24, %s23598_s24 }
  0x84   : > { %p23601_p2 = pnand %p23599_p1, %p23937_p0  ;;  %p23608_p8 = por %p23607_p7, %p23606_p4 }
  0x86   : > { %p23602_p3 = pneg %p23601_p2 }
  0x88   : > { %p23609_p11 = pnand %p23608_p8, %p23602_p3 }
  0x8a   : > { %23612 = shalt.err (!%p23609_p11)
}
  0x8b   : > { %s25438_s23 = smov 128   ;;  %s25439_s28 = smov 8  }
  0x8c   : > { %23157 = dma.hbm_to_vmem [thread:$0]  (!%p23923_p12), %s25420_s5, 12288, %s345_s26, [#allocation6], %s25438_s23, %s25438_s23, %s25439_s28  }
  0x8d   : > { %s23796_s4 = smov [#allocation10]   ;;  %s23613_s16 = scalar_lea.hbm %s25422_s7, 49152 }
  0x8e   : > { %s370_s19 = sshll.u32 %s23796_s4, 4  ;;  %p23614_p13 = scmp.ne.s32.totalorder %s25422_s7, %s23613_s16  ;;  %s371_s19 = int_to_ptr.vmem [resolvable:$true] %s370_s19 }
  0x8f   : > { %p23620_p9 = scmp.lt.u32.totalorder %s23613_s16, %s25422_s7 }
  0x90   : > { %p23616_p5 = pnand %p23614_p13, %p23937_p0 }
  0x92   : > { %p23617_p6 = pneg %p23616_p5 }
  0x94   : > { %p23622_p10 = pnand %p23620_p9, %p23617_p6 }
  0x96   : > { %23625 = shalt.err (!%p23622_p10)
}
  0x97   : > { %s23626_s26 = scalar_lea.vmem %s371_s19, 49152  ;;  %p23634_p4 = scmp.lt.s32.totalorder %s371_s19, %s371_s19 }
  0x98   : > { %p23627_p1 = scmp.ne.s32.totalorder %s371_s19, %s23626_s26  ;;  %p23635_p7 = scmp.lt.s32.totalorder %s23626_s26, %s23626_s26 }
  0x9a   : > { %p23629_p2 = pnand %p23627_p1, %p23937_p0  ;;  %p23636_p8 = por %p23635_p7, %p23634_p4 }
  0x9c   : > { %p23630_p3 = pneg %p23629_p2 }
  0x9e   : > { %p23637_p11 = pnand %p23636_p8, %p23630_p3 }
  0xa0   : > { %23640 = shalt.err (!%p23637_p11)
}
  0xa1   : > { %s23797_s17 = smov 512   ;;  %s23798_s20 = smov 32  }
  0xa2   : > { %23163 = dma.hbm_to_vmem [thread:$0]  (!%p23923_p12), %s25422_s7, 49152, %s371_s19, [#allocation9], %s23797_s17, %s23797_s17, %s23798_s20  }
  0xa3   : > { %s23799_s14 = smov [#allocation13]   ;;  %s23800_s12 = smov [#allocation14]  }
  0xa4   : > { %s396_s16 = sshll.u32 %s23799_s14, 4  ;;  %s409_s15 = sshll.u32 %s23800_s12, 4  ;;  %s397_s16 = int_to_ptr.vmem [resolvable:$true] %s396_s16  ;;  %s24054_s15 = int_to_ptr.vmem [resolvable:$true] %s409_s15 }
  0xa5   : > { %s23641_s26 = scalar_lea.hbm %s25424_s9, 49152 }
  0xa6   : > { %p23642_p13 = scmp.ne.s32.totalorder %s25424_s9, %s23641_s26  ;;  %p23648_p9 = scmp.lt.u32.totalorder %s23641_s26, %s25424_s9 }
  0xa8   : > { %p23644_p5 = pnand %p23642_p13, %p23937_p0 }
  0xaa   : > { %p23645_p6 = pneg %p23644_p5 }
  0xac   : > { %p23650_p10 = pnand %p23648_p9, %p23645_p6 }
  0xae   : > { %23653 = shalt.err (!%p23650_p10)
}
  0xaf   : > { %s23654_s17 = scalar_lea.vmem %s397_s16, 49152  ;;  %p23662_p4 = scmp.lt.s32.totalorder %s397_s16, %s397_s16 }
  0xb0   : > { %p23655_p1 = scmp.ne.s32.totalorder %s397_s16, %s23654_s17  ;;  %p23663_p7 = scmp.lt.s32.totalorder %s23654_s17, %s23654_s17 }
  0xb2   : > { %p23657_p2 = pnand %p23655_p1, %p23937_p0  ;;  %p23664_p8 = por %p23663_p7, %p23662_p4 }
  0xb4   : > { %p23658_p3 = pneg %p23657_p2 }
  0xb6   : > { %p23665_p11 = pnand %p23664_p8, %p23658_p3 }
  0xb8   : > { %23668 = shalt.err (!%p23665_p11)
}
  0xb9   : > { %s25453_s23 = smov 8   ;;  %s25454_s28 = smov 128  }
  0xba   : > { %23169 = dma.hbm_to_vmem [thread:$0]  (!%p23923_p12), %s25424_s9, 49152, %s397_s16, [#allocation12], %s25454_s28, %s25454_s28, %s25453_s23  }
  0xbb   : > { %s23669_s22 = scalar_lea.hbm %s25425_s10, 96 }
  0xbc   : > { %p23670_p13 = scmp.ne.s32.totalorder %s25425_s10, %s23669_s22  ;;  %p23676_p9 = scmp.lt.u32.totalorder %s23669_s22, %s25425_s10 }
  0xbe   : > { %p23672_p5 = pnand %p23670_p13, %p23937_p0 }
  0xc0   : > { %p23673_p6 = pneg %p23672_p5 }
  0xc2   : > { %p23678_p10 = pnand %p23676_p9, %p23673_p6 }
  0xc4   : > { %23681 = shalt.err (!%p23678_p10)
}
  0xc5   : > { %s23682_s16 = scalar_lea.vmem %s24054_s15, 96  ;;  %p23690_p4 = scmp.lt.s32.totalorder %s24054_s15, %s24054_s15 }
  0xc6   : > { %p23683_p1 = scmp.ne.s32.totalorder %s24054_s15, %s23682_s16  ;;  %p23691_p7 = scmp.lt.s32.totalorder %s23682_s16, %s23682_s16 }
  0xc8   : > { %p23685_p2 = pnand %p23683_p1, %p23937_p0  ;;  %p23692_p8 = por %p23691_p7, %p23690_p4 }
  0xca   : > { %p23686_p3 = pneg %p23685_p2 }
  0xcc   : > { %p23693_p11 = pnand %p23692_p8, %p23686_p3 }
  0xce   : > { %23696 = shalt.err (!%p23693_p11)
}
  0xcf   : > { %s25455_s17 = smov 1   ;;  %s25456_s23 = smov 16  }
  0xd0   : > { %23172 = dma.hbm_to_vmem [thread:$0]  (!%p23923_p12), %s25425_s10, 96, %s24054_s15, [#allocation15], %s25456_s23, %s25456_s23, %s25455_s17  }
  0xd1   : > { %p25457_p13 = scmp.ne.s32.totalorder %s25449_s29, 0 }
  0xd2   : > { %p25458_p0 = scmp.eq.s32.totalorder (!%p25457_p13), %s23887_s21, 0 }
  0xd3   : > { %445 = sbr.rel (%p25457_p13) target bundleno = 18770 (0x4952), region = 64 }
  0xda   : > { %23742 = dma.done.wait (%p25458_p0), [#allocation3], 36864   ;;  %p25459_p5 = pmov %p25458_p0 }
  0xdb   : > { %p25460_p6 = pmov %p25458_p0 }
  0xdc   : > { %23744 = vsyncadd (%p25459_p5), [#allocation3], 4294930432 }
  0xdd   : > { %23746 = dma.done.wait (%p25460_p6), [#allocation6], 12576   ;;  %p25461_p9 = pmov %p25458_p0 }
  0xde   : > { %p25462_p10 = pmov %p25458_p0 }
  0xdf   : > { %23748 = vsyncadd (%p25461_p9), [#allocation6], 4294954720 }
  0xe0   : > { %23750 = dma.done.wait (%p25462_p10), [#allocation9], 49248   ;;  %p25463_p12 = pmov %p25458_p0 }
  0xe1   : > { %p25464_p1 = pmov %p25458_p0 }
  0xe2   : > { %23752 = vsyncadd (%p25463_p12), [#allocation9], 4294918048 }
  0xe3   : > { %23754 = dma.done.wait (%p25464_p1), [#allocation12], 49536   ;;  %p25465_p2 = pmov %p25458_p0 }
  0xe4   : > { %p25466_p3 = pmov %p25458_p0 }
  0xe5   : > { %23756 = vsyncadd (%p25465_p2), [#allocation12], 4294917760 }
  0xe6   : > { %23758 = dma.done.wait (%p25466_p3), [#allocation15], 96   ;;  %p25467_p4 = pmov %p25458_p0 }
  0xe7   : > { %v23801_v0 = vmov 0.0   ;;  %v534_v1 = vld [vmem:[#allocation2 + $0x8] sm:$0xff]  ;;  %v537_v2 = vld [vmem:[#allocation2 + $0x20] sm:$0xff]  ;;  %v536_v5 = vld [vmem:[#allocation2 + $0x18] sm:$0xff]  ;;  %p519_p7 = scmp.lt.s32.totalorder %s23887_s21, 1  ;;  %v583_v50 = vlaneseq  ;;  %vm23803_vm0 = vmmov 0  }
  0xe8   : > { %23760 = vsyncadd (%p25467_p4), [#allocation15], 4294967200  ;;  %662 = vmatprep.mubr.f32.mxu0 %v23801_v0  ;;  %v533_v3 = vld [vmem:[#allocation2] sm:$0xff]  ;;  %v21866_v4 = vpack.c.bf16 %v537_v2, %v534_v1  ;;  %v540_v6 = vld [vmem:[#allocation2 + $0x38] sm:$0xff]  ;;  %20998 = vmatprep.mubr.msk.f32.mxu1 %vm23803_vm0, %v23801_v0  ;;  %vm1609_vm1 = vcmask 130048   ;;  %vm2218_vm2 = vcmask 64512  }
  0xe9   : > { %v543_v7 = vld [vmem:[#allocation2 + $0x50] sm:$0xff]  ;;  %v21868_v8 = vpack.c.bf16 %v536_v5, %v533_v3  ;;  %v542_v11 = vld [vmem:[#allocation2 + $0x48] sm:$0xff]  ;;  %v549_v13 = vld [vmem:[#allocation2 + $0x80] sm:$0xff]  ;;  %s24128_s29 = scalar_select %p519_p7, %s23887_s21, 1  ;;  %v24143_v51 = vshrl.u32 %v583_v50, 7 }
  0xea   : > { %v21870_v9 = vpack.c.bf16 %v543_v7, %v540_v6  ;;  %v539_v10 = vld [vmem:[#allocation2 + $0x30] sm:$0xff]  ;;  %v546_v12 = vld [vmem:[#allocation2 + $0x68] sm:$0xff]  ;;  %21867 = vmatprep.subr.bf16.mxu0 %v21866_v4  ;;  %v545_v16 = vld [vmem:[#allocation2 + $0x60] sm:$0xff]  ;;  %v23802_v7 = vmov 0.0|0.0   ;;  %s516_s19 = sand.u32 1, %s23771_s18   ;;  %s20147_s17 = sshll.u32 %s23887_s21, 7 }
  0xeb   : > { %21869 = vmatpush1.bf16.msra.mxu0 %v21868_v8  ;;  %v21872_v14 = vpack.c.bf16 %v542_v11, %v539_v10  ;;  %v21874_v15 = vpack.c.bf16 %v549_v13, %v546_v12  ;;  %v548_v17 = vld [vmem:[#allocation2 + $0x78] sm:$0xff]  ;;  %v555_v19 = vld [vmem:[#allocation2 + $0xb0] sm:$0xff]  ;;  %v554_v23 = vld [vmem:[#allocation2 + $0xa8] sm:$0xff]  ;;  %s19987_s13 = sshll.u32 %s24128_s29, 3  ;;  %v24146_v52 = vsub.s32 0, %v24143_v51  ;;  %v24153_v58 = vsub.s32 1, %v24143_v51  ;;  %21898 = vmatprep.subr.bf16.mxu1 %v23802_v7  ;;  %s24235_s22 = scalar_lea.vmem %s25416_s1, %s24128_s29 }
  0xec   : > { %21871 = vmatprep.subr.bf16.mxu0 %v21870_v9  ;;  %v552_v18 = vld [vmem:[#allocation2 + $0x98] sm:$0xff]  ;;  %v21876_v20 = vpack.c.bf16 %v548_v17, %v545_v16  ;;  %v551_v22 = vld [vmem:[#allocation2 + $0x90] sm:$0xff]  ;;  %v558_v24 = vld [vmem:[#allocation2 + $0xc8] sm:$0xff]  ;;  %s24136_s25 = scalar_lea.vmem %s25415_s0, %s19987_s13  ;;  %s529_s4 = scalar_lea.vmem %s25417_s2, %s19987_s13 }
  0xed   : > { %v21878_v21 = vpack.c.bf16 %v555_v19, %v552_v18  ;;  %v561_v25 = vld [vmem:[#allocation2 + $0xe0] sm:$0xff]  ;;  %v21880_v26 = vpack.c.bf16 %v554_v23, %v551_v22  ;;  %v560_v29 = vld [vmem:[#allocation2 + $0xd8] sm:$0xff]  ;;  %v567_v31 = vld [vmem:[#allocation2 + $0x110] sm:$0xff]  ;;  %s19986_s16 = sshll.u32 %s516_s19, 3  ;;  %s25373_s13 = scalar_lea.hbm %s25426_s11, %s20147_s17 }
  0xee   : > { %v21882_v27 = vpack.c.bf16 %v561_v25, %v558_v24  ;;  %v557_v28 = vld [vmem:[#allocation2 + $0xc0] sm:$0xff]  ;;  %v564_v30 = vld [vmem:[#allocation2 + $0xf8] sm:$0xff]  ;;  %v563_v34 = vld [vmem:[#allocation2 + $0xf0] sm:$0xff]  ;;  %s518_s23 = scalar_lea.vmem [#allocation16], %s19986_s16  ;;  %s19794_s30 = scalar_lea.sflag [#allocation4], %s516_s19 }
  0xef   : > { %21873 = vmatpush1.bf16.msra.mxu0 %v21872_v14  ;;  %v21884_v32 = vpack.c.bf16 %v560_v29, %v557_v28  ;;  %v21886_v33 = vpack.c.bf16 %v567_v31, %v564_v30  ;;  %v566_v35 = vld [vmem:[#allocation2 + $0x108] sm:$0xff]  ;;  %v573_v37 = vld [vmem:[#allocation2 + $0x140] sm:$0xff]  ;;  %v572_v41 = vld [vmem:[#allocation2 + $0x138] sm:$0xff]  ;;  %s19807_s28 = sshll.u32 %s518_s23, 4  ;;  %p25468_p11 = scmp.ne.s32.totalorder %s25446_s27, 0  ;;  %s25375_s28 = int_to_ptr.vmem [resolvable:$true] %s19807_s28 }
  0xf0   : > { %21875 = vmatprep.subr.bf16.mxu0 %v21874_v15  ;;  %v570_v36 = vld [vmem:[#allocation2 + $0x128] sm:$0xff]  ;;  %v21888_v38 = vpack.c.bf16 %v566_v35, %v563_v34  ;;  %v569_v40 = vld [vmem:[#allocation2 + $0x120] sm:$0xff]  ;;  %v576_v42 = vld [vmem:[#allocation2 + $0x158] sm:$0xff]  ;;  %s23697_s15 = scalar_lea.vmem %s25375_s28, 128  ;;  %s23805_s21 = smov [#allocation16]  }
  0xf1   : > { %v21890_v39 = vpack.c.bf16 %v573_v37, %v570_v36  ;;  %v579_v43 = vld [vmem:[#allocation2 + $0x170] sm:$0xff]  ;;  %v21892_v44 = vpack.c.bf16 %v572_v41, %v569_v40  ;;  %v578_v47 = vld [vmem:[#allocation2 + $0x168] sm:$0xff]  ;;  %v24139_v49 = vld [vmem:[%s24136_s25] sm:$0xff]  ;;  %p23698_p8 = scmp.ne.s32.totalorder %s25375_s28, %s23697_s15 }
  0xf2   : > { %v21894_v45 = vpack.c.bf16 %v579_v43, %v576_v42  ;;  %v575_v46 = vld [vmem:[#allocation2 + $0x150] sm:$0xff]  ;;  %v24148_v53 = vld [vmem:[#allocation5] sm:$0x7]  ;;  %v538_v6 = vld [vmem:[#allocation2 + $0x28] sm:$0xff] }
  0xf3   : > { %21877 = vmatpush1.bf16.msra.mxu0 %v21876_v20  ;;  %v21896_v48 = vpack.c.bf16 %v578_v47, %v575_v46  ;;  %v586_v54 = vrot.slane %v24148_v53, %v24146_v52  ;;  %v590_v59 = vrot.slane %v24148_v53, %v24153_v58  ;;  %v535_v5 = vld [vmem:[#allocation2 + $0x10] sm:$0xff]  ;;  %v541_v10 = vld [vmem:[#allocation2 + $0x40] sm:$0xff]  ;;  %v544_v11 = vld [vmem:[#allocation2 + $0x58] sm:$0xff]  ;;  %p23699_p13 = pnand %p23698_p8, %p25468_p11 }
  0xf4   : > { %21879 = vmatprep.subr.bf16.mxu0 %v21878_v21  ;;  %v21899_v8 = vpack.c.bf16 %v538_v6, %v535_v5  ;;  %v21902_v12 = vpack.c.bf16 %v544_v11, %v541_v10  ;;  %v547_v14 = vld [vmem:[#allocation2 + $0x70] sm:$0xff]  ;;  %v550_v15 = vld [vmem:[#allocation2 + $0x88] sm:$0xff]  ;;  %v553_v18 = vld [vmem:[#allocation2 + $0xa0] sm:$0xff] }
  0xf5   : > { %v21905_v16 = vpack.c.bf16 %v550_v15, %v547_v14  ;;  %v556_v19 = vld [vmem:[#allocation2 + $0xb8] sm:$0xff]  ;;  %v559_v22 = vld [vmem:[#allocation2 + $0xd0] sm:$0xff]  ;;  %v562_v23 = vld [vmem:[#allocation2 + $0xe8] sm:$0xff]  ;;  %p23700_p0 = pneg %p23699_p13 }
  0xf6   : > { %21900 = vmatpush3.bf16.msra.mxu1 %v21899_v8  ;;  %v21908_v20 = vpack.c.bf16 %v556_v19, %v553_v18  ;;  %v21911_v24 = vpack.c.bf16 %v562_v23, %v559_v22  ;;  %v571_v28 = vld [vmem:[#allocation2 + $0x130] sm:$0xff]  ;;  %v574_v30 = vld [vmem:[#allocation2 + $0x148] sm:$0xff]  ;;  %v580_v34 = vld [vmem:[#allocation2 + $0x178] sm:$0xff] }
  0xf7   : > { %21881 = vmatpush1.bf16.msra.mxu0 %v21880_v26  ;;  %21901 = vmatprep.subr.bf16.mxu1 %v23802_v7  ;;  %v565_v26 = vld [vmem:[#allocation2 + $0x100] sm:$0xff] }
  0xf8   : > { %21883 = vmatprep.subr.bf16.mxu0 %v21882_v27  ;;  %v568_v27 = vld [vmem:[#allocation2 + $0x118] sm:$0xff] }
  0xf9   : > { %v21914_v29 = vpack.c.bf16 %v568_v27, %v565_v26 }
  0xfa   : > { %21903 = vmatpush3.bf16.msra.mxu1 %v21902_v12 }
  0xfb   : > { %21885 = vmatpush1.bf16.msra.mxu0 %v21884_v32  ;;  %21904 = vmatprep.subr.bf16.mxu1 %v23802_v7  ;;  %v21917_v32 = vpack.c.bf16 %v574_v30, %v571_v28 }
  0xfc   : > { %21887 = vmatprep.subr.bf16.mxu0 %v21886_v33  ;;  %v577_v33 = vld [vmem:[#allocation2 + $0x160] sm:$0xff] }
  0xfd   : > { %v21920_v36 = vpack.c.bf16 %v580_v34, %v577_v33 }
  0xfe   : > { %21906 = vmatpush3.bf16.msra.mxu1 %v21905_v16  ;;  %v19989_v16 = vld [vmem:[%s24235_s22] ss:$0 sm:$0xff] }
  0xff   : > { %21889 = vmatpush1.bf16.msra.mxu0 %v21888_v38  ;;  %21907 = vmatprep.subr.bf16.mxu1 %v23802_v7 }
 0x100   : > { %21891 = vmatprep.subr.bf16.mxu0 %v21890_v39 }
 0x102   : > { %21909 = vmatpush3.bf16.msra.mxu1 %v21908_v20 }
 0x103   : > { %21893 = vmatpush1.bf16.msra.mxu0 %v21892_v44  ;;  %21910 = vmatprep.subr.bf16.mxu1 %v23802_v7 }
 0x104   : > { %21895 = vmatprep.subr.bf16.mxu0 %v21894_v45 }
 0x106   : > { %21912 = vmatpush3.bf16.msra.mxu1 %v21911_v24 }
 0x107   : > { %21897 = vmatpush1.bf16.msra.mxu0 %v21896_v48  ;;  %21913 = vmatprep.subr.bf16.mxu1 %v23802_v7 }
 0x108   : > { %21041 = vmatprep.subr.mxu0 %v23801_v0 }
 0x10a   : > { %663 = vmatmul.mubr.f32.vlgmr.msra.gmra.mrb[0].mxu0 %v24139_v49  ;;  %21915 = vmatpush3.bf16.msra.mxu1 %v21914_v29 }
 0x10b   : > { %21043 = vmatprep.mubr.msk.f32.mxu0 %vm23803_vm0, %v23801_v0  ;;  %21916 = vmatprep.subr.bf16.mxu1 %v23802_v7 }
 0x10e   : > { %21918 = vmatpush3.bf16.msra.mxu1 %v21917_v32 }
 0x10f   : > { %21919 = vmatprep.subr.bf16.mxu1 %v23802_v7 }
 0x112   : > { %21921 = vmatpush3.bf16.msra.mxu1 %v21920_v36 }
 0x113   : > { %21001 = vmatprep.subr.mxu1 %v23801_v0 }
 0x115   : > { %20999 = vmatmul.mubr.f32.vlgmr.msra.gmra.mrb[0].mxu1 %v24139_v49 }
 0x116   : > { %21003 = vmatprep.mubr.msk.f32.mxu1 %vm23803_vm0, %v23801_v0 }
 0x1dd   : > { %v664_v55 = vpop.f32.mrb[0].mxu0 }
 0x1de   : > { %v666_v56 = vpop.f32.mrb[1].mxu0  ;;  %v665_v57 = vadd.f32 %v664_v55, %v586_v54 }
 0x1df   : > { %v667_v60 = vadd.f32 %v666_v56, %v590_v59 }
 0x1e0   : > { %739 = vxpose.xlu0.b32.start.end [1/1] (short) %v665_v57, 128 }
 0x1e8   : > { %v735_v10 = vpop.f32.mrb[0].mxu1 }
 0x1e9   : > { %v21000_v11 = vpop.f32.mrb[1].mxu1 }
 0x21d   : > { %771 = vxpose.xlu0.b32.start.end [1/1] (short) %v667_v60, 128 }
 0x260   : > { %v755_v61 = vpop.trf.xlu0 }
 0x261   : > { %835 = vxpose.xlu1.b32.start [1/2] (short) (narrow) %v755_v61, 8 }
 0x264   : > { %v756_v62 = vpop.trf.xlu0 }
 0x265   : > { %836 = vxpose.xlu1.b32.end [2/2] (short) (narrow) %v756_v62, 8 }
 0x268   : > { %v24157_v63 = vpop.trf.xlu0 }
 0x26c   : > { %v24159_v1 = vpop.trf.xlu0 }
 0x270   : > { %v24161_v2 = vpop.trf.xlu0 }
 0x274   : > { %v24163_v3 = vpop.trf.xlu0 }
 0x278   : > { %v24165_v4 = vpop.trf.xlu0 }
 0x27c   : > { %v24168_v9 = vpop.trf.xlu0 }
 0x280   : > { %v763_v13 = vpop.trf.xlu0 }
 0x281   : > { %963 = vxpose.xlu0.b32.start [1/2] (short) (narrow) %v763_v13, 8 }
 0x284   : > { %v764_v17 = vpop.trf.xlu0 }
 0x285   : > { %964 = vxpose.xlu0.b32.end [2/2] (short) (narrow) %v764_v17, 8 }
 0x288   : > { %v765_v21 = vpop.trf.xlu0 }
 0x28c   : > { %v766_v25 = vpop.trf.xlu0 }
 0x290   : > { %v767_v31 = vpop.trf.xlu0 }
 0x294   : > { %v768_v35 = vpop.trf.xlu0 }
 0x298   : > { %v769_v37 = vpop.trf.xlu0 }
 0x29c   : > { %v770_v38 = vpop.trf.xlu0 }
 0x2a0   : > { %v787_v39 = vpop.trf.xlu0 }
 0x2a1   : > { %1091 = vxpose.xlu1.b32.start [1/2] (short) (narrow) %v787_v39, 8 }
 0x2a4   : > { %v788_v40 = vpop.trf.xlu0 }
 0x2a5   : > { %1092 = vxpose.xlu1.b32.end [2/2] (short) (narrow) %v788_v40, 8 }
 0x2a8   : > { %v789_v41 = vpop.trf.xlu0 }
 0x2a9   : > { %867 = vxpose.xlu1.b32.start [1/2] (short) (narrow) %v24157_v63, 8 }
 0x2ac   : > { %v790_v42 = vpop.trf.xlu0 }
 0x2ad   : > { %868 = vxpose.xlu1.b32.end [2/2] (short) (narrow) %v24159_v1, 8 }
 0x2b0   : > { %v791_v43 = vpop.trf.xlu0 }
 0x2b1   : > { %1123 = vxpose.xlu1.b32.start [1/2] (short) (narrow) %v789_v41, 8 }
 0x2b4   : > { %v792_v44 = vpop.trf.xlu0 }
 0x2b5   : > { %1124 = vxpose.xlu1.b32.end [2/2] (short) (narrow) %v790_v42, 8 }
 0x2b8   : > { %v793_v45 = vpop.trf.xlu0 }
 0x2b9   : > { %899 = vxpose.xlu1.b32.start [1/2] (short) (narrow) %v24161_v2, 8 }
 0x2bc   : > { %v794_v46 = vpop.trf.xlu0 }
 0x2bd   : > { %900 = vxpose.xlu1.b32.end [2/2] (short) (narrow) %v24163_v3, 8 }
 0x2c0   : > { %v795_v47 = vpop.trf.xlu0 }
 0x2c1   : > { %1155 = vxpose.xlu1.b32.start [1/2] (short) (narrow) %v791_v43, 8 }
 0x2c4   : > { %v796_v48 = vpop.trf.xlu0 }
 0x2c5   : > { %1156 = vxpose.xlu1.b32.end [2/2] (short) (narrow) %v792_v44, 8 }
 0x2c8   : > { %v797_v50 = vpop.trf.xlu0 }
 0x2c9   : > { %931 = vxpose.xlu1.b32.start [1/2] (short) (narrow) %v24165_v4, 8 }
 0x2cc   : > { %v798_v54 = vpop.trf.xlu0 }
 0x2cd   : > { %932 = vxpose.xlu1.b32.end [2/2] (short) (narrow) %v24168_v9, 8 }
 0x2d0   : > { %v799_v55 = vpop.trf.xlu0 }
 0x2d1   : > { %1187 = vxpose.xlu1.b32.start [1/2] (short) (narrow) %v793_v45, 8  ;;  %v24260_v45 = vsub.s32 2, %v24143_v51 }
 0x2d4   : > { %v800_v56 = vpop.trf.xlu0 }
 0x2d5   : > { %1188 = vxpose.xlu1.b32.end [2/2] (short) (narrow) %v794_v46, 8  ;;  %v594_v46 = vrot.slane %v24148_v53, %v24260_v45 }
 0x2d8   : > { %v801_v57 = vpop.trf.xlu0 }
 0x2d9   : > { %1219 = vxpose.xlu1.b32.start [1/2] (short) (narrow) %v795_v47, 8  ;;  %v736_v47 = vadd.f32 %v735_v10, %v594_v46 }
 0x2dc   : > { %v802_v59 = vpop.trf.xlu0 }
 0x2dd   : > { %1220 = vxpose.xlu1.b32.end [2/2] (short) (narrow) %v796_v48, 8 }
 0x2e1   : > { %995 = vxpose.xlu1.b32.start [1/2] (short) (narrow) %v765_v21, 8  ;;  %v851_v60 = vpop.trf.xlu1 }
 0x2e5   : > { %996 = vxpose.xlu1.b32.end [2/2] (short) (narrow) %v766_v25, 8 }
 0x2e9   : > { %1251 = vxpose.xlu1.b32.start [1/2] (short) (narrow) %v797_v50, 8 }
 0x2ed   : > { %1252 = vxpose.xlu1.b32.end [2/2] (short) (narrow) %v798_v54, 8 }
 0x2f1   : > { %1027 = vxpose.xlu1.b32.start [1/2] (short) (narrow) %v767_v31, 8 }
 0x2f5   : > { %1028 = vxpose.xlu1.b32.end [2/2] (short) (narrow) %v768_v35, 8 }
 0x2f9   : > { %1283 = vxpose.xlu1.b32.start [1/2] (short) (narrow) %v799_v55, 8 }
 0x2fd   : > { %1284 = vxpose.xlu1.b32.end [2/2] (short) (narrow) %v800_v56, 8 }
 0x301   : > { %1315 = vxpose.xlu1.b32.start [1/2] (short) (narrow) %v801_v57, 8  ;;  %v979_v6 = vpop.trf.xlu0 }
 0x305   : > { %1316 = vxpose.xlu1.b32.end [2/2] (short) (narrow) %v802_v59, 8 }
 0x309   : > { %1059 = vxpose.xlu1.b32.start [1/2] (short) (narrow) %v769_v37, 8 }
 0x30d   : > { %1060 = vxpose.xlu1.b32.end [2/2] (short) (narrow) %v770_v38, 8 }
 0x321   : > { %v1107_v61 = vpop.trf.xlu1 }
 0x322   : > { %21002 = vmatpush3.xpose.msk.msra.mxu1 %vm1609_vm1, %v1107_v61 }
 0x323   : > { %21006 = vmatprep.subr.mxu1 %v23801_v0 }
 0x325   : > { %21004 = vmatmul.mubr.msk.f32.vlgmr.msra.gmra.mrb[2].mxu1 %vm1609_vm1, %v851_v60 }
 0x326   : > { %21008 = vmatprep.mubr.msk.f32.mxu1 %vm23803_vm0, %v23801_v0 }
 0x329   : > { %v883_v62 = vpop.trf.xlu1 }
 0x331   : > { %v1139_v63 = vpop.trf.xlu1 }
 0x332   : > { %21007 = vmatpush3.xpose.msk.msra.mxu1 %vm1609_vm1, %v1139_v63 }
 0x333   : > { %21011 = vmatprep.subr.mxu1 %v23801_v0 }
 0x335   : > { %21009 = vmatmul.mubr.msk.f32.vlgmr.msra.gmra.mrb[4].mxu1 %vm1609_vm1, %v883_v62 }
 0x336   : > { %21013 = vmatprep.mubr.msk.f32.mxu1 %vm23803_vm0, %v23801_v0 }
 0x339   : > { %v915_v1 = vpop.trf.xlu1 }
 0x341   : > { %v1171_v2 = vpop.trf.xlu1 }
 0x342   : > { %21012 = vmatpush3.xpose.msk.msra.mxu1 %vm1609_vm1, %v1171_v2 }
 0x343   : > { %21016 = vmatprep.subr.mxu1 %v23801_v0 }
 0x345   : > { %21014 = vmatmul.mubr.msk.f32.vlgmr.msra.gmra.mrb[6].mxu1 %vm1609_vm1, %v915_v1 }
 0x346   : > { %21018 = vmatprep.mubr.msk.f32.mxu1 %vm23803_vm0, %v23801_v0 }
 0x349   : > { %v947_v3 = vpop.trf.xlu1 }
 0x351   : > { %v1203_v4 = vpop.trf.xlu1 }
 0x352   : > { %21017 = vmatpush3.xpose.msk.msra.mxu1 %vm1609_vm1, %v1203_v4 }
 0x353   : > { %21021 = vmatprep.subr.mxu1 %v23801_v0 }
 0x355   : > { %21019 = vmatmul.mubr.msk.f32.vlgmr.msra.gmra.mrb[8].mxu1 %vm1609_vm1, %v947_v3 }
 0x356   : > { %21023 = vmatprep.mubr.msk.f32.mxu1 %vm23803_vm0, %v23801_v0 }
 0x359   : > { %v1235_v5 = vpop.trf.xlu1 }
 0x35a   : > { %21022 = vmatpush3.xpose.msk.msra.mxu1 %vm1609_vm1, %v1235_v5 }
 0x35b   : > { %21026 = vmatprep.subr.mxu1 %v23801_v0 }
 0x35d   : > { %21024 = vmatmul.mubr.msk.f32.vlgmr.msra.gmra.mrb[10].mxu1 %vm1609_vm1, %v979_v6 }
 0x35e   : > { %21028 = vmatprep.mubr.msk.f32.mxu1 %vm23803_vm0, %v23801_v0 }
 0x361   : > { %v1011_v8 = vpop.trf.xlu1 }
 0x369   : > { %v1267_v9 = vpop.trf.xlu1 }
 0x36a   : > { %21027 = vmatpush3.xpose.msk.msra.mxu1 %vm1609_vm1, %v1267_v9 }
 0x36b   : > { %21031 = vmatprep.subr.mxu1 %v23801_v0 }
 0x36d   : > { %21029 = vmatmul.mubr.msk.f32.vlgmr.msra.gmra.mrb[12].mxu1 %vm1609_vm1, %v1011_v8 }
 0x36e   : > { %21033 = vmatprep.mubr.msk.f32.mxu1 %vm23803_vm0, %v23801_v0 }
 0x371   : > { %v1043_v12 = vpop.trf.xlu1 }
 0x379   : > { %v1299_v13 = vpop.trf.xlu1 }
 0x37a   : > { %21032 = vmatpush3.xpose.msk.msra.mxu1 %vm1609_vm1, %v1299_v13 }
 0x37b   : > { %21036 = vmatprep.subr.mxu1 %v23801_v0 }
 0x37d   : > { %21034 = vmatmul.mubr.msk.f32.vlgmr.msra.gmra.mrb[14].mxu1 %vm1609_vm1, %v1043_v12 }
 0x37e   : > { %21038 = vmatprep.mubr.msk.f32.mxu1 %vm23803_vm0, %v23801_v0 }
 0x381   : > { %v1331_v14 = vpop.trf.xlu1 }
 0x382   : > { %21037 = vmatpush3.xpose.msk.msra.mxu1 %vm1609_vm1, %v1331_v14 }
 0x383   : > { %21046 = vmatprep.subr.mxu1 %v23801_v0 }
 0x389   : > { %v1075_v15 = vpop.trf.xlu1 }
 0x38a   : > { %21039 = vmatmul.mubr.msk.f32.vlgmr.msra.gmra.mrb[16].mxu1 %vm1609_vm1, %v1075_v15 }
 0x38b   : > { %21048 = vmatprep.mubr.msk.f32.mxu1 %vm23803_vm0, %v23801_v0 }
 0x3f8   : > { %v1682_v17 = vpop.f32.mrb[2].mxu1 }
 0x3f9   : > { %v1683_v18 = vadd.f32 %v19989_v16, %v1682_v17  ;;  %v21005_v19 = vpop.f32.mrb[3].mxu1 }
 0x3fb   : > { %v2219_v20 = vsel %vm2218_vm2, %v1683_v18, -inf }
 0x3fc   : > { %2220 = vmax.xlane.f32.xlu1 %v2219_v20 }
 0x408   : > { %v1758_v21 = vpop.f32.mrb[4].mxu1 }
 0x409   : > { %v21010_v22 = vpop.f32.mrb[5].mxu1  ;;  %v1759_v63 = vadd.f32 %v19989_v16, %v1758_v21 }
 0x40b   : > { %v2222_v53 = vsel %vm2218_vm2, %v1759_v63, -inf }
 0x418   : > { %v1834_v23 = vpop.f32.mrb[6].mxu1 }
 0x419   : > { %v24239_v24 = vadd.f32 %v19989_v16, %v1834_v23  ;;  %v21015_v25 = vpop.f32.mrb[7].mxu1 }
 0x41b   : > { %v2225_v26 = vsel %vm2218_vm2, %v24239_v24, -inf }
 0x41c   : > { %2226 = vmax.xlane.f32.xlu1 %v2225_v26 }
 0x428   : > { %v1910_v27 = vpop.f32.mrb[8].mxu1 }
 0x429   : > { %v24243_v28 = vadd.f32 %v19989_v16, %v1910_v27  ;;  %v21020_v29 = vpop.f32.mrb[9].mxu1 }
 0x42b   : > { %v2228_v30 = vsel %vm2218_vm2, %v24243_v28, -inf }
 0x42c   : > { %2229 = vmax.xlane.f32.xlu1 %v2228_v30 }
 0x430   : > { %v1986_v31 = vpop.f32.mrb[10].mxu1 }
 0x431   : > { %v24247_v32 = vadd.f32 %v19989_v16, %v1986_v31  ;;  %v21025_v33 = vpop.f32.mrb[11].mxu1 }
 0x433   : > { %v2231_v34 = vsel %vm2218_vm2, %v24247_v32, -inf }
 0x434   : > { %2232 = vmax.xlane.f32.xlu1 %v2231_v34 }
 0x440   : > { %v2062_v35 = vpop.f32.mrb[12].mxu1 }
 0x441   : > { %v24251_v36 = vadd.f32 %v19989_v16, %v2062_v35  ;;  %v21030_v37 = vpop.f32.mrb[13].mxu1 }
 0x443   : > { %v2234_v38 = vsel %vm2218_vm2, %v24251_v36, -inf }
 0x444   : > { %2235 = vmax.xlane.f32.xlu1 %v2234_v38 }
 0x450   : > { %v2138_v39 = vpop.f32.mrb[14].mxu1 }
 0x451   : > { %v21035_v40 = vpop.f32.mrb[15].mxu1  ;;  %v24266_v1 = vadd.f32 %v19989_v16, %v2138_v39 }
 0x453   : > { %v2237_v2 = vsel %vm2218_vm2, %v24266_v1, -inf }
 0x45d   : > { %v2214_v41 = vpop.f32.mrb[16].mxu1 }
 0x45e   : > { %v24255_v42 = vadd.f32 %v19989_v16, %v2214_v41  ;;  %v21040_v43 = vpop.f32.mrb[17].mxu1 }
 0x460   : > { %v2240_v44 = vsel %vm2218_vm2, %v24255_v42, -inf }
 0x461   : > { %2241 = vmax.xlane.f32.xlu1 %v2240_v44 }
 0x489   : > { %v2221_v48 = vpop.xlane.xlu1 %2220 }
 0x48a   : > { %v2243_v61 = vsub.f32 %v1683_v18, %v2221_v48 }
 0x48c   : > { %v2251_v62 = vmul.f32 1.442695, %v2243_v61 }
 0x48e   : > { %23251 = vpow2.f32 %v2251_v62 }
 0x494   : > { %803 = vxpose.xlu1.b32.start.end [1/1] (short) %v736_v47, 128 }
 0x498   : > { %v24271_v3 = vpop.eup %23251 }
 0x499   : > { %v2267_v4 = vsel %vm2218_vm2, %v24271_v3, 0.0 }
 0x4a9   : > { %v2227_v50 = vpop.xlane.xlu1 %2226 }
 0x4aa   : > { %v2245_v19 = vsub.f32 %v24239_v24, %v2227_v50 }
 0x4ac   : > { %v2255_v20 = vmul.f32 1.442695, %v2245_v19 }
 0x4ae   : > { %23253 = vpow2.f32 %v2255_v20 }
 0x4b8   : > { %v23254_v29 = vpop.eup %23253 }
 0x4b9   : > { %v2230_v54 = vpop.xlane.xlu1 %2229  ;;  %v2273_v30 = vsel %vm2218_vm2, %v23254_v29, 0.0 }
 0x4ba   : > { %v2246_v21 = vsub.f32 %v24243_v28, %v2230_v54 }
 0x4bc   : > { %v2257_v22 = vmul.f32 1.442695, %v2246_v21 }
 0x4be   : > { %23255 = vpow2.f32 %v2257_v22 }
 0x4c1   : > { %v2233_v55 = vpop.xlane.xlu1 %2232 }
 0x4c2   : > { %v2247_v23 = vsub.f32 %v24247_v32, %v2233_v55 }
 0x4c4   : > { %v2259_v25 = vmul.f32 1.442695, %v2247_v23 }
 0x4c6   : > { %23257 = vpow2.f32 %v2259_v25 }
 0x4c8   : > { %v24285_v31 = vpop.eup %23255 }
 0x4c9   : > { %v2276_v24 = vsel %vm2218_vm2, %v24285_v31, 0.0 }
 0x4d0   : > { %v23258_v28 = vpop.eup %23257 }
 0x4d1   : > { %v2236_v56 = vpop.xlane.xlu1 %2235  ;;  %v2279_v32 = vsel %vm2218_vm2, %v23258_v28, 0.0 }
 0x4d2   : > { %v2248_v26 = vsub.f32 %v24251_v36, %v2236_v56 }
 0x4d4   : > { %v2261_v27 = vmul.f32 1.442695, %v2248_v26 }
 0x4d6   : > { %23259 = vpow2.f32 %v2261_v27 }
 0x4e0   : > { %v24290_v34 = vpop.eup %23259 }
 0x4e1   : > { %v2282_v39 = vsel %vm2218_vm2, %v24290_v34, 0.0 }
 0x4ee   : > { %v24264_v57 = vpop.xlane.xlu1 %2241 }
 0x4ef   : > { %v2250_v36 = vsub.f32 %v24255_v42, %v24264_v57 }
 0x4f1   : > { %v2265_v41 = vmul.f32 1.442695, %v2250_v36 }
 0x514   : > { %v819_v59 = vpop.trf.xlu1 }
 0x515   : > { %1347 = vxpose.xlu0.b32.start [1/2] (short) (narrow) %v819_v59, 8 }
 0x518   : > { %v820_v60 = vpop.trf.xlu1 }
 0x519   : > { %1348 = vxpose.xlu0.b32.end [2/2] (short) (narrow) %v820_v60, 8 }
 0x51c   : > { %v24275_v5 = vpop.trf.xlu1 }
 0x520   : > { %v24277_v6 = vpop.trf.xlu1 }
 0x524   : > { %v823_v8 = vpop.trf.xlu1 }
 0x528   : > { %v824_v9 = vpop.trf.xlu1 }
 0x52c   : > { %v825_v10 = vpop.trf.xlu1 }
 0x530   : > { %v826_v11 = vpop.trf.xlu1 }
 0x534   : > { %v827_v12 = vpop.trf.xlu1 }
 0x538   : > { %v828_v13 = vpop.trf.xlu1 }
 0x53c   : > { %v829_v14 = vpop.trf.xlu1 }
 0x540   : > { %v830_v15 = vpop.trf.xlu1 }
 0x544   : > { %v831_v17 = vpop.trf.xlu1 }
 0x546   : > { %2223 = vmax.xlane.f32.xlu0 %v2222_v53 }
 0x548   : > { %v832_v18 = vpop.trf.xlu1 }
 0x54a   : > { %2238 = vmax.xlane.f32.xlu0 %v2237_v2 }
 0x54c   : > { %v833_v59 = vpop.trf.xlu1 }
 0x54e   : > { %2268 = vadd.xlane.f32.xlu0 %v2267_v4 }
 0x550   : > { %v834_v60 = vpop.trf.xlu1 }
 0x57b   : > { %1411 = vxpose.xlu0.b32.start [1/2] (short) (narrow) %v823_v8, 8 }
 0x57f   : > { %1412 = vxpose.xlu0.b32.end [2/2] (short) (narrow) %v824_v9, 8 }
 0x583   : > { %1443 = vxpose.xlu0.b32.start [1/2] (short) (narrow) %v825_v10, 8 }
 0x587   : > { %1444 = vxpose.xlu0.b32.end [2/2] (short) (narrow) %v826_v11, 8 }
 0x58b   : > { %1475 = vxpose.xlu0.b32.start [1/2] (short) (narrow) %v827_v12, 8 }
 0x58f   : > { %1476 = vxpose.xlu0.b32.end [2/2] (short) (narrow) %v828_v13, 8 }
 0x593   : > { %1507 = vxpose.xlu0.b32.start [1/2] (short) (narrow) %v829_v14, 8 }
 0x595   : > { %v1363_v16 = vpop.trf.xlu0 }
 0x596   : > { %21042 = vmatpush3.msra.mxu0 %v1363_v16 }
 0x597   : > { %1508 = vxpose.xlu0.b32.end [2/2] (short) (narrow) %v830_v15, 8  ;;  %21051 = vmatprep.subr.mxu0 %v23801_v0 }
 0x59b   : > { %1539 = vxpose.xlu0.b32.start [1/2] (short) (narrow) %v831_v17, 8 }
 0x59f   : > { %1540 = vxpose.xlu0.b32.end [2/2] (short) (narrow) %v832_v18, 8 }
 0x5cc   : > { %2274 = vadd.xlane.f32.xlu0 %v2273_v30 }
 0x5d0   : > { %2277 = vadd.xlane.f32.xlu0 %v2276_v24 }
 0x5d3   : > { %v2224_v33 = vpop.xlane.xlu0 %2223 }
 0x5d4   : > { %v2244_v35 = vsub.f32 %v1759_v63, %v2224_v33  ;;  %2280 = vadd.xlane.f32.xlu0 %v2279_v32 }
 0x5d6   : > { %v2253_v37 = vmul.f32 1.442695, %v2244_v35 }
 0x5d7   : > { %v2239_v38 = vpop.xlane.xlu0 %2238 }
 0x5d8   : > { %23261 = vpow2.f32 %v2253_v37  ;;  %v2249_v40 = vsub.f32 %v24266_v1, %v2239_v38  ;;  %2283 = vadd.xlane.f32.xlu0 %v2282_v39 }
 0x5da   : > { %v2263_v43 = vmul.f32 1.442695, %v2249_v40 }
 0x5db   : > { %v2269_v44 = vpop.xlane.xlu0 %2268 }
 0x5dc   : > { %23263 = vpow2.f32 %v2263_v43 }
 0x5dd   : > { %23265 = vrcp.f32 %v2269_v44  ;;  %v3179_v44 = vld [vmem:[#allocation7] sm:$0xff] }
 0x5de   : > { %23267 = vpow2.f32 %v2265_v41 }
 0x5e2   : > { %v23262_v46 = vpop.eup %23261 }
 0x5e3   : > { %v2270_v47 = vsel %vm2218_vm2, %v23262_v46, 0.0 }
 0x5e4   : > { %2271 = vadd.xlane.f32.xlu1 %v2270_v47  ;;  %v3181_v47 = vld [vmem:[#allocation7 + $0x10] sm:$0xff] }
 0x5e6   : > { %v23264_v42 = vpop.eup %23263 }
 0x5e7   : > { %v23266_v48 = vpop.eup %23265  ;;  %v2285_v50 = vsel %vm2218_vm2, %v23264_v42, 0.0 }
 0x5e8   : > { %v24299_v54 = vpop.eup %23267  ;;  %2286 = vadd.xlane.f32.xlu0 %v2285_v50  ;;  %v2299_v55 = vmul.f32 %v23266_v48, %v24271_v3  ;;  %v3182_v48 = vld [vmem:[#allocation7 + $0x18] sm:$0xff] }
 0x5e9   : > { %v2288_v56 = vsel %vm2218_vm2, %v24299_v54, 0.0  ;;  %v21926_v50 = vpack.c.bf16 %v3182_v48, %v3181_v47  ;;  %v3302_v47 = vld [vmem:[#allocation10 + $0x58] sm:$0xff] }
 0x5ea   : > { %21044 = vmatmul.mubr.msk.f32.vlgmr.msra.gmra.mrb[2].mxu0 %vm2218_vm2, %v2299_v55  ;;  %v3184_v55 = vld [vmem:[#allocation7 + $0x28] sm:$0xff] }
 0x5eb   : > { %21053 = vmatprep.mubr.msk.f32.mxu0 %vm23803_vm0, %v23801_v0 }
 0x5ec   : > { %2289 = vadd.xlane.f32.xlu0 %v2288_v56 }
 0x5fb   : > { %v1427_v57 = vpop.trf.xlu0 }
 0x5fc   : > { %21052 = vmatpush3.msra.mxu0 %v1427_v57  ;;  %v3185_v57 = vld [vmem:[#allocation7 + $0x30] sm:$0xff] }
 0x5fd   : > { %21061 = vmatprep.subr.mxu0 %v23801_v0 }
 0x603   : > { %v1459_v61 = vpop.trf.xlu0 }
 0x60b   : > { %v1491_v62 = vpop.trf.xlu0 }
 0x613   : > { %v1523_v63 = vpop.trf.xlu0 }
 0x617   : > { %1379 = vxpose.xlu1.b32.start [1/2] (short) (narrow) %v24275_v5, 8 }
 0x619   : > { %1571 = vxpose.xlu0.b32.start [1/2] (short) (narrow) %v833_v59, 8  ;;  %v3186_v59 = vld [vmem:[#allocation7 + $0x38] sm:$0xff] }
 0x61b   : > { %1380 = vxpose.xlu1.b32.end [2/2] (short) (narrow) %v24277_v6, 8  ;;  %v1555_v1 = vpop.trf.xlu0 }
 0x61d   : > { %1572 = vxpose.xlu0.b32.end [2/2] (short) (narrow) %v834_v60, 8  ;;  %v21932_v60 = vpack.c.bf16 %v3186_v59, %v3185_v57  ;;  %v3305_v57 = vld [vmem:[#allocation10 + $0x70] sm:$0xff]  ;;  %v3308_v59 = vld [vmem:[#allocation10 + $0x88] sm:$0xff] }
 0x659   : > { %v2275_v53 = vpop.xlane.xlu0 %2274 }
 0x65a   : > { %23269 = vrcp.f32 %v2275_v53  ;;  %v3190_v53 = vld [vmem:[#allocation7 + $0x58] sm:$0xff] }
 0x65d   : > { %v2278_v2 = vpop.xlane.xlu0 %2277 }
 0x661   : > { %v2281_v3 = vpop.xlane.xlu0 %2280 }
 0x662   : > { %23271 = vrcp.f32 %v2281_v3  ;;  %v3191_v3 = vld [vmem:[#allocation7 + $0x60] sm:$0xff] }
 0x664   : > { %v23270_v4 = vpop.eup %23269 }
 0x665   : > { %v2301_v8 = vmul.f32 %v23270_v4, %v23254_v29  ;;  %v2284_v9 = vpop.xlane.xlu0 %2283  ;;  %v3192_v4 = vld [vmem:[#allocation7 + $0x68] sm:$0xff] }
 0x667   : > { %21054 = vmatmul.mubr.msk.f32.vlgmr.msra.gmra.mrb[4].mxu0 %vm2218_vm2, %v2301_v8  ;;  %v21941_v8 = vpack.c.bf16 %v3192_v4, %v3191_v3  ;;  %v3311_v3 = vld [vmem:[#allocation10 + $0xa0] sm:$0xff]  ;;  %v3309_v4 = vld [vmem:[#allocation10 + $0x90] sm:$0xff] }
 0x668   : > { %21062 = vmatpush3.msra.mxu0 %v1491_v62  ;;  %21063 = vmatprep.mubr.msk.f32.mxu0 %vm23803_vm0, %v23801_v0  ;;  %v3188_v62 = vld [vmem:[#allocation7 + $0x48] sm:$0xff] }
 0x669   : > { %21071 = vmatprep.subr.mxu0 %v23801_v0 }
 0x66c   : > { %v23272_v5 = vpop.eup %23271 }
 0x66d   : > { %v2303_v6 = vmul.f32 %v23272_v5, %v23258_v28  ;;  %v3193_v5 = vld [vmem:[#allocation7 + $0x70] sm:$0xff] }
 0x66f   : > { %21064 = vmatmul.mubr.msk.f32.vlgmr.msra.gmra.mrb[6].mxu0 %vm2218_vm2, %v2303_v6  ;;  %v3194_v6 = vld [vmem:[#allocation7 + $0x78] sm:$0xff] }
 0x670   : > { %21072 = vmatpush3.msra.mxu0 %v1555_v1  ;;  %21073 = vmatprep.mubr.msk.f32.mxu0 %vm23803_vm0, %v23801_v0  ;;  %v3189_v1 = vld [vmem:[#allocation7 + $0x50] sm:$0xff] }
 0x671   : > { %21922 = vmatprep.subr.bf16.mxu0 %v23802_v7  ;;  %v2272_v13 = vpop.xlane.xlu1 %2271 }
 0x675   : > { %v2287_v10 = vpop.xlane.xlu0 %2286 }
 0x676   : > { %23273 = vrcp.f32 %v2287_v10 }
 0x677   : > { %23275 = vrcp.f32 %v2272_v13 }
 0x678   : > { %23277 = vrcp.f32 %v2278_v2  ;;  %v21938_v2 = vpack.c.bf16 %v3190_v53, %v3189_v1  ;;  %v3314_v1 = vld [vmem:[#allocation10 + $0xb8] sm:$0xff]  ;;  %v3307_v53 = vld [vmem:[#allocation10 + $0x80] sm:$0xff] }
 0x679   : > { %23279 = vrcp.f32 %v2284_v9  ;;  %v2290_v14 = vpop.xlane.xlu0 %2289  ;;  %v21944_v9 = vpack.c.bf16 %v3194_v6, %v3193_v5  ;;  %v21956_v5 = vpack.c.bf16 %v3311_v3, %v3307_v53  ;;  %v3316_v6 = vld [vmem:[#allocation10 + $0xc8] sm:$0xff]  ;;  %v3345_v53 = vld [vmem:[#allocation10 + $0x1b0] sm:$0xff] }
 0x67a   : > { %23281 = vrcp.f32 %v2290_v14  ;;  %v3352_v3 = vld [vmem:[#allocation10 + $0x1e8] sm:$0xff] }
 0x680   : > { %v23274_v11 = vpop.eup %23273 }
 0x681   : > { %v2305_v12 = vmul.f32 %v23274_v11, %v23264_v42  ;;  %v23276_v15 = vpop.eup %23275 }
 0x682   : > { %v2300_v16 = vmul.f32 %v23276_v15, %v23262_v46  ;;  %v23278_v18 = vpop.eup %23277  ;;  %v3180_v46 = vld [vmem:[#allocation7 + $0x8] sm:$0xff] }
 0x683   : > { %21074 = vmatmul.mubr.msk.f32.vlgmr.msra.gmra.mrb[8].mxu0 %vm2218_vm2, %v2305_v12  ;;  %v2302_v19 = vmul.f32 %v23278_v18, %v24285_v31  ;;  %v23280_v20 = vpop.eup %23279  ;;  %v21923_v42 = vpack.c.bf16 %v3180_v46, %v3179_v44  ;;  %v3304_v46 = vld [vmem:[#allocation10 + $0x68] sm:$0xff] }
 0x684   : > { %21113 = vmatprep.mubr.msk.f32.mxu0 %vm23803_vm0, %v23801_v0  ;;  %v2304_v21 = vmul.f32 %v23280_v20, %v24290_v34  ;;  %v23282_v23 = vpop.eup %23281 }
 0x685   : > { %v2306_v25 = vmul.f32 %v23282_v23, %v24299_v54  ;;  %21924 = vmatpush3.bf16.msra.mxu0 %v21923_v42  ;;  %v3183_v54 = vld [vmem:[#allocation7 + $0x20] sm:$0xff] }
 0x686   : > { %21925 = vmatprep.subr.bf16.mxu0 %v23802_v7  ;;  %v21929_v56 = vpack.c.bf16 %v3184_v55, %v3183_v54  ;;  %v3303_v54 = vld [vmem:[#allocation10 + $0x60] sm:$0xff]  ;;  %v3301_v55 = vld [vmem:[#allocation10 + $0x50] sm:$0xff] }
 0x689   : > { %21927 = vmatpush3.bf16.msra.mxu0 %v21926_v50  ;;  %v3299_v50 = vld [vmem:[#allocation10 + $0x40] sm:$0xff] }
 0x68a   : > { %21928 = vmatprep.subr.bf16.mxu0 %v23802_v7 }
 0x68d   : > { %21930 = vmatpush3.bf16.msra.mxu0 %v21929_v56  ;;  %v21952_v56 = vpack.c.bf16 %v3303_v54, %v3299_v50  ;;  %v3340_v50 = vld [vmem:[#allocation10 + $0x188] sm:$0xff] }
 0x68e   : > { %21931 = vmatprep.subr.bf16.mxu0 %v23802_v7 }
 0x691   : > { %21933 = vmatpush3.bf16.msra.mxu0 %v21932_v60  ;;  %v3312_v60 = vld [vmem:[#allocation10 + $0xa8] sm:$0xff] }
 0x692   : > { %21934 = vmatprep.subr.bf16.mxu0 %v23802_v7 }
 0x697   : > { %v1395_v17 = vpop.trf.xlu1 }
 0x698   : > { %21047 = vmatpush3.msra.mxu1 %v1395_v17 }
 0x699   : > { %21049 = vmatmul.mubr.msk.f32.vlgmr.msra.gmra.mrb[18].mxu1 %vm2218_vm2, %v2300_v16  ;;  %21056 = vmatprep.subr.mxu1 %v23801_v0  ;;  %v1587_v22 = vpop.trf.xlu0 }
 0x69a   : > { %21057 = vmatpush3.msra.mxu1 %v1459_v61  ;;  %21058 = vmatprep.mubr.msk.f32.mxu1 %vm23803_vm0, %v23801_v0  ;;  %v3187_v61 = vld [vmem:[#allocation7 + $0x40] sm:$0xff] }
 0x69b   : > { %21066 = vmatprep.subr.mxu1 %v23801_v0 }
 0x69d   : > { %21059 = vmatmul.mubr.msk.f32.vlgmr.msra.gmra.mrb[20].mxu1 %vm2218_vm2, %v2302_v19 }
 0x69e   : > { %21067 = vmatpush3.msra.mxu1 %v1523_v63  ;;  %21068 = vmatprep.mubr.msk.f32.mxu1 %vm23803_vm0, %v23801_v0  ;;  %v21935_v63 = vpack.c.bf16 %v3188_v62, %v3187_v61  ;;  %v21984_v61 = vpack.c.bf16 %v3305_v57, %v3301_v55  ;;  %v21954_v62 = vpack.c.bf16 %v3312_v60, %v3308_v59  ;;  %v3344_v55 = vld [vmem:[#allocation10 + $0x1a8] sm:$0xff]  ;;  %v3346_v57 = vld [vmem:[#allocation10 + $0x1b8] sm:$0xff] }
 0x69f   : > { %21076 = vmatprep.subr.mxu1 %v23801_v0  ;;  %v21970_v59 = vpack.c.bf16 %v3344_v55, %v3340_v50  ;;  %v3576_v50 = vld [vmem:[#allocation13 + $0x1a8] sm:$0xff]  ;;  %v3527_v55 = vld [vmem:[#allocation13 + $0x20] sm:$0xff] }
 0x6a0   : > { %21936 = vmatpush3.bf16.msra.mxu0 %v21935_v63  ;;  %v3310_v63 = vld [vmem:[#allocation10 + $0x98] sm:$0xff] }
 0x6a1   : > { %21069 = vmatmul.mubr.msk.f32.vlgmr.msra.gmra.mrb[22].mxu1 %vm2218_vm2, %v2304_v21  ;;  %21937 = vmatprep.subr.bf16.mxu0 %v23802_v7 }
 0x6a2   : > { %21077 = vmatpush3.msra.mxu1 %v1587_v22  ;;  %21078 = vmatprep.mubr.msk.f32.mxu1 %vm23803_vm0, %v23801_v0 }
 0x6a4   : > { %21939 = vmatpush3.bf16.msra.mxu0 %v21938_v2  ;;  %v21986_v2 = vpack.c.bf16 %v3314_v1, %v3310_v63  ;;  %v3341_v63 = vld [vmem:[#allocation10 + $0x190] sm:$0xff] }
 0x6a5   : > { %21079 = vmatmul.mubr.msk.f32.vlgmr.msra.gmra.mrb[24].mxu1 %vm2218_vm2, %v2306_v25  ;;  %21940 = vmatprep.subr.bf16.mxu0 %v23802_v7 }
 0x6a6   : > { %3441 = vmatprep.mubr.f32.mxu1 %v23801_v0 }
 0x6a8   : > { %21942 = vmatpush3.bf16.msra.mxu0 %v21941_v8  ;;  %v3313_v8 = vld [vmem:[#allocation10 + $0xb0] sm:$0xff] }
 0x6a9   : > { %21943 = vmatprep.subr.bf16.mxu0 %v23802_v7 }
 0x6ac   : > { %21945 = vmatpush3.bf16.msra.mxu0 %v21944_v9  ;;  %v3320_v9 = vld [vmem:[#allocation10 + $0xe8] sm:$0xff] }
 0x6bd   : > { %v2376_v26 = vpop.f32.mrb[2].mxu0 }
 0x6be   : > { %v21045_v27 = vpop.f32.mrb[3].mxu0  ;;  %2891 = vxpose.xlu1.b32.start.end [1/1] (short) (narrow) %v2376_v26, 16  ;;  %v20014_v26 = vld [vmem:[#allocation8] ss:$0 sm:$0xff] }
 0x73a   : > { %v2522_v29 = vpop.f32.mrb[4].mxu0 }
 0x73b   : > { %v21055_v30 = vpop.f32.mrb[5].mxu0  ;;  %2955 = vxpose.xlu0.b32.start.end [1/1] (short) (narrow) %v2522_v29, 16 }
 0x73e   : > { %v2907_v39 = vpop.trf.xlu1 }
 0x742   : > { %v2668_v31 = vpop.f32.mrb[6].mxu0  ;;  %v2908_v43 = vpop.trf.xlu1 }
 0x743   : > { %v21065_v24 = vpop.f32.mrb[7].mxu0 }
 0x744   : > { %v23804_v24 = vmov 0  }
 0x756   : > { %v2814_v28 = vpop.f32.mrb[8].mxu0 }
 0x757   : > { %v21075_v33 = vpop.f32.mrb[9].mxu0 }
 0x758   : > { %v3296_v33 = vld [vmem:[#allocation10 + $0x28] sm:$0xff] }
 0x76c   : > { %v2449_v32 = vpop.f32.mrb[18].mxu1 }
 0x76d   : > { %2923 = vxpose.xlu1.b32.start.end [1/1] (short) (narrow) %v2449_v32, 16  ;;  %v21050_v34 = vpop.f32.mrb[19].mxu1  ;;  %v3294_v32 = vld [vmem:[#allocation10 + $0x18] sm:$0xff] }
 0x770   : > { %v2595_v35 = vpop.f32.mrb[20].mxu1 }
 0x771   : > { %2987 = vxpose.xlu0.b32.start.end [1/1] (short) (narrow) %v2595_v35, 16  ;;  %v21060_v36 = vpop.f32.mrb[21].mxu1  ;;  %v3298_v35 = vld [vmem:[#allocation10 + $0x38] sm:$0xff] }
 0x772   : > { %3019 = vxpose.xlu1.b32.start.end [1/1] (short) (narrow) %v2668_v31, 16  ;;  %v3291_v36 = vld [vmem:[#allocation10] sm:$0xff] }
 0x774   : > { %v2741_v37 = vpop.f32.mrb[22].mxu1 }
 0x775   : > { %v21070_v38 = vpop.f32.mrb[23].mxu1 }
 0x776   : > { %3051 = vxpose.xlu0.b32.start.end [1/1] (short) (narrow) %v2741_v37, 16  ;;  %v3295_v37 = vld [vmem:[#allocation10 + $0x20] sm:$0xff]  ;;  %v21978_v38 = vpack.c.bf16 %v3298_v35, %v3294_v32  ;;  %v3325_v35 = vld [vmem:[#allocation10 + $0x110] sm:$0xff] }
 0x777   : > { %3083 = vxpose.xlu1.b32.start.end [1/1] (short) (narrow) %v2814_v28, 16  ;;  %v3292_v28 = vld [vmem:[#allocation10 + $0x8] sm:$0xff] }
 0x778   : > { %v2887_v40 = vpop.f32.mrb[24].mxu1  ;;  %v21946_v34 = vpack.c.bf16 %v3296_v33, %v3292_v28  ;;  %21979 = vmatprep.subr.bf16.mxu0 %v21978_v38  ;;  %v3327_v28 = vld [vmem:[#allocation10 + $0x120] sm:$0xff]  ;;  %v531_v33 = vld [vmem:[%s529_s4] sm:$0xff] }
 0x779   : > { %v21080_v41 = vpop.f32.mrb[25].mxu1  ;;  %v3332_v38 = vld [vmem:[#allocation10 + $0x148] sm:$0xff] }
 0x77a   : > { %v3297_v41 = vld [vmem:[#allocation10 + $0x30] sm:$0xff]  ;;  %21947 = vmatprep.subr.bf16.mxu1 %v21946_v34 }
 0x77b   : > { %3115 = vxpose.xlu0.b32.start.end [1/1] (short) (narrow) %v2887_v40, 16  ;;  %v3293_v40 = vld [vmem:[#allocation10 + $0x10] sm:$0xff] }
 0x77c   : > { %3147 = vxpose.xlu1.b32.start [1/16] (narrow) %v2907_v39, 8  ;;  %v21948_v39 = vpack.c.bf16 %v3295_v37, %v3291_v36  ;;  %v21980_v44 = vpack.c.bf16 %v3297_v41, %v3293_v40  ;;  %v3329_v36 = vld [vmem:[#allocation10 + $0x130] sm:$0xff]  ;;  %v3334_v40 = vld [vmem:[#allocation10 + $0x158] sm:$0xff] }
 0x77d   : > { %v21996_v37 = vpack.c.bf16 %v3329_v36, %v3325_v35  ;;  %v3574_v35 = vld [vmem:[#allocation13 + $0x198] sm:$0xff] }
 0x77e   : > { %21949 = vmatpush1.bf16.msra.mxu1 %v21948_v39  ;;  %v3336_v39 = vld [vmem:[#allocation10 + $0x168] sm:$0xff] }
 0x77f   : > { %v21966_v41 = vpack.c.bf16 %v3336_v39, %v3332_v38  ;;  %v3525_v39 = vld [vmem:[#allocation13 + $0x10] sm:$0xff] }
 0x780   : > { %3148 = vxpose.xlu1.b32.cont [2/16] (narrow) %v2908_v43, 8  ;;  %v3300_v43 = vld [vmem:[#allocation10 + $0x48] sm:$0xff] }
 0x781   : > { %v21950_v42 = vpack.c.bf16 %v3304_v46, %v3300_v43  ;;  %v3338_v43 = vld [vmem:[#allocation10 + $0x178] sm:$0xff]  ;;  %v3335_v46 = vld [vmem:[#allocation10 + $0x160] sm:$0xff] }
 0x783   : > { %21951 = vmatprep.subr.bf16.mxu1 %v21950_v42  ;;  %v3333_v42 = vld [vmem:[#allocation10 + $0x150] sm:$0xff] }
 0x784   : > { %21953 = vmatpush1.bf16.msra.mxu1 %v21952_v56  ;;  %v3342_v56 = vld [vmem:[#allocation10 + $0x198] sm:$0xff] }
 0x785   : > { %21955 = vmatprep.subr.bf16.mxu1 %v21954_v62  ;;  %v22002_v60 = vpack.c.bf16 %v3346_v57, %v3342_v56  ;;  %v3343_v62 = vld [vmem:[#allocation10 + $0x1a0] sm:$0xff] }
 0x786   : > { %v3528_v56 = vld [vmem:[#allocation13 + $0x28] sm:$0xff] }
 0x788   : > { %21957 = vmatpush1.bf16.msra.mxu1 %v21956_v5  ;;  %v3350_v5 = vld [vmem:[#allocation10 + $0x1d8] sm:$0xff] }
 0x7a4   : > { %23250 = vset.pattern.permute.xlu0 %v23804_v24  ;;  %v3323_v24 = vld [vmem:[#allocation10 + $0x100] sm:$0xff] }
 0x7a5   : > { %v21964_v34 = vpack.c.bf16 %v3327_v28, %v3323_v24  ;;  %v3541_v24 = vld [vmem:[#allocation13 + $0x90] sm:$0xff] }
 0x7bb   : > { %v2971_v11 = vpop.trf.xlu0 }
 0x7bf   : > { %v2972_v13 = vpop.trf.xlu0 }
 0x7ed   : > { %v2939_v10 = vpop.trf.xlu1 }
 0x7ee   : > { %3149 = vxpose.xlu1.b32.cont [3/16] (narrow) %v2939_v10, 8  ;;  %v3318_v10 = vld [vmem:[#allocation10 + $0xd8] sm:$0xff] }
 0x7f1   : > { %v2940_v12 = vpop.trf.xlu1  ;;  %v3003_v14 = vpop.trf.xlu0 }
 0x7f2   : > { %3150 = vxpose.xlu1.b32.cont [4/16] (narrow) %v2940_v12, 8  ;;  %v21958_v12 = vpack.c.bf16 %v3320_v9, %v3316_v6  ;;  %v3354_v6 = vld [vmem:[#allocation10 + $0x1f8] sm:$0xff]  ;;  %v3347_v9 = vld [vmem:[#allocation10 + $0x1c0] sm:$0xff] }
 0x7f4   : > { %21959 = vmatprep.subr.bf16.mxu1 %v21958_v12  ;;  %v3349_v12 = vld [vmem:[#allocation10 + $0x1d0] sm:$0xff] }
 0x7f5   : > { %v3004_v15 = vpop.trf.xlu0  ;;  %v3035_v16 = vpop.trf.xlu1 }
 0x7f6   : > { %3151 = vxpose.xlu1.b32.cont [5/16] (narrow) %v2971_v11, 8  ;;  %v21988_v11 = vpack.c.bf16 %v3313_v8, %v3309_v4  ;;  %v22004_v4 = vpack.c.bf16 %v3345_v53, %v3341_v63  ;;  %v3546_v63 = vld [vmem:[#allocation13 + $0xb8] sm:$0xff] }
 0x7f7   : > { %v3578_v53 = vld [vmem:[#allocation13 + $0x1b8] sm:$0xff] }
 0x7f9   : > { %v3036_v17 = vpop.trf.xlu1  ;;  %v3067_v18 = vpop.trf.xlu0 }
 0x7fa   : > { %3152 = vxpose.xlu1.b32.cont [6/16] (narrow) %v2972_v13, 8  ;;  %v3322_v13 = vld [vmem:[#allocation10 + $0xf8] sm:$0xff] }
 0x7fd   : > { %v3068_v19 = vpop.trf.xlu0  ;;  %v3099_v20 = vpop.trf.xlu1 }
 0x7fe   : > { %3153 = vxpose.xlu1.b32.cont [7/16] (narrow) %v3003_v14, 8  ;;  %v21990_v14 = vpack.c.bf16 %v3322_v13, %v3318_v10  ;;  %v22006_v10 = vpack.c.bf16 %v3354_v6, %v3350_v5  ;;  %v3353_v13 = vld [vmem:[#allocation10 + $0x1f0] sm:$0xff] }
 0x801   : > { %v3100_v21 = vpop.trf.xlu1  ;;  %v3131_v22 = vpop.trf.xlu0 }
 0x802   : > { %3154 = vxpose.xlu1.b32.cont [8/16] (narrow) %v3004_v15, 8 }
 0x805   : > { %v3132_v23 = vpop.trf.xlu0 }
 0x806   : > { %3155 = vxpose.xlu1.b32.cont [9/16] (narrow) %v3035_v16, 8 }
 0x80a   : > { %3156 = vxpose.xlu1.b32.cont [10/16] (narrow) %v3036_v17, 8 }
 0x80e   : > { %3157 = vxpose.xlu1.b32.cont [11/16] (narrow) %v3067_v18, 8 }
 0x812   : > { %3158 = vxpose.xlu1.b32.cont [12/16] (narrow) %v3068_v19, 8  ;;  %v3315_v19 = vld [vmem:[#allocation10 + $0xc0] sm:$0xff] }
 0x816   : > { %3159 = vxpose.xlu1.b32.cont [13/16] (narrow) %v3099_v20, 8  ;;  %v3319_v20 = vld [vmem:[#allocation10 + $0xe0] sm:$0xff] }
 0x81a   : > { %3160 = vxpose.xlu1.b32.cont [14/16] (narrow) %v3100_v21, 8  ;;  %v3317_v21 = vld [vmem:[#allocation10 + $0xd0] sm:$0xff] }
 0x81e   : > { %3161 = vxpose.xlu1.b32.cont [15/16] (narrow) %v3131_v22, 8  ;;  %v21960_v22 = vpack.c.bf16 %v3319_v20, %v3315_v19  ;;  %v3571_v19 = vld [vmem:[#allocation13 + $0x180] sm:$0xff] }
 0x820   : > { %21961 = vmatpush1.bf16.msra.mxu1 %v21960_v22 }
 0x822   : > { %3162 = vxpose.xlu1.b32.end [16/16] (narrow) %v3132_v23, 8  ;;  %v3321_v23 = vld [vmem:[#allocation10 + $0xf0] sm:$0xff] }
 0x866   : > { %v3163_v25 = vpop.trf.xlu1 }
 0x867   : > { %21114 = vmatmul.mubr.f32.vlgmr.msra.gmra.mrb[10].mxu0 %v3163_v25  ;;  %v21992_v25 = vpack.c.bf16 %v3321_v23, %v3317_v21  ;;  %v3572_v21 = vld [vmem:[#allocation13 + $0x188] sm:$0xff] }
 0x868   : > { %3512 = vmatprep.mubr.f32.mxu0 %v23801_v0  ;;  %21981 = vmatpush1.bf16.msra.mxu0 %v21980_v44  ;;  %v3331_v44 = vld [vmem:[#allocation10 + $0x140] sm:$0xff]  ;;  %v22042_v22 = vpack.c.bf16 %v3572_v21, %v3571_v19 }
 0x869   : > { %v3532_v19 = vld [vmem:[#allocation13 + $0x48] sm:$0xff] }
 0x93a   : > { %v3268_v27 = vpop.f32.mrb[10].mxu0 }
 0x93b   : > { %v3269_v29 = vadd.f32 %v20014_v26, %v3268_v27  ;;  %v21115_v30 = vpop.f32.mrb[11].mxu0  ;;  %v3324_v26 = vld [vmem:[#allocation10 + $0x108] sm:$0xff] }
 0x93c   : > { %v3328_v27 = vld [vmem:[#allocation10 + $0x128] sm:$0xff] }
 0x93d   : > { %v3272_v31 = vadd.f32 %v3269_v29, %v24139_v49  ;;  %v3306_v49 = vld [vmem:[#allocation10 + $0x78] sm:$0xff]  ;;  %v21962_v30 = vpack.c.bf16 %v3328_v27, %v3324_v26 }
 0x93e   : > { %v21982_v48 = vpack.c.bf16 %v3306_v49, %v3302_v47  ;;  %v3326_v29 = vld [vmem:[#allocation10 + $0x118] sm:$0xff]  ;;  %v21998_v47 = vpack.c.bf16 %v3338_v43, %v3334_v40  ;;  %v21968_v49 = vpack.c.bf16 %v3335_v46, %v3331_v44  ;;  %v3526_v40 = vld [vmem:[#allocation13 + $0x18] sm:$0xff]  ;;  %v3557_v46 = vld [vmem:[#allocation13 + $0x110] sm:$0xff] }
 0x93f   : > { %3273 = vadd.xlane.f32.xlu0 %v3272_v31  ;;  %21963 = vmatprep.subr.bf16.mxu1 %v21962_v30  ;;  %v3523_v27 = vld [vmem:[#allocation13] sm:$0xff] }
 0x940   : > { %21983 = vmatprep.subr.bf16.mxu0 %v21982_v48  ;;  %21965 = vmatpush1.bf16.msra.mxu1 %v21964_v34  ;;  %v3337_v48 = vld [vmem:[#allocation10 + $0x170] sm:$0xff]  ;;  %v3555_v30 = vld [vmem:[#allocation13 + $0x100] sm:$0xff]  ;;  %v3573_v34 = vld [vmem:[#allocation13 + $0x190] sm:$0xff] }
 0x941   : > { %21985 = vmatpush1.bf16.msra.mxu0 %v21984_v61  ;;  %21967 = vmatprep.subr.bf16.mxu1 %v21966_v41  ;;  %v22000_v54 = vpack.c.bf16 %v3337_v48, %v3333_v42  ;;  %v3339_v61 = vld [vmem:[#allocation10 + $0x180] sm:$0xff]  ;;  %v22046_v44 = vpack.c.bf16 %v3574_v35, %v3573_v34  ;;  %v3575_v48 = vld [vmem:[#allocation13 + $0x1a0] sm:$0xff]  ;;  %v3565_v35 = vld [vmem:[#allocation13 + $0x150] sm:$0xff] }
 0x942   : > { %21987 = vmatprep.subr.bf16.mxu0 %v21986_v2  ;;  %v21972_v1 = vpack.c.bf16 %v3343_v62, %v3339_v61  ;;  %v3348_v2 = vld [vmem:[#allocation10 + $0x1c8] sm:$0xff]  ;;  %v3544_v42 = vld [vmem:[#allocation13 + $0xa8] sm:$0xff] }
 0x943   : > { %v21974_v8 = vpack.c.bf16 %v3352_v3, %v3348_v2  ;;  %v3560_v61 = vld [vmem:[#allocation13 + $0x128] sm:$0xff]  ;;  %v3545_v62 = vld [vmem:[#allocation13 + $0xb0] sm:$0xff]  ;;  %v22020_v2 = vpack.c.bf16 %v3528_v56, %v3527_v55  ;;  %v3554_v56 = vld [vmem:[#allocation13 + $0xf8] sm:$0xff] }
 0x944   : > { %21969 = vmatpush1.bf16.msra.mxu1 %v21968_v49  ;;  %v3543_v49 = vld [vmem:[#allocation13 + $0xa0] sm:$0xff]  ;;  %v22022_v5 = vpack.c.bf16 %v3546_v63, %v3545_v62  ;;  %v3553_v55 = vld [vmem:[#allocation13 + $0xf0] sm:$0xff]  ;;  %v3538_v62 = vld [vmem:[#allocation13 + $0x78] sm:$0xff] }
 0x945   : > { %21989 = vmatpush1.bf16.msra.mxu0 %v21988_v11  ;;  %21971 = vmatprep.subr.bf16.mxu1 %v21970_v59  ;;  %v3351_v11 = vld [vmem:[#allocation10 + $0x1e0] sm:$0xff]  ;;  %v22018_v57 = vpack.c.bf16 %v3544_v42, %v3543_v49  ;;  %v22050_v59 = vpack.c.bf16 %v3576_v50, %v3575_v48  ;;  %v3535_v49 = vld [vmem:[#allocation13 + $0x60] sm:$0xff] }
 0x946   : > { %21991 = vmatprep.subr.bf16.mxu0 %v21990_v14  ;;  %v21976_v14 = vpack.c.bf16 %v3351_v11, %v3347_v9  ;;  %v3561_v9 = vld [vmem:[#allocation13 + $0x130] sm:$0xff]  ;;  %v3547_v11 = vld [vmem:[#allocation13 + $0xc0] sm:$0xff]  ;;  %v3536_v42 = vld [vmem:[#allocation13 + $0x68] sm:$0xff] }
 0x947   : > { %v3567_v48 = vld [vmem:[#allocation13 + $0x160] sm:$0xff]  ;;  %v22036_v50 = vpack.c.bf16 %v3536_v42, %v3535_v49 }
 0x948   : > { %21973 = vmatpush1.bf16.msra.mxu1 %v21972_v1  ;;  %v3577_v1 = vld [vmem:[#allocation13 + $0x1b0] sm:$0xff]  ;;  %v3755_v49 = vld [vmem:[#allocation2 + $0x1b0] sm:$0xff] }
 0x949   : > { %21993 = vmatpush1.bf16.msra.mxu0 %v21992_v25  ;;  %21975 = vmatprep.subr.bf16.mxu1 %v21974_v8  ;;  %v3530_v8 = vld [vmem:[#allocation13 + $0x38] sm:$0xff]  ;;  %v22054_v6 = vpack.c.bf16 %v3578_v53, %v3577_v1  ;;  %v3569_v53 = vld [vmem:[#allocation13 + $0x170] sm:$0xff] }
 0x94c   : > { %21977 = vmatpush1.bf16.msra.mxu1 %v21976_v14  ;;  %v3580_v14 = vld [vmem:[#allocation13 + $0x1c8] sm:$0xff] }
 0x9cc   : > { %v3274_v15 = vpop.xlane.xlu0 %3273 }
 0x9cd   : > { %v3276_v16 = vmul.f32 0.0078125, %v3274_v15  ;;  %v22008_v15 = vpack.c.bf16 %v3353_v13, %v3349_v12  ;;  %v3548_v12 = vld [vmem:[#allocation13 + $0xc8] sm:$0xff]  ;;  %v3579_v13 = vld [vmem:[#allocation13 + $0x1c0] sm:$0xff] }
 0x9ce   : > { %v22058_v21 = vpack.c.bf16 %v3580_v14, %v3579_v13 }
 0x9cf   : > { %v24347_v17 = vsub.f32 %v3272_v31, %v3276_v16  ;;  %v3330_v31 = vld [vmem:[#allocation10 + $0x138] sm:$0xff] }
 0x9d0   : > { %v21994_v32 = vpack.c.bf16 %v3330_v31, %v3326_v29  ;;  %v3539_v16 = vld [vmem:[#allocation13 + $0x80] sm:$0xff]  ;;  %v3524_v29 = vld [vmem:[#allocation13 + $0x8] sm:$0xff] }
 0x9d1   : > { %v3278_v18 = vmul.f32 %v24347_v17, %v24347_v17  ;;  %v3556_v31 = vld [vmem:[#allocation13 + $0x108] sm:$0xff] }
 0x9d2   : > { %21995 = vmatprep.subr.bf16.mxu0 %v21994_v32  ;;  %v3542_v32 = vld [vmem:[#allocation13 + $0x98] sm:$0xff]  ;;  %v22044_v38 = vpack.c.bf16 %v3556_v31, %v3555_v30 }
 0x9d3   : > { %3279 = vadd.xlane.f32.xlu0 %v3278_v18  ;;  %21997 = vmatpush1.bf16.msra.mxu0 %v21996_v37  ;;  %v3540_v18 = vld [vmem:[#allocation13 + $0x88] sm:$0xff]  ;;  %v22012_v37 = vpack.c.bf16 %v3524_v29, %v3523_v27  ;;  %v22014_v43 = vpack.c.bf16 %v3542_v32, %v3541_v24  ;;  %v3581_v27 = vld [vmem:[#allocation13 + $0x1d0] sm:$0xff]  ;;  %v3582_v29 = vld [vmem:[#allocation13 + $0x1d8] sm:$0xff] }
 0x9d4   : > { %21999 = vmatprep.subr.bf16.mxu0 %v21998_v47  ;;  %v22010_v20 = vpack.c.bf16 %v3540_v18, %v3539_v16  ;;  %v3558_v47 = vld [vmem:[#allocation13 + $0x118] sm:$0xff]  ;;  %v3531_v18 = vld [vmem:[#allocation13 + $0x40] sm:$0xff]  ;;  %v3533_v24 = vld [vmem:[#allocation13 + $0x50] sm:$0xff]  ;;  %v22062_v34 = vpack.c.bf16 %v3582_v29, %v3581_v27 }
 0x9d5   : > { %v22028_v30 = vpack.c.bf16 %v3532_v19, %v3531_v18 }
 0x9d6   : > { %22011 = vmatprep.subr.bf16.mxu1 %v22010_v20  ;;  %v22026_v20 = vpack.c.bf16 %v3548_v12, %v3547_v11 }
 0x9d7   : > { %22001 = vmatpush1.bf16.msra.mxu0 %v22000_v54  ;;  %v22048_v54 = vpack.c.bf16 %v3558_v47, %v3557_v46 }
 0x9d8   : > { %22003 = vmatprep.subr.bf16.mxu0 %v22002_v60  ;;  %v3559_v60 = vld [vmem:[#allocation13 + $0x120] sm:$0xff] }
 0x9d9   : > { %v22052_v3 = vpack.c.bf16 %v3560_v61, %v3559_v60  ;;  %v3586_v60 = vld [vmem:[#allocation13 + $0x1f8] sm:$0xff]  ;;  %v3537_v61 = vld [vmem:[#allocation13 + $0x70] sm:$0xff] }
 0x9da   : > { %v22040_v1 = vpack.c.bf16 %v3538_v62, %v3537_v61  ;;  %v3763_v61 = vld [vmem:[#allocation2 + $0x1f0] sm:$0xff]  ;;  %v3766_v62 = vld [vmem:[#allocation2 + $0x208] sm:$0xff] }
 0x9db   : > { %22005 = vmatpush1.bf16.msra.mxu0 %v22004_v4  ;;  %v3529_v4 = vld [vmem:[#allocation13 + $0x30] sm:$0xff] }
 0x9dc   : > { %22007 = vmatprep.subr.bf16.mxu0 %v22006_v10  ;;  %v3562_v10 = vld [vmem:[#allocation13 + $0x138] sm:$0xff] }
 0x9dd   : > { %v22056_v16 = vpack.c.bf16 %v3562_v10, %v3561_v9 }
 0x9df   : > { %22009 = vmatpush1.bf16.msra.mxu0 %v22008_v15  ;;  %v22024_v15 = vpack.c.bf16 %v3530_v8, %v3529_v4  ;;  %v3355_v4 = vld [vmem:[#allocation11] sm:$0xf]  ;;  %v24366_v8 = vsub.s32 3, %v24143_v51 }
 0x9e0   : > { %22043 = vmatprep.subr.bf16.mxu0 %v22042_v22  ;;  %v3563_v22 = vld [vmem:[#allocation13 + $0x140] sm:$0xff]  ;;  %v3364_v9 = vrot.slane %v3355_v4, %v24153_v58 }
 0x9e1   : > { %v3372_v10 = vrot.slane %v3355_v4, %v24366_v8 }
 0x9e9   : > { %3287 = vperm.xlu0 %23250, %v531_v33  }
 0xa60   : > { %v3280_v23 = vpop.xlane.xlu0 %3279 }
 0xa61   : > { %v3281_v25 = vmul.f32 0.007874016, %v3280_v23  ;;  %v3564_v23 = vld [vmem:[#allocation13 + $0x148] sm:$0xff] }
 0xa62   : > { %v22060_v31 = vpack.c.bf16 %v3564_v23, %v3563_v22 }
 0xa63   : > { %v3282_v26 = vadd.f32 1e-08, %v3281_v25  ;;  %v3549_v25 = vld [vmem:[#allocation13 + $0xd0] sm:$0xff] }
 0xa65   : > { %23283 = vrsqrt.f32 %v3282_v26  ;;  %v3550_v26 = vld [vmem:[#allocation13 + $0xd8] sm:$0xff] }
 0xa66   : > { %v22030_v32 = vpack.c.bf16 %v3550_v26, %v3549_v25  ;;  %v20015_v26 = vld [vmem:[#allocation14] ss:$0 sm:$0xff] }
 0xa68   : > { %v24356_v33 = vpop.permute.xlu0 %3287 }
 0xa6f   : > { %v23284_v28 = vpop.eup %23283 }
 0xa70   : > { %v3284_v36 = vmul.f32 %v23284_v28, %v24347_v17  ;;  %v22016_v17 = vpack.c.bf16 %v3526_v40, %v3525_v39  ;;  %v3534_v28 = vld [vmem:[#allocation13 + $0x58] sm:$0xff]  ;;  %v3583_v39 = vld [vmem:[#allocation13 + $0x1e0] sm:$0xff]  ;;  %v3584_v40 = vld [vmem:[#allocation13 + $0x1e8] sm:$0xff] }
 0xa71   : > { %v22066_v47 = vpack.c.bf16 %v3584_v40, %v3583_v39  ;;  %v3751_v39 = vld [vmem:[#allocation2 + $0x190] sm:$0xff]  ;;  %v3754_v40 = vld [vmem:[#allocation2 + $0x1a8] sm:$0xff] }
 0xa72   : > { %v24360_v41 = vmul.f32 %v24356_v33, %v3284_v36  ;;  %v3566_v36 = vld [vmem:[#allocation13 + $0x158] sm:$0xff] }
 0xa74   : > { %3442 = vmatmul.mubr.f32.vlgmr.msra.gmra.mrb[26].mxu1 %v24360_v41  ;;  %3513 = vmatmul.mubr.f32.vlgmr.msra.gmra.mrb[12].mxu0 %v24360_v41 }
 0xa75   : > { %22013 = vmatpush3.bf16.msra.mxu1 %v22012_v37  ;;  %22045 = vmatpush3.bf16.msra.mxu0 %v22044_v38  ;;  %v3551_v37 = vld [vmem:[#allocation13 + $0xe0] sm:$0xff]  ;;  %v3552_v38 = vld [vmem:[#allocation13 + $0xe8] sm:$0xff] }
 0xa76   : > { %22015 = vmatprep.subr.bf16.mxu1 %v22014_v43  ;;  %22047 = vmatprep.subr.bf16.mxu0 %v22046_v44  ;;  %v22032_v43 = vpack.c.bf16 %v3534_v28, %v3533_v24  ;;  %v22064_v44 = vpack.c.bf16 %v3566_v36, %v3565_v35  ;;  %v22034_v46 = vpack.c.bf16 %v3552_v38, %v3551_v37  ;;  %v3753_v35 = vld [vmem:[#allocation2 + $0x1a0] sm:$0xff]  ;;  %v3752_v38 = vld [vmem:[#allocation2 + $0x198] sm:$0xff] }
 0xa77   : > { %v3749_v36 = vld [vmem:[#allocation2 + $0x180] sm:$0xff] }
 0xa79   : > { %22017 = vmatpush3.bf16.msra.mxu1 %v22016_v17  ;;  %22049 = vmatpush3.bf16.msra.mxu0 %v22048_v54  ;;  %v3568_v17 = vld [vmem:[#allocation13 + $0x168] sm:$0xff] }
 0xa7a   : > { %22019 = vmatprep.subr.bf16.mxu1 %v22018_v57  ;;  %22051 = vmatprep.subr.bf16.mxu0 %v22050_v59  ;;  %v22068_v54 = vpack.c.bf16 %v3568_v17, %v3567_v48  ;;  %v3585_v57 = vld [vmem:[#allocation13 + $0x1f0] sm:$0xff]  ;;  %v22038_v59 = vpack.c.bf16 %v3554_v56, %v3553_v55  ;;  %v3758_v48 = vld [vmem:[#allocation2 + $0x1c8] sm:$0xff]  ;;  %v3760_v17 = vld [vmem:[#allocation2 + $0x1d8] sm:$0xff] }
 0xa7b   : > { %v22070_v63 = vpack.c.bf16 %v3586_v60, %v3585_v57  ;;  %v3762_v55 = vld [vmem:[#allocation2 + $0x1e8] sm:$0xff]  ;;  %v3765_v56 = vld [vmem:[#allocation2 + $0x200] sm:$0xff]  ;;  %v3764_v60 = vld [vmem:[#allocation2 + $0x1f8] sm:$0xff] }
 0xa7c   : > { %v3761_v57 = vld [vmem:[#allocation2 + $0x1e0] sm:$0xff] }
 0xa7d   : > { %22021 = vmatpush3.bf16.msra.mxu1 %v22020_v2  ;;  %22053 = vmatpush3.bf16.msra.mxu0 %v22052_v3  ;;  %v3570_v2 = vld [vmem:[#allocation13 + $0x178] sm:$0xff] }
 0xa7e   : > { %22023 = vmatprep.subr.bf16.mxu1 %v22022_v5  ;;  %22055 = vmatprep.subr.bf16.mxu0 %v22054_v6  ;;  %v22072_v3 = vpack.c.bf16 %v3570_v2, %v3569_v53  ;;  %v3360_v5 = vrot.slane %v3355_v4, %v24146_v52  ;;  %v3368_v6 = vrot.slane %v3355_v4, %v24260_v45 }
 0xa81   : > { %22025 = vmatpush3.bf16.msra.mxu1 %v22024_v15  ;;  %22057 = vmatpush3.bf16.msra.mxu0 %v22056_v16 }
 0xa82   : > { %22027 = vmatprep.subr.bf16.mxu1 %v22026_v20  ;;  %22059 = vmatprep.subr.bf16.mxu0 %v22058_v21 }
 0xa85   : > { %22029 = vmatpush3.bf16.msra.mxu1 %v22028_v30  ;;  %22061 = vmatpush3.bf16.msra.mxu0 %v22060_v31 }
 0xa86   : > { %22031 = vmatprep.subr.bf16.mxu1 %v22030_v32  ;;  %22063 = vmatprep.subr.bf16.mxu0 %v22062_v34  ;;  %v3750_v34 = vld [vmem:[#allocation2 + $0x188] sm:$0xff] }
 0xa87   : > { %v22074_v37 = vpack.c.bf16 %v3753_v35, %v3750_v34  ;;  %v3786_v34 = vld [vmem:[#allocation2 + $0x2a8] sm:$0xff]  ;;  %v3789_v35 = vld [vmem:[#allocation2 + $0x2c0] sm:$0xff] }
 0xa89   : > { %22033 = vmatpush3.bf16.msra.mxu1 %v22032_v43  ;;  %22065 = vmatpush3.bf16.msra.mxu0 %v22064_v44  ;;  %v22076_v43 = vpack.c.bf16 %v3752_v38, %v3749_v36  ;;  %v22107_v44 = vpack.c.bf16 %v3754_v40, %v3751_v39  ;;  %v3785_v38 = vld [vmem:[#allocation2 + $0x2a0] sm:$0xff]  ;;  %v3788_v39 = vld [vmem:[#allocation2 + $0x2b8] sm:$0xff]  ;;  %v3787_v40 = vld [vmem:[#allocation2 + $0x2b0] sm:$0xff] }
 0xa8a   : > { %22035 = vmatprep.subr.bf16.mxu1 %v22034_v46  ;;  %22067 = vmatprep.subr.bf16.mxu0 %v22066_v47  ;;  %v3756_v46 = vld [vmem:[#allocation2 + $0x1b8] sm:$0xff]  ;;  %v3759_v47 = vld [vmem:[#allocation2 + $0x1d0] sm:$0xff] }
 0xa8b   : > { %v22078_v42 = vpack.c.bf16 %v3759_v47, %v3756_v46  ;;  %v3795_v46 = vld [vmem:[#allocation2 + $0x2f0] sm:$0xff]  ;;  %v22100_v47 = vpack.c.bf16 %v3788_v39, %v3785_v38 }
 0xa8d   : > { %22037 = vmatpush3.bf16.msra.mxu1 %v22036_v50  ;;  %22069 = vmatpush3.bf16.msra.mxu0 %v22068_v54  ;;  %v3757_v50 = vld [vmem:[#allocation2 + $0x1c0] sm:$0xff] }
 0xa8e   : > { %22039 = vmatprep.subr.bf16.mxu1 %v22038_v59  ;;  %22071 = vmatprep.subr.bf16.mxu0 %v22070_v63  ;;  %v22110_v54 = vpack.c.bf16 %v3760_v17, %v3757_v50  ;;  %v22082_v59 = vpack.c.bf16 %v3765_v56, %v3762_v55  ;;  %v22084_v63 = vpack.c.bf16 %v3764_v60, %v3761_v57  ;;  %v3794_v50 = vld [vmem:[#allocation2 + $0x2e8] sm:$0xff]  ;;  %v3793_v17 = vld [vmem:[#allocation2 + $0x2e0] sm:$0xff] }
 0xa91   : > { %22041 = vmatpush3.bf16.msra.mxu1 %v22040_v1  ;;  %22073 = vmatpush3.bf16.msra.mxu0 %v22072_v3  ;;  %v22113_v1 = vpack.c.bf16 %v3766_v62, %v3763_v61 }
 0xa92   : > { %22106 = vmatprep.subr.bf16.mxu0 %v23802_v7  ;;  %22075 = vmatprep.subr.bf16.mxu1 %v22074_v37  ;;  %v22098_v37 = vpack.c.bf16 %v3789_v35, %v3786_v34 }
 0xb47   : > { %v3443_v11 = vpop.f32.mrb[26].mxu1  ;;  %v3514_v12 = vpop.f32.mrb[12].mxu0 }
 0xb48   : > { %v3444_v13 = vadd.f32 %v3443_v11, %v3360_v5  ;;  %v3515_v14 = vadd.f32 %v3514_v12, %v3368_v6  ;;  %v3445_v15 = vpop.f32.mrb[27].mxu1  ;;  %v3516_v16 = vpop.f32.mrb[13].mxu0  ;;  %v3768_v5 = vld [vmem:[#allocation2 + $0x218] sm:$0xff]  ;;  %v3771_v6 = vld [vmem:[#allocation2 + $0x230] sm:$0xff]  ;;  %v3770_v11 = vld [vmem:[#allocation2 + $0x228] sm:$0xff] }
 0xb49   : > { %v3446_v18 = vadd.f32 %v3445_v15, %v3364_v9  ;;  %v3517_v19 = vadd.f32 %v3516_v16, %v3372_v10  ;;  %v22086_v9 = vpack.c.bf16 %v3771_v6, %v3768_v5  ;;  %v3767_v10 = vld [vmem:[#allocation2 + $0x210] sm:$0xff]  ;;  %v3769_v12 = vld [vmem:[#allocation2 + $0x220] sm:$0xff]  ;;  %v3774_v16 = vld [vmem:[#allocation2 + $0x248] sm:$0xff] }
 0xb4a   : > { %v3519_v51 = vmax.f32 %v3444_v13, 0.0  ;;  %v3521_v22 = vmax.f32 %v3515_v14, 0.0  ;;  %v22088_v13 = vpack.c.bf16 %v3770_v11, %v3767_v10  ;;  %v3772_v14 = vld [vmem:[#allocation2 + $0x238] sm:$0xff] }
 0xb4b   : > { %v3520_v20 = vmax.f32 %v3446_v18, 0.0  ;;  %v3522_v21 = vmax.f32 %v3517_v19, 0.0  ;;  %v22116_v15 = vpack.c.bf16 %v3772_v14, %v3769_v12  ;;  %v3777_v18 = vld [vmem:[#allocation2 + $0x260] sm:$0xff] }
 0xb4c   : > { %v22090_v19 = vpack.c.bf16 %v3777_v18, %v3774_v16 }
 0xb4d   : > { %3658 = vmatprep.mubr.f32.mxu1 %v3520_v20  ;;  %3728 = vmatprep.mubr.f32.mxu0 %v3522_v21  ;;  %v3773_v20 = vld [vmem:[#allocation2 + $0x240] sm:$0xff]  ;;  %v3776_v21 = vld [vmem:[#allocation2 + $0x258] sm:$0xff] }
 0xb4e   : > { %3659 = vmatmul.mubr.f32.vlgmr.msra.gmra.mrb[28].mxu1 %v3519_v51  ;;  %3729 = vmatmul.mubr.f32.vlgmr.msra.gmra.mrb[14].mxu0 %v3521_v22  ;;  %v3775_v51 = vld [vmem:[#allocation2 + $0x250] sm:$0xff]  ;;  %v22092_v22 = vpack.c.bf16 %v3776_v21, %v3773_v20 }
 0xb4f   : > { %3879 = vmatprep.mubr.f32.mxu1 %v23801_v0  ;;  %21148 = vmatprep.mubr.msk.f32.mxu0 %vm23803_vm0, %v23801_v0 }
 0xb50   : > { %22077 = vmatpush1.bf16.msra.mxu1 %v22076_v43  ;;  %22108 = vmatpush3.bf16.msra.mxu0 %v22107_v44  ;;  %v3790_v43 = vld [vmem:[#allocation2 + $0x2c8] sm:$0xff]  ;;  %v3792_v44 = vld [vmem:[#allocation2 + $0x2d8] sm:$0xff] }
 0xb51   : > { %22079 = vmatprep.subr.bf16.mxu1 %v22078_v42  ;;  %22109 = vmatprep.subr.bf16.mxu0 %v23802_v7  ;;  %v22102_v42 = vpack.c.bf16 %v3795_v46, %v3792_v44 }
 0xb54   : > { %22111 = vmatpush3.bf16.msra.mxu0 %v22110_v54 }
 0xb55   : > { %22112 = vmatprep.subr.bf16.mxu0 %v23802_v7 }
 0xb58   : > { %22114 = vmatpush3.bf16.msra.mxu0 %v22113_v1 }
 0xb59   : > { %22115 = vmatprep.subr.bf16.mxu0 %v23802_v7 }
 0xb5c   : > { %22117 = vmatpush3.bf16.msra.mxu0 %v22116_v15 }
 0xb5d   : > { %22118 = vmatprep.subr.bf16.mxu0 %v23802_v7 }
 0xc21   : > { %v20248_v23 = vpop.f32.mrb[28].mxu1  ;;  %v20283_v25 = vpop.f32.mrb[14].mxu0 }
 0xc22   : > { %v20249_v27 = vpop.f32.mrb[29].mxu1  ;;  %v20284_v29 = vpop.f32.mrb[15].mxu0 }
 0xc23   : > { %v20250_v30 = vadd.f32 %v20249_v27, %v20248_v23  ;;  %v20285_v31 = vadd.f32 %v20284_v29, %v20283_v25  ;;  %v3778_v23 = vld [vmem:[#allocation2 + $0x268] sm:$0xff]  ;;  %v3780_v25 = vld [vmem:[#allocation2 + $0x278] sm:$0xff] }
 0xc24   : > { %v22119_v27 = vpack.c.bf16 %v3778_v23, %v3775_v51 }
 0xc25   : > { %v3661_v24 = vadd.f32 %v20250_v30, %v20015_v26  ;;  %v3783_v26 = vld [vmem:[#allocation2 + $0x290] sm:$0xff] }
 0xc26   : > { %v22094_v29 = vpack.c.bf16 %v3783_v26, %v3780_v25  ;;  %v3779_v30 = vld [vmem:[#allocation2 + $0x270] sm:$0xff]  ;;  %22120 = vmatpush3.bf16.msra.mxu0 %v22119_v27 }
 0xc27   : > { %v3731_v28 = vadd.f32 %v20285_v31, %v3661_v24  ;;  %v3782_v31 = vld [vmem:[#allocation2 + $0x288] sm:$0xff]  ;;  %v3781_v24 = vld [vmem:[#allocation2 + $0x280] sm:$0xff]  ;;  %22121 = vmatprep.subr.bf16.mxu0 %v23802_v7 }
 0xc29   : > { %v3734_v32 = vadd.f32 %v3731_v28, %v24360_v41  ;;  %v22080_v41 = vpack.c.bf16 %v3758_v48, %v3755_v49  ;;  %v22096_v28 = vpack.c.bf16 %v3782_v31, %v3779_v30  ;;  %v22125_v49 = vpack.c.bf16 %v3790_v43, %v3787_v40  ;;  %v3791_v48 = vld [vmem:[#allocation2 + $0x2d0] sm:$0xff] }
 0xc2a   : > { %v22104_v54 = vpack.c.bf16 %v3794_v50, %v3791_v48 }
 0xc2b   : > { %3735 = vadd.xlane.f32.xlu1 %v3734_v32  ;;  %22081 = vmatpush1.bf16.msra.mxu1 %v22080_v41  ;;  %v3796_v41 = vld [vmem:[#allocation2 + $0x2f8] sm:$0xff] }
 0xc2c   : > { %22083 = vmatprep.subr.bf16.mxu1 %v22082_v59  ;;  %v22128_v55 = vpack.c.bf16 %v3796_v41, %v3793_v17 }
 0xc2f   : > { %22085 = vmatpush1.bf16.msra.mxu1 %v22084_v63  ;;  %v23467_v63 = vld [vmem:[%s24136_s25] sm:$0xff]  ;;  %s23701_s25 = sshll.u32 %s23805_s21, 4  ;;  %s23702_s25 = int_to_ptr.vmem [resolvable:$false] %s23701_s25 }
 0xc30   : > { %22087 = vmatprep.subr.bf16.mxu1 %v22086_v9  ;;  %s23703_s14 = scalar_lea.vmem %s23702_s25, 256  ;;  %p23704_p5 = scmp.lt.s32.totalorder %s25375_s28, %s23702_s25 }
 0xc31   : > { %p23705_p6 = scmp.lt.s32.totalorder %s23703_s14, %s23697_s15 }
 0xc33   : > { %22089 = vmatpush1.bf16.msra.mxu1 %v22088_v13  ;;  %p23706_p9 = por %p23705_p6, %p23704_p5 }
 0xc34   : > { %22091 = vmatprep.subr.bf16.mxu1 %v22090_v19 }
 0xc35   : > { %p23707_p10 = pnand %p23706_p9, %p23700_p0 }
 0xc37   : > { %22093 = vmatpush1.bf16.msra.mxu1 %v22092_v22 }
 0xc38   : > { %22095 = vmatprep.subr.bf16.mxu1 %v22094_v29 }
 0xc3b   : > { %22097 = vmatpush1.bf16.msra.mxu1 %v22096_v28 }
 0xc3c   : > { %22099 = vmatprep.subr.bf16.mxu1 %v22098_v37 }
 0xc3f   : > { %22101 = vmatpush1.bf16.msra.mxu1 %v22100_v47 }
 0xc40   : > { %22103 = vmatprep.subr.bf16.mxu1 %v22102_v42 }
 0xc43   : > { %22105 = vmatpush1.bf16.msra.mxu1 %v22104_v54 }
 0xc44   : > { %21151 = vmatprep.subr.mxu1 %v23801_v0 }
 0xcb8   : > { %v3736_v53 = vpop.xlane.xlu1 %3735 }
 0xcb9   : > { %v3737_v2 = vmul.f32 0.0078125, %v3736_v53  ;;  %v24400_v53 = vld [vmem:[#allocation5 + $0x3] sm:$0x7] }
 0xcbb   : > { %v24379_v3 = vsub.f32 %v3734_v32, %v3737_v2  ;;  %v3784_v32 = vld [vmem:[#allocation2 + $0x298] sm:$0xff]  ;;  %v3803_v2 = vrot.slane %v24400_v53, %v24146_v52 }
 0xcbc   : > { %v22122_v36 = vpack.c.bf16 %v3784_v32, %v3781_v24 }
 0xcbd   : > { %v3739_v4 = vmul.f32 %v24379_v3, %v24379_v3 }
 0xcbe   : > { %22123 = vmatpush3.bf16.msra.mxu0 %v22122_v36 }
 0xcbf   : > { %3740 = vadd.xlane.f32.xlu0 %v3739_v4  ;;  %22124 = vmatprep.subr.bf16.mxu0 %v23802_v7 }
 0xcc2   : > { %22126 = vmatpush3.bf16.msra.mxu0 %v22125_v49 }
 0xcc3   : > { %22127 = vmatprep.subr.bf16.mxu0 %v23802_v7 }
 0xcc6   : > { %22129 = vmatpush3.bf16.msra.mxu0 %v22128_v55 }
 0xcc7   : > { %21191 = vmatprep.subr.mxu0 %v23801_v0 }
 0xd4c   : > { %v3741_v56 = vpop.xlane.xlu0 %3740 }
 0xd4d   : > { %v3742_v57 = vmul.f32 0.007874016, %v3741_v56 }
 0xd4f   : > { %v3743_v59 = vadd.f32 1e-08, %v3742_v57 }
 0xd51   : > { %23285 = vrsqrt.f32 %v3743_v59 }
 0xd5b   : > { %v23286_v60 = vpop.eup %23285 }
 0xd5c   : > { %v3745_v61 = vmul.f32 %v23286_v60, %v24379_v3  ;;  %v3807_v3 = vrot.slane %v24400_v53, %v24153_v58 }
 0xd5e   : > { %v3746_v62 = vmul.f32 %v3745_v61, %v24356_v33 }
 0xd60   : > { %v24392_v1 = vadd.f32 %v23467_v63, %v3746_v62 }
 0xd62   : > { %3880 = vmatmul.mubr.f32.vlgmr.msra.gmra.mrb[30].mxu1 %v24392_v1  ;;  %21149 = vmatmul.mubr.f32.vlgmr.msra.gmra.mrb[16].mxu0 %v24392_v1 }
 0xd63   : > { %21153 = vmatprep.mubr.msk.f32.mxu1 %vm23803_vm0, %v23801_v0  ;;  %21193 = vmatprep.mubr.msk.f32.mxu0 %vm23803_vm0, %v23801_v0 }
 0xe35   : > { %v3881_v4 = vpop.f32.mrb[30].mxu1  ;;  %v24406_v5 = vpop.f32.mrb[16].mxu0 }
 0xe36   : > { %v3882_v6 = vadd.f32 %v3881_v4, %v3803_v2  ;;  %v3883_v9 = vpop.f32.mrb[31].mxu1  ;;  %v21150_v10 = vpop.f32.mrb[17].mxu0  ;;  %v23468_v4 = vld [vmem:[%s24235_s22] ss:$0 sm:$0xff] }
 0xe37   : > { %v3884_v11 = vadd.f32 %v3883_v9, %v3807_v3 }
 0xe38   : > { %3956 = vxpose.xlu0.b32.start.end [1/1] (short) %v3882_v6, 128 }
 0xe39   : > { %3988 = vxpose.xlu1.b32.start.end [1/1] (short) %v3884_v11, 128 }
 0xeb8   : > { %v3972_v12 = vpop.trf.xlu0 }
 0xeb9   : > { %v4004_v13 = vpop.trf.xlu1  ;;  %4052 = vxpose.xlu0.b32.start [1/2] (short) (narrow) %v3972_v12, 8 }
 0xeba   : > { %4308 = vxpose.xlu1.b32.start [1/2] (short) (narrow) %v4004_v13, 8 }
 0xebc   : > { %v3973_v14 = vpop.trf.xlu0 }
 0xebd   : > { %v4005_v15 = vpop.trf.xlu1  ;;  %4053 = vxpose.xlu0.b32.end [2/2] (short) (narrow) %v3973_v14, 8 }
 0xebe   : > { %4309 = vxpose.xlu1.b32.end [2/2] (short) (narrow) %v4005_v15, 8 }
 0xec0   : > { %v3974_v16 = vpop.trf.xlu0 }
 0xec1   : > { %v4006_v18 = vpop.trf.xlu1 }
 0xec2   : > { %4084 = vxpose.xlu1.b32.start [1/2] (short) (narrow) %v3974_v16, 8 }
 0xec4   : > { %v3975_v19 = vpop.trf.xlu0 }
 0xec5   : > { %v4007_v20 = vpop.trf.xlu1 }
 0xec6   : > { %4085 = vxpose.xlu1.b32.end [2/2] (short) (narrow) %v3975_v19, 8 }
 0xec8   : > { %v3976_v21 = vpop.trf.xlu0 }
 0xec9   : > { %v4008_v51 = vpop.trf.xlu1  ;;  %4116 = vxpose.xlu0.b32.start [1/2] (short) (narrow) %v3976_v21, 8 }
 0xeca   : > { %4340 = vxpose.xlu1.b32.start [1/2] (short) (narrow) %v4006_v18, 8 }
 0xecc   : > { %v3977_v22 = vpop.trf.xlu0 }
 0xecd   : > { %v4009_v23 = vpop.trf.xlu1  ;;  %4117 = vxpose.xlu0.b32.end [2/2] (short) (narrow) %v3977_v22, 8 }
 0xece   : > { %4341 = vxpose.xlu1.b32.end [2/2] (short) (narrow) %v4007_v20, 8 }
 0xed0   : > { %v3978_v25 = vpop.trf.xlu0 }
 0xed1   : > { %v4010_v26 = vpop.trf.xlu1  ;;  %4148 = vxpose.xlu0.b32.start [1/2] (short) (narrow) %v3978_v25, 8 }
 0xed2   : > { %4372 = vxpose.xlu1.b32.start [1/2] (short) (narrow) %v4008_v51, 8 }
 0xed4   : > { %v3979_v27 = vpop.trf.xlu0 }
 0xed5   : > { %v4011_v29 = vpop.trf.xlu1  ;;  %4149 = vxpose.xlu0.b32.end [2/2] (short) (narrow) %v3979_v27, 8 }
 0xed6   : > { %4373 = vxpose.xlu1.b32.end [2/2] (short) (narrow) %v4009_v23, 8 }
 0xed8   : > { %v3980_v30 = vpop.trf.xlu0 }
 0xed9   : > { %v4012_v31 = vpop.trf.xlu1  ;;  %4180 = vxpose.xlu0.b32.start [1/2] (short) (narrow) %v3980_v30, 8 }
 0xeda   : > { %4404 = vxpose.xlu1.b32.start [1/2] (short) (narrow) %v4010_v26, 8 }
 0xedc   : > { %v3981_v24 = vpop.trf.xlu0 }
 0xedd   : > { %v4013_v28 = vpop.trf.xlu1  ;;  %4181 = vxpose.xlu0.b32.end [2/2] (short) (narrow) %v3981_v24, 8 }
 0xede   : > { %4405 = vxpose.xlu1.b32.end [2/2] (short) (narrow) %v4011_v29, 8 }
 0xee0   : > { %v3982_v32 = vpop.trf.xlu0 }
 0xee1   : > { %v4014_v34 = vpop.trf.xlu1  ;;  %4212 = vxpose.xlu0.b32.start [1/2] (short) (narrow) %v3982_v32, 8 }
 0xee2   : > { %4436 = vxpose.xlu1.b32.start [1/2] (short) (narrow) %v4012_v31, 8 }
 0xee4   : > { %v3983_v35 = vpop.trf.xlu0 }
 0xee5   : > { %v4015_v36 = vpop.trf.xlu1  ;;  %4213 = vxpose.xlu0.b32.end [2/2] (short) (narrow) %v3983_v35, 8 }
 0xee6   : > { %4437 = vxpose.xlu1.b32.end [2/2] (short) (narrow) %v4013_v28, 8 }
 0xee8   : > { %v3984_v37 = vpop.trf.xlu0 }
 0xee9   : > { %v4016_v38 = vpop.trf.xlu1  ;;  %4244 = vxpose.xlu0.b32.start [1/2] (short) (narrow) %v3984_v37, 8 }
 0xeea   : > { %4468 = vxpose.xlu1.b32.start [1/2] (short) (narrow) %v4014_v34, 8 }
 0xeec   : > { %v3985_v39 = vpop.trf.xlu0 }
 0xeed   : > { %4245 = vxpose.xlu0.b32.end [2/2] (short) (narrow) %v3985_v39, 8  ;;  %v4017_v40 = vpop.trf.xlu1 }
 0xeee   : > { %4469 = vxpose.xlu1.b32.end [2/2] (short) (narrow) %v4015_v36, 8  ;;  %v3811_v36 = vrot.slane %v24400_v53, %v24260_v45 }
 0xef0   : > { %v3986_v43 = vpop.trf.xlu0  ;;  %v3953_v37 = vadd.f32 %v24406_v5, %v3811_v36 }
 0xef1   : > { %4276 = vxpose.xlu0.b32.start [1/2] (short) (narrow) %v3986_v43, 8  ;;  %v4018_v46 = vpop.trf.xlu1 }
 0xef2   : > { %4500 = vxpose.xlu1.b32.start [1/2] (short) (narrow) %v4016_v38, 8 }
 0xef4   : > { %v3987_v44 = vpop.trf.xlu0 }
 0xef5   : > { %4277 = vxpose.xlu0.b32.end [2/2] (short) (narrow) %v3987_v44, 8  ;;  %v4019_v47 = vpop.trf.xlu1 }
 0xef6   : > { %4501 = vxpose.xlu1.b32.end [2/2] (short) (narrow) %v4017_v40, 8 }
 0xefa   : > { %4532 = vxpose.xlu1.b32.start [1/2] (short) (narrow) %v4018_v46, 8 }
 0xefe   : > { %4533 = vxpose.xlu1.b32.end [2/2] (short) (narrow) %v4019_v47, 8 }
 0xf39   : > { %v4068_v42 = vpop.trf.xlu0 }
 0xf3a   : > { %v4324_v49 = vpop.trf.xlu1 }
 0xf3b   : > { %21152 = vmatpush3.xpose.msk.msra.mxu1 %vm1609_vm1, %v4324_v49 }
 0xf3c   : > { %21156 = vmatprep.subr.mxu1 %v23801_v0 }
 0xf3e   : > { %21154 = vmatmul.mubr.msk.f32.vlgmr.msra.gmra.mrb[32].mxu1 %vm1609_vm1, %v4068_v42 }
 0xf3f   : > { %21158 = vmatprep.mubr.msk.f32.mxu1 %vm23803_vm0, %v23801_v0 }
 0xf42   : > { %v4100_v48 = vpop.trf.xlu1 }
 0xf49   : > { %v4132_v41 = vpop.trf.xlu0 }
 0xf4a   : > { %v4356_v50 = vpop.trf.xlu1 }
 0xf4b   : > { %21157 = vmatpush3.xpose.msk.msra.mxu1 %vm1609_vm1, %v4356_v50 }
 0xf4c   : > { %21161 = vmatprep.subr.mxu1 %v23801_v0 }
 0xf4e   : > { %21159 = vmatmul.mubr.msk.f32.vlgmr.msra.gmra.mrb[34].mxu1 %vm1609_vm1, %v4100_v48 }
 0xf4f   : > { %21163 = vmatprep.mubr.msk.f32.mxu1 %vm23803_vm0, %v23801_v0 }
 0xf51   : > { %v4164_v55 = vpop.trf.xlu0 }
 0xf52   : > { %v4388_v17 = vpop.trf.xlu1 }
 0xf53   : > { %21162 = vmatpush3.xpose.msk.msra.mxu1 %vm1609_vm1, %v4388_v17 }
 0xf54   : > { %21166 = vmatprep.subr.mxu1 %v23801_v0 }
 0xf56   : > { %21164 = vmatmul.mubr.msk.f32.vlgmr.msra.gmra.mrb[36].mxu1 %vm1609_vm1, %v4132_v41 }
 0xf57   : > { %21168 = vmatprep.mubr.msk.f32.mxu1 %vm23803_vm0, %v23801_v0 }
 0xf59   : > { %v4196_v57 = vpop.trf.xlu0 }
 0xf5a   : > { %v4420_v54 = vpop.trf.xlu1 }
 0xf5b   : > { %21167 = vmatpush3.xpose.msk.msra.mxu1 %vm1609_vm1, %v4420_v54 }
 0xf5c   : > { %21171 = vmatprep.subr.mxu1 %v23801_v0 }
 0xf5e   : > { %21169 = vmatmul.mubr.msk.f32.vlgmr.msra.gmra.mrb[38].mxu1 %vm1609_vm1, %v4164_v55 }
 0xf5f   : > { %21173 = vmatprep.mubr.msk.f32.mxu1 %vm23803_vm0, %v23801_v0 }
 0xf61   : > { %v4228_v60 = vpop.trf.xlu0 }
 0xf62   : > { %v4452_v56 = vpop.trf.xlu1 }
 0xf63   : > { %21172 = vmatpush3.xpose.msk.msra.mxu1 %vm1609_vm1, %v4452_v56 }
 0xf64   : > { %21176 = vmatprep.subr.mxu1 %v23801_v0 }
 0xf66   : > { %21174 = vmatmul.mubr.msk.f32.vlgmr.msra.gmra.mrb[40].mxu1 %vm1609_vm1, %v4196_v57 }
 0xf67   : > { %21178 = vmatprep.mubr.msk.f32.mxu1 %vm23803_vm0, %v23801_v0 }
 0xf69   : > { %v4260_v62 = vpop.trf.xlu0 }
 0xf6a   : > { %v4484_v59 = vpop.trf.xlu1 }
 0xf6b   : > { %21177 = vmatpush3.xpose.msk.msra.mxu1 %vm1609_vm1, %v4484_v59 }
 0xf6c   : > { %21181 = vmatprep.subr.mxu1 %v23801_v0 }
 0xf6e   : > { %21179 = vmatmul.mubr.msk.f32.vlgmr.msra.gmra.mrb[42].mxu1 %vm1609_vm1, %v4228_v60 }
 0xf6f   : > { %21183 = vmatprep.mubr.msk.f32.mxu1 %vm23803_vm0, %v23801_v0 }
 0xf71   : > { %v4292_v2 = vpop.trf.xlu0 }
 0xf72   : > { %v4516_v61 = vpop.trf.xlu1 }
 0xf73   : > { %21182 = vmatpush3.xpose.msk.msra.mxu1 %vm1609_vm1, %v4516_v61 }
 0xf74   : > { %21186 = vmatprep.subr.mxu1 %v23801_v0 }
 0xf76   : > { %21184 = vmatmul.mubr.msk.f32.vlgmr.msra.gmra.mrb[44].mxu1 %vm1609_vm1, %v4260_v62 }
 0xf77   : > { %21188 = vmatprep.mubr.msk.f32.mxu1 %vm23803_vm0, %v23801_v0 }
 0xf7a   : > { %v4548_v63 = vpop.trf.xlu1 }
 0xf7b   : > { %21187 = vmatpush3.xpose.msk.msra.mxu1 %vm1609_vm1, %v4548_v63 }
 0xf7c   : > { %21196 = vmatprep.subr.mxu1 %v23801_v0 }
 0xf7e   : > { %21189 = vmatmul.mubr.msk.f32.vlgmr.msra.gmra.mrb[46].mxu1 %vm1609_vm1, %v4292_v2 }
 0xf7f   : > { %21198 = vmatprep.mubr.msk.f32.mxu1 %vm23803_vm0, %v23801_v0 }
0x1011   : > { %v4892_v3 = vpop.f32.mrb[32].mxu1 }
0x1012   : > { %v4893_v6 = vadd.f32 %v23468_v4, %v4892_v3  ;;  %v21155_v9 = vpop.f32.mrb[33].mxu1 }
0x1014   : > { %v5428_v10 = vsel %vm2218_vm2, %v4893_v6, -inf }
0x1015   : > { %5429 = vmax.xlane.f32.xlu1 %v5428_v10 }
0x1021   : > { %v4968_v11 = vpop.f32.mrb[34].mxu1 }
0x1022   : > { %v21160_v12 = vpop.f32.mrb[35].mxu1  ;;  %v4969_v50 = vadd.f32 %v23468_v4, %v4968_v11 }
0x1024   : > { %v5431_v53 = vsel %vm2218_vm2, %v4969_v50, -inf }
0x1029   : > { %v5044_v13 = vpop.f32.mrb[36].mxu1 }
0x102a   : > { %v24450_v14 = vadd.f32 %v23468_v4, %v5044_v13  ;;  %v21165_v15 = vpop.f32.mrb[37].mxu1 }
0x102c   : > { %v5434_v16 = vsel %vm2218_vm2, %v24450_v14, -inf }
0x102d   : > { %5435 = vmax.xlane.f32.xlu1 %v5434_v16 }
0x1031   : > { %v5120_v18 = vpop.f32.mrb[38].mxu1 }
0x1032   : > { %v24454_v19 = vadd.f32 %v23468_v4, %v5120_v18  ;;  %v21170_v20 = vpop.f32.mrb[39].mxu1 }
0x1034   : > { %v5437_v21 = vsel %vm2218_vm2, %v24454_v19, -inf }
0x1035   : > { %5438 = vmax.xlane.f32.xlu1 %v5437_v21 }
0x1039   : > { %v5196_v51 = vpop.f32.mrb[40].mxu1 }
0x103a   : > { %v24458_v22 = vadd.f32 %v23468_v4, %v5196_v51  ;;  %v21175_v23 = vpop.f32.mrb[41].mxu1 }
0x103c   : > { %v5440_v25 = vsel %vm2218_vm2, %v24458_v22, -inf }
0x103d   : > { %5441 = vmax.xlane.f32.xlu1 %v5440_v25 }
0x1041   : > { %v5272_v26 = vpop.f32.mrb[42].mxu1 }
0x1042   : > { %v24462_v27 = vadd.f32 %v23468_v4, %v5272_v26  ;;  %v21180_v29 = vpop.f32.mrb[43].mxu1 }
0x1044   : > { %v5443_v30 = vsel %vm2218_vm2, %v24462_v27, -inf }
0x1045   : > { %5444 = vmax.xlane.f32.xlu1 %v5443_v30 }
0x1049   : > { %v5348_v31 = vpop.f32.mrb[44].mxu1 }
0x104a   : > { %v21185_v24 = vpop.f32.mrb[45].mxu1  ;;  %v24475_v17 = vadd.f32 %v23468_v4, %v5348_v31 }
0x104c   : > { %v5446_v5 = vsel %vm2218_vm2, %v24475_v17, -inf }
0x1051   : > { %v5424_v28 = vpop.f32.mrb[46].mxu1 }
0x1052   : > { %v24466_v32 = vadd.f32 %v23468_v4, %v5424_v28  ;;  %v21190_v34 = vpop.f32.mrb[47].mxu1 }
0x1054   : > { %v5449_v35 = vsel %vm2218_vm2, %v24466_v32, -inf }
0x1055   : > { %5450 = vmax.xlane.f32.xlu1 %v5449_v35 }
0x1088   : > { %4020 = vxpose.xlu1.b32.start.end [1/1] (short) %v3953_v37, 128 }
0x10a2   : > { %v5430_v38 = vpop.xlane.xlu1 %5429 }
0x10a3   : > { %v5452_v42 = vsub.f32 %v4893_v6, %v5430_v38 }
0x10a5   : > { %v5460_v48 = vmul.f32 1.442695, %v5452_v42 }
0x10a7   : > { %23287 = vpow2.f32 %v5460_v48 }
0x10b1   : > { %v24480_v41 = vpop.eup %23287 }
0x10b2   : > { %v5476_v54 = vsel %vm2218_vm2, %v24480_v41, 0.0 }
0x10ba   : > { %v5436_v39 = vpop.xlane.xlu1 %5435 }
0x10bb   : > { %v5454_v10 = vsub.f32 %v24450_v14, %v5436_v39 }
0x10bd   : > { %v5464_v11 = vmul.f32 1.442695, %v5454_v10 }
0x10bf   : > { %23289 = vpow2.f32 %v5464_v11 }
0x10c2   : > { %v5439_v40 = vpop.xlane.xlu1 %5438 }
0x10c3   : > { %v5455_v12 = vsub.f32 %v24454_v19, %v5439_v40 }
0x10c5   : > { %v5466_v13 = vmul.f32 1.442695, %v5455_v12 }
0x10c7   : > { %23291 = vpow2.f32 %v5466_v13 }
0x10c9   : > { %v23290_v21 = vpop.eup %23289 }
0x10ca   : > { %v5442_v43 = vpop.xlane.xlu1 %5441  ;;  %v5482_v51 = vsel %vm2218_vm2, %v23290_v21, 0.0 }
0x10cb   : > { %v5456_v15 = vsub.f32 %v24458_v22, %v5442_v43 }
0x10cd   : > { %v5468_v16 = vmul.f32 1.442695, %v5456_v15 }
0x10cf   : > { %23293 = vpow2.f32 %v5468_v16 }
0x10d1   : > { %v24494_v23 = vpop.eup %23291 }
0x10d2   : > { %v5445_v44 = vpop.xlane.xlu1 %5444  ;;  %v5485_v14 = vsel %vm2218_vm2, %v24494_v23, 0.0 }
0x10d3   : > { %v5457_v18 = vsub.f32 %v24462_v27, %v5445_v44 }
0x10d5   : > { %v5470_v20 = vmul.f32 1.442695, %v5457_v18 }
0x10d7   : > { %23295 = vpow2.f32 %v5470_v20 }
0x10d9   : > { %v23294_v19 = vpop.eup %23293 }
0x10da   : > { %v5488_v22 = vsel %vm2218_vm2, %v23294_v19, 0.0 }
0x10e1   : > { %v24499_v26 = vpop.eup %23295 }
0x10e2   : > { %v24473_v46 = vpop.xlane.xlu1 %5450  ;;  %v5491_v24 = vsel %vm2218_vm2, %v24499_v26, 0.0 }
0x10e3   : > { %v5459_v29 = vsub.f32 %v24466_v32, %v24473_v46 }
0x10e5   : > { %v5474_v34 = vmul.f32 1.442695, %v5459_v29 }
0x1108   : > { %v4036_v47 = vpop.trf.xlu1 }
0x1109   : > { %4564 = vxpose.xlu0.b32.start [1/2] (short) (narrow) %v4036_v47, 8 }
0x110c   : > { %v4037_v49 = vpop.trf.xlu1 }
0x110d   : > { %4565 = vxpose.xlu0.b32.end [2/2] (short) (narrow) %v4037_v49, 8 }
0x1110   : > { %v24484_v55 = vpop.trf.xlu1 }
0x1114   : > { %v24486_v56 = vpop.trf.xlu1 }
0x1118   : > { %v4040_v57 = vpop.trf.xlu1 }
0x111c   : > { %v4041_v59 = vpop.trf.xlu1 }
0x1120   : > { %v4042_v60 = vpop.trf.xlu1 }
0x1124   : > { %v4043_v61 = vpop.trf.xlu1 }
0x1128   : > { %v4044_v62 = vpop.trf.xlu1 }
0x112c   : > { %v4045_v63 = vpop.trf.xlu1 }
0x1130   : > { %v4046_v2 = vpop.trf.xlu1 }
0x1134   : > { %v4047_v3 = vpop.trf.xlu1 }
0x1138   : > { %v4048_v6 = vpop.trf.xlu1 }
0x113a   : > { %5432 = vmax.xlane.f32.xlu0 %v5431_v53 }
0x113c   : > { %v4049_v9 = vpop.trf.xlu1 }
0x113e   : > { %5447 = vmax.xlane.f32.xlu0 %v5446_v5 }
0x1140   : > { %v4050_v49 = vpop.trf.xlu1 }
0x1142   : > { %5477 = vadd.xlane.f32.xlu0 %v5476_v54 }
0x1144   : > { %v4051_v42 = vpop.trf.xlu1 }
0x116f   : > { %4628 = vxpose.xlu0.b32.start [1/2] (short) (narrow) %v4040_v57, 8 }
0x1173   : > { %4629 = vxpose.xlu0.b32.end [2/2] (short) (narrow) %v4041_v59, 8 }
0x1177   : > { %4660 = vxpose.xlu0.b32.start [1/2] (short) (narrow) %v4042_v60, 8 }
0x117b   : > { %4661 = vxpose.xlu0.b32.end [2/2] (short) (narrow) %v4043_v61, 8 }
0x117f   : > { %4692 = vxpose.xlu0.b32.start [1/2] (short) (narrow) %v4044_v62, 8 }
0x1183   : > { %4693 = vxpose.xlu0.b32.end [2/2] (short) (narrow) %v4045_v63, 8 }
0x1187   : > { %4724 = vxpose.xlu0.b32.start [1/2] (short) (narrow) %v4046_v2, 8 }
0x1189   : > { %v4580_v4 = vpop.trf.xlu0 }
0x118a   : > { %21192 = vmatpush3.msra.mxu0 %v4580_v4 }
0x118b   : > { %4725 = vxpose.xlu0.b32.end [2/2] (short) (narrow) %v4047_v3, 8  ;;  %21201 = vmatprep.subr.mxu0 %v23801_v0 }
0x118f   : > { %4756 = vxpose.xlu0.b32.start [1/2] (short) (narrow) %v4048_v6, 8 }
0x1193   : > { %4757 = vxpose.xlu0.b32.end [2/2] (short) (narrow) %v4049_v9, 8 }
0x11c0   : > { %5483 = vadd.xlane.f32.xlu0 %v5482_v51 }
0x11c4   : > { %5486 = vadd.xlane.f32.xlu0 %v5485_v14 }
0x11c7   : > { %v5433_v25 = vpop.xlane.xlu0 %5432 }
0x11c8   : > { %v5453_v27 = vsub.f32 %v4969_v50, %v5433_v25  ;;  %5489 = vadd.xlane.f32.xlu0 %v5488_v22 }
0x11ca   : > { %v5462_v30 = vmul.f32 1.442695, %v5453_v27 }
0x11cb   : > { %v5448_v31 = vpop.xlane.xlu0 %5447 }
0x11cc   : > { %23297 = vpow2.f32 %v5462_v30  ;;  %v5458_v28 = vsub.f32 %v24475_v17, %v5448_v31  ;;  %5492 = vadd.xlane.f32.xlu0 %v5491_v24 }
0x11ce   : > { %v5472_v35 = vmul.f32 1.442695, %v5458_v28 }
0x11cf   : > { %v5478_v36 = vpop.xlane.xlu0 %5477 }
0x11d0   : > { %23299 = vpow2.f32 %v5472_v35 }
0x11d1   : > { %23301 = vrcp.f32 %v5478_v36 }
0x11d2   : > { %23303 = vpow2.f32 %v5474_v34 }
0x11d6   : > { %v23298_v37 = vpop.eup %23297 }
0x11d7   : > { %v5479_v38 = vsel %vm2218_vm2, %v23298_v37, 0.0 }
0x11d8   : > { %5480 = vadd.xlane.f32.xlu1 %v5479_v38  ;;  %v6390_v38 = vld [vmem:[#allocation7 + $0x88] sm:$0xff] }
0x11da   : > { %v23300_v32 = vpop.eup %23299 }
0x11db   : > { %v23302_v39 = vpop.eup %23301  ;;  %v5494_v40 = vsel %vm2218_vm2, %v23300_v32, 0.0 }
0x11dc   : > { %v24508_v43 = vpop.eup %23303  ;;  %5495 = vadd.xlane.f32.xlu0 %v5494_v40  ;;  %v5508_v44 = vmul.f32 %v23302_v39, %v24480_v41  ;;  %v6392_v40 = vld [vmem:[#allocation7 + $0x98] sm:$0xff] }
0x11dd   : > { %v5497_v46 = vsel %vm2218_vm2, %v24508_v43, 0.0 }
0x11de   : > { %21194 = vmatmul.mubr.msk.f32.vlgmr.msra.gmra.mrb[18].mxu0 %vm2218_vm2, %v5508_v44  ;;  %v6393_v44 = vld [vmem:[#allocation7 + $0xa0] sm:$0xff] }
0x11df   : > { %21203 = vmatprep.mubr.msk.f32.mxu0 %vm23803_vm0, %v23801_v0 }
0x11e0   : > { %5498 = vadd.xlane.f32.xlu0 %v5497_v46  ;;  %v6394_v46 = vld [vmem:[#allocation7 + $0xa8] sm:$0xff] }
0x11ef   : > { %v4644_v47 = vpop.trf.xlu0 }
0x11f0   : > { %21202 = vmatpush3.msra.mxu0 %v4644_v47  ;;  %v22137_v47 = vpack.c.bf16 %v6394_v46, %v6393_v44  ;;  %v6505_v44 = vld [vmem:[#allocation10 + $0x240] sm:$0xff] }
0x11f1   : > { %21211 = vmatprep.subr.mxu0 %v23801_v0  ;;  %v6509_v46 = vld [vmem:[#allocation10 + $0x260] sm:$0xff] }
0x11f7   : > { %v4676_v48 = vpop.trf.xlu0 }
0x11ff   : > { %v4708_v50 = vpop.trf.xlu0 }
0x1207   : > { %v4740_v17 = vpop.trf.xlu0 }
0x120b   : > { %4596 = vxpose.xlu1.b32.start [1/2] (short) (narrow) %v24484_v55, 8 }
0x120d   : > { %4788 = vxpose.xlu0.b32.start [1/2] (short) (narrow) %v4050_v49, 8  ;;  %v6395_v49 = vld [vmem:[#allocation7 + $0xb0] sm:$0xff] }
0x120f   : > { %4597 = vxpose.xlu1.b32.end [2/2] (short) (narrow) %v24486_v56, 8  ;;  %v4772_v53 = vpop.trf.xlu0 }
0x1211   : > { %4789 = vxpose.xlu0.b32.end [2/2] (short) (narrow) %v4051_v42, 8  ;;  %v6396_v42 = vld [vmem:[#allocation7 + $0xb8] sm:$0xff] }
0x124d   : > { %v5484_v5 = vpop.xlane.xlu0 %5483 }
0x124e   : > { %23305 = vrcp.f32 %v5484_v5  ;;  %v6399_v5 = vld [vmem:[#allocation7 + $0xd0] sm:$0xff] }
0x1251   : > { %v5487_v41 = vpop.xlane.xlu0 %5486 }
0x1255   : > { %v5490_v54 = vpop.xlane.xlu0 %5489 }
0x1256   : > { %23307 = vrcp.f32 %v5490_v54 }
0x1258   : > { %v23306_v57 = vpop.eup %23305 }
0x1259   : > { %v5510_v59 = vmul.f32 %v23306_v57, %v23290_v21  ;;  %v5493_v60 = vpop.xlane.xlu0 %5492  ;;  %v6401_v57 = vld [vmem:[#allocation7 + $0xe0] sm:$0xff] }
0x125b   : > { %21204 = vmatmul.mubr.msk.f32.vlgmr.msra.gmra.mrb[20].mxu0 %vm2218_vm2, %v5510_v59  ;;  %v6402_v59 = vld [vmem:[#allocation7 + $0xe8] sm:$0xff] }
0x125c   : > { %21212 = vmatpush3.msra.mxu0 %v4708_v50  ;;  %21213 = vmatprep.mubr.msk.f32.mxu0 %vm23803_vm0, %v23801_v0  ;;  %v6397_v50 = vld [vmem:[#allocation7 + $0xc0] sm:$0xff] }
0x125d   : > { %21221 = vmatprep.subr.mxu0 %v23801_v0 }
0x1260   : > { %v23308_v55 = vpop.eup %23307 }
0x1261   : > { %v5512_v56 = vmul.f32 %v23308_v55, %v23294_v19  ;;  %v22149_v55 = vpack.c.bf16 %v6402_v59, %v6401_v57  ;;  %v6517_v59 = vld [vmem:[#allocation10 + $0x2a0] sm:$0xff] }
0x1263   : > { %21214 = vmatmul.mubr.msk.f32.vlgmr.msra.gmra.mrb[22].mxu0 %vm2218_vm2, %v5512_v56  ;;  %v6403_v56 = vld [vmem:[#allocation7 + $0xf0] sm:$0xff] }
0x1264   : > { %21222 = vmatpush3.msra.mxu0 %v4772_v53  ;;  %21223 = vmatprep.mubr.msk.f32.mxu0 %vm23803_vm0, %v23801_v0 }
0x1265   : > { %22130 = vmatprep.subr.bf16.mxu0 %v23802_v7  ;;  %v5481_v2 = vpop.xlane.xlu1 %5480 }
0x1269   : > { %v5496_v61 = vpop.xlane.xlu0 %5495 }
0x126a   : > { %23309 = vrcp.f32 %v5496_v61 }
0x126b   : > { %23311 = vrcp.f32 %v5481_v2 }
0x126c   : > { %23313 = vrcp.f32 %v5487_v41  ;;  %v6400_v41 = vld [vmem:[#allocation7 + $0xd8] sm:$0xff] }
0x126d   : > { %23315 = vrcp.f32 %v5493_v60  ;;  %v5499_v3 = vpop.xlane.xlu0 %5498  ;;  %v22146_v54 = vpack.c.bf16 %v6400_v41, %v6399_v5  ;;  %v6404_v60 = vld [vmem:[#allocation7 + $0xf8] sm:$0xff] }
0x126e   : > { %23317 = vrcp.f32 %v5499_v3  ;;  %v22152_v61 = vpack.c.bf16 %v6404_v60, %v6403_v56  ;;  %v6516_v5 = vld [vmem:[#allocation10 + $0x298] sm:$0xff]  ;;  %v6519_v56 = vld [vmem:[#allocation10 + $0x2b0] sm:$0xff] }
0x126f   : > { %v6520_v41 = vld [vmem:[#allocation10 + $0x2b8] sm:$0xff] }
0x1270   : > { %v22194_v57 = vpack.c.bf16 %v6520_v41, %v6516_v5  ;;  %v6549_v5 = vld [vmem:[#allocation10 + $0x3a0] sm:$0xff]  ;;  %v6547_v41 = vld [vmem:[#allocation10 + $0x390] sm:$0xff] }
0x1274   : > { %v23310_v62 = vpop.eup %23309 }
0x1275   : > { %v5514_v63 = vmul.f32 %v23310_v62, %v23300_v32  ;;  %v23312_v4 = vpop.eup %23311  ;;  %v6391_v32 = vld [vmem:[#allocation7 + $0x90] sm:$0xff] }
0x1276   : > { %v5509_v6 = vmul.f32 %v23312_v4, %v23298_v37  ;;  %v23314_v10 = vpop.eup %23313  ;;  %v6389_v37 = vld [vmem:[#allocation7 + $0x80] sm:$0xff] }
0x1277   : > { %21224 = vmatmul.mubr.msk.f32.vlgmr.msra.gmra.mrb[24].mxu0 %vm2218_vm2, %v5514_v63  ;;  %v5511_v11 = vmul.f32 %v23314_v10, %v24494_v23  ;;  %v23316_v12 = vpop.eup %23315  ;;  %v22131_v39 = vpack.c.bf16 %v6390_v38, %v6389_v37  ;;  %v6510_v38 = vld [vmem:[#allocation10 + $0x268] sm:$0xff] }
0x1278   : > { %21263 = vmatprep.mubr.msk.f32.mxu0 %vm23803_vm0, %v23801_v0  ;;  %v5513_v13 = vmul.f32 %v23316_v12, %v24499_v26  ;;  %v23318_v16 = vpop.eup %23317 }
0x1279   : > { %v5515_v18 = vmul.f32 %v23318_v16, %v24508_v43  ;;  %22132 = vmatpush3.bf16.msra.mxu0 %v22131_v39  ;;  %v22134_v43 = vpack.c.bf16 %v6392_v40, %v6391_v32  ;;  %v6508_v32 = vld [vmem:[#allocation10 + $0x258] sm:$0xff] }
0x127a   : > { %22133 = vmatprep.subr.bf16.mxu0 %v23802_v7  ;;  %v6512_v39 = vld [vmem:[#allocation10 + $0x278] sm:$0xff] }
0x127d   : > { %22135 = vmatpush3.bf16.msra.mxu0 %v22134_v43  ;;  %v22190_v43 = vpack.c.bf16 %v6512_v39, %v6508_v32  ;;  %v6541_v32 = vld [vmem:[#allocation10 + $0x360] sm:$0xff] }
0x127e   : > { %22136 = vmatprep.subr.bf16.mxu0 %v23802_v7 }
0x1281   : > { %22138 = vmatpush3.bf16.msra.mxu0 %v22137_v47  ;;  %v6507_v47 = vld [vmem:[#allocation10 + $0x250] sm:$0xff] }
0x1282   : > { %22139 = vmatprep.subr.bf16.mxu0 %v23802_v7 }
0x128b   : > { %v4612_v9 = vpop.trf.xlu1 }
0x128c   : > { %21197 = vmatpush3.msra.mxu1 %v4612_v9 }
0x128d   : > { %21199 = vmatmul.mubr.msk.f32.vlgmr.msra.gmra.mrb[48].mxu1 %vm2218_vm2, %v5509_v6  ;;  %21206 = vmatprep.subr.mxu1 %v23801_v0  ;;  %v4804_v15 = vpop.trf.xlu0 }
0x128e   : > { %21207 = vmatpush3.msra.mxu1 %v4676_v48  ;;  %21208 = vmatprep.mubr.msk.f32.mxu1 %vm23803_vm0, %v23801_v0  ;;  %v22140_v48 = vpack.c.bf16 %v6396_v42, %v6395_v49  ;;  %v22160_v49 = vpack.c.bf16 %v6509_v46, %v6505_v44  ;;  %v6511_v42 = vld [vmem:[#allocation10 + $0x270] sm:$0xff]  ;;  %v6546_v46 = vld [vmem:[#allocation10 + $0x388] sm:$0xff] }
0x128f   : > { %21216 = vmatprep.subr.mxu1 %v23801_v0  ;;  %v6543_v44 = vld [vmem:[#allocation10 + $0x370] sm:$0xff] }
0x1290   : > { %22141 = vmatpush3.bf16.msra.mxu0 %v22140_v48  ;;  %v6514_v48 = vld [vmem:[#allocation10 + $0x288] sm:$0xff] }
0x1291   : > { %21209 = vmatmul.mubr.msk.f32.vlgmr.msra.gmra.mrb[50].mxu1 %vm2218_vm2, %v5511_v11  ;;  %22142 = vmatprep.subr.bf16.mxu0 %v23802_v7 }
0x1292   : > { %21217 = vmatpush3.msra.mxu1 %v4740_v17  ;;  %21218 = vmatprep.mubr.msk.f32.mxu1 %vm23803_vm0, %v23801_v0  ;;  %v6398_v17 = vld [vmem:[#allocation7 + $0xc8] sm:$0xff] }
0x1293   : > { %21226 = vmatprep.subr.mxu1 %v23801_v0  ;;  %v22143_v53 = vpack.c.bf16 %v6398_v17, %v6397_v50  ;;  %v6518_v50 = vld [vmem:[#allocation10 + $0x2a8] sm:$0xff]  ;;  %v22192_v17 = vpack.c.bf16 %v6511_v42, %v6507_v47  ;;  %v6548_v42 = vld [vmem:[#allocation10 + $0x398] sm:$0xff] }
0x1295   : > { %21219 = vmatmul.mubr.msk.f32.vlgmr.msra.gmra.mrb[52].mxu1 %vm2218_vm2, %v5513_v13  ;;  %22144 = vmatpush3.bf16.msra.mxu0 %v22143_v53  ;;  %v22162_v53 = vpack.c.bf16 %v6518_v50, %v6514_v48  ;;  %v6552_v48 = vld [vmem:[#allocation10 + $0x3b8] sm:$0xff] }
0x1296   : > { %21227 = vmatpush3.msra.mxu1 %v4804_v15  ;;  %21228 = vmatprep.mubr.msk.f32.mxu1 %vm23803_vm0, %v23801_v0 }
0x1297   : > { %22145 = vmatprep.subr.bf16.mxu0 %v23802_v7 }
0x1299   : > { %21229 = vmatmul.mubr.msk.f32.vlgmr.msra.gmra.mrb[54].mxu1 %vm2218_vm2, %v5515_v18  ;;  %22147 = vmatpush3.bf16.msra.mxu0 %v22146_v54  ;;  %v6513_v54 = vld [vmem:[#allocation10 + $0x280] sm:$0xff] }
0x129a   : > { %6648 = vmatprep.mubr.f32.mxu1 %v23801_v0  ;;  %22148 = vmatprep.subr.bf16.mxu0 %v23802_v7  ;;  %v22164_v60 = vpack.c.bf16 %v6517_v59, %v6513_v54  ;;  %v6554_v59 = vld [vmem:[#allocation10 + $0x3c8] sm:$0xff] }
0x129d   : > { %22150 = vmatpush3.bf16.msra.mxu0 %v22149_v55  ;;  %v6515_v55 = vld [vmem:[#allocation10 + $0x290] sm:$0xff] }
0x129e   : > { %22151 = vmatprep.subr.bf16.mxu0 %v23802_v7 }
0x12a1   : > { %22153 = vmatpush3.bf16.msra.mxu0 %v22152_v61  ;;  %v6522_v61 = vld [vmem:[#allocation10 + $0x2c8] sm:$0xff] }
0x12b1   : > { %v5585_v20 = vpop.f32.mrb[18].mxu0 }
0x12b2   : > { %v21195_v21 = vpop.f32.mrb[19].mxu0  ;;  %6100 = vxpose.xlu1.b32.start.end [1/1] (short) (narrow) %v5585_v20, 16 }
0x12b3   : > { %v20040_v21 = vld [vmem:[#allocation8 + $0x1] ss:$0 sm:$0xff] }
0x132e   : > { %v5731_v51 = vpop.f32.mrb[20].mxu0 }
0x132f   : > { %6164 = vxpose.xlu1.b32.start.end [1/1] (short) (narrow) %v5731_v51, 16  ;;  %v21205_v23 = vpop.f32.mrb[21].mxu0 }
0x1332   : > { %v6116_v26 = vpop.trf.xlu1 }
0x1336   : > { %v5877_v14 = vpop.f32.mrb[22].mxu0  ;;  %v6117_v27 = vpop.trf.xlu1 }
0x1337   : > { %6228 = vxpose.xlu1.b32.start.end [1/1] (short) (narrow) %v5877_v14, 16  ;;  %v21215_v19 = vpop.f32.mrb[23].mxu0 }
0x134a   : > { %v6023_v25 = vpop.f32.mrb[24].mxu0 }
0x134b   : > { %6292 = vxpose.xlu1.b32.start.end [1/1] (short) (narrow) %v6023_v25, 16  ;;  %v21225_v22 = vpop.f32.mrb[25].mxu0  ;;  %v6498_v25 = vld [vmem:[#allocation10 + $0x208] sm:$0xff] }
0x134c   : > { %v6502_v22 = vld [vmem:[#allocation10 + $0x228] sm:$0xff] }
0x1350   : > { %6356 = vxpose.xlu1.b32.start [1/16] (narrow) %v6116_v26, 8  ;;  %v6500_v26 = vld [vmem:[#allocation10 + $0x218] sm:$0xff] }
0x1354   : > { %6357 = vxpose.xlu1.b32.cont [2/16] (narrow) %v6117_v27, 8  ;;  %v22154_v27 = vpack.c.bf16 %v6502_v22, %v6498_v25  ;;  %v6536_v22 = vld [vmem:[#allocation10 + $0x338] sm:$0xff] }
0x1356   : > { %22155 = vmatprep.subr.bf16.mxu1 %v22154_v27 }
0x1360   : > { %v5658_v29 = vpop.f32.mrb[48].mxu1 }
0x1361   : > { %6132 = vxpose.xlu0.b32.start.end [1/1] (short) (narrow) %v5658_v29, 16  ;;  %v21200_v30 = vpop.f32.mrb[49].mxu1  ;;  %v6504_v29 = vld [vmem:[#allocation10 + $0x238] sm:$0xff] }
0x1362   : > { %v6497_v30 = vld [vmem:[#allocation10 + $0x200] sm:$0xff] }
0x1364   : > { %v5804_v31 = vpop.f32.mrb[50].mxu1 }
0x1365   : > { %v21210_v24 = vpop.f32.mrb[51].mxu1 }
0x1366   : > { %6196 = vxpose.xlu0.b32.start.end [1/1] (short) (narrow) %v5804_v31, 16  ;;  %v6501_v31 = vld [vmem:[#allocation10 + $0x220] sm:$0xff]  ;;  %v22186_v24 = vpack.c.bf16 %v6504_v29, %v6500_v26 }
0x1367   : > { %v6529_v26 = vld [vmem:[#allocation10 + $0x300] sm:$0xff] }
0x1368   : > { %v5950_v28 = vpop.f32.mrb[52].mxu1  ;;  %22187 = vmatprep.subr.bf16.mxu0 %v22186_v24 }
0x1369   : > { %v21220_v34 = vpop.f32.mrb[53].mxu1 }
0x136a   : > { %v6499_v34 = vld [vmem:[#allocation10 + $0x210] sm:$0xff] }
0x136b   : > { %6260 = vxpose.xlu0.b32.start.end [1/1] (short) (narrow) %v5950_v28, 16  ;;  %v22156_v28 = vpack.c.bf16 %v6501_v31, %v6497_v30  ;;  %v6531_v30 = vld [vmem:[#allocation10 + $0x310] sm:$0xff] }
0x136c   : > { %v6096_v35 = vpop.f32.mrb[54].mxu1  ;;  %v6535_v31 = vld [vmem:[#allocation10 + $0x330] sm:$0xff] }
0x136d   : > { %v21230_v36 = vpop.f32.mrb[55].mxu1  ;;  %22157 = vmatpush1.bf16.msra.mxu1 %v22156_v28  ;;  %v22204_v24 = vpack.c.bf16 %v6535_v31, %v6531_v30  ;;  %v6538_v28 = vld [vmem:[#allocation10 + $0x348] sm:$0xff]  ;;  %v6782_v31 = vld [vmem:[#allocation13 + $0x398] sm:$0xff] }
0x136e   : > { %v6506_v36 = vld [vmem:[#allocation10 + $0x248] sm:$0xff] }
0x136f   : > { %v22158_v40 = vpack.c.bf16 %v6510_v38, %v6506_v36  ;;  %v6537_v38 = vld [vmem:[#allocation10 + $0x340] sm:$0xff]  ;;  %v6781_v30 = vld [vmem:[#allocation13 + $0x390] sm:$0xff] }
0x1370   : > { %6324 = vxpose.xlu0.b32.start.end [1/1] (short) (narrow) %v6096_v35, 16  ;;  %v6503_v35 = vld [vmem:[#allocation10 + $0x230] sm:$0xff] }
0x1371   : > { %v22188_v37 = vpack.c.bf16 %v6503_v35, %v6499_v34  ;;  %22159 = vmatprep.subr.bf16.mxu1 %v22158_v40  ;;  %v6542_v34 = vld [vmem:[#allocation10 + $0x368] sm:$0xff]  ;;  %v6540_v35 = vld [vmem:[#allocation10 + $0x358] sm:$0xff]  ;;  %v22176_v40 = vpack.c.bf16 %v6541_v32, %v6537_v38  ;;  %v22254_v32 = vpack.c.bf16 %v6782_v31, %v6781_v30 }
0x1372   : > { %22161 = vmatpush1.bf16.msra.mxu1 %v22160_v49  ;;  %v22174_v36 = vpack.c.bf16 %v6542_v34, %v6538_v28  ;;  %v6550_v49 = vld [vmem:[#allocation10 + $0x3a8] sm:$0xff] }
0x1373   : > { %22163 = vmatprep.subr.bf16.mxu1 %v22162_v53  ;;  %v22178_v50 = vpack.c.bf16 %v6550_v49, %v6546_v46  ;;  %v6545_v53 = vld [vmem:[#allocation10 + $0x380] sm:$0xff]  ;;  %v6783_v46 = vld [vmem:[#allocation13 + $0x3a0] sm:$0xff] }
0x1374   : > { %v22180_v54 = vpack.c.bf16 %v6549_v5, %v6545_v53  ;;  %v6767_v53 = vld [vmem:[#allocation13 + $0x320] sm:$0xff]  ;;  %v6768_v5 = vld [vmem:[#allocation13 + $0x328] sm:$0xff] }
0x1376   : > { %22165 = vmatpush1.bf16.msra.mxu1 %v22164_v60 }
0x13af   : > { %v6180_v2 = vpop.trf.xlu1 }
0x13b3   : > { %v6181_v3 = vpop.trf.xlu1 }
0x13b7   : > { %v6244_v9 = vpop.trf.xlu1 }
0x13bb   : > { %v6245_v10 = vpop.trf.xlu1 }
0x13cb   : > { %v6308_v13 = vpop.trf.xlu1 }
0x13cf   : > { %v6309_v15 = vpop.trf.xlu1 }
0x13e1   : > { %v6148_v62 = vpop.trf.xlu0 }
0x13e2   : > { %6358 = vxpose.xlu1.b32.cont [3/16] (narrow) %v6148_v62, 8  ;;  %v6526_v62 = vld [vmem:[#allocation10 + $0x2e8] sm:$0xff] }
0x13e5   : > { %v6149_v63 = vpop.trf.xlu0 }
0x13e6   : > { %6359 = vxpose.xlu1.b32.cont [4/16] (narrow) %v6149_v63, 8  ;;  %v6524_v63 = vld [vmem:[#allocation10 + $0x2d8] sm:$0xff] }
0x13e9   : > { %v6212_v4 = vpop.trf.xlu0 }
0x13ea   : > { %6360 = vxpose.xlu1.b32.cont [5/16] (narrow) %v6180_v2, 8  ;;  %v22196_v2 = vpack.c.bf16 %v6519_v56, %v6515_v55  ;;  %v6558_v55 = vld [vmem:[#allocation10 + $0x3e8] sm:$0xff] }
0x13eb   : > { %v22182_v60 = vpack.c.bf16 %v6558_v55, %v6554_v59  ;;  %v6786_v59 = vld [vmem:[#allocation13 + $0x3b8] sm:$0xff] }
0x13ed   : > { %v6213_v6 = vpop.trf.xlu0 }
0x13ee   : > { %6361 = vxpose.xlu1.b32.cont [6/16] (narrow) %v6181_v3, 8  ;;  %v22166_v3 = vpack.c.bf16 %v6526_v62, %v6522_v61  ;;  %v6556_v61 = vld [vmem:[#allocation10 + $0x3d8] sm:$0xff] }
0x13ef   : > { %v6560_v62 = vld [vmem:[#allocation10 + $0x3f8] sm:$0xff] }
0x13f0   : > { %22167 = vmatprep.subr.bf16.mxu1 %v22166_v3  ;;  %v6557_v3 = vld [vmem:[#allocation10 + $0x3e0] sm:$0xff] }
0x13f1   : > { %v6276_v11 = vpop.trf.xlu0 }
0x13f2   : > { %6362 = vxpose.xlu1.b32.cont [7/16] (narrow) %v6212_v4, 8  ;;  %v6528_v4 = vld [vmem:[#allocation10 + $0x2f8] sm:$0xff] }
0x13f5   : > { %v6277_v12 = vpop.trf.xlu0 }
0x13f6   : > { %6363 = vxpose.xlu1.b32.cont [8/16] (narrow) %v6213_v6, 8  ;;  %v22198_v6 = vpack.c.bf16 %v6528_v4, %v6524_v63  ;;  %v6553_v63 = vld [vmem:[#allocation10 + $0x3c0] sm:$0xff]  ;;  %v6555_v4 = vld [vmem:[#allocation10 + $0x3d0] sm:$0xff] }
0x13f9   : > { %v6340_v16 = vpop.trf.xlu0 }
0x13fa   : > { %6364 = vxpose.xlu1.b32.cont [9/16] (narrow) %v6244_v9, 8 }
0x13fd   : > { %v6341_v18 = vpop.trf.xlu0 }
0x13fe   : > { %6365 = vxpose.xlu1.b32.cont [10/16] (narrow) %v6245_v10, 8 }
0x1402   : > { %6366 = vxpose.xlu1.b32.cont [11/16] (narrow) %v6276_v11, 8 }
0x1406   : > { %6367 = vxpose.xlu1.b32.cont [12/16] (narrow) %v6277_v12, 8 }
0x140a   : > { %6368 = vxpose.xlu1.b32.cont [13/16] (narrow) %v6308_v13, 8  ;;  %v6521_v13 = vld [vmem:[#allocation10 + $0x2c0] sm:$0xff] }
0x140e   : > { %6369 = vxpose.xlu1.b32.cont [14/16] (narrow) %v6309_v15, 8  ;;  %v6525_v15 = vld [vmem:[#allocation10 + $0x2e0] sm:$0xff] }
0x1412   : > { %6370 = vxpose.xlu1.b32.cont [15/16] (narrow) %v6340_v16, 8  ;;  %v6523_v16 = vld [vmem:[#allocation10 + $0x2d0] sm:$0xff] }
0x1416   : > { %6371 = vxpose.xlu1.b32.end [16/16] (narrow) %v6341_v18, 8  ;;  %v22168_v18 = vpack.c.bf16 %v6525_v15, %v6521_v13  ;;  %v6748_v13 = vld [vmem:[#allocation13 + $0x288] sm:$0xff]  ;;  %v6779_v15 = vld [vmem:[#allocation13 + $0x380] sm:$0xff] }
0x1418   : > { %22169 = vmatpush1.bf16.msra.mxu1 %v22168_v18  ;;  %v6780_v18 = vld [vmem:[#allocation13 + $0x388] sm:$0xff] }
0x145a   : > { %v6372_v20 = vpop.trf.xlu1 }
0x145b   : > { %21264 = vmatmul.mubr.f32.vlgmr.msra.gmra.mrb[26].mxu0 %v6372_v20  ;;  %v6527_v20 = vld [vmem:[#allocation10 + $0x2f0] sm:$0xff] }
0x145c   : > { %6719 = vmatprep.mubr.f32.mxu0 %v23801_v0  ;;  %22189 = vmatpush1.bf16.msra.mxu0 %v22188_v37  ;;  %v6544_v37 = vld [vmem:[#allocation10 + $0x378] sm:$0xff] }
0x145d   : > { %22191 = vmatprep.subr.bf16.mxu0 %v22190_v43  ;;  %v22206_v39 = vpack.c.bf16 %v6544_v37, %v6540_v35  ;;  %v6539_v43 = vld [vmem:[#allocation10 + $0x350] sm:$0xff]  ;;  %v6733_v35 = vld [vmem:[#allocation13 + $0x210] sm:$0xff] }
0x145e   : > { %v22208_v47 = vpack.c.bf16 %v6543_v44, %v6539_v43  ;;  %v6751_v43 = vld [vmem:[#allocation13 + $0x2a0] sm:$0xff]  ;;  %v6752_v44 = vld [vmem:[#allocation13 + $0x2a8] sm:$0xff] }
0x1460   : > { %22193 = vmatpush1.bf16.msra.mxu0 %v22192_v17  ;;  %v22210_v17 = vpack.c.bf16 %v6552_v48, %v6548_v42  ;;  %v6735_v42 = vld [vmem:[#allocation13 + $0x220] sm:$0xff]  ;;  %v6736_v48 = vld [vmem:[#allocation13 + $0x228] sm:$0xff] }
0x1461   : > { %22195 = vmatprep.subr.bf16.mxu0 %v22194_v57  ;;  %v6551_v57 = vld [vmem:[#allocation10 + $0x3b0] sm:$0xff]  ;;  %v22228_v55 = vpack.c.bf16 %v6736_v48, %v6735_v42  ;;  %v6761_v48 = vld [vmem:[#allocation13 + $0x2f0] sm:$0xff] }
0x1462   : > { %v22212_v56 = vpack.c.bf16 %v6551_v57, %v6547_v41  ;;  %v6753_v41 = vld [vmem:[#allocation13 + $0x2b0] sm:$0xff] }
0x1463   : > { %v6785_v57 = vld [vmem:[#allocation13 + $0x3b0] sm:$0xff] }
0x1464   : > { %22197 = vmatpush1.bf16.msra.mxu0 %v22196_v2  ;;  %v22214_v2 = vpack.c.bf16 %v6560_v62, %v6556_v61  ;;  %v6738_v61 = vld [vmem:[#allocation13 + $0x238] sm:$0xff] }
0x1465   : > { %22199 = vmatprep.subr.bf16.mxu0 %v22198_v6  ;;  %v6559_v6 = vld [vmem:[#allocation10 + $0x3f0] sm:$0xff] }
0x152e   : > { %v6479_v51 = vpop.f32.mrb[26].mxu0 }
0x152f   : > { %v6480_v23 = vadd.f32 %v20040_v21, %v6479_v51  ;;  %v21265_v14 = vpop.f32.mrb[27].mxu0  ;;  %v22200_v21 = vpack.c.bf16 %v6527_v20, %v6523_v16  ;;  %v6530_v51 = vld [vmem:[#allocation10 + $0x308] sm:$0xff]  ;;  %v22250_v20 = vpack.c.bf16 %v6780_v18, %v6779_v15  ;;  %v6739_v15 = vld [vmem:[#allocation13 + $0x240] sm:$0xff] }
0x1530   : > { %v6532_v14 = vld [vmem:[#allocation10 + $0x318] sm:$0xff] }
0x1531   : > { %v6483_v19 = vadd.f32 %v6480_v23, %v24392_v1  ;;  %v6534_v23 = vld [vmem:[#allocation10 + $0x328] sm:$0xff]  ;;  %22201 = vmatpush1.bf16.msra.mxu0 %v22200_v21  ;;  %v22202_v27 = vpack.c.bf16 %v6536_v22, %v6532_v14  ;;  %v6731_v14 = vld [vmem:[#allocation13 + $0x200] sm:$0xff] }
0x1532   : > { %v22170_v25 = vpack.c.bf16 %v6534_v23, %v6530_v51  ;;  %v6763_v22 = vld [vmem:[#allocation13 + $0x300] sm:$0xff] }
0x1533   : > { %6484 = vadd.xlane.f32.xlu0 %v6483_v19  ;;  %22203 = vmatprep.subr.bf16.mxu0 %v22202_v27 }
0x1534   : > { %22171 = vmatprep.subr.bf16.mxu1 %v22170_v25  ;;  %v6732_v25 = vld [vmem:[#allocation13 + $0x208] sm:$0xff] }
0x1535   : > { %22205 = vmatpush1.bf16.msra.mxu0 %v22204_v24  ;;  %v22220_v28 = vpack.c.bf16 %v6732_v25, %v6731_v14  ;;  %v6758_v14 = vld [vmem:[#allocation13 + $0x2d8] sm:$0xff]  ;;  %v6789_v25 = vld [vmem:[#allocation13 + $0x3d0] sm:$0xff] }
0x1536   : > { %22207 = vmatprep.subr.bf16.mxu0 %v22206_v39  ;;  %v6765_v39 = vld [vmem:[#allocation13 + $0x310] sm:$0xff] }
0x1539   : > { %22209 = vmatpush1.bf16.msra.mxu0 %v22208_v47  ;;  %v6784_v47 = vld [vmem:[#allocation13 + $0x3a8] sm:$0xff] }
0x153a   : > { %22211 = vmatprep.subr.bf16.mxu0 %v22210_v17  ;;  %v22258_v17 = vpack.c.bf16 %v6784_v47, %v6783_v46  ;;  %v6744_v46 = vld [vmem:[#allocation13 + $0x268] sm:$0xff]  ;;  %v6775_v47 = vld [vmem:[#allocation13 + $0x360] sm:$0xff] }
0x153d   : > { %22213 = vmatpush1.bf16.msra.mxu0 %v22212_v56  ;;  %v22260_v56 = vpack.c.bf16 %v6768_v5, %v6767_v53  ;;  %v6794_v5 = vld [vmem:[#allocation13 + $0x3f8] sm:$0xff] }
0x153e   : > { %22215 = vmatprep.subr.bf16.mxu0 %v22214_v2  ;;  %v6769_v2 = vld [vmem:[#allocation13 + $0x330] sm:$0xff] }
0x15c0   : > { %v6485_v9 = vpop.xlane.xlu0 %6484 }
0x15c1   : > { %v6486_v10 = vmul.f32 0.0078125, %v6485_v9  ;;  %v22184_v9 = vpack.c.bf16 %v6557_v3, %v6553_v63  ;;  %v22262_v63 = vpack.c.bf16 %v6786_v59, %v6785_v57  ;;  %v6770_v3 = vld [vmem:[#allocation13 + $0x338] sm:$0xff] }
0x15c3   : > { %v24556_v11 = vsub.f32 %v6483_v19, %v6486_v10  ;;  %v6533_v19 = vld [vmem:[#allocation10 + $0x320] sm:$0xff]  ;;  %v22216_v10 = vpack.c.bf16 %v6559_v6, %v6555_v4  ;;  %v6755_v4 = vld [vmem:[#allocation13 + $0x2c0] sm:$0xff] }
0x15c4   : > { %v22172_v29 = vpack.c.bf16 %v6533_v19, %v6529_v26  ;;  %v6764_v26 = vld [vmem:[#allocation13 + $0x308] sm:$0xff]  ;;  %v6749_v19 = vld [vmem:[#allocation13 + $0x290] sm:$0xff] }
0x15c5   : > { %v6488_v12 = vmul.f32 %v24556_v11, %v24556_v11  ;;  %22217 = vmatpush1.bf16.msra.mxu0 %v22216_v10  ;;  %v22252_v34 = vpack.c.bf16 %v6764_v26, %v6763_v22  ;;  %v6756_v6 = vld [vmem:[#allocation13 + $0x2c8] sm:$0xff]  ;;  %v6790_v22 = vld [vmem:[#allocation13 + $0x3d8] sm:$0xff] }
0x15c6   : > { %22173 = vmatpush1.bf16.msra.mxu1 %v22172_v29  ;;  %22251 = vmatprep.subr.bf16.mxu0 %v22250_v20  ;;  %v6750_v29 = vld [vmem:[#allocation13 + $0x298] sm:$0xff]  ;;  %v6788_v10 = vld [vmem:[#allocation13 + $0x3c8] sm:$0xff]  ;;  %v22234_v18 = vpack.c.bf16 %v6756_v6, %v6755_v4  ;;  %v22270_v31 = vpack.c.bf16 %v6790_v22, %v6789_v25  ;;  %v20041_v25 = vld [vmem:[#allocation14 + $0x1] ss:$0 sm:$0xff] }
0x15c7   : > { %6489 = vadd.xlane.f32.xlu0 %v6488_v12  ;;  %22175 = vmatprep.subr.bf16.mxu1 %v22174_v36  ;;  %v6747_v12 = vld [vmem:[#allocation13 + $0x280] sm:$0xff]  ;;  %v6734_v36 = vld [vmem:[#allocation13 + $0x218] sm:$0xff]  ;;  %v22222_v38 = vpack.c.bf16 %v6750_v29, %v6749_v19 }
0x15c8   : > { %v22218_v16 = vpack.c.bf16 %v6748_v13, %v6747_v12  ;;  %v22264_v13 = vpack.c.bf16 %v6770_v3, %v6769_v2  ;;  %v6742_v29 = vld [vmem:[#allocation13 + $0x258] sm:$0xff] }
0x15ca   : > { %22177 = vmatpush1.bf16.msra.mxu1 %v22176_v40  ;;  %v6766_v40 = vld [vmem:[#allocation13 + $0x318] sm:$0xff] }
0x15cb   : > { %22179 = vmatprep.subr.bf16.mxu1 %v22178_v50  ;;  %v22256_v49 = vpack.c.bf16 %v6766_v40, %v6765_v39  ;;  %v22226_v50 = vpack.c.bf16 %v6752_v44, %v6751_v43  ;;  %v6743_v44 = vld [vmem:[#allocation13 + $0x260] sm:$0xff] }
0x15ce   : > { %22181 = vmatpush1.bf16.msra.mxu1 %v22180_v54  ;;  %v6754_v54 = vld [vmem:[#allocation13 + $0x2b8] sm:$0xff] }
0x15cf   : > { %22183 = vmatprep.subr.bf16.mxu1 %v22182_v60  ;;  %v6737_v60 = vld [vmem:[#allocation13 + $0x230] sm:$0xff]  ;;  %v22230_v62 = vpack.c.bf16 %v6754_v54, %v6753_v41  ;;  %v6746_v54 = vld [vmem:[#allocation13 + $0x278] sm:$0xff] }
0x15d0   : > { %v22232_v12 = vpack.c.bf16 %v6738_v61, %v6737_v60  ;;  %v6745_v41 = vld [vmem:[#allocation13 + $0x270] sm:$0xff]  ;;  %v6562_v61 = vld [vmem:[#allocation11 + $0x4] sm:$0xf] }
0x15d1   : > { %v22248_v59 = vpack.c.bf16 %v6746_v54, %v6745_v41  ;;  %v6571_v2 = vrot.slane %v6562_v61, %v24153_v58  ;;  %v6579_v3 = vrot.slane %v6562_v61, %v24366_v8  ;;  %v6973_v41 = vld [vmem:[#allocation2 + $0x378] sm:$0xff]  ;;  %v6972_v54 = vld [vmem:[#allocation2 + $0x370] sm:$0xff] }
0x15d2   : > { %22185 = vmatpush1.bf16.msra.mxu1 %v22184_v9  ;;  %v6787_v9 = vld [vmem:[#allocation13 + $0x3c0] sm:$0xff] }
0x15d3   : > { %22219 = vmatprep.subr.bf16.mxu1 %v22218_v16  ;;  %v6740_v16 = vld [vmem:[#allocation13 + $0x248] sm:$0xff]  ;;  %v22266_v20 = vpack.c.bf16 %v6788_v10, %v6787_v9 }
0x15d4   : > { %v22236_v26 = vpack.c.bf16 %v6740_v16, %v6739_v15 }
0x1654   : > { %v6490_v21 = vpop.xlane.xlu0 %6489 }
0x1655   : > { %v6491_v51 = vmul.f32 0.007874016, %v6490_v21  ;;  %v6771_v21 = vld [vmem:[#allocation13 + $0x340] sm:$0xff] }
0x1657   : > { %v6492_v23 = vadd.f32 1e-08, %v6491_v51  ;;  %v6772_v51 = vld [vmem:[#allocation13 + $0x348] sm:$0xff] }
0x1658   : > { %v22268_v19 = vpack.c.bf16 %v6772_v51, %v6771_v21 }
0x1659   : > { %23319 = vrsqrt.f32 %v6492_v23  ;;  %v6757_v23 = vld [vmem:[#allocation13 + $0x2d0] sm:$0xff] }
0x165a   : > { %v22238_v30 = vpack.c.bf16 %v6758_v14, %v6757_v23 }
0x1663   : > { %v23320_v27 = vpop.eup %23319 }
0x1664   : > { %v6494_v24 = vmul.f32 %v23320_v27, %v24556_v11  ;;  %v22224_v11 = vpack.c.bf16 %v6734_v36, %v6733_v35  ;;  %v6741_v27 = vld [vmem:[#allocation13 + $0x250] sm:$0xff]  ;;  %v6760_v35 = vld [vmem:[#allocation13 + $0x2e8] sm:$0xff]  ;;  %v6791_v36 = vld [vmem:[#allocation13 + $0x3e0] sm:$0xff] }
0x1666   : > { %v24562_v37 = vmul.f32 %v6494_v24, %v24356_v33  ;;  %v6773_v24 = vld [vmem:[#allocation13 + $0x350] sm:$0xff] }
0x1668   : > { %6649 = vmatmul.mubr.f32.vlgmr.msra.gmra.mrb[56].mxu1 %v24562_v37  ;;  %6720 = vmatmul.mubr.f32.vlgmr.msra.gmra.mrb[28].mxu0 %v24562_v37 }
0x1669   : > { %22221 = vmatpush3.bf16.msra.mxu1 %v22220_v28  ;;  %22253 = vmatpush3.bf16.msra.mxu0 %v22252_v34  ;;  %v6774_v28 = vld [vmem:[#allocation13 + $0x358] sm:$0xff]  ;;  %v6759_v34 = vld [vmem:[#allocation13 + $0x2e0] sm:$0xff] }
0x166a   : > { %22223 = vmatprep.subr.bf16.mxu1 %v22222_v38  ;;  %22255 = vmatprep.subr.bf16.mxu0 %v22254_v32  ;;  %v6792_v38 = vld [vmem:[#allocation13 + $0x3e8] sm:$0xff]  ;;  %v22240_v32 = vpack.c.bf16 %v6742_v29, %v6741_v27  ;;  %v22272_v39 = vpack.c.bf16 %v6774_v28, %v6773_v24  ;;  %v22242_v40 = vpack.c.bf16 %v6760_v35, %v6759_v34  ;;  %v6959_v24 = vld [vmem:[#allocation2 + $0x308] sm:$0xff]  ;;  %v6962_v28 = vld [vmem:[#allocation2 + $0x320] sm:$0xff] }
0x166b   : > { %v22274_v43 = vpack.c.bf16 %v6792_v38, %v6791_v36  ;;  %v6958_v34 = vld [vmem:[#allocation2 + $0x300] sm:$0xff]  ;;  %v22282_v35 = vpack.c.bf16 %v6962_v28, %v6959_v24  ;;  %v6961_v36 = vld [vmem:[#allocation2 + $0x318] sm:$0xff]  ;;  %v6960_v38 = vld [vmem:[#allocation2 + $0x310] sm:$0xff] }
0x166c   : > { %v6993_v24 = vld [vmem:[#allocation2 + $0x418] sm:$0xff]  ;;  %v6995_v28 = vld [vmem:[#allocation2 + $0x428] sm:$0xff] }
0x166d   : > { %22225 = vmatpush3.bf16.msra.mxu1 %v22224_v11  ;;  %22257 = vmatpush3.bf16.msra.mxu0 %v22256_v49  ;;  %v22244_v11 = vpack.c.bf16 %v6744_v46, %v6743_v44  ;;  %v6776_v49 = vld [vmem:[#allocation13 + $0x368] sm:$0xff]  ;;  %v6968_v44 = vld [vmem:[#allocation2 + $0x350] sm:$0xff] }
0x166e   : > { %22227 = vmatprep.subr.bf16.mxu1 %v22226_v50  ;;  %22259 = vmatprep.subr.bf16.mxu0 %v22258_v17  ;;  %v22276_v42 = vpack.c.bf16 %v6776_v49, %v6775_v47  ;;  %v6762_v50 = vld [vmem:[#allocation13 + $0x2f8] sm:$0xff]  ;;  %v6793_v17 = vld [vmem:[#allocation13 + $0x3f0] sm:$0xff]  ;;  %v6964_v46 = vld [vmem:[#allocation2 + $0x330] sm:$0xff] }
0x166f   : > { %v22246_v53 = vpack.c.bf16 %v6762_v50, %v6761_v48  ;;  %v22278_v57 = vpack.c.bf16 %v6794_v5, %v6793_v17  ;;  %v6966_v49 = vld [vmem:[#allocation2 + $0x340] sm:$0xff]  ;;  %v6971_v50 = vld [vmem:[#allocation2 + $0x368] sm:$0xff] }
0x1670   : > { %v6974_v17 = vld [vmem:[#allocation2 + $0x380] sm:$0xff] }
0x1671   : > { %22229 = vmatpush3.bf16.msra.mxu1 %v22228_v55  ;;  %22261 = vmatpush3.bf16.msra.mxu0 %v22260_v56  ;;  %v6777_v55 = vld [vmem:[#allocation13 + $0x370] sm:$0xff]  ;;  %v6778_v56 = vld [vmem:[#allocation13 + $0x378] sm:$0xff]  ;;  %v22290_v5 = vpack.c.bf16 %v6974_v17, %v6971_v50 }
0x1672   : > { %22231 = vmatprep.subr.bf16.mxu1 %v22230_v62  ;;  %22263 = vmatprep.subr.bf16.mxu0 %v22262_v63  ;;  %v22280_v60 = vpack.c.bf16 %v6778_v56, %v6777_v55  ;;  %v6567_v62 = vrot.slane %v6562_v61, %v24146_v52  ;;  %v6575_v63 = vrot.slane %v6562_v61, %v24260_v45 }
0x1675   : > { %22233 = vmatpush3.bf16.msra.mxu1 %v22232_v12  ;;  %22265 = vmatpush3.bf16.msra.mxu0 %v22264_v13 }
0x1676   : > { %22235 = vmatprep.subr.bf16.mxu1 %v22234_v18  ;;  %22267 = vmatprep.subr.bf16.mxu0 %v22266_v20 }
0x1679   : > { %22237 = vmatpush3.bf16.msra.mxu1 %v22236_v26  ;;  %22269 = vmatpush3.bf16.msra.mxu0 %v22268_v19 }
0x167a   : > { %22239 = vmatprep.subr.bf16.mxu1 %v22238_v30  ;;  %22271 = vmatprep.subr.bf16.mxu0 %v22270_v31 }
0x167d   : > { %22241 = vmatpush3.bf16.msra.mxu1 %v22240_v32  ;;  %22273 = vmatpush3.bf16.msra.mxu0 %v22272_v39  ;;  %v6963_v32 = vld [vmem:[#allocation2 + $0x328] sm:$0xff]  ;;  %v22284_v39 = vpack.c.bf16 %v6961_v36, %v6958_v34  ;;  %v6998_v34 = vld [vmem:[#allocation2 + $0x440] sm:$0xff] }
0x167e   : > { %22243 = vmatprep.subr.bf16.mxu1 %v22242_v40  ;;  %22275 = vmatprep.subr.bf16.mxu0 %v22274_v43  ;;  %v22315_v40 = vpack.c.bf16 %v6963_v32, %v6960_v38  ;;  %v6965_v43 = vld [vmem:[#allocation2 + $0x338] sm:$0xff]  ;;  %v22306_v36 = vpack.c.bf16 %v6998_v34, %v6995_v28  ;;  %v6994_v38 = vld [vmem:[#allocation2 + $0x420] sm:$0xff] }
0x167f   : > { %v22286_v47 = vpack.c.bf16 %v6968_v44, %v6965_v43  ;;  %v6997_v32 = vld [vmem:[#allocation2 + $0x438] sm:$0xff]  ;;  %v7004_v44 = vld [vmem:[#allocation2 + $0x470] sm:$0xff] }
0x1680   : > { %v7001_v43 = vld [vmem:[#allocation2 + $0x458] sm:$0xff] }
0x1681   : > { %22245 = vmatpush3.bf16.msra.mxu1 %v22244_v11  ;;  %22277 = vmatpush3.bf16.msra.mxu0 %v22276_v42  ;;  %v6967_v11 = vld [vmem:[#allocation2 + $0x348] sm:$0xff]  ;;  %v6969_v42 = vld [vmem:[#allocation2 + $0x358] sm:$0xff] }
0x1682   : > { %22247 = vmatprep.subr.bf16.mxu1 %v22246_v53  ;;  %22279 = vmatprep.subr.bf16.mxu0 %v22278_v57  ;;  %v22318_v48 = vpack.c.bf16 %v6969_v42, %v6966_v49  ;;  %v6970_v53 = vld [vmem:[#allocation2 + $0x360] sm:$0xff]  ;;  %v6975_v57 = vld [vmem:[#allocation2 + $0x388] sm:$0xff]  ;;  %v7000_v49 = vld [vmem:[#allocation2 + $0x450] sm:$0xff] }
0x1683   : > { %v22321_v55 = vpack.c.bf16 %v6975_v57, %v6972_v54  ;;  %v7003_v42 = vld [vmem:[#allocation2 + $0x468] sm:$0xff] }
0x1684   : > { %v22312_v50 = vpack.c.bf16 %v7003_v42, %v7000_v49 }
0x1685   : > { %22249 = vmatpush3.bf16.msra.mxu1 %v22248_v59  ;;  %22281 = vmatpush3.bf16.msra.mxu0 %v22280_v60  ;;  %v22292_v59 = vpack.c.bf16 %v6973_v41, %v6970_v53 }
0x1686   : > { %22314 = vmatprep.subr.bf16.mxu0 %v23802_v7  ;;  %22283 = vmatprep.subr.bf16.mxu1 %v22282_v35 }
0x173b   : > { %v6650_v4 = vpop.f32.mrb[56].mxu1  ;;  %v6721_v6 = vpop.f32.mrb[28].mxu0 }
0x173c   : > { %v6651_v9 = vadd.f32 %v6650_v4, %v6567_v62  ;;  %v6722_v10 = vadd.f32 %v6721_v6, %v6575_v63  ;;  %v6652_v12 = vpop.f32.mrb[57].mxu1  ;;  %v6723_v13 = vpop.f32.mrb[29].mxu0  ;;  %v6977_v63 = vld [vmem:[#allocation2 + $0x398] sm:$0xff]  ;;  %v6976_v4 = vld [vmem:[#allocation2 + $0x390] sm:$0xff]  ;;  %v6979_v6 = vld [vmem:[#allocation2 + $0x3a8] sm:$0xff] }
0x173d   : > { %v6653_v15 = vadd.f32 %v6652_v12, %v6571_v2  ;;  %v6724_v16 = vadd.f32 %v6723_v13, %v6579_v3  ;;  %v6980_v2 = vld [vmem:[#allocation2 + $0x3b0] sm:$0xff]  ;;  %v6981_v12 = vld [vmem:[#allocation2 + $0x3b8] sm:$0xff] }
0x173e   : > { %v6726_v21 = vmax.f32 %v6651_v9, 0.0  ;;  %v6728_v51 = vmax.f32 %v6722_v10, 0.0  ;;  %v22294_v3 = vpack.c.bf16 %v6980_v2, %v6977_v63  ;;  %v6978_v9 = vld [vmem:[#allocation2 + $0x3a0] sm:$0xff]  ;;  %v22296_v10 = vpack.c.bf16 %v6979_v6, %v6976_v4 }
0x173f   : > { %v6727_v18 = vmax.f32 %v6653_v15, 0.0  ;;  %v6729_v20 = vmax.f32 %v6724_v16, 0.0  ;;  %v22324_v13 = vpack.c.bf16 %v6981_v12, %v6978_v9  ;;  %v6983_v15 = vld [vmem:[#allocation2 + $0x3c8] sm:$0xff]  ;;  %v6986_v16 = vld [vmem:[#allocation2 + $0x3e0] sm:$0xff] }
0x1741   : > { %6867 = vmatprep.mubr.f32.mxu1 %v6727_v18  ;;  %6937 = vmatprep.mubr.f32.mxu0 %v6729_v20  ;;  %v22298_v18 = vpack.c.bf16 %v6986_v16, %v6983_v15  ;;  %v6982_v20 = vld [vmem:[#allocation2 + $0x3c0] sm:$0xff] }
0x1742   : > { %6868 = vmatmul.mubr.f32.vlgmr.msra.gmra.mrb[58].mxu1 %v6726_v21  ;;  %6938 = vmatmul.mubr.f32.vlgmr.msra.gmra.mrb[30].mxu0 %v6728_v51  ;;  %v6985_v21 = vld [vmem:[#allocation2 + $0x3d8] sm:$0xff]  ;;  %v6984_v51 = vld [vmem:[#allocation2 + $0x3d0] sm:$0xff] }
0x1743   : > { %7088 = vmatprep.mubr.f32.mxu1 %v23801_v0  ;;  %21298 = vmatprep.mubr.msk.f32.mxu0 %vm23803_vm0, %v23801_v0 }
0x1744   : > { %22285 = vmatpush1.bf16.msra.mxu1 %v22284_v39  ;;  %22316 = vmatpush3.bf16.msra.mxu0 %v22315_v40  ;;  %v6996_v39 = vld [vmem:[#allocation2 + $0x430] sm:$0xff]  ;;  %v6999_v40 = vld [vmem:[#allocation2 + $0x448] sm:$0xff] }
0x1745   : > { %22287 = vmatprep.subr.bf16.mxu1 %v22286_v47  ;;  %22317 = vmatprep.subr.bf16.mxu0 %v23802_v7  ;;  %v22333_v47 = vpack.c.bf16 %v6999_v40, %v6996_v39 }
0x1748   : > { %22319 = vmatpush3.bf16.msra.mxu0 %v22318_v48  ;;  %v7005_v48 = vld [vmem:[#allocation2 + $0x478] sm:$0xff] }
0x1749   : > { %22320 = vmatprep.subr.bf16.mxu0 %v23802_v7 }
0x174c   : > { %22322 = vmatpush3.bf16.msra.mxu0 %v22321_v55 }
0x174d   : > { %22323 = vmatprep.subr.bf16.mxu0 %v23802_v7 }
0x1750   : > { %22325 = vmatpush3.bf16.msra.mxu0 %v22324_v13 }
0x1751   : > { %22326 = vmatprep.subr.bf16.mxu0 %v23802_v7 }
0x1815   : > { %v20384_v23 = vpop.f32.mrb[58].mxu1  ;;  %v20419_v14 = vpop.f32.mrb[30].mxu0 }
0x1816   : > { %v20385_v22 = vpop.f32.mrb[59].mxu1  ;;  %v20420_v26 = vpop.f32.mrb[31].mxu0 }
0x1817   : > { %v20386_v19 = vadd.f32 %v20385_v22, %v20384_v23  ;;  %v20421_v27 = vadd.f32 %v20420_v26, %v20419_v14  ;;  %v22300_v23 = vpack.c.bf16 %v6985_v21, %v6982_v20  ;;  %v6987_v14 = vld [vmem:[#allocation2 + $0x3e8] sm:$0xff]  ;;  %v6992_v22 = vld [vmem:[#allocation2 + $0x410] sm:$0xff] }
0x1818   : > { %v22327_v26 = vpack.c.bf16 %v6987_v14, %v6984_v51 }
0x1819   : > { %v6870_v29 = vadd.f32 %v20386_v19, %v20041_v25  ;;  %v6989_v25 = vld [vmem:[#allocation2 + $0x3f8] sm:$0xff] }
0x181a   : > { %v22302_v19 = vpack.c.bf16 %v6992_v22, %v6989_v25  ;;  %22328 = vmatpush3.bf16.msra.mxu0 %v22327_v26 }
0x181b   : > { %v6940_v30 = vadd.f32 %v20421_v27, %v6870_v29  ;;  %v6988_v27 = vld [vmem:[#allocation2 + $0x3f0] sm:$0xff]  ;;  %v6991_v29 = vld [vmem:[#allocation2 + $0x408] sm:$0xff]  ;;  %22329 = vmatprep.subr.bf16.mxu0 %v23802_v7 }
0x181d   : > { %v6943_v31 = vadd.f32 %v6940_v30, %v24562_v37  ;;  %v22288_v37 = vpack.c.bf16 %v6967_v11, %v6964_v46  ;;  %v6990_v30 = vld [vmem:[#allocation2 + $0x400] sm:$0xff]  ;;  %v22308_v46 = vpack.c.bf16 %v6997_v32, %v6994_v38  ;;  %v22310_v11 = vpack.c.bf16 %v7004_v44, %v7001_v43 }
0x181e   : > { %v22330_v35 = vpack.c.bf16 %v6993_v24, %v6990_v30 }
0x181f   : > { %6944 = vadd.xlane.f32.xlu0 %v6943_v31  ;;  %22289 = vmatpush1.bf16.msra.mxu1 %v22288_v37  ;;  %v7002_v37 = vld [vmem:[#allocation2 + $0x460] sm:$0xff] }
0x1820   : > { %22291 = vmatprep.subr.bf16.mxu1 %v22290_v5  ;;  %22331 = vmatpush3.bf16.msra.mxu0 %v22330_v35  ;;  %v22336_v17 = vpack.c.bf16 %v7005_v48, %v7002_v37 }
0x1821   : > { %22332 = vmatprep.subr.bf16.mxu0 %v23802_v7 }
0x1823   : > { %22293 = vmatpush1.bf16.msra.mxu1 %v22292_v59 }
0x1824   : > { %22295 = vmatprep.subr.bf16.mxu1 %v22294_v3  ;;  %22334 = vmatpush3.bf16.msra.mxu0 %v22333_v47 }
0x1825   : > { %22335 = vmatprep.subr.bf16.mxu0 %v23802_v7 }
0x1827   : > { %22297 = vmatpush1.bf16.msra.mxu1 %v22296_v10 }
0x1828   : > { %22299 = vmatprep.subr.bf16.mxu1 %v22298_v18  ;;  %22337 = vmatpush3.bf16.msra.mxu0 %v22336_v17 }
0x1829   : > { %21341 = vmatprep.subr.mxu0 %v23801_v0 }
0x182b   : > { %22301 = vmatpush1.bf16.msra.mxu1 %v22300_v23 }
0x182c   : > { %22303 = vmatprep.subr.bf16.mxu1 %v22302_v19 }
0x18ac   : > { %v6945_v56 = vpop.xlane.xlu0 %6944 }
0x18ad   : > { %v6946_v60 = vmul.f32 0.0078125, %v6945_v56  ;;  %v24599_v56 = vld [vmem:[#allocation5 + $0x6] sm:$0x7] }
0x18af   : > { %v24578_v61 = vsub.f32 %v6943_v31, %v6946_v60  ;;  %v22304_v31 = vpack.c.bf16 %v6991_v29, %v6988_v27  ;;  %v7012_v60 = vrot.slane %v24599_v56, %v24146_v52 }
0x18b1   : > { %v6948_v62 = vmul.f32 %v24578_v61, %v24578_v61  ;;  %22305 = vmatpush1.bf16.msra.mxu1 %v22304_v31 }
0x18b2   : > { %22307 = vmatprep.subr.bf16.mxu1 %v22306_v36 }
0x18b3   : > { %6949 = vadd.xlane.f32.xlu0 %v6948_v62 }
0x18b5   : > { %22309 = vmatpush1.bf16.msra.mxu1 %v22308_v46 }
0x18b6   : > { %22311 = vmatprep.subr.bf16.mxu1 %v22310_v11 }
0x18b9   : > { %22313 = vmatpush1.bf16.msra.mxu1 %v22312_v50 }
0x18ba   : > { %21301 = vmatprep.subr.mxu1 %v23801_v0 }
0x1940   : > { %v6950_v53 = vpop.xlane.xlu0 %6949 }
0x1941   : > { %v6951_v5 = vmul.f32 0.007874016, %v6950_v53 }
0x1943   : > { %v6952_v41 = vadd.f32 1e-08, %v6951_v5 }
0x1945   : > { %23321 = vrsqrt.f32 %v6952_v41 }
0x194f   : > { %v23322_v54 = vpop.eup %23321 }
0x1950   : > { %v6954_v57 = vmul.f32 %v23322_v54, %v24578_v61  ;;  %v7016_v61 = vrot.slane %v24599_v56, %v24153_v58 }
0x1952   : > { %v6955_v59 = vmul.f32 %v6954_v57, %v24356_v33 }
0x1954   : > { %v24591_v55 = vadd.f32 %v6955_v59, %v24392_v1 }
0x1956   : > { %7089 = vmatmul.mubr.f32.vlgmr.msra.gmra.mrb[60].mxu1 %v24591_v55  ;;  %21299 = vmatmul.mubr.f32.vlgmr.msra.gmra.mrb[32].mxu0 %v24591_v55 }
0x1957   : > { %21303 = vmatprep.mubr.msk.f32.mxu1 %vm23803_vm0, %v23801_v0  ;;  %21343 = vmatprep.mubr.msk.f32.mxu0 %vm23803_vm0, %v23801_v0 }
0x1a29   : > { %v7090_v1 = vpop.f32.mrb[60].mxu1  ;;  %v24605_v62 = vpop.f32.mrb[32].mxu0 }
0x1a2a   : > { %v7091_v63 = vadd.f32 %v7090_v1, %v7012_v60  ;;  %v7092_v2 = vpop.f32.mrb[61].mxu1  ;;  %v21300_v3 = vpop.f32.mrb[33].mxu0  ;;  %v23469_v1 = vld [vmem:[%s24235_s22] ss:$0 sm:$0xff] }
0x1a2b   : > { %v7093_v4 = vadd.f32 %v7092_v2, %v7016_v61 }
0x1a2c   : > { %7165 = vxpose.xlu1.b32.start.end [1/1] (short) %v7091_v63, 128 }
0x1a2d   : > { %7197 = vxpose.xlu0.b32.start.end [1/1] (short) %v7093_v4, 128 }
0x1aac   : > { %v7181_v6 = vpop.trf.xlu1 }
0x1aad   : > { %v7213_v9 = vpop.trf.xlu0  ;;  %7261 = vxpose.xlu0.b32.start [1/2] (short) (narrow) %v7181_v6, 8 }
0x1aae   : > { %7517 = vxpose.xlu1.b32.start [1/2] (short) (narrow) %v7213_v9, 8 }
0x1ab0   : > { %v7182_v10 = vpop.trf.xlu1 }
0x1ab1   : > { %v7214_v12 = vpop.trf.xlu0  ;;  %7262 = vxpose.xlu0.b32.end [2/2] (short) (narrow) %v7182_v10, 8 }
0x1ab2   : > { %7518 = vxpose.xlu1.b32.end [2/2] (short) (narrow) %v7214_v12, 8 }
0x1ab4   : > { %v7183_v13 = vpop.trf.xlu1 }
0x1ab5   : > { %v7215_v15 = vpop.trf.xlu0 }
0x1ab6   : > { %7293 = vxpose.xlu1.b32.start [1/2] (short) (narrow) %v7183_v13, 8 }
0x1ab8   : > { %v7184_v16 = vpop.trf.xlu1 }
0x1ab9   : > { %v7216_v18 = vpop.trf.xlu0 }
0x1aba   : > { %7294 = vxpose.xlu1.b32.end [2/2] (short) (narrow) %v7184_v16, 8 }
0x1abc   : > { %v7185_v20 = vpop.trf.xlu1 }
0x1abd   : > { %v7217_v21 = vpop.trf.xlu0 }
0x1abe   : > { %7549 = vxpose.xlu1.b32.start [1/2] (short) (narrow) %v7215_v15, 8 }
0x1ac0   : > { %v7186_v51 = vpop.trf.xlu1 }
0x1ac1   : > { %v7218_v23 = vpop.trf.xlu0 }
0x1ac2   : > { %7550 = vxpose.xlu1.b32.end [2/2] (short) (narrow) %v7216_v18, 8 }
0x1ac4   : > { %v7187_v14 = vpop.trf.xlu1 }
0x1ac5   : > { %v7219_v25 = vpop.trf.xlu0  ;;  %7357 = vxpose.xlu0.b32.start [1/2] (short) (narrow) %v7187_v14, 8 }
0x1ac6   : > { %7325 = vxpose.xlu1.b32.start [1/2] (short) (narrow) %v7185_v20, 8 }
0x1ac8   : > { %v7188_v22 = vpop.trf.xlu1 }
0x1ac9   : > { %v7220_v26 = vpop.trf.xlu0  ;;  %7358 = vxpose.xlu0.b32.end [2/2] (short) (narrow) %v7188_v22, 8 }
0x1aca   : > { %7326 = vxpose.xlu1.b32.end [2/2] (short) (narrow) %v7186_v51, 8 }
0x1acc   : > { %v7189_v19 = vpop.trf.xlu1 }
0x1acd   : > { %v7221_v27 = vpop.trf.xlu0  ;;  %7389 = vxpose.xlu0.b32.start [1/2] (short) (narrow) %v7189_v19, 8 }
0x1ace   : > { %7581 = vxpose.xlu1.b32.start [1/2] (short) (narrow) %v7217_v21, 8 }
0x1ad0   : > { %v7190_v29 = vpop.trf.xlu1 }
0x1ad1   : > { %7390 = vxpose.xlu0.b32.end [2/2] (short) (narrow) %v7190_v29, 8  ;;  %v7222_v30 = vpop.trf.xlu0 }
0x1ad2   : > { %7582 = vxpose.xlu1.b32.end [2/2] (short) (narrow) %v7218_v23, 8 }
0x1ad4   : > { %v7191_v31 = vpop.trf.xlu1 }
0x1ad5   : > { %7421 = vxpose.xlu0.b32.start [1/2] (short) (narrow) %v7191_v31, 8  ;;  %v7223_v28 = vpop.trf.xlu0 }
0x1ad6   : > { %7613 = vxpose.xlu1.b32.start [1/2] (short) (narrow) %v7219_v25, 8 }
0x1ad8   : > { %v7192_v24 = vpop.trf.xlu1 }
0x1ad9   : > { %7422 = vxpose.xlu0.b32.end [2/2] (short) (narrow) %v7192_v24, 8  ;;  %v7224_v35 = vpop.trf.xlu0 }
0x1ada   : > { %7614 = vxpose.xlu1.b32.end [2/2] (short) (narrow) %v7220_v26, 8 }
0x1adc   : > { %v7193_v34 = vpop.trf.xlu1 }
0x1add   : > { %7453 = vxpose.xlu0.b32.start [1/2] (short) (narrow) %v7193_v34, 8  ;;  %v7225_v32 = vpop.trf.xlu0  ;;  %v7020_v34 = vrot.slane %v24599_v56, %v24260_v45 }
0x1ade   : > { %7645 = vxpose.xlu1.b32.start [1/2] (short) (narrow) %v7221_v27, 8 }
0x1ae0   : > { %v7194_v36 = vpop.trf.xlu1 }
0x1ae1   : > { %7454 = vxpose.xlu0.b32.end [2/2] (short) (narrow) %v7194_v36, 8  ;;  %v7226_v40 = vpop.trf.xlu0 }
0x1ae2   : > { %7646 = vxpose.xlu1.b32.end [2/2] (short) (narrow) %v7222_v30, 8 }
0x1ae4   : > { %v7195_v38 = vpop.trf.xlu1 }
0x1ae5   : > { %7485 = vxpose.xlu0.b32.start [1/2] (short) (narrow) %v7195_v38, 8  ;;  %v7227_v43 = vpop.trf.xlu0 }
0x1ae6   : > { %7677 = vxpose.xlu1.b32.start [1/2] (short) (narrow) %v7223_v28, 8 }
0x1ae8   : > { %v7196_v39 = vpop.trf.xlu1 }
0x1ae9   : > { %7486 = vxpose.xlu0.b32.end [2/2] (short) (narrow) %v7196_v39, 8  ;;  %v7228_v44 = vpop.trf.xlu0 }
0x1aea   : > { %7678 = vxpose.xlu1.b32.end [2/2] (short) (narrow) %v7224_v35, 8  ;;  %v7162_v35 = vadd.f32 %v24605_v62, %v7020_v34 }
0x1aee   : > { %7709 = vxpose.xlu1.b32.start [1/2] (short) (narrow) %v7225_v32, 8 }
0x1af2   : > { %7710 = vxpose.xlu1.b32.end [2/2] (short) (narrow) %v7226_v40, 8 }
0x1af6   : > { %7741 = vxpose.xlu1.b32.start [1/2] (short) (narrow) %v7227_v43, 8 }
0x1afa   : > { %7742 = vxpose.xlu1.b32.end [2/2] (short) (narrow) %v7228_v44, 8 }
0x1b2d   : > { %v7277_v47 = vpop.trf.xlu0 }
0x1b2e   : > { %v7533_v46 = vpop.trf.xlu1 }
0x1b2f   : > { %21302 = vmatpush3.xpose.msk.msra.mxu1 %vm1609_vm1, %v7533_v46 }
0x1b30   : > { %21306 = vmatprep.subr.mxu1 %v23801_v0 }
0x1b32   : > { %21304 = vmatmul.mubr.msk.f32.vlgmr.msra.gmra.mrb[62].mxu1 %vm1609_vm1, %v7277_v47 }
0x1b33   : > { %21308 = vmatprep.mubr.msk.f32.mxu1 %vm23803_vm0, %v23801_v0 }
0x1b36   : > { %v7309_v11 = vpop.trf.xlu1 }
0x1b3e   : > { %v7565_v49 = vpop.trf.xlu1 }
0x1b3f   : > { %21307 = vmatpush3.xpose.msk.msra.mxu1 %vm1609_vm1, %v7565_v49 }
0x1b40   : > { %21311 = vmatprep.subr.mxu1 %v23801_v0 }
0x1b42   : > { %21309 = vmatmul.mubr.msk.f32.vlgmr.msra.gmra.mrb[64].mxu1 %vm1609_vm1, %v7309_v11 }
0x1b43   : > { %21313 = vmatprep.mubr.msk.f32.mxu1 %vm23803_vm0, %v23801_v0 }
0x1b45   : > { %v7373_v50 = vpop.trf.xlu0 }
0x1b46   : > { %v7341_v42 = vpop.trf.xlu1 }
0x1b4d   : > { %v7405_v53 = vpop.trf.xlu0 }
0x1b4e   : > { %v7597_v37 = vpop.trf.xlu1 }
0x1b4f   : > { %21312 = vmatpush3.xpose.msk.msra.mxu1 %vm1609_vm1, %v7597_v37 }
0x1b50   : > { %21316 = vmatprep.subr.mxu1 %v23801_v0 }
0x1b52   : > { %21314 = vmatmul.mubr.msk.f32.vlgmr.msra.gmra.mrb[66].mxu1 %vm1609_vm1, %v7341_v42 }
0x1b53   : > { %21318 = vmatprep.mubr.msk.f32.mxu1 %vm23803_vm0, %v23801_v0 }
0x1b55   : > { %v7437_v41 = vpop.trf.xlu0 }
0x1b56   : > { %v7629_v48 = vpop.trf.xlu1 }
0x1b57   : > { %21317 = vmatpush3.xpose.msk.msra.mxu1 %vm1609_vm1, %v7629_v48 }
0x1b58   : > { %21321 = vmatprep.subr.mxu1 %v23801_v0 }
0x1b5a   : > { %21319 = vmatmul.mubr.msk.f32.vlgmr.msra.gmra.mrb[68].mxu1 %vm1609_vm1, %v7373_v50 }
0x1b5b   : > { %21323 = vmatprep.mubr.msk.f32.mxu1 %vm23803_vm0, %v23801_v0 }
0x1b5d   : > { %v7469_v57 = vpop.trf.xlu0 }
0x1b5e   : > { %v7661_v17 = vpop.trf.xlu1 }
0x1b5f   : > { %21322 = vmatpush3.xpose.msk.msra.mxu1 %vm1609_vm1, %v7661_v17 }
0x1b60   : > { %21326 = vmatprep.subr.mxu1 %v23801_v0 }
0x1b62   : > { %21324 = vmatmul.mubr.msk.f32.vlgmr.msra.gmra.mrb[70].mxu1 %vm1609_vm1, %v7405_v53 }
0x1b63   : > { %21328 = vmatprep.mubr.msk.f32.mxu1 %vm23803_vm0, %v23801_v0 }
0x1b65   : > { %v7501_v60 = vpop.trf.xlu0 }
0x1b66   : > { %v7693_v5 = vpop.trf.xlu1 }
0x1b67   : > { %21327 = vmatpush3.xpose.msk.msra.mxu1 %vm1609_vm1, %v7693_v5 }
0x1b68   : > { %21331 = vmatprep.subr.mxu1 %v23801_v0 }
0x1b6a   : > { %21329 = vmatmul.mubr.msk.f32.vlgmr.msra.gmra.mrb[72].mxu1 %vm1609_vm1, %v7437_v41 }
0x1b6b   : > { %21333 = vmatprep.mubr.msk.f32.mxu1 %vm23803_vm0, %v23801_v0 }
0x1b6e   : > { %v7725_v54 = vpop.trf.xlu1 }
0x1b6f   : > { %21332 = vmatpush3.xpose.msk.msra.mxu1 %vm1609_vm1, %v7725_v54 }
0x1b70   : > { %21336 = vmatprep.subr.mxu1 %v23801_v0 }
0x1b72   : > { %21334 = vmatmul.mubr.msk.f32.vlgmr.msra.gmra.mrb[74].mxu1 %vm1609_vm1, %v7469_v57 }
0x1b73   : > { %21338 = vmatprep.mubr.msk.f32.mxu1 %vm23803_vm0, %v23801_v0 }
0x1b76   : > { %v7757_v59 = vpop.trf.xlu1 }
0x1b77   : > { %21337 = vmatpush3.xpose.msk.msra.mxu1 %vm1609_vm1, %v7757_v59 }
0x1b78   : > { %21346 = vmatprep.subr.mxu1 %v23801_v0 }
0x1b7a   : > { %21339 = vmatmul.mubr.msk.f32.vlgmr.msra.gmra.mrb[76].mxu1 %vm1609_vm1, %v7501_v60 }
0x1b7b   : > { %21348 = vmatprep.mubr.msk.f32.mxu1 %vm23803_vm0, %v23801_v0 }
0x1c05   : > { %v8101_v61 = vpop.f32.mrb[62].mxu1 }
0x1c06   : > { %v8102_v63 = vadd.f32 %v23469_v1, %v8101_v61  ;;  %v21305_v2 = vpop.f32.mrb[63].mxu1 }
0x1c08   : > { %v8637_v3 = vsel %vm2218_vm2, %v8102_v63, -inf }
0x1c09   : > { %8638 = vmax.xlane.f32.xlu1 %v8637_v3 }
0x1c15   : > { %v8177_v4 = vpop.f32.mrb[64].mxu1 }
0x1c16   : > { %v21310_v6 = vpop.f32.mrb[65].mxu1  ;;  %v8178_v49 = vadd.f32 %v23469_v1, %v8177_v4 }
0x1c18   : > { %v8640_v56 = vsel %vm2218_vm2, %v8178_v49, -inf }
0x1c25   : > { %v8253_v9 = vpop.f32.mrb[66].mxu1 }
0x1c26   : > { %v24649_v10 = vadd.f32 %v23469_v1, %v8253_v9  ;;  %v21315_v12 = vpop.f32.mrb[67].mxu1 }
0x1c28   : > { %v8643_v13 = vsel %vm2218_vm2, %v24649_v10, -inf }
0x1c29   : > { %8644 = vmax.xlane.f32.xlu1 %v8643_v13 }
0x1c2d   : > { %v8329_v15 = vpop.f32.mrb[68].mxu1 }
0x1c2e   : > { %v24653_v16 = vadd.f32 %v23469_v1, %v8329_v15  ;;  %v21320_v18 = vpop.f32.mrb[69].mxu1 }
0x1c30   : > { %v8646_v20 = vsel %vm2218_vm2, %v24653_v16, -inf }
0x1c31   : > { %8647 = vmax.xlane.f32.xlu1 %v8646_v20 }
0x1c35   : > { %v8405_v21 = vpop.f32.mrb[70].mxu1 }
0x1c36   : > { %v24657_v51 = vadd.f32 %v23469_v1, %v8405_v21  ;;  %v21325_v23 = vpop.f32.mrb[71].mxu1 }
0x1c38   : > { %v8649_v14 = vsel %vm2218_vm2, %v24657_v51, -inf }
0x1c39   : > { %8650 = vmax.xlane.f32.xlu1 %v8649_v14 }
0x1c3d   : > { %v8481_v25 = vpop.f32.mrb[72].mxu1 }
0x1c3e   : > { %v24661_v22 = vadd.f32 %v23469_v1, %v8481_v25  ;;  %v21330_v26 = vpop.f32.mrb[73].mxu1 }
0x1c40   : > { %v8652_v19 = vsel %vm2218_vm2, %v24661_v22, -inf }
0x1c41   : > { %8653 = vmax.xlane.f32.xlu1 %v8652_v19 }
0x1c45   : > { %v8557_v27 = vpop.f32.mrb[74].mxu1 }
0x1c46   : > { %v21335_v29 = vpop.f32.mrb[75].mxu1  ;;  %v24674_v42 = vadd.f32 %v23469_v1, %v8557_v27 }
0x1c48   : > { %v8655_v62 = vsel %vm2218_vm2, %v24674_v42, -inf }
0x1c4d   : > { %v8633_v30 = vpop.f32.mrb[76].mxu1 }
0x1c4e   : > { %v24665_v31 = vadd.f32 %v23469_v1, %v8633_v30  ;;  %v21340_v24 = vpop.f32.mrb[77].mxu1 }
0x1c50   : > { %v8658_v28 = vsel %vm2218_vm2, %v24665_v31, -inf }
0x1c51   : > { %8659 = vmax.xlane.f32.xlu1 %v8658_v28 }
0x1c84   : > { %7229 = vxpose.xlu1.b32.start.end [1/1] (short) %v7162_v35, 128 }
0x1c96   : > { %v8639_v36 = vpop.xlane.xlu1 %8638 }
0x1c97   : > { %v8661_v47 = vsub.f32 %v8102_v63, %v8639_v36 }
0x1c99   : > { %v8669_v11 = vmul.f32 1.442695, %v8661_v47 }
0x1c9b   : > { %23323 = vpow2.f32 %v8669_v11 }
0x1ca5   : > { %v24679_v37 = vpop.eup %23323 }
0x1ca6   : > { %v8685_v48 = vsel %vm2218_vm2, %v24679_v37, 0.0 }
0x1cb6   : > { %v8645_v38 = vpop.xlane.xlu1 %8644 }
0x1cb7   : > { %v8663_v3 = vsub.f32 %v24649_v10, %v8645_v38 }
0x1cb9   : > { %v8673_v4 = vmul.f32 1.442695, %v8663_v3 }
0x1cbb   : > { %23325 = vpow2.f32 %v8673_v4 }
0x1cbe   : > { %v8648_v32 = vpop.xlane.xlu1 %8647 }
0x1cbf   : > { %v8664_v6 = vsub.f32 %v24653_v16, %v8648_v32 }
0x1cc1   : > { %v8675_v9 = vmul.f32 1.442695, %v8664_v6 }
0x1cc3   : > { %23327 = vpow2.f32 %v8675_v9 }
0x1cc5   : > { %v23326_v20 = vpop.eup %23325 }
0x1cc6   : > { %v8651_v39 = vpop.xlane.xlu1 %8650  ;;  %v8691_v21 = vsel %vm2218_vm2, %v23326_v20, 0.0 }
0x1cc7   : > { %v8665_v12 = vsub.f32 %v24657_v51, %v8651_v39 }
0x1cc9   : > { %v8677_v13 = vmul.f32 1.442695, %v8665_v12 }
0x1ccb   : > { %23329 = vpow2.f32 %v8677_v13 }
0x1ccd   : > { %v24693_v23 = vpop.eup %23327 }
0x1cce   : > { %v8654_v40 = vpop.xlane.xlu1 %8653  ;;  %v8694_v10 = vsel %vm2218_vm2, %v24693_v23, 0.0 }
0x1ccf   : > { %v8666_v15 = vsub.f32 %v24661_v22, %v8654_v40 }
0x1cd1   : > { %v8679_v18 = vmul.f32 1.442695, %v8666_v15 }
0x1cd3   : > { %23331 = vpow2.f32 %v8679_v18 }
0x1cd5   : > { %v23330_v16 = vpop.eup %23329 }
0x1cd6   : > { %v8697_v51 = vsel %vm2218_vm2, %v23330_v16, 0.0 }
0x1cdd   : > { %v24698_v25 = vpop.eup %23331 }
0x1cde   : > { %v24672_v43 = vpop.xlane.xlu1 %8659  ;;  %v8700_v29 = vsel %vm2218_vm2, %v24698_v25, 0.0 }
0x1cdf   : > { %v8668_v26 = vsub.f32 %v24665_v31, %v24672_v43 }
0x1ce1   : > { %v8683_v24 = vmul.f32 1.442695, %v8668_v26 }
0x1d04   : > { %v7245_v44 = vpop.trf.xlu1 }
0x1d05   : > { %7773 = vxpose.xlu0.b32.start [1/2] (short) (narrow) %v7245_v44, 8 }
0x1d08   : > { %v7246_v46 = vpop.trf.xlu1 }
0x1d09   : > { %7774 = vxpose.xlu0.b32.end [2/2] (short) (narrow) %v7246_v46, 8 }
0x1d0c   : > { %v24683_v50 = vpop.trf.xlu1 }
0x1d10   : > { %v24685_v17 = vpop.trf.xlu1 }
0x1d14   : > { %v7249_v53 = vpop.trf.xlu1 }
0x1d18   : > { %v7250_v5 = vpop.trf.xlu1 }
0x1d1c   : > { %v7251_v41 = vpop.trf.xlu1 }
0x1d20   : > { %v7252_v54 = vpop.trf.xlu1 }
0x1d24   : > { %v7253_v57 = vpop.trf.xlu1 }
0x1d28   : > { %v7254_v59 = vpop.trf.xlu1 }
0x1d2c   : > { %v7255_v60 = vpop.trf.xlu1 }
0x1d30   : > { %v7256_v61 = vpop.trf.xlu1 }
0x1d34   : > { %v7257_v63 = vpop.trf.xlu1 }
0x1d36   : > { %8641 = vmax.xlane.f32.xlu0 %v8640_v56 }
0x1d38   : > { %v7258_v2 = vpop.trf.xlu1 }
0x1d3a   : > { %8656 = vmax.xlane.f32.xlu0 %v8655_v62 }
0x1d3c   : > { %v7259_v46 = vpop.trf.xlu1 }
0x1d3e   : > { %8686 = vadd.xlane.f32.xlu0 %v8685_v48 }
0x1d40   : > { %v7260_v47 = vpop.trf.xlu1 }
0x1d6b   : > { %7837 = vxpose.xlu0.b32.start [1/2] (short) (narrow) %v7249_v53, 8 }
0x1d6f   : > { %7838 = vxpose.xlu0.b32.end [2/2] (short) (narrow) %v7250_v5, 8 }
0x1d73   : > { %7869 = vxpose.xlu0.b32.start [1/2] (short) (narrow) %v7251_v41, 8 }
0x1d77   : > { %7870 = vxpose.xlu0.b32.end [2/2] (short) (narrow) %v7252_v54, 8 }
0x1d7b   : > { %7901 = vxpose.xlu0.b32.start [1/2] (short) (narrow) %v7253_v57, 8 }
0x1d7f   : > { %7902 = vxpose.xlu0.b32.end [2/2] (short) (narrow) %v7254_v59, 8 }
0x1d83   : > { %7933 = vxpose.xlu0.b32.start [1/2] (short) (narrow) %v7255_v60, 8 }
0x1d85   : > { %v7789_v1 = vpop.trf.xlu0 }
0x1d86   : > { %21342 = vmatpush3.msra.mxu0 %v7789_v1 }
0x1d87   : > { %7934 = vxpose.xlu0.b32.end [2/2] (short) (narrow) %v7256_v61, 8  ;;  %21351 = vmatprep.subr.mxu0 %v23801_v0 }
0x1d8b   : > { %7965 = vxpose.xlu0.b32.start [1/2] (short) (narrow) %v7257_v63, 8 }
0x1d8f   : > { %7966 = vxpose.xlu0.b32.end [2/2] (short) (narrow) %v7258_v2, 8 }
0x1dbc   : > { %8692 = vadd.xlane.f32.xlu0 %v8691_v21 }
0x1dc0   : > { %8695 = vadd.xlane.f32.xlu0 %v8694_v10 }
0x1dc3   : > { %v8642_v14 = vpop.xlane.xlu0 %8641 }
0x1dc4   : > { %v8662_v22 = vsub.f32 %v8178_v49, %v8642_v14  ;;  %8698 = vadd.xlane.f32.xlu0 %v8697_v51 }
0x1dc6   : > { %v8671_v19 = vmul.f32 1.442695, %v8662_v22 }
0x1dc7   : > { %v8657_v27 = vpop.xlane.xlu0 %8656 }
0x1dc8   : > { %23333 = vpow2.f32 %v8671_v19  ;;  %v8667_v30 = vsub.f32 %v24674_v42, %v8657_v27  ;;  %8701 = vadd.xlane.f32.xlu0 %v8700_v29 }
0x1dca   : > { %v8681_v28 = vmul.f32 1.442695, %v8667_v30 }
0x1dcb   : > { %v8687_v34 = vpop.xlane.xlu0 %8686 }
0x1dcc   : > { %23335 = vpow2.f32 %v8681_v28 }
0x1dcd   : > { %23337 = vrcp.f32 %v8687_v34 }
0x1dce   : > { %23339 = vpow2.f32 %v8683_v24 }
0x1dd2   : > { %v23334_v35 = vpop.eup %23333 }
0x1dd3   : > { %v8688_v36 = vsel %vm2218_vm2, %v23334_v35, 0.0 }
0x1dd4   : > { %8689 = vadd.xlane.f32.xlu1 %v8688_v36  ;;  %v9599_v36 = vld [vmem:[#allocation7 + $0x108] sm:$0xff] }
0x1dd6   : > { %v23336_v31 = vpop.eup %23335 }
0x1dd7   : > { %v23338_v38 = vpop.eup %23337  ;;  %v8703_v32 = vsel %vm2218_vm2, %v23336_v31, 0.0 }
0x1dd8   : > { %v24707_v39 = vpop.eup %23339  ;;  %8704 = vadd.xlane.f32.xlu0 %v8703_v32  ;;  %v8717_v40 = vmul.f32 %v23338_v38, %v24679_v37  ;;  %v9601_v32 = vld [vmem:[#allocation7 + $0x118] sm:$0xff] }
0x1dd9   : > { %v8706_v43 = vsel %vm2218_vm2, %v24707_v39, 0.0 }
0x1dda   : > { %21344 = vmatmul.mubr.msk.f32.vlgmr.msra.gmra.mrb[34].mxu0 %vm2218_vm2, %v8717_v40  ;;  %v9602_v40 = vld [vmem:[#allocation7 + $0x120] sm:$0xff] }
0x1ddb   : > { %21353 = vmatprep.mubr.msk.f32.mxu0 %vm23803_vm0, %v23801_v0 }
0x1ddc   : > { %8707 = vadd.xlane.f32.xlu0 %v8706_v43  ;;  %v9603_v43 = vld [vmem:[#allocation7 + $0x128] sm:$0xff] }
0x1deb   : > { %v7853_v44 = vpop.trf.xlu0 }
0x1dec   : > { %21352 = vmatpush3.msra.mxu0 %v7853_v44  ;;  %v22345_v44 = vpack.c.bf16 %v9603_v43, %v9602_v40  ;;  %v9714_v40 = vld [vmem:[#allocation10 + $0x440] sm:$0xff] }
0x1ded   : > { %21361 = vmatprep.subr.mxu0 %v23801_v0  ;;  %v9718_v43 = vld [vmem:[#allocation10 + $0x460] sm:$0xff] }
0x1df3   : > { %v7885_v11 = vpop.trf.xlu0 }
0x1dfb   : > { %v7917_v49 = vpop.trf.xlu0 }
0x1e03   : > { %v7949_v42 = vpop.trf.xlu0 }
0x1e07   : > { %7805 = vxpose.xlu1.b32.start [1/2] (short) (narrow) %v24683_v50, 8 }
0x1e09   : > { %7997 = vxpose.xlu0.b32.start [1/2] (short) (narrow) %v7259_v46, 8  ;;  %v9604_v46 = vld [vmem:[#allocation7 + $0x130] sm:$0xff] }
0x1e0b   : > { %7806 = vxpose.xlu1.b32.end [2/2] (short) (narrow) %v24685_v17, 8  ;;  %v7981_v56 = vpop.trf.xlu0 }
0x1e0d   : > { %7998 = vxpose.xlu0.b32.end [2/2] (short) (narrow) %v7260_v47, 8  ;;  %v9605_v47 = vld [vmem:[#allocation7 + $0x138] sm:$0xff] }
0x1e49   : > { %v8693_v62 = vpop.xlane.xlu0 %8692 }
0x1e4a   : > { %23341 = vrcp.f32 %v8693_v62  ;;  %v9608_v62 = vld [vmem:[#allocation7 + $0x150] sm:$0xff] }
0x1e4d   : > { %v8696_v37 = vpop.xlane.xlu0 %8695 }
0x1e51   : > { %v8699_v48 = vpop.xlane.xlu0 %8698 }
0x1e52   : > { %23343 = vrcp.f32 %v8699_v48 }
0x1e54   : > { %v23342_v53 = vpop.eup %23341 }
0x1e55   : > { %v8719_v5 = vmul.f32 %v23342_v53, %v23326_v20  ;;  %v8702_v41 = vpop.xlane.xlu0 %8701  ;;  %v9610_v53 = vld [vmem:[#allocation7 + $0x160] sm:$0xff] }
0x1e57   : > { %21354 = vmatmul.mubr.msk.f32.vlgmr.msra.gmra.mrb[36].mxu0 %vm2218_vm2, %v8719_v5  ;;  %v9611_v5 = vld [vmem:[#allocation7 + $0x168] sm:$0xff] }
0x1e58   : > { %21362 = vmatpush3.msra.mxu0 %v7917_v49  ;;  %21363 = vmatprep.mubr.msk.f32.mxu0 %vm23803_vm0, %v23801_v0  ;;  %v9606_v49 = vld [vmem:[#allocation7 + $0x140] sm:$0xff] }
0x1e59   : > { %21371 = vmatprep.subr.mxu0 %v23801_v0 }
0x1e5c   : > { %v23344_v50 = vpop.eup %23343 }
0x1e5d   : > { %v8721_v17 = vmul.f32 %v23344_v50, %v23330_v16  ;;  %v22357_v50 = vpack.c.bf16 %v9611_v5, %v9610_v53  ;;  %v9726_v5 = vld [vmem:[#allocation10 + $0x4a0] sm:$0xff] }
0x1e5f   : > { %21364 = vmatmul.mubr.msk.f32.vlgmr.msra.gmra.mrb[38].mxu0 %vm2218_vm2, %v8721_v17  ;;  %v9612_v17 = vld [vmem:[#allocation7 + $0x170] sm:$0xff] }
0x1e60   : > { %21372 = vmatpush3.msra.mxu0 %v7981_v56  ;;  %21373 = vmatprep.mubr.msk.f32.mxu0 %vm23803_vm0, %v23801_v0 }
0x1e61   : > { %22338 = vmatprep.subr.bf16.mxu0 %v23802_v7  ;;  %v8690_v60 = vpop.xlane.xlu1 %8689 }
0x1e65   : > { %v8705_v54 = vpop.xlane.xlu0 %8704 }
0x1e66   : > { %23345 = vrcp.f32 %v8705_v54 }
0x1e67   : > { %23347 = vrcp.f32 %v8690_v60 }
0x1e68   : > { %23349 = vrcp.f32 %v8696_v37  ;;  %v9609_v37 = vld [vmem:[#allocation7 + $0x158] sm:$0xff] }
0x1e69   : > { %23351 = vrcp.f32 %v8702_v41  ;;  %v8708_v61 = vpop.xlane.xlu0 %8707  ;;  %v22354_v48 = vpack.c.bf16 %v9609_v37, %v9608_v62  ;;  %v9613_v41 = vld [vmem:[#allocation7 + $0x178] sm:$0xff] }
0x1e6a   : > { %23353 = vrcp.f32 %v8708_v61  ;;  %v22360_v54 = vpack.c.bf16 %v9613_v41, %v9612_v17  ;;  %v9725_v62 = vld [vmem:[#allocation10 + $0x498] sm:$0xff]  ;;  %v9728_v17 = vld [vmem:[#allocation10 + $0x4b0] sm:$0xff] }
0x1e6b   : > { %v9729_v37 = vld [vmem:[#allocation10 + $0x4b8] sm:$0xff] }
0x1e6c   : > { %v22402_v53 = vpack.c.bf16 %v9729_v37, %v9725_v62  ;;  %v9758_v62 = vld [vmem:[#allocation10 + $0x5a0] sm:$0xff]  ;;  %v9756_v37 = vld [vmem:[#allocation10 + $0x590] sm:$0xff] }
0x1e70   : > { %v23346_v57 = vpop.eup %23345 }
0x1e71   : > { %v8723_v59 = vmul.f32 %v23346_v57, %v23336_v31  ;;  %v23348_v1 = vpop.eup %23347  ;;  %v9600_v31 = vld [vmem:[#allocation7 + $0x110] sm:$0xff] }
0x1e72   : > { %v8718_v63 = vmul.f32 %v23348_v1, %v23334_v35  ;;  %v23350_v3 = vpop.eup %23349  ;;  %v9598_v35 = vld [vmem:[#allocation7 + $0x100] sm:$0xff] }
0x1e73   : > { %21374 = vmatmul.mubr.msk.f32.vlgmr.msra.gmra.mrb[40].mxu0 %vm2218_vm2, %v8723_v59  ;;  %v8720_v4 = vmul.f32 %v23350_v3, %v24693_v23  ;;  %v23352_v6 = vpop.eup %23351  ;;  %v22339_v38 = vpack.c.bf16 %v9599_v36, %v9598_v35  ;;  %v9719_v36 = vld [vmem:[#allocation10 + $0x468] sm:$0xff] }
0x1e74   : > { %21413 = vmatprep.mubr.msk.f32.mxu0 %vm23803_vm0, %v23801_v0  ;;  %v8722_v9 = vmul.f32 %v23352_v6, %v24698_v25  ;;  %v23354_v13 = vpop.eup %23353 }
0x1e75   : > { %v8724_v15 = vmul.f32 %v23354_v13, %v24707_v39  ;;  %22340 = vmatpush3.bf16.msra.mxu0 %v22339_v38  ;;  %v22342_v39 = vpack.c.bf16 %v9601_v32, %v9600_v31  ;;  %v9717_v31 = vld [vmem:[#allocation10 + $0x458] sm:$0xff] }
0x1e76   : > { %22341 = vmatprep.subr.bf16.mxu0 %v23802_v7  ;;  %v9721_v38 = vld [vmem:[#allocation10 + $0x478] sm:$0xff] }
0x1e79   : > { %22343 = vmatpush3.bf16.msra.mxu0 %v22342_v39  ;;  %v22398_v39 = vpack.c.bf16 %v9721_v38, %v9717_v31  ;;  %v9750_v31 = vld [vmem:[#allocation10 + $0x560] sm:$0xff] }
0x1e7a   : > { %22344 = vmatprep.subr.bf16.mxu0 %v23802_v7 }
0x1e7d   : > { %22346 = vmatpush3.bf16.msra.mxu0 %v22345_v44  ;;  %v9716_v44 = vld [vmem:[#allocation10 + $0x450] sm:$0xff] }
0x1e7e   : > { %22347 = vmatprep.subr.bf16.mxu0 %v23802_v7 }
0x1e87   : > { %v7821_v2 = vpop.trf.xlu1 }
0x1e88   : > { %21347 = vmatpush3.msra.mxu1 %v7821_v2 }
0x1e89   : > { %21349 = vmatmul.mubr.msk.f32.vlgmr.msra.gmra.mrb[78].mxu1 %vm2218_vm2, %v8718_v63  ;;  %21356 = vmatprep.subr.mxu1 %v23801_v0  ;;  %v8013_v12 = vpop.trf.xlu0 }
0x1e8a   : > { %21357 = vmatpush3.msra.mxu1 %v7885_v11  ;;  %21358 = vmatprep.mubr.msk.f32.mxu1 %vm23803_vm0, %v23801_v0  ;;  %v22348_v11 = vpack.c.bf16 %v9605_v47, %v9604_v46  ;;  %v22368_v46 = vpack.c.bf16 %v9718_v43, %v9714_v40  ;;  %v9720_v47 = vld [vmem:[#allocation10 + $0x470] sm:$0xff]  ;;  %v9755_v43 = vld [vmem:[#allocation10 + $0x588] sm:$0xff] }
0x1e8b   : > { %21366 = vmatprep.subr.mxu1 %v23801_v0  ;;  %v9752_v40 = vld [vmem:[#allocation10 + $0x570] sm:$0xff] }
0x1e8c   : > { %22349 = vmatpush3.bf16.msra.mxu0 %v22348_v11  ;;  %v9723_v11 = vld [vmem:[#allocation10 + $0x488] sm:$0xff] }
0x1e8d   : > { %21359 = vmatmul.mubr.msk.f32.vlgmr.msra.gmra.mrb[80].mxu1 %vm2218_vm2, %v8720_v4  ;;  %22350 = vmatprep.subr.bf16.mxu0 %v23802_v7 }
0x1e8e   : > { %21367 = vmatpush3.msra.mxu1 %v7949_v42  ;;  %21368 = vmatprep.mubr.msk.f32.mxu1 %vm23803_vm0, %v23801_v0  ;;  %v9607_v42 = vld [vmem:[#allocation7 + $0x148] sm:$0xff] }
0x1e8f   : > { %21376 = vmatprep.subr.mxu1 %v23801_v0  ;;  %v22351_v56 = vpack.c.bf16 %v9607_v42, %v9606_v49  ;;  %v9727_v49 = vld [vmem:[#allocation10 + $0x4a8] sm:$0xff]  ;;  %v22400_v42 = vpack.c.bf16 %v9720_v47, %v9716_v44  ;;  %v9757_v47 = vld [vmem:[#allocation10 + $0x598] sm:$0xff] }
0x1e91   : > { %21369 = vmatmul.mubr.msk.f32.vlgmr.msra.gmra.mrb[82].mxu1 %vm2218_vm2, %v8722_v9  ;;  %22352 = vmatpush3.bf16.msra.mxu0 %v22351_v56  ;;  %v22370_v56 = vpack.c.bf16 %v9727_v49, %v9723_v11  ;;  %v9761_v11 = vld [vmem:[#allocation10 + $0x5b8] sm:$0xff] }
0x1e92   : > { %21377 = vmatpush3.msra.mxu1 %v8013_v12  ;;  %21378 = vmatprep.mubr.msk.f32.mxu1 %vm23803_vm0, %v23801_v0 }
0x1e93   : > { %22353 = vmatprep.subr.bf16.mxu0 %v23802_v7 }
0x1e95   : > { %21379 = vmatmul.mubr.msk.f32.vlgmr.msra.gmra.mrb[84].mxu1 %vm2218_vm2, %v8724_v15  ;;  %22355 = vmatpush3.bf16.msra.mxu0 %v22354_v48  ;;  %v9722_v48 = vld [vmem:[#allocation10 + $0x480] sm:$0xff] }
0x1e96   : > { %9857 = vmatprep.mubr.f32.mxu1 %v23801_v0  ;;  %22356 = vmatprep.subr.bf16.mxu0 %v23802_v7  ;;  %v22372_v41 = vpack.c.bf16 %v9726_v5, %v9722_v48  ;;  %v9763_v5 = vld [vmem:[#allocation10 + $0x5c8] sm:$0xff] }
0x1e99   : > { %22358 = vmatpush3.bf16.msra.mxu0 %v22357_v50  ;;  %v9724_v50 = vld [vmem:[#allocation10 + $0x490] sm:$0xff] }
0x1e9a   : > { %22359 = vmatprep.subr.bf16.mxu0 %v23802_v7 }
0x1e9d   : > { %22361 = vmatpush3.bf16.msra.mxu0 %v22360_v54  ;;  %v9731_v54 = vld [vmem:[#allocation10 + $0x4c8] sm:$0xff] }
0x1ead   : > { %v8794_v18 = vpop.f32.mrb[34].mxu0 }
0x1eae   : > { %v21345_v20 = vpop.f32.mrb[35].mxu0  ;;  %9309 = vxpose.xlu1.b32.start.end [1/1] (short) (narrow) %v8794_v18, 16 }
0x1eaf   : > { %v20066_v20 = vld [vmem:[#allocation8 + $0x2] ss:$0 sm:$0xff] }
0x1f2a   : > { %v8940_v21 = vpop.f32.mrb[36].mxu0 }
0x1f2b   : > { %9373 = vxpose.xlu1.b32.start.end [1/1] (short) (narrow) %v8940_v21, 16  ;;  %v21355_v23 = vpop.f32.mrb[37].mxu0 }
0x1f2e   : > { %v9325_v25 = vpop.trf.xlu1 }
0x1f32   : > { %v9086_v10 = vpop.f32.mrb[38].mxu0  ;;  %v9326_v22 = vpop.trf.xlu1 }
0x1f33   : > { %9437 = vxpose.xlu1.b32.start.end [1/1] (short) (narrow) %v9086_v10, 16  ;;  %v21365_v16 = vpop.f32.mrb[39].mxu0 }
0x1f46   : > { %v9232_v14 = vpop.f32.mrb[40].mxu0 }
0x1f47   : > { %9501 = vxpose.xlu1.b32.start.end [1/1] (short) (narrow) %v9232_v14, 16  ;;  %v21375_v51 = vpop.f32.mrb[41].mxu0  ;;  %v9707_v14 = vld [vmem:[#allocation10 + $0x408] sm:$0xff] }
0x1f48   : > { %v9711_v51 = vld [vmem:[#allocation10 + $0x428] sm:$0xff] }
0x1f4c   : > { %9565 = vxpose.xlu1.b32.start [1/16] (narrow) %v9325_v25, 8  ;;  %v9709_v25 = vld [vmem:[#allocation10 + $0x418] sm:$0xff] }
0x1f50   : > { %9566 = vxpose.xlu1.b32.cont [2/16] (narrow) %v9326_v22, 8  ;;  %v22362_v22 = vpack.c.bf16 %v9711_v51, %v9707_v14  ;;  %v9745_v51 = vld [vmem:[#allocation10 + $0x538] sm:$0xff] }
0x1f52   : > { %22363 = vmatprep.subr.bf16.mxu1 %v22362_v22 }
0x1f5c   : > { %v8867_v26 = vpop.f32.mrb[78].mxu1 }
0x1f5d   : > { %9341 = vxpose.xlu0.b32.start.end [1/1] (short) (narrow) %v8867_v26, 16  ;;  %v21350_v19 = vpop.f32.mrb[79].mxu1  ;;  %v9713_v26 = vld [vmem:[#allocation10 + $0x438] sm:$0xff] }
0x1f5e   : > { %v9706_v19 = vld [vmem:[#allocation10 + $0x400] sm:$0xff] }
0x1f60   : > { %v9013_v27 = vpop.f32.mrb[80].mxu1 }
0x1f61   : > { %v21360_v29 = vpop.f32.mrb[81].mxu1 }
0x1f62   : > { %9405 = vxpose.xlu0.b32.start.end [1/1] (short) (narrow) %v9013_v27, 16  ;;  %v9710_v27 = vld [vmem:[#allocation10 + $0x420] sm:$0xff]  ;;  %v22394_v29 = vpack.c.bf16 %v9713_v26, %v9709_v25 }
0x1f63   : > { %v9738_v25 = vld [vmem:[#allocation10 + $0x500] sm:$0xff] }
0x1f64   : > { %v9159_v30 = vpop.f32.mrb[82].mxu1  ;;  %22395 = vmatprep.subr.bf16.mxu0 %v22394_v29 }
0x1f65   : > { %v21370_v24 = vpop.f32.mrb[83].mxu1 }
0x1f66   : > { %v9708_v24 = vld [vmem:[#allocation10 + $0x410] sm:$0xff] }
0x1f67   : > { %9469 = vxpose.xlu0.b32.start.end [1/1] (short) (narrow) %v9159_v30, 16  ;;  %v22364_v30 = vpack.c.bf16 %v9710_v27, %v9706_v19  ;;  %v9740_v19 = vld [vmem:[#allocation10 + $0x510] sm:$0xff] }
0x1f68   : > { %v9305_v28 = vpop.f32.mrb[84].mxu1  ;;  %v9744_v27 = vld [vmem:[#allocation10 + $0x530] sm:$0xff] }
0x1f69   : > { %v21380_v34 = vpop.f32.mrb[85].mxu1  ;;  %22365 = vmatpush1.bf16.msra.mxu1 %v22364_v30  ;;  %v22412_v29 = vpack.c.bf16 %v9744_v27, %v9740_v19  ;;  %v9747_v30 = vld [vmem:[#allocation10 + $0x548] sm:$0xff]  ;;  %v9991_v27 = vld [vmem:[#allocation13 + $0x598] sm:$0xff] }
0x1f6a   : > { %v9715_v34 = vld [vmem:[#allocation10 + $0x448] sm:$0xff] }
0x1f6b   : > { %v22366_v32 = vpack.c.bf16 %v9719_v36, %v9715_v34  ;;  %v9746_v36 = vld [vmem:[#allocation10 + $0x540] sm:$0xff]  ;;  %v9990_v19 = vld [vmem:[#allocation13 + $0x590] sm:$0xff] }
0x1f6c   : > { %9533 = vxpose.xlu0.b32.start.end [1/1] (short) (narrow) %v9305_v28, 16  ;;  %v9712_v28 = vld [vmem:[#allocation10 + $0x430] sm:$0xff] }
0x1f6d   : > { %v22396_v35 = vpack.c.bf16 %v9712_v28, %v9708_v24  ;;  %22367 = vmatprep.subr.bf16.mxu1 %v22366_v32  ;;  %v9751_v24 = vld [vmem:[#allocation10 + $0x568] sm:$0xff]  ;;  %v9749_v28 = vld [vmem:[#allocation10 + $0x558] sm:$0xff]  ;;  %v22384_v32 = vpack.c.bf16 %v9750_v31, %v9746_v36  ;;  %v22462_v31 = vpack.c.bf16 %v9991_v27, %v9990_v19 }
0x1f6e   : > { %22369 = vmatpush1.bf16.msra.mxu1 %v22368_v46  ;;  %v22382_v34 = vpack.c.bf16 %v9751_v24, %v9747_v30  ;;  %v9759_v46 = vld [vmem:[#allocation10 + $0x5a8] sm:$0xff] }
0x1f6f   : > { %22371 = vmatprep.subr.bf16.mxu1 %v22370_v56  ;;  %v22386_v49 = vpack.c.bf16 %v9759_v46, %v9755_v43  ;;  %v9754_v56 = vld [vmem:[#allocation10 + $0x580] sm:$0xff]  ;;  %v9992_v43 = vld [vmem:[#allocation13 + $0x5a0] sm:$0xff] }
0x1f70   : > { %v22388_v48 = vpack.c.bf16 %v9758_v62, %v9754_v56  ;;  %v9976_v56 = vld [vmem:[#allocation13 + $0x520] sm:$0xff]  ;;  %v9977_v62 = vld [vmem:[#allocation13 + $0x528] sm:$0xff] }
0x1f72   : > { %22373 = vmatpush1.bf16.msra.mxu1 %v22372_v41 }
0x1fab   : > { %v9389_v60 = vpop.trf.xlu1 }
0x1faf   : > { %v9390_v61 = vpop.trf.xlu1 }
0x1fb3   : > { %v9453_v2 = vpop.trf.xlu1 }
0x1fb7   : > { %v9454_v3 = vpop.trf.xlu1 }
0x1fc7   : > { %v9517_v9 = vpop.trf.xlu1 }
0x1fcb   : > { %v9518_v12 = vpop.trf.xlu1 }
0x1fdd   : > { %v9357_v57 = vpop.trf.xlu0 }
0x1fde   : > { %9567 = vxpose.xlu1.b32.cont [3/16] (narrow) %v9357_v57, 8  ;;  %v9735_v57 = vld [vmem:[#allocation10 + $0x4e8] sm:$0xff] }
0x1fe1   : > { %v9358_v59 = vpop.trf.xlu0 }
0x1fe2   : > { %9568 = vxpose.xlu1.b32.cont [4/16] (narrow) %v9358_v59, 8  ;;  %v9733_v59 = vld [vmem:[#allocation10 + $0x4d8] sm:$0xff] }
0x1fe5   : > { %v9421_v1 = vpop.trf.xlu0 }
0x1fe6   : > { %9569 = vxpose.xlu1.b32.cont [5/16] (narrow) %v9389_v60, 8  ;;  %v22404_v60 = vpack.c.bf16 %v9728_v17, %v9724_v50  ;;  %v9767_v50 = vld [vmem:[#allocation10 + $0x5e8] sm:$0xff] }
0x1fe7   : > { %v22390_v41 = vpack.c.bf16 %v9767_v50, %v9763_v5  ;;  %v9995_v5 = vld [vmem:[#allocation13 + $0x5b8] sm:$0xff] }
0x1fe9   : > { %v9422_v63 = vpop.trf.xlu0 }
0x1fea   : > { %9570 = vxpose.xlu1.b32.cont [6/16] (narrow) %v9390_v61, 8  ;;  %v22374_v61 = vpack.c.bf16 %v9735_v57, %v9731_v54  ;;  %v9765_v54 = vld [vmem:[#allocation10 + $0x5d8] sm:$0xff] }
0x1feb   : > { %v9769_v57 = vld [vmem:[#allocation10 + $0x5f8] sm:$0xff] }
0x1fec   : > { %22375 = vmatprep.subr.bf16.mxu1 %v22374_v61  ;;  %v9766_v61 = vld [vmem:[#allocation10 + $0x5e0] sm:$0xff] }
0x1fed   : > { %v9485_v4 = vpop.trf.xlu0 }
0x1fee   : > { %9571 = vxpose.xlu1.b32.cont [7/16] (narrow) %v9421_v1, 8  ;;  %v9737_v1 = vld [vmem:[#allocation10 + $0x4f8] sm:$0xff] }
0x1ff1   : > { %v9486_v6 = vpop.trf.xlu0 }
0x1ff2   : > { %9572 = vxpose.xlu1.b32.cont [8/16] (narrow) %v9422_v63, 8  ;;  %v22406_v63 = vpack.c.bf16 %v9737_v1, %v9733_v59  ;;  %v9762_v59 = vld [vmem:[#allocation10 + $0x5c0] sm:$0xff]  ;;  %v9764_v1 = vld [vmem:[#allocation10 + $0x5d0] sm:$0xff] }
0x1ff5   : > { %v9549_v13 = vpop.trf.xlu0 }
0x1ff6   : > { %9573 = vxpose.xlu1.b32.cont [9/16] (narrow) %v9453_v2, 8 }
0x1ff9   : > { %v9550_v15 = vpop.trf.xlu0 }
0x1ffa   : > { %9574 = vxpose.xlu1.b32.cont [10/16] (narrow) %v9454_v3, 8 }
0x1ffe   : > { %9575 = vxpose.xlu1.b32.cont [11/16] (narrow) %v9485_v4, 8 }
0x2002   : > { %9576 = vxpose.xlu1.b32.cont [12/16] (narrow) %v9486_v6, 8 }
0x2006   : > { %9577 = vxpose.xlu1.b32.cont [13/16] (narrow) %v9517_v9, 8  ;;  %v9730_v9 = vld [vmem:[#allocation10 + $0x4c0] sm:$0xff] }
0x200a   : > { %9578 = vxpose.xlu1.b32.cont [14/16] (narrow) %v9518_v12, 8  ;;  %v9734_v12 = vld [vmem:[#allocation10 + $0x4e0] sm:$0xff] }
0x200e   : > { %9579 = vxpose.xlu1.b32.cont [15/16] (narrow) %v9549_v13, 8  ;;  %v9732_v13 = vld [vmem:[#allocation10 + $0x4d0] sm:$0xff] }
0x2012   : > { %9580 = vxpose.xlu1.b32.end [16/16] (narrow) %v9550_v15, 8  ;;  %v22376_v15 = vpack.c.bf16 %v9734_v12, %v9730_v9  ;;  %v9957_v9 = vld [vmem:[#allocation13 + $0x488] sm:$0xff]  ;;  %v9988_v12 = vld [vmem:[#allocation13 + $0x580] sm:$0xff] }
0x2014   : > { %22377 = vmatpush1.bf16.msra.mxu1 %v22376_v15  ;;  %v9989_v15 = vld [vmem:[#allocation13 + $0x588] sm:$0xff] }
0x2056   : > { %v9581_v18 = vpop.trf.xlu1 }
0x2057   : > { %21414 = vmatmul.mubr.f32.vlgmr.msra.gmra.mrb[42].mxu0 %v9581_v18  ;;  %v9736_v18 = vld [vmem:[#allocation10 + $0x4f0] sm:$0xff] }
0x2058   : > { %9928 = vmatprep.mubr.f32.mxu0 %v23801_v0  ;;  %22397 = vmatpush1.bf16.msra.mxu0 %v22396_v35  ;;  %v9753_v35 = vld [vmem:[#allocation10 + $0x578] sm:$0xff] }
0x2059   : > { %22399 = vmatprep.subr.bf16.mxu0 %v22398_v39  ;;  %v22414_v38 = vpack.c.bf16 %v9753_v35, %v9749_v28  ;;  %v9748_v39 = vld [vmem:[#allocation10 + $0x550] sm:$0xff]  ;;  %v9942_v28 = vld [vmem:[#allocation13 + $0x410] sm:$0xff] }
0x205a   : > { %v22416_v44 = vpack.c.bf16 %v9752_v40, %v9748_v39  ;;  %v9960_v39 = vld [vmem:[#allocation13 + $0x4a0] sm:$0xff]  ;;  %v9961_v40 = vld [vmem:[#allocation13 + $0x4a8] sm:$0xff] }
0x205c   : > { %22401 = vmatpush1.bf16.msra.mxu0 %v22400_v42  ;;  %v22418_v42 = vpack.c.bf16 %v9761_v11, %v9757_v47  ;;  %v9944_v47 = vld [vmem:[#allocation13 + $0x420] sm:$0xff]  ;;  %v9945_v11 = vld [vmem:[#allocation13 + $0x428] sm:$0xff] }
0x205d   : > { %22403 = vmatprep.subr.bf16.mxu0 %v22402_v53  ;;  %v9760_v53 = vld [vmem:[#allocation10 + $0x5b0] sm:$0xff]  ;;  %v22436_v50 = vpack.c.bf16 %v9945_v11, %v9944_v47  ;;  %v9970_v11 = vld [vmem:[#allocation13 + $0x4f0] sm:$0xff] }
0x205e   : > { %v22420_v17 = vpack.c.bf16 %v9760_v53, %v9756_v37  ;;  %v9962_v37 = vld [vmem:[#allocation13 + $0x4b0] sm:$0xff] }
0x205f   : > { %v9994_v53 = vld [vmem:[#allocation13 + $0x5b0] sm:$0xff] }
0x2060   : > { %22405 = vmatpush1.bf16.msra.mxu0 %v22404_v60  ;;  %v22422_v60 = vpack.c.bf16 %v9769_v57, %v9765_v54  ;;  %v9947_v54 = vld [vmem:[#allocation13 + $0x438] sm:$0xff] }
0x2061   : > { %22407 = vmatprep.subr.bf16.mxu0 %v22406_v63  ;;  %v9768_v63 = vld [vmem:[#allocation10 + $0x5f0] sm:$0xff] }
0x212a   : > { %v9688_v21 = vpop.f32.mrb[42].mxu0 }
0x212b   : > { %v9689_v23 = vadd.f32 %v20066_v20, %v9688_v21  ;;  %v21415_v10 = vpop.f32.mrb[43].mxu0  ;;  %v22408_v20 = vpack.c.bf16 %v9736_v18, %v9732_v13  ;;  %v9739_v21 = vld [vmem:[#allocation10 + $0x508] sm:$0xff]  ;;  %v22458_v18 = vpack.c.bf16 %v9989_v15, %v9988_v12  ;;  %v9948_v12 = vld [vmem:[#allocation13 + $0x440] sm:$0xff] }
0x212c   : > { %v9741_v10 = vld [vmem:[#allocation10 + $0x518] sm:$0xff] }
0x212d   : > { %v9692_v16 = vadd.f32 %v9689_v23, %v24591_v55  ;;  %v9743_v23 = vld [vmem:[#allocation10 + $0x528] sm:$0xff]  ;;  %22409 = vmatpush1.bf16.msra.mxu0 %v22408_v20  ;;  %v22410_v22 = vpack.c.bf16 %v9745_v51, %v9741_v10  ;;  %v9940_v10 = vld [vmem:[#allocation13 + $0x400] sm:$0xff] }
0x212e   : > { %v22378_v14 = vpack.c.bf16 %v9743_v23, %v9739_v21  ;;  %v9972_v51 = vld [vmem:[#allocation13 + $0x500] sm:$0xff] }
0x212f   : > { %9693 = vadd.xlane.f32.xlu0 %v9692_v16  ;;  %22411 = vmatprep.subr.bf16.mxu0 %v22410_v22 }
0x2130   : > { %22379 = vmatprep.subr.bf16.mxu1 %v22378_v14  ;;  %v9941_v14 = vld [vmem:[#allocation13 + $0x408] sm:$0xff] }
0x2131   : > { %22413 = vmatpush1.bf16.msra.mxu0 %v22412_v29  ;;  %v22428_v30 = vpack.c.bf16 %v9941_v14, %v9940_v10  ;;  %v9967_v10 = vld [vmem:[#allocation13 + $0x4d8] sm:$0xff]  ;;  %v9998_v14 = vld [vmem:[#allocation13 + $0x5d0] sm:$0xff] }
0x2132   : > { %22415 = vmatprep.subr.bf16.mxu0 %v22414_v38  ;;  %v9974_v38 = vld [vmem:[#allocation13 + $0x510] sm:$0xff] }
0x2135   : > { %22417 = vmatpush1.bf16.msra.mxu0 %v22416_v44  ;;  %v9993_v44 = vld [vmem:[#allocation13 + $0x5a8] sm:$0xff] }
0x2136   : > { %22419 = vmatprep.subr.bf16.mxu0 %v22418_v42  ;;  %v22466_v42 = vpack.c.bf16 %v9993_v44, %v9992_v43  ;;  %v9953_v43 = vld [vmem:[#allocation13 + $0x468] sm:$0xff]  ;;  %v9984_v44 = vld [vmem:[#allocation13 + $0x560] sm:$0xff] }
0x2139   : > { %22421 = vmatpush1.bf16.msra.mxu0 %v22420_v17  ;;  %v22468_v17 = vpack.c.bf16 %v9977_v62, %v9976_v56  ;;  %v10003_v62 = vld [vmem:[#allocation13 + $0x5f8] sm:$0xff] }
0x213a   : > { %22423 = vmatprep.subr.bf16.mxu0 %v22422_v60  ;;  %v9978_v60 = vld [vmem:[#allocation13 + $0x530] sm:$0xff] }
0x21bc   : > { %v9694_v2 = vpop.xlane.xlu0 %9693 }
0x21bd   : > { %v9695_v3 = vmul.f32 0.0078125, %v9694_v2  ;;  %v22392_v2 = vpack.c.bf16 %v9766_v61, %v9762_v59  ;;  %v22470_v59 = vpack.c.bf16 %v9995_v5, %v9994_v53  ;;  %v9979_v61 = vld [vmem:[#allocation13 + $0x538] sm:$0xff] }
0x21bf   : > { %v24755_v4 = vsub.f32 %v9692_v16, %v9695_v3  ;;  %v9742_v16 = vld [vmem:[#allocation10 + $0x520] sm:$0xff]  ;;  %v22424_v3 = vpack.c.bf16 %v9768_v63, %v9764_v1  ;;  %v9964_v1 = vld [vmem:[#allocation13 + $0x4c0] sm:$0xff] }
0x21c0   : > { %v22380_v26 = vpack.c.bf16 %v9742_v16, %v9738_v25  ;;  %v9973_v25 = vld [vmem:[#allocation13 + $0x508] sm:$0xff]  ;;  %v9958_v16 = vld [vmem:[#allocation13 + $0x490] sm:$0xff] }
0x21c1   : > { %v9697_v6 = vmul.f32 %v24755_v4, %v24755_v4  ;;  %22425 = vmatpush1.bf16.msra.mxu0 %v22424_v3  ;;  %v22460_v24 = vpack.c.bf16 %v9973_v25, %v9972_v51  ;;  %v9965_v63 = vld [vmem:[#allocation13 + $0x4c8] sm:$0xff]  ;;  %v9999_v51 = vld [vmem:[#allocation13 + $0x5d8] sm:$0xff] }
0x21c2   : > { %22381 = vmatpush1.bf16.msra.mxu1 %v22380_v26  ;;  %22459 = vmatprep.subr.bf16.mxu0 %v22458_v18  ;;  %v9959_v26 = vld [vmem:[#allocation13 + $0x498] sm:$0xff]  ;;  %v9997_v3 = vld [vmem:[#allocation13 + $0x5c8] sm:$0xff]  ;;  %v22442_v15 = vpack.c.bf16 %v9965_v63, %v9964_v1  ;;  %v22478_v27 = vpack.c.bf16 %v9999_v51, %v9998_v14  ;;  %v20067_v14 = vld [vmem:[#allocation14 + $0x2] ss:$0 sm:$0xff] }
0x21c3   : > { %9698 = vadd.xlane.f32.xlu0 %v9697_v6  ;;  %22383 = vmatprep.subr.bf16.mxu1 %v22382_v34  ;;  %v9956_v6 = vld [vmem:[#allocation13 + $0x480] sm:$0xff]  ;;  %v9943_v34 = vld [vmem:[#allocation13 + $0x418] sm:$0xff]  ;;  %v22430_v36 = vpack.c.bf16 %v9959_v26, %v9958_v16 }
0x21c4   : > { %v22426_v13 = vpack.c.bf16 %v9957_v9, %v9956_v6  ;;  %v22472_v9 = vpack.c.bf16 %v9979_v61, %v9978_v60  ;;  %v9951_v26 = vld [vmem:[#allocation13 + $0x458] sm:$0xff] }
0x21c6   : > { %22385 = vmatpush1.bf16.msra.mxu1 %v22384_v32  ;;  %v9975_v32 = vld [vmem:[#allocation13 + $0x518] sm:$0xff] }
0x21c7   : > { %22387 = vmatprep.subr.bf16.mxu1 %v22386_v49  ;;  %v22464_v46 = vpack.c.bf16 %v9975_v32, %v9974_v38  ;;  %v22434_v49 = vpack.c.bf16 %v9961_v40, %v9960_v39  ;;  %v9952_v40 = vld [vmem:[#allocation13 + $0x460] sm:$0xff] }
0x21ca   : > { %22389 = vmatpush1.bf16.msra.mxu1 %v22388_v48  ;;  %v9963_v48 = vld [vmem:[#allocation13 + $0x4b8] sm:$0xff] }
0x21cb   : > { %22391 = vmatprep.subr.bf16.mxu1 %v22390_v41  ;;  %v9946_v41 = vld [vmem:[#allocation13 + $0x430] sm:$0xff]  ;;  %v22438_v57 = vpack.c.bf16 %v9963_v48, %v9962_v37  ;;  %v9955_v48 = vld [vmem:[#allocation13 + $0x478] sm:$0xff] }
0x21cc   : > { %v22440_v6 = vpack.c.bf16 %v9947_v54, %v9946_v41  ;;  %v9954_v37 = vld [vmem:[#allocation13 + $0x470] sm:$0xff] }
0x21cd   : > { %v22456_v5 = vpack.c.bf16 %v9955_v48, %v9954_v37  ;;  %v9771_v54 = vld [vmem:[#allocation11 + $0x8] sm:$0xf]  ;;  %v10182_v37 = vld [vmem:[#allocation2 + $0x4f8] sm:$0xff]  ;;  %v10181_v48 = vld [vmem:[#allocation2 + $0x4f0] sm:$0xff] }
0x21ce   : > { %22393 = vmatpush1.bf16.msra.mxu1 %v22392_v2  ;;  %v9996_v2 = vld [vmem:[#allocation13 + $0x5c0] sm:$0xff]  ;;  %v9780_v60 = vrot.slane %v9771_v54, %v24153_v58  ;;  %v9788_v61 = vrot.slane %v9771_v54, %v24366_v8 }
0x21cf   : > { %22427 = vmatprep.subr.bf16.mxu1 %v22426_v13  ;;  %v9949_v13 = vld [vmem:[#allocation13 + $0x448] sm:$0xff]  ;;  %v22474_v18 = vpack.c.bf16 %v9997_v3, %v9996_v2 }
0x21d0   : > { %v22444_v25 = vpack.c.bf16 %v9949_v13, %v9948_v12 }
0x2250   : > { %v9699_v20 = vpop.xlane.xlu0 %9698 }
0x2251   : > { %v9700_v21 = vmul.f32 0.007874016, %v9699_v20  ;;  %v9980_v20 = vld [vmem:[#allocation13 + $0x540] sm:$0xff] }
0x2253   : > { %v9701_v23 = vadd.f32 1e-08, %v9700_v21  ;;  %v9981_v21 = vld [vmem:[#allocation13 + $0x548] sm:$0xff] }
0x2254   : > { %v22476_v16 = vpack.c.bf16 %v9981_v21, %v9980_v20 }
0x2255   : > { %23355 = vrsqrt.f32 %v9701_v23  ;;  %v9966_v23 = vld [vmem:[#allocation13 + $0x4d0] sm:$0xff] }
0x2256   : > { %v22446_v19 = vpack.c.bf16 %v9967_v10, %v9966_v23 }
0x225f   : > { %v23356_v22 = vpop.eup %23355 }
0x2260   : > { %v9703_v29 = vmul.f32 %v23356_v22, %v24755_v4  ;;  %v22432_v4 = vpack.c.bf16 %v9943_v34, %v9942_v28  ;;  %v9950_v22 = vld [vmem:[#allocation13 + $0x450] sm:$0xff]  ;;  %v9969_v28 = vld [vmem:[#allocation13 + $0x4e8] sm:$0xff]  ;;  %v10000_v34 = vld [vmem:[#allocation13 + $0x5e0] sm:$0xff] }
0x2262   : > { %v24761_v35 = vmul.f32 %v9703_v29, %v24356_v33  ;;  %v9982_v29 = vld [vmem:[#allocation13 + $0x550] sm:$0xff] }
0x2264   : > { %9858 = vmatmul.mubr.f32.vlgmr.msra.gmra.mrb[86].mxu1 %v24761_v35  ;;  %9929 = vmatmul.mubr.f32.vlgmr.msra.gmra.mrb[44].mxu0 %v24761_v35 }
0x2265   : > { %22429 = vmatpush3.bf16.msra.mxu1 %v22428_v30  ;;  %22461 = vmatpush3.bf16.msra.mxu0 %v22460_v24  ;;  %v9983_v30 = vld [vmem:[#allocation13 + $0x558] sm:$0xff]  ;;  %v9968_v24 = vld [vmem:[#allocation13 + $0x4e0] sm:$0xff] }
0x2266   : > { %22431 = vmatprep.subr.bf16.mxu1 %v22430_v36  ;;  %22463 = vmatprep.subr.bf16.mxu0 %v22462_v31  ;;  %v10001_v36 = vld [vmem:[#allocation13 + $0x5e8] sm:$0xff]  ;;  %v22448_v31 = vpack.c.bf16 %v9951_v26, %v9950_v22  ;;  %v22480_v38 = vpack.c.bf16 %v9983_v30, %v9982_v29  ;;  %v22450_v32 = vpack.c.bf16 %v9969_v28, %v9968_v24  ;;  %v10168_v29 = vld [vmem:[#allocation2 + $0x488] sm:$0xff]  ;;  %v10171_v30 = vld [vmem:[#allocation2 + $0x4a0] sm:$0xff] }
0x2267   : > { %v22482_v39 = vpack.c.bf16 %v10001_v36, %v10000_v34  ;;  %v10167_v24 = vld [vmem:[#allocation2 + $0x480] sm:$0xff]  ;;  %v22490_v28 = vpack.c.bf16 %v10171_v30, %v10168_v29  ;;  %v10170_v34 = vld [vmem:[#allocation2 + $0x498] sm:$0xff]  ;;  %v10169_v36 = vld [vmem:[#allocation2 + $0x490] sm:$0xff] }
0x2268   : > { %v10202_v29 = vld [vmem:[#allocation2 + $0x598] sm:$0xff]  ;;  %v10204_v30 = vld [vmem:[#allocation2 + $0x5a8] sm:$0xff] }
0x2269   : > { %22433 = vmatpush3.bf16.msra.mxu1 %v22432_v4  ;;  %22465 = vmatpush3.bf16.msra.mxu0 %v22464_v46  ;;  %v22452_v4 = vpack.c.bf16 %v9953_v43, %v9952_v40  ;;  %v9985_v46 = vld [vmem:[#allocation13 + $0x568] sm:$0xff]  ;;  %v10177_v40 = vld [vmem:[#allocation2 + $0x4d0] sm:$0xff] }
0x226a   : > { %22435 = vmatprep.subr.bf16.mxu1 %v22434_v49  ;;  %22467 = vmatprep.subr.bf16.mxu0 %v22466_v42  ;;  %v22484_v47 = vpack.c.bf16 %v9985_v46, %v9984_v44  ;;  %v9971_v49 = vld [vmem:[#allocation13 + $0x4f8] sm:$0xff]  ;;  %v10002_v42 = vld [vmem:[#allocation13 + $0x5f0] sm:$0xff]  ;;  %v10173_v43 = vld [vmem:[#allocation2 + $0x4b0] sm:$0xff] }
0x226b   : > { %v22454_v56 = vpack.c.bf16 %v9971_v49, %v9970_v11  ;;  %v22486_v53 = vpack.c.bf16 %v10003_v62, %v10002_v42  ;;  %v10175_v46 = vld [vmem:[#allocation2 + $0x4c0] sm:$0xff]  ;;  %v10180_v49 = vld [vmem:[#allocation2 + $0x4e8] sm:$0xff] }
0x226c   : > { %v10183_v42 = vld [vmem:[#allocation2 + $0x500] sm:$0xff] }
0x226d   : > { %22437 = vmatpush3.bf16.msra.mxu1 %v22436_v50  ;;  %22469 = vmatpush3.bf16.msra.mxu0 %v22468_v17  ;;  %v9986_v50 = vld [vmem:[#allocation13 + $0x570] sm:$0xff]  ;;  %v9987_v17 = vld [vmem:[#allocation13 + $0x578] sm:$0xff]  ;;  %v22498_v62 = vpack.c.bf16 %v10183_v42, %v10180_v49 }
0x226e   : > { %22439 = vmatprep.subr.bf16.mxu1 %v22438_v57  ;;  %22471 = vmatprep.subr.bf16.mxu0 %v22470_v59  ;;  %v22488_v41 = vpack.c.bf16 %v9987_v17, %v9986_v50  ;;  %v9776_v57 = vrot.slane %v9771_v54, %v24146_v52  ;;  %v9784_v59 = vrot.slane %v9771_v54, %v24260_v45 }
0x2271   : > { %22441 = vmatpush3.bf16.msra.mxu1 %v22440_v6  ;;  %22473 = vmatpush3.bf16.msra.mxu0 %v22472_v9 }
0x2272   : > { %22443 = vmatprep.subr.bf16.mxu1 %v22442_v15  ;;  %22475 = vmatprep.subr.bf16.mxu0 %v22474_v18 }
0x2275   : > { %22445 = vmatpush3.bf16.msra.mxu1 %v22444_v25  ;;  %22477 = vmatpush3.bf16.msra.mxu0 %v22476_v16 }
0x2276   : > { %22447 = vmatprep.subr.bf16.mxu1 %v22446_v19  ;;  %22479 = vmatprep.subr.bf16.mxu0 %v22478_v27 }
0x2279   : > { %22449 = vmatpush3.bf16.msra.mxu1 %v22448_v31  ;;  %22481 = vmatpush3.bf16.msra.mxu0 %v22480_v38  ;;  %v10172_v31 = vld [vmem:[#allocation2 + $0x4a8] sm:$0xff]  ;;  %v22492_v38 = vpack.c.bf16 %v10170_v34, %v10167_v24  ;;  %v10207_v24 = vld [vmem:[#allocation2 + $0x5c0] sm:$0xff] }
0x227a   : > { %22451 = vmatprep.subr.bf16.mxu1 %v22450_v32  ;;  %22483 = vmatprep.subr.bf16.mxu0 %v22482_v39  ;;  %v22523_v32 = vpack.c.bf16 %v10172_v31, %v10169_v36  ;;  %v10174_v39 = vld [vmem:[#allocation2 + $0x4b8] sm:$0xff]  ;;  %v22514_v34 = vpack.c.bf16 %v10207_v24, %v10204_v30  ;;  %v10203_v36 = vld [vmem:[#allocation2 + $0x5a0] sm:$0xff] }
0x227b   : > { %v22494_v44 = vpack.c.bf16 %v10177_v40, %v10174_v39  ;;  %v10206_v31 = vld [vmem:[#allocation2 + $0x5b8] sm:$0xff]  ;;  %v10213_v40 = vld [vmem:[#allocation2 + $0x5f0] sm:$0xff] }
0x227c   : > { %v10210_v39 = vld [vmem:[#allocation2 + $0x5d8] sm:$0xff] }
0x227d   : > { %22453 = vmatpush3.bf16.msra.mxu1 %v22452_v4  ;;  %22485 = vmatpush3.bf16.msra.mxu0 %v22484_v47  ;;  %v10176_v4 = vld [vmem:[#allocation2 + $0x4c8] sm:$0xff]  ;;  %v10178_v47 = vld [vmem:[#allocation2 + $0x4d8] sm:$0xff] }
0x227e   : > { %22455 = vmatprep.subr.bf16.mxu1 %v22454_v56  ;;  %22487 = vmatprep.subr.bf16.mxu0 %v22486_v53  ;;  %v22526_v11 = vpack.c.bf16 %v10178_v47, %v10175_v46  ;;  %v10179_v56 = vld [vmem:[#allocation2 + $0x4e0] sm:$0xff]  ;;  %v10184_v53 = vld [vmem:[#allocation2 + $0x508] sm:$0xff]  ;;  %v10209_v46 = vld [vmem:[#allocation2 + $0x5d0] sm:$0xff] }
0x227f   : > { %v22529_v50 = vpack.c.bf16 %v10184_v53, %v10181_v48  ;;  %v10212_v47 = vld [vmem:[#allocation2 + $0x5e8] sm:$0xff] }
0x2280   : > { %v22520_v49 = vpack.c.bf16 %v10212_v47, %v10209_v46 }
0x2281   : > { %22457 = vmatpush3.bf16.msra.mxu1 %v22456_v5  ;;  %22489 = vmatpush3.bf16.msra.mxu0 %v22488_v41  ;;  %v22500_v5 = vpack.c.bf16 %v10182_v37, %v10179_v56 }
0x2282   : > { %22522 = vmatprep.subr.bf16.mxu0 %v23802_v7  ;;  %22491 = vmatprep.subr.bf16.mxu1 %v22490_v28 }
0x2337   : > { %v9859_v1 = vpop.f32.mrb[86].mxu1  ;;  %v9930_v63 = vpop.f32.mrb[44].mxu0 }
0x2338   : > { %v9860_v2 = vadd.f32 %v9859_v1, %v9776_v57  ;;  %v9931_v3 = vadd.f32 %v9930_v63, %v9784_v59  ;;  %v9861_v6 = vpop.f32.mrb[87].mxu1  ;;  %v9932_v9 = vpop.f32.mrb[45].mxu0  ;;  %v10186_v59 = vld [vmem:[#allocation2 + $0x518] sm:$0xff]  ;;  %v10185_v1 = vld [vmem:[#allocation2 + $0x510] sm:$0xff]  ;;  %v10188_v63 = vld [vmem:[#allocation2 + $0x528] sm:$0xff] }
0x2339   : > { %v9862_v12 = vadd.f32 %v9861_v6, %v9780_v60  ;;  %v9933_v13 = vadd.f32 %v9932_v9, %v9788_v61  ;;  %v10189_v60 = vld [vmem:[#allocation2 + $0x530] sm:$0xff]  ;;  %v10190_v6 = vld [vmem:[#allocation2 + $0x538] sm:$0xff] }
0x233a   : > { %v9935_v20 = vmax.f32 %v9860_v2, 0.0  ;;  %v9937_v21 = vmax.f32 %v9931_v3, 0.0  ;;  %v22502_v61 = vpack.c.bf16 %v10189_v60, %v10186_v59  ;;  %v10187_v2 = vld [vmem:[#allocation2 + $0x520] sm:$0xff]  ;;  %v22504_v3 = vpack.c.bf16 %v10188_v63, %v10185_v1 }
0x233b   : > { %v9936_v15 = vmax.f32 %v9862_v12, 0.0  ;;  %v9938_v18 = vmax.f32 %v9933_v13, 0.0  ;;  %v22532_v9 = vpack.c.bf16 %v10190_v6, %v10187_v2  ;;  %v10192_v12 = vld [vmem:[#allocation2 + $0x548] sm:$0xff]  ;;  %v10195_v13 = vld [vmem:[#allocation2 + $0x560] sm:$0xff] }
0x233d   : > { %10076 = vmatprep.mubr.f32.mxu1 %v9936_v15  ;;  %10146 = vmatprep.mubr.f32.mxu0 %v9938_v18  ;;  %v22506_v15 = vpack.c.bf16 %v10195_v13, %v10192_v12  ;;  %v10191_v18 = vld [vmem:[#allocation2 + $0x540] sm:$0xff] }
0x233e   : > { %10077 = vmatmul.mubr.f32.vlgmr.msra.gmra.mrb[88].mxu1 %v9935_v20  ;;  %10147 = vmatmul.mubr.f32.vlgmr.msra.gmra.mrb[46].mxu0 %v9937_v21  ;;  %v10194_v20 = vld [vmem:[#allocation2 + $0x558] sm:$0xff]  ;;  %v10193_v21 = vld [vmem:[#allocation2 + $0x550] sm:$0xff] }
0x233f   : > { %10297 = vmatprep.mubr.f32.mxu1 %v23801_v0  ;;  %21448 = vmatprep.mubr.msk.f32.mxu0 %vm23803_vm0, %v23801_v0 }
0x2340   : > { %22493 = vmatpush1.bf16.msra.mxu1 %v22492_v38  ;;  %22524 = vmatpush3.bf16.msra.mxu0 %v22523_v32  ;;  %v10205_v38 = vld [vmem:[#allocation2 + $0x5b0] sm:$0xff]  ;;  %v10208_v32 = vld [vmem:[#allocation2 + $0x5c8] sm:$0xff] }
0x2341   : > { %22495 = vmatprep.subr.bf16.mxu1 %v22494_v44  ;;  %22525 = vmatprep.subr.bf16.mxu0 %v23802_v7  ;;  %v22541_v44 = vpack.c.bf16 %v10208_v32, %v10205_v38 }
0x2344   : > { %22527 = vmatpush3.bf16.msra.mxu0 %v22526_v11  ;;  %v10214_v11 = vld [vmem:[#allocation2 + $0x5f8] sm:$0xff] }
0x2345   : > { %22528 = vmatprep.subr.bf16.mxu0 %v23802_v7 }
0x2348   : > { %22530 = vmatpush3.bf16.msra.mxu0 %v22529_v50 }
0x2349   : > { %22531 = vmatprep.subr.bf16.mxu0 %v23802_v7 }
0x234c   : > { %22533 = vmatpush3.bf16.msra.mxu0 %v22532_v9 }
0x234d   : > { %22534 = vmatprep.subr.bf16.mxu0 %v23802_v7 }
0x2411   : > { %v20520_v23 = vpop.f32.mrb[88].mxu1  ;;  %v20555_v10 = vpop.f32.mrb[46].mxu0 }
0x2412   : > { %v20521_v51 = vpop.f32.mrb[89].mxu1  ;;  %v20556_v25 = vpop.f32.mrb[47].mxu0 }
0x2413   : > { %v20522_v16 = vadd.f32 %v20521_v51, %v20520_v23  ;;  %v20557_v22 = vadd.f32 %v20556_v25, %v20555_v10  ;;  %v22508_v23 = vpack.c.bf16 %v10194_v20, %v10191_v18  ;;  %v10196_v10 = vld [vmem:[#allocation2 + $0x568] sm:$0xff]  ;;  %v10201_v51 = vld [vmem:[#allocation2 + $0x590] sm:$0xff] }
0x2414   : > { %v22535_v25 = vpack.c.bf16 %v10196_v10, %v10193_v21 }
0x2415   : > { %v10079_v26 = vadd.f32 %v20522_v16, %v20067_v14  ;;  %v10198_v14 = vld [vmem:[#allocation2 + $0x578] sm:$0xff] }
0x2416   : > { %v22510_v16 = vpack.c.bf16 %v10201_v51, %v10198_v14  ;;  %22536 = vmatpush3.bf16.msra.mxu0 %v22535_v25 }
0x2417   : > { %v10149_v19 = vadd.f32 %v20557_v22, %v10079_v26  ;;  %v10197_v22 = vld [vmem:[#allocation2 + $0x570] sm:$0xff]  ;;  %v10200_v26 = vld [vmem:[#allocation2 + $0x588] sm:$0xff]  ;;  %22537 = vmatprep.subr.bf16.mxu0 %v23802_v7 }
0x2419   : > { %v10152_v27 = vadd.f32 %v10149_v19, %v24761_v35  ;;  %v22496_v35 = vpack.c.bf16 %v10176_v4, %v10173_v43  ;;  %v10199_v19 = vld [vmem:[#allocation2 + $0x580] sm:$0xff]  ;;  %v22516_v43 = vpack.c.bf16 %v10206_v31, %v10203_v36  ;;  %v22518_v4 = vpack.c.bf16 %v10213_v40, %v10210_v39 }
0x241a   : > { %v22538_v28 = vpack.c.bf16 %v10202_v29, %v10199_v19 }
0x241b   : > { %10153 = vadd.xlane.f32.xlu0 %v10152_v27  ;;  %22497 = vmatpush1.bf16.msra.mxu1 %v22496_v35  ;;  %v10211_v35 = vld [vmem:[#allocation2 + $0x5e0] sm:$0xff] }
0x241c   : > { %22499 = vmatprep.subr.bf16.mxu1 %v22498_v62  ;;  %22539 = vmatpush3.bf16.msra.mxu0 %v22538_v28  ;;  %v22544_v42 = vpack.c.bf16 %v10214_v11, %v10211_v35 }
0x241d   : > { %22540 = vmatprep.subr.bf16.mxu0 %v23802_v7 }
0x241f   : > { %22501 = vmatpush1.bf16.msra.mxu1 %v22500_v5 }
0x2420   : > { %22503 = vmatprep.subr.bf16.mxu1 %v22502_v61  ;;  %22542 = vmatpush3.bf16.msra.mxu0 %v22541_v44 }
0x2421   : > { %22543 = vmatprep.subr.bf16.mxu0 %v23802_v7 }
0x2423   : > { %22505 = vmatpush1.bf16.msra.mxu1 %v22504_v3 }
0x2424   : > { %22507 = vmatprep.subr.bf16.mxu1 %v22506_v15  ;;  %22545 = vmatpush3.bf16.msra.mxu0 %v22544_v42 }
0x2425   : > { %21491 = vmatprep.subr.mxu0 %v23801_v0 }
0x2427   : > { %22509 = vmatpush1.bf16.msra.mxu1 %v22508_v23 }
0x2428   : > { %22511 = vmatprep.subr.bf16.mxu1 %v22510_v16 }
0x24a8   : > { %v10154_v17 = vpop.xlane.xlu0 %10153 }
0x24a9   : > { %v10155_v41 = vmul.f32 0.0078125, %v10154_v17  ;;  %v24798_v17 = vld [vmem:[#allocation5 + $0x9] sm:$0x7] }
0x24ab   : > { %v24777_v54 = vsub.f32 %v10152_v27, %v10155_v41  ;;  %v22512_v27 = vpack.c.bf16 %v10200_v26, %v10197_v22  ;;  %v10221_v41 = vrot.slane %v24798_v17, %v24146_v52 }
0x24ad   : > { %v10157_v57 = vmul.f32 %v24777_v54, %v24777_v54  ;;  %22513 = vmatpush1.bf16.msra.mxu1 %v22512_v27 }
0x24ae   : > { %22515 = vmatprep.subr.bf16.mxu1 %v22514_v34 }
0x24af   : > { %10158 = vadd.xlane.f32.xlu0 %v10157_v57 }
0x24b1   : > { %22517 = vmatpush1.bf16.msra.mxu1 %v22516_v43 }
0x24b2   : > { %22519 = vmatprep.subr.bf16.mxu1 %v22518_v4 }
0x24b5   : > { %22521 = vmatpush1.bf16.msra.mxu1 %v22520_v49 }
0x24b6   : > { %21451 = vmatprep.subr.mxu1 %v23801_v0 }
0x253c   : > { %v10159_v56 = vpop.xlane.xlu0 %10158 }
0x253d   : > { %v10160_v62 = vmul.f32 0.007874016, %v10159_v56 }
0x253f   : > { %v10161_v37 = vadd.f32 1e-08, %v10160_v62 }
0x2541   : > { %23357 = vrsqrt.f32 %v10161_v37 }
0x254b   : > { %v23358_v48 = vpop.eup %23357 }
0x254c   : > { %v10163_v53 = vmul.f32 %v23358_v48, %v24777_v54  ;;  %v10225_v54 = vrot.slane %v24798_v17, %v24153_v58 }
0x254e   : > { %v10164_v5 = vmul.f32 %v10163_v53, %v24356_v33 }
0x2550   : > { %v24790_v50 = vadd.f32 %v10164_v5, %v24591_v55 }
0x2552   : > { %10298 = vmatmul.mubr.f32.vlgmr.msra.gmra.mrb[90].mxu1 %v24790_v50  ;;  %21449 = vmatmul.mubr.f32.vlgmr.msra.gmra.mrb[48].mxu0 %v24790_v50 }
0x2553   : > { %21453 = vmatprep.mubr.msk.f32.mxu1 %vm23803_vm0, %v23801_v0  ;;  %21493 = vmatprep.mubr.msk.f32.mxu0 %vm23803_vm0, %v23801_v0 }
0x2625   : > { %v10299_v55 = vpop.f32.mrb[90].mxu1  ;;  %v24804_v57 = vpop.f32.mrb[48].mxu0 }
0x2626   : > { %v10300_v59 = vadd.f32 %v10299_v55, %v10221_v41  ;;  %v10301_v60 = vpop.f32.mrb[91].mxu1  ;;  %v21450_v61 = vpop.f32.mrb[49].mxu0  ;;  %v23470_v55 = vld [vmem:[%s24235_s22] ss:$0 sm:$0xff] }
0x2627   : > { %v10302_v1 = vadd.f32 %v10301_v60, %v10225_v54 }
0x2628   : > { %10374 = vxpose.xlu1.b32.start.end [1/1] (short) %v10300_v59, 128 }
0x2629   : > { %10406 = vxpose.xlu0.b32.start.end [1/1] (short) %v10302_v1, 128 }
0x26a8   : > { %v10390_v63 = vpop.trf.xlu1 }
0x26a9   : > { %v10422_v2 = vpop.trf.xlu0  ;;  %10470 = vxpose.xlu0.b32.start [1/2] (short) (narrow) %v10390_v63, 8 }
0x26aa   : > { %10726 = vxpose.xlu1.b32.start [1/2] (short) (narrow) %v10422_v2, 8 }
0x26ac   : > { %v10391_v3 = vpop.trf.xlu1 }
0x26ad   : > { %v10423_v6 = vpop.trf.xlu0  ;;  %10471 = vxpose.xlu0.b32.end [2/2] (short) (narrow) %v10391_v3, 8 }
0x26ae   : > { %10727 = vxpose.xlu1.b32.end [2/2] (short) (narrow) %v10423_v6, 8 }
0x26b0   : > { %v10392_v9 = vpop.trf.xlu1 }
0x26b1   : > { %v10424_v12 = vpop.trf.xlu0 }
0x26b2   : > { %10502 = vxpose.xlu1.b32.start [1/2] (short) (narrow) %v10392_v9, 8 }
0x26b4   : > { %v10393_v13 = vpop.trf.xlu1 }
0x26b5   : > { %v10425_v15 = vpop.trf.xlu0 }
0x26b6   : > { %10503 = vxpose.xlu1.b32.end [2/2] (short) (narrow) %v10393_v13, 8 }
0x26b8   : > { %v10394_v18 = vpop.trf.xlu1 }
0x26b9   : > { %v10426_v20 = vpop.trf.xlu0 }
0x26ba   : > { %10758 = vxpose.xlu1.b32.start [1/2] (short) (narrow) %v10424_v12, 8 }
0x26bc   : > { %v10395_v21 = vpop.trf.xlu1 }
0x26bd   : > { %v10427_v23 = vpop.trf.xlu0 }
0x26be   : > { %10759 = vxpose.xlu1.b32.end [2/2] (short) (narrow) %v10425_v15, 8 }
0x26c0   : > { %v10396_v10 = vpop.trf.xlu1 }
0x26c1   : > { %v10428_v14 = vpop.trf.xlu0  ;;  %10566 = vxpose.xlu0.b32.start [1/2] (short) (narrow) %v10396_v10, 8 }
0x26c2   : > { %10534 = vxpose.xlu1.b32.start [1/2] (short) (narrow) %v10394_v18, 8 }
0x26c4   : > { %v10397_v51 = vpop.trf.xlu1 }
0x26c5   : > { %v10429_v25 = vpop.trf.xlu0  ;;  %10567 = vxpose.xlu0.b32.end [2/2] (short) (narrow) %v10397_v51, 8 }
0x26c6   : > { %10535 = vxpose.xlu1.b32.end [2/2] (short) (narrow) %v10395_v21, 8 }
0x26c8   : > { %v10398_v16 = vpop.trf.xlu1 }
0x26c9   : > { %v10430_v22 = vpop.trf.xlu0  ;;  %10598 = vxpose.xlu0.b32.start [1/2] (short) (narrow) %v10398_v16, 8 }
0x26ca   : > { %10790 = vxpose.xlu1.b32.start [1/2] (short) (narrow) %v10426_v20, 8 }
0x26cc   : > { %v10399_v26 = vpop.trf.xlu1 }
0x26cd   : > { %10599 = vxpose.xlu0.b32.end [2/2] (short) (narrow) %v10399_v26, 8  ;;  %v10431_v19 = vpop.trf.xlu0 }
0x26ce   : > { %10791 = vxpose.xlu1.b32.end [2/2] (short) (narrow) %v10427_v23, 8 }
0x26d0   : > { %v10400_v27 = vpop.trf.xlu1 }
0x26d1   : > { %10630 = vxpose.xlu0.b32.start [1/2] (short) (narrow) %v10400_v27, 8  ;;  %v10432_v30 = vpop.trf.xlu0 }
0x26d2   : > { %10822 = vxpose.xlu1.b32.start [1/2] (short) (narrow) %v10428_v14, 8 }
0x26d4   : > { %v10401_v29 = vpop.trf.xlu1 }
0x26d5   : > { %10631 = vxpose.xlu0.b32.end [2/2] (short) (narrow) %v10401_v29, 8  ;;  %v10433_v28 = vpop.trf.xlu0 }
0x26d6   : > { %10823 = vxpose.xlu1.b32.end [2/2] (short) (narrow) %v10429_v25, 8 }
0x26d8   : > { %v10402_v24 = vpop.trf.xlu1 }
0x26d9   : > { %10662 = vxpose.xlu0.b32.start [1/2] (short) (narrow) %v10402_v24, 8  ;;  %v10434_v31 = vpop.trf.xlu0  ;;  %v10229_v24 = vrot.slane %v24798_v17, %v24260_v45 }
0x26da   : > { %10854 = vxpose.xlu1.b32.start [1/2] (short) (narrow) %v10430_v22, 8 }
0x26dc   : > { %v10403_v34 = vpop.trf.xlu1 }
0x26dd   : > { %10663 = vxpose.xlu0.b32.end [2/2] (short) (narrow) %v10403_v34, 8  ;;  %v10435_v32 = vpop.trf.xlu0 }
0x26de   : > { %10855 = vxpose.xlu1.b32.end [2/2] (short) (narrow) %v10431_v19, 8 }
0x26e0   : > { %v10404_v36 = vpop.trf.xlu1 }
0x26e1   : > { %10694 = vxpose.xlu0.b32.start [1/2] (short) (narrow) %v10404_v36, 8  ;;  %v10436_v39 = vpop.trf.xlu0 }
0x26e2   : > { %10886 = vxpose.xlu1.b32.start [1/2] (short) (narrow) %v10432_v30, 8 }
0x26e4   : > { %v10405_v38 = vpop.trf.xlu1 }
0x26e5   : > { %10695 = vxpose.xlu0.b32.end [2/2] (short) (narrow) %v10405_v38, 8  ;;  %v10437_v40 = vpop.trf.xlu0 }
0x26e6   : > { %10887 = vxpose.xlu1.b32.end [2/2] (short) (narrow) %v10433_v28, 8  ;;  %v10371_v28 = vadd.f32 %v24804_v57, %v10229_v24 }
0x26ea   : > { %10918 = vxpose.xlu1.b32.start [1/2] (short) (narrow) %v10434_v31, 8 }
0x26ee   : > { %10919 = vxpose.xlu1.b32.end [2/2] (short) (narrow) %v10435_v32, 8 }
0x26f2   : > { %10950 = vxpose.xlu1.b32.start [1/2] (short) (narrow) %v10436_v39, 8 }
0x26f6   : > { %10951 = vxpose.xlu1.b32.end [2/2] (short) (narrow) %v10437_v40, 8 }
0x2729   : > { %v10486_v44 = vpop.trf.xlu0 }
0x272a   : > { %v10742_v43 = vpop.trf.xlu1 }
0x272b   : > { %21452 = vmatpush3.xpose.msk.msra.mxu1 %vm1609_vm1, %v10742_v43 }
0x272c   : > { %21456 = vmatprep.subr.mxu1 %v23801_v0 }
0x272e   : > { %21454 = vmatmul.mubr.msk.f32.vlgmr.msra.gmra.mrb[92].mxu1 %vm1609_vm1, %v10486_v44 }
0x272f   : > { %21458 = vmatprep.mubr.msk.f32.mxu1 %vm23803_vm0, %v23801_v0 }
0x2732   : > { %v10518_v4 = vpop.trf.xlu1 }
0x273a   : > { %v10774_v46 = vpop.trf.xlu1 }
0x273b   : > { %21457 = vmatpush3.xpose.msk.msra.mxu1 %vm1609_vm1, %v10774_v46 }
0x273c   : > { %21461 = vmatprep.subr.mxu1 %v23801_v0 }
0x273e   : > { %21459 = vmatmul.mubr.msk.f32.vlgmr.msra.gmra.mrb[94].mxu1 %vm1609_vm1, %v10518_v4 }
0x273f   : > { %21463 = vmatprep.mubr.msk.f32.mxu1 %vm23803_vm0, %v23801_v0 }
0x2741   : > { %v10582_v49 = vpop.trf.xlu0 }
0x2742   : > { %v10550_v47 = vpop.trf.xlu1 }
0x2749   : > { %v10614_v56 = vpop.trf.xlu0 }
0x274a   : > { %v10806_v35 = vpop.trf.xlu1 }
0x274b   : > { %21462 = vmatpush3.xpose.msk.msra.mxu1 %vm1609_vm1, %v10806_v35 }
0x274c   : > { %21466 = vmatprep.subr.mxu1 %v23801_v0 }
0x274e   : > { %21464 = vmatmul.mubr.msk.f32.vlgmr.msra.gmra.mrb[96].mxu1 %vm1609_vm1, %v10550_v47 }
0x274f   : > { %21468 = vmatprep.mubr.msk.f32.mxu1 %vm23803_vm0, %v23801_v0 }
0x2751   : > { %v10646_v37 = vpop.trf.xlu0 }
0x2752   : > { %v10838_v11 = vpop.trf.xlu1 }
0x2753   : > { %21467 = vmatpush3.xpose.msk.msra.mxu1 %vm1609_vm1, %v10838_v11 }
0x2754   : > { %21471 = vmatprep.subr.mxu1 %v23801_v0 }
0x2756   : > { %21469 = vmatmul.mubr.msk.f32.vlgmr.msra.gmra.mrb[98].mxu1 %vm1609_vm1, %v10582_v49 }
0x2757   : > { %21473 = vmatprep.mubr.msk.f32.mxu1 %vm23803_vm0, %v23801_v0 }
0x2759   : > { %v10678_v53 = vpop.trf.xlu0 }
0x275a   : > { %v10870_v42 = vpop.trf.xlu1 }
0x275b   : > { %21472 = vmatpush3.xpose.msk.msra.mxu1 %vm1609_vm1, %v10870_v42 }
0x275c   : > { %21476 = vmatprep.subr.mxu1 %v23801_v0 }
0x275e   : > { %21474 = vmatmul.mubr.msk.f32.vlgmr.msra.gmra.mrb[100].mxu1 %vm1609_vm1, %v10614_v56 }
0x275f   : > { %21478 = vmatprep.mubr.msk.f32.mxu1 %vm23803_vm0, %v23801_v0 }
0x2761   : > { %v10710_v41 = vpop.trf.xlu0 }
0x2762   : > { %v10902_v62 = vpop.trf.xlu1 }
0x2763   : > { %21477 = vmatpush3.xpose.msk.msra.mxu1 %vm1609_vm1, %v10902_v62 }
0x2764   : > { %21481 = vmatprep.subr.mxu1 %v23801_v0 }
0x2766   : > { %21479 = vmatmul.mubr.msk.f32.vlgmr.msra.gmra.mrb[102].mxu1 %vm1609_vm1, %v10646_v37 }
0x2767   : > { %21483 = vmatprep.mubr.msk.f32.mxu1 %vm23803_vm0, %v23801_v0 }
0x276a   : > { %v10934_v48 = vpop.trf.xlu1 }
0x276b   : > { %21482 = vmatpush3.xpose.msk.msra.mxu1 %vm1609_vm1, %v10934_v48 }
0x276c   : > { %21486 = vmatprep.subr.mxu1 %v23801_v0 }
0x276e   : > { %21484 = vmatmul.mubr.msk.f32.vlgmr.msra.gmra.mrb[104].mxu1 %vm1609_vm1, %v10678_v53 }
0x276f   : > { %21488 = vmatprep.mubr.msk.f32.mxu1 %vm23803_vm0, %v23801_v0 }
0x2772   : > { %v10966_v5 = vpop.trf.xlu1 }
0x2773   : > { %21487 = vmatpush3.xpose.msk.msra.mxu1 %vm1609_vm1, %v10966_v5 }
0x2774   : > { %21496 = vmatprep.subr.mxu1 %v23801_v0 }
0x2776   : > { %21489 = vmatmul.mubr.msk.f32.vlgmr.msra.gmra.mrb[106].mxu1 %vm1609_vm1, %v10710_v41 }
0x2777   : > { %21498 = vmatprep.mubr.msk.f32.mxu1 %vm23803_vm0, %v23801_v0 }
0x2801   : > { %v11310_v54 = vpop.f32.mrb[92].mxu1 }
0x2802   : > { %v11311_v59 = vadd.f32 %v23470_v55, %v11310_v54  ;;  %v21455_v60 = vpop.f32.mrb[93].mxu1 }
0x2804   : > { %v11846_v61 = vsel %vm2218_vm2, %v11311_v59, -inf }
0x2805   : > { %11847 = vmax.xlane.f32.xlu1 %v11846_v61 }
0x2811   : > { %v11386_v1 = vpop.f32.mrb[94].mxu1 }
0x2812   : > { %v21460_v63 = vpop.f32.mrb[95].mxu1  ;;  %v11387_v46 = vadd.f32 %v23470_v55, %v11386_v1 }
0x2814   : > { %v11849_v17 = vsel %vm2218_vm2, %v11387_v46, -inf }
0x2821   : > { %v11462_v2 = vpop.f32.mrb[96].mxu1 }
0x2822   : > { %v24848_v3 = vadd.f32 %v23470_v55, %v11462_v2  ;;  %v21465_v6 = vpop.f32.mrb[97].mxu1 }
0x2824   : > { %v11852_v9 = vsel %vm2218_vm2, %v24848_v3, -inf }
0x2825   : > { %11853 = vmax.xlane.f32.xlu1 %v11852_v9 }
0x2829   : > { %v11538_v12 = vpop.f32.mrb[98].mxu1 }
0x282a   : > { %v24852_v13 = vadd.f32 %v23470_v55, %v11538_v12  ;;  %v21470_v15 = vpop.f32.mrb[99].mxu1 }
0x282c   : > { %v11855_v18 = vsel %vm2218_vm2, %v24852_v13, -inf }
0x282d   : > { %11856 = vmax.xlane.f32.xlu1 %v11855_v18 }
0x2831   : > { %v11614_v20 = vpop.f32.mrb[100].mxu1 }
0x2832   : > { %v24856_v21 = vadd.f32 %v23470_v55, %v11614_v20  ;;  %v21475_v23 = vpop.f32.mrb[101].mxu1 }
0x2834   : > { %v11858_v10 = vsel %vm2218_vm2, %v24856_v21, -inf }
0x2835   : > { %11859 = vmax.xlane.f32.xlu1 %v11858_v10 }
0x2839   : > { %v11690_v14 = vpop.f32.mrb[102].mxu1 }
0x283a   : > { %v24860_v51 = vadd.f32 %v23470_v55, %v11690_v14  ;;  %v21480_v25 = vpop.f32.mrb[103].mxu1 }
0x283c   : > { %v11861_v16 = vsel %vm2218_vm2, %v24860_v51, -inf }
0x283d   : > { %11862 = vmax.xlane.f32.xlu1 %v11861_v16 }
0x2841   : > { %v11766_v22 = vpop.f32.mrb[104].mxu1 }
0x2842   : > { %v21485_v26 = vpop.f32.mrb[105].mxu1  ;;  %v24873_v47 = vadd.f32 %v23470_v55, %v11766_v22 }
0x2844   : > { %v11864_v57 = vsel %vm2218_vm2, %v24873_v47, -inf }
0x2849   : > { %v11842_v19 = vpop.f32.mrb[106].mxu1 }
0x284a   : > { %v24864_v27 = vadd.f32 %v23470_v55, %v11842_v19  ;;  %v21490_v29 = vpop.f32.mrb[107].mxu1 }
0x284c   : > { %v11867_v30 = vsel %vm2218_vm2, %v24864_v27, -inf }
0x284d   : > { %11868 = vmax.xlane.f32.xlu1 %v11867_v30 }
0x2880   : > { %10438 = vxpose.xlu1.b32.start.end [1/1] (short) %v10371_v28, 128 }
0x2892   : > { %v11848_v34 = vpop.xlane.xlu1 %11847 }
0x2893   : > { %v11870_v44 = vsub.f32 %v11311_v59, %v11848_v34 }
0x2895   : > { %v11878_v4 = vmul.f32 1.442695, %v11870_v44 }
0x2897   : > { %23359 = vpow2.f32 %v11878_v4 }
0x28a1   : > { %v24878_v35 = vpop.eup %23359 }
0x28a2   : > { %v11894_v11 = vsel %vm2218_vm2, %v24878_v35, 0.0 }
0x28b2   : > { %v11854_v36 = vpop.xlane.xlu1 %11853 }
0x28b3   : > { %v11872_v61 = vsub.f32 %v24848_v3, %v11854_v36 }
0x28b5   : > { %v11882_v1 = vmul.f32 1.442695, %v11872_v61 }
0x28b7   : > { %23361 = vpow2.f32 %v11882_v1 }
0x28ba   : > { %v11857_v31 = vpop.xlane.xlu1 %11856 }
0x28bb   : > { %v11873_v63 = vsub.f32 %v24852_v13, %v11857_v31 }
0x28bd   : > { %v11884_v2 = vmul.f32 1.442695, %v11873_v63 }
0x28bf   : > { %23363 = vpow2.f32 %v11884_v2 }
0x28c1   : > { %v23362_v18 = vpop.eup %23361 }
0x28c2   : > { %v11860_v38 = vpop.xlane.xlu1 %11859  ;;  %v11900_v20 = vsel %vm2218_vm2, %v23362_v18, 0.0 }
0x28c3   : > { %v11874_v6 = vsub.f32 %v24856_v21, %v11860_v38 }
0x28c5   : > { %v11886_v9 = vmul.f32 1.442695, %v11874_v6 }
0x28c7   : > { %23365 = vpow2.f32 %v11886_v9 }
0x28c9   : > { %v24892_v23 = vpop.eup %23363 }
0x28ca   : > { %v11863_v32 = vpop.xlane.xlu1 %11862  ;;  %v11903_v3 = vsel %vm2218_vm2, %v24892_v23, 0.0 }
0x28cb   : > { %v11875_v12 = vsub.f32 %v24860_v51, %v11863_v32 }
0x28cd   : > { %v11888_v15 = vmul.f32 1.442695, %v11875_v12 }
0x28cf   : > { %23367 = vpow2.f32 %v11888_v15 }
0x28d1   : > { %v23366_v13 = vpop.eup %23365 }
0x28d2   : > { %v11906_v21 = vsel %vm2218_vm2, %v23366_v13, 0.0 }
0x28d9   : > { %v24897_v14 = vpop.eup %23367 }
0x28da   : > { %v24871_v39 = vpop.xlane.xlu1 %11868  ;;  %v11909_v26 = vsel %vm2218_vm2, %v24897_v14, 0.0 }
0x28db   : > { %v11877_v25 = vsub.f32 %v24864_v27, %v24871_v39 }
0x28dd   : > { %v11892_v29 = vmul.f32 1.442695, %v11877_v25 }
0x2900   : > { %v10454_v40 = vpop.trf.xlu1 }
0x2901   : > { %10982 = vxpose.xlu0.b32.start [1/2] (short) (narrow) %v10454_v40, 8 }
0x2904   : > { %v10455_v43 = vpop.trf.xlu1 }
0x2905   : > { %10983 = vxpose.xlu0.b32.end [2/2] (short) (narrow) %v10455_v43, 8 }
0x2908   : > { %v24882_v49 = vpop.trf.xlu1 }
0x290c   : > { %v24884_v42 = vpop.trf.xlu1 }
0x2910   : > { %v10458_v56 = vpop.trf.xlu1 }
0x2914   : > { %v10459_v62 = vpop.trf.xlu1 }
0x2918   : > { %v10460_v37 = vpop.trf.xlu1 }
0x291c   : > { %v10461_v48 = vpop.trf.xlu1 }
0x2920   : > { %v10462_v53 = vpop.trf.xlu1 }
0x2924   : > { %v10463_v5 = vpop.trf.xlu1 }
0x2928   : > { %v10464_v41 = vpop.trf.xlu1 }
0x292c   : > { %v10465_v54 = vpop.trf.xlu1 }
0x2930   : > { %v10466_v59 = vpop.trf.xlu1 }
0x2932   : > { %11850 = vmax.xlane.f32.xlu0 %v11849_v17 }
0x2934   : > { %v10467_v60 = vpop.trf.xlu1 }
0x2936   : > { %11865 = vmax.xlane.f32.xlu0 %v11864_v57 }
0x2938   : > { %v10468_v43 = vpop.trf.xlu1 }
0x293a   : > { %11895 = vadd.xlane.f32.xlu0 %v11894_v11 }
0x293c   : > { %v10469_v44 = vpop.trf.xlu1 }
0x2967   : > { %11046 = vxpose.xlu0.b32.start [1/2] (short) (narrow) %v10458_v56, 8 }
0x296b   : > { %11047 = vxpose.xlu0.b32.end [2/2] (short) (narrow) %v10459_v62, 8 }
0x296f   : > { %11078 = vxpose.xlu0.b32.start [1/2] (short) (narrow) %v10460_v37, 8 }
0x2973   : > { %11079 = vxpose.xlu0.b32.end [2/2] (short) (narrow) %v10461_v48, 8 }
0x2977   : > { %11110 = vxpose.xlu0.b32.start [1/2] (short) (narrow) %v10462_v53, 8 }
0x297b   : > { %11111 = vxpose.xlu0.b32.end [2/2] (short) (narrow) %v10463_v5, 8 }
0x297f   : > { %11142 = vxpose.xlu0.b32.start [1/2] (short) (narrow) %v10464_v41, 8 }
0x2981   : > { %v10998_v55 = vpop.trf.xlu0 }
0x2982   : > { %21492 = vmatpush3.msra.mxu0 %v10998_v55 }
0x2983   : > { %11143 = vxpose.xlu0.b32.end [2/2] (short) (narrow) %v10465_v54, 8  ;;  %21501 = vmatprep.subr.mxu0 %v23801_v0 }
0x2987   : > { %11174 = vxpose.xlu0.b32.start [1/2] (short) (narrow) %v10466_v59, 8 }
0x298b   : > { %11175 = vxpose.xlu0.b32.end [2/2] (short) (narrow) %v10467_v60, 8 }
0x29b8   : > { %11901 = vadd.xlane.f32.xlu0 %v11900_v20 }
0x29bc   : > { %11904 = vadd.xlane.f32.xlu0 %v11903_v3 }
0x29bf   : > { %v11851_v10 = vpop.xlane.xlu0 %11850 }
0x29c0   : > { %v11871_v51 = vsub.f32 %v11387_v46, %v11851_v10  ;;  %11907 = vadd.xlane.f32.xlu0 %v11906_v21 }
0x29c2   : > { %v11880_v16 = vmul.f32 1.442695, %v11871_v51 }
0x29c3   : > { %v11866_v22 = vpop.xlane.xlu0 %11865 }
0x29c4   : > { %23369 = vpow2.f32 %v11880_v16  ;;  %v11876_v19 = vsub.f32 %v24873_v47, %v11866_v22  ;;  %11910 = vadd.xlane.f32.xlu0 %v11909_v26 }
0x29c6   : > { %v11890_v30 = vmul.f32 1.442695, %v11876_v19 }
0x29c7   : > { %v11896_v24 = vpop.xlane.xlu0 %11895 }
0x29c8   : > { %23371 = vpow2.f32 %v11890_v30 }
0x29c9   : > { %23373 = vrcp.f32 %v11896_v24 }
0x29ca   : > { %23375 = vpow2.f32 %v11892_v29 }
0x29ce   : > { %v23370_v28 = vpop.eup %23369 }
0x29cf   : > { %v11897_v34 = vsel %vm2218_vm2, %v23370_v28, 0.0 }
0x29d0   : > { %11898 = vadd.xlane.f32.xlu1 %v11897_v34  ;;  %v12808_v34 = vld [vmem:[#allocation7 + $0x188] sm:$0xff] }
0x29d2   : > { %v23372_v27 = vpop.eup %23371 }
0x29d3   : > { %v23374_v36 = vpop.eup %23373  ;;  %v11912_v31 = vsel %vm2218_vm2, %v23372_v27, 0.0 }
0x29d4   : > { %v24906_v38 = vpop.eup %23375  ;;  %11913 = vadd.xlane.f32.xlu0 %v11912_v31  ;;  %v11926_v32 = vmul.f32 %v23374_v36, %v24878_v35  ;;  %v12810_v31 = vld [vmem:[#allocation7 + $0x198] sm:$0xff] }
0x29d5   : > { %v11915_v39 = vsel %vm2218_vm2, %v24906_v38, 0.0 }
0x29d6   : > { %21494 = vmatmul.mubr.msk.f32.vlgmr.msra.gmra.mrb[50].mxu0 %vm2218_vm2, %v11926_v32  ;;  %v12811_v32 = vld [vmem:[#allocation7 + $0x1a0] sm:$0xff] }
0x29d7   : > { %21503 = vmatprep.mubr.msk.f32.mxu0 %vm23803_vm0, %v23801_v0 }
0x29d8   : > { %11916 = vadd.xlane.f32.xlu0 %v11915_v39  ;;  %v12812_v39 = vld [vmem:[#allocation7 + $0x1a8] sm:$0xff] }
0x29e7   : > { %v11062_v40 = vpop.trf.xlu0 }
0x29e8   : > { %21502 = vmatpush3.msra.mxu0 %v11062_v40  ;;  %v22553_v40 = vpack.c.bf16 %v12812_v39, %v12811_v32  ;;  %v12923_v32 = vld [vmem:[#allocation10 + $0x640] sm:$0xff] }
0x29e9   : > { %21511 = vmatprep.subr.mxu0 %v23801_v0  ;;  %v12927_v39 = vld [vmem:[#allocation10 + $0x660] sm:$0xff] }
0x29ef   : > { %v11094_v4 = vpop.trf.xlu0 }
0x29f7   : > { %v11126_v46 = vpop.trf.xlu0 }
0x29ff   : > { %v11158_v47 = vpop.trf.xlu0 }
0x2a03   : > { %11014 = vxpose.xlu1.b32.start [1/2] (short) (narrow) %v24882_v49, 8 }
0x2a05   : > { %11206 = vxpose.xlu0.b32.start [1/2] (short) (narrow) %v10468_v43, 8  ;;  %v12813_v43 = vld [vmem:[#allocation7 + $0x1b0] sm:$0xff] }
0x2a07   : > { %11015 = vxpose.xlu1.b32.end [2/2] (short) (narrow) %v24884_v42, 8  ;;  %v11190_v17 = vpop.trf.xlu0 }
0x2a09   : > { %11207 = vxpose.xlu0.b32.end [2/2] (short) (narrow) %v10469_v44, 8  ;;  %v12814_v44 = vld [vmem:[#allocation7 + $0x1b8] sm:$0xff] }
0x2a45   : > { %v11902_v57 = vpop.xlane.xlu0 %11901 }
0x2a46   : > { %23377 = vrcp.f32 %v11902_v57  ;;  %v12817_v57 = vld [vmem:[#allocation7 + $0x1d0] sm:$0xff] }
0x2a49   : > { %v11905_v35 = vpop.xlane.xlu0 %11904 }
0x2a4d   : > { %v11908_v11 = vpop.xlane.xlu0 %11907 }
0x2a4e   : > { %23379 = vrcp.f32 %v11908_v11 }
0x2a50   : > { %v23378_v56 = vpop.eup %23377 }
0x2a51   : > { %v11928_v62 = vmul.f32 %v23378_v56, %v23362_v18  ;;  %v11911_v37 = vpop.xlane.xlu0 %11910  ;;  %v12819_v56 = vld [vmem:[#allocation7 + $0x1e0] sm:$0xff] }
0x2a53   : > { %21504 = vmatmul.mubr.msk.f32.vlgmr.msra.gmra.mrb[52].mxu0 %vm2218_vm2, %v11928_v62  ;;  %v12820_v62 = vld [vmem:[#allocation7 + $0x1e8] sm:$0xff] }
0x2a54   : > { %21512 = vmatpush3.msra.mxu0 %v11126_v46  ;;  %21513 = vmatprep.mubr.msk.f32.mxu0 %vm23803_vm0, %v23801_v0  ;;  %v12815_v46 = vld [vmem:[#allocation7 + $0x1c0] sm:$0xff] }
0x2a55   : > { %21521 = vmatprep.subr.mxu0 %v23801_v0 }
0x2a58   : > { %v23380_v49 = vpop.eup %23379 }
0x2a59   : > { %v11930_v42 = vmul.f32 %v23380_v49, %v23366_v13  ;;  %v22565_v49 = vpack.c.bf16 %v12820_v62, %v12819_v56  ;;  %v12935_v62 = vld [vmem:[#allocation10 + $0x6a0] sm:$0xff] }
0x2a5b   : > { %21514 = vmatmul.mubr.msk.f32.vlgmr.msra.gmra.mrb[54].mxu0 %vm2218_vm2, %v11930_v42  ;;  %v12821_v42 = vld [vmem:[#allocation7 + $0x1f0] sm:$0xff] }
0x2a5c   : > { %21522 = vmatpush3.msra.mxu0 %v11190_v17  ;;  %21523 = vmatprep.mubr.msk.f32.mxu0 %vm23803_vm0, %v23801_v0 }
0x2a5d   : > { %22546 = vmatprep.subr.bf16.mxu0 %v23802_v7  ;;  %v11899_v41 = vpop.xlane.xlu1 %11898 }
0x2a61   : > { %v11914_v48 = vpop.xlane.xlu0 %11913 }
0x2a62   : > { %23381 = vrcp.f32 %v11914_v48 }
0x2a63   : > { %23383 = vrcp.f32 %v11899_v41 }
0x2a64   : > { %23385 = vrcp.f32 %v11905_v35  ;;  %v12818_v35 = vld [vmem:[#allocation7 + $0x1d8] sm:$0xff] }
0x2a65   : > { %23387 = vrcp.f32 %v11911_v37  ;;  %v11917_v54 = vpop.xlane.xlu0 %11916  ;;  %v22562_v11 = vpack.c.bf16 %v12818_v35, %v12817_v57  ;;  %v12822_v37 = vld [vmem:[#allocation7 + $0x1f8] sm:$0xff] }
0x2a66   : > { %23389 = vrcp.f32 %v11917_v54  ;;  %v22568_v48 = vpack.c.bf16 %v12822_v37, %v12821_v42  ;;  %v12934_v57 = vld [vmem:[#allocation10 + $0x698] sm:$0xff]  ;;  %v12937_v42 = vld [vmem:[#allocation10 + $0x6b0] sm:$0xff] }
0x2a67   : > { %v12938_v35 = vld [vmem:[#allocation10 + $0x6b8] sm:$0xff] }
0x2a68   : > { %v22610_v56 = vpack.c.bf16 %v12938_v35, %v12934_v57  ;;  %v12967_v57 = vld [vmem:[#allocation10 + $0x7a0] sm:$0xff]  ;;  %v12965_v35 = vld [vmem:[#allocation10 + $0x790] sm:$0xff] }
0x2a6c   : > { %v23382_v53 = vpop.eup %23381 }
0x2a6d   : > { %v11932_v5 = vmul.f32 %v23382_v53, %v23372_v27  ;;  %v23384_v55 = vpop.eup %23383  ;;  %v12809_v27 = vld [vmem:[#allocation7 + $0x190] sm:$0xff] }
0x2a6e   : > { %v11927_v59 = vmul.f32 %v23384_v55, %v23370_v28  ;;  %v23386_v61 = vpop.eup %23385  ;;  %v12807_v28 = vld [vmem:[#allocation7 + $0x180] sm:$0xff] }
0x2a6f   : > { %21524 = vmatmul.mubr.msk.f32.vlgmr.msra.gmra.mrb[56].mxu0 %vm2218_vm2, %v11932_v5  ;;  %v11929_v1 = vmul.f32 %v23386_v61, %v24892_v23  ;;  %v23388_v63 = vpop.eup %23387  ;;  %v22547_v36 = vpack.c.bf16 %v12808_v34, %v12807_v28  ;;  %v12928_v34 = vld [vmem:[#allocation10 + $0x668] sm:$0xff] }
0x2a70   : > { %21563 = vmatprep.mubr.msk.f32.mxu0 %vm23803_vm0, %v23801_v0  ;;  %v11931_v2 = vmul.f32 %v23388_v63, %v24897_v14  ;;  %v23390_v9 = vpop.eup %23389 }
0x2a71   : > { %v11933_v12 = vmul.f32 %v23390_v9, %v24906_v38  ;;  %22548 = vmatpush3.bf16.msra.mxu0 %v22547_v36  ;;  %v22550_v38 = vpack.c.bf16 %v12810_v31, %v12809_v27  ;;  %v12926_v27 = vld [vmem:[#allocation10 + $0x658] sm:$0xff] }
0x2a72   : > { %22549 = vmatprep.subr.bf16.mxu0 %v23802_v7  ;;  %v12930_v36 = vld [vmem:[#allocation10 + $0x678] sm:$0xff] }
0x2a75   : > { %22551 = vmatpush3.bf16.msra.mxu0 %v22550_v38  ;;  %v22606_v38 = vpack.c.bf16 %v12930_v36, %v12926_v27  ;;  %v12959_v27 = vld [vmem:[#allocation10 + $0x760] sm:$0xff] }
0x2a76   : > { %22552 = vmatprep.subr.bf16.mxu0 %v23802_v7 }
0x2a79   : > { %22554 = vmatpush3.bf16.msra.mxu0 %v22553_v40  ;;  %v12925_v40 = vld [vmem:[#allocation10 + $0x650] sm:$0xff] }
0x2a7a   : > { %22555 = vmatprep.subr.bf16.mxu0 %v23802_v7 }
0x2a83   : > { %v11030_v60 = vpop.trf.xlu1 }
0x2a84   : > { %21497 = vmatpush3.msra.mxu1 %v11030_v60 }
0x2a85   : > { %21499 = vmatmul.mubr.msk.f32.vlgmr.msra.gmra.mrb[108].mxu1 %vm2218_vm2, %v11927_v59  ;;  %21506 = vmatprep.subr.mxu1 %v23801_v0  ;;  %v11222_v6 = vpop.trf.xlu0 }
0x2a86   : > { %21507 = vmatpush3.msra.mxu1 %v11094_v4  ;;  %21508 = vmatprep.mubr.msk.f32.mxu1 %vm23803_vm0, %v23801_v0  ;;  %v22556_v4 = vpack.c.bf16 %v12814_v44, %v12813_v43  ;;  %v22576_v43 = vpack.c.bf16 %v12927_v39, %v12923_v32  ;;  %v12929_v44 = vld [vmem:[#allocation10 + $0x670] sm:$0xff]  ;;  %v12964_v39 = vld [vmem:[#allocation10 + $0x788] sm:$0xff] }
0x2a87   : > { %21516 = vmatprep.subr.mxu1 %v23801_v0  ;;  %v12961_v32 = vld [vmem:[#allocation10 + $0x770] sm:$0xff] }
0x2a88   : > { %22557 = vmatpush3.bf16.msra.mxu0 %v22556_v4  ;;  %v12932_v4 = vld [vmem:[#allocation10 + $0x688] sm:$0xff] }
0x2a89   : > { %21509 = vmatmul.mubr.msk.f32.vlgmr.msra.gmra.mrb[110].mxu1 %vm2218_vm2, %v11929_v1  ;;  %22558 = vmatprep.subr.bf16.mxu0 %v23802_v7 }
0x2a8a   : > { %21517 = vmatpush3.msra.mxu1 %v11158_v47  ;;  %21518 = vmatprep.mubr.msk.f32.mxu1 %vm23803_vm0, %v23801_v0  ;;  %v12816_v47 = vld [vmem:[#allocation7 + $0x1c8] sm:$0xff] }
0x2a8b   : > { %21526 = vmatprep.subr.mxu1 %v23801_v0  ;;  %v22559_v17 = vpack.c.bf16 %v12816_v47, %v12815_v46  ;;  %v12936_v46 = vld [vmem:[#allocation10 + $0x6a8] sm:$0xff]  ;;  %v22608_v47 = vpack.c.bf16 %v12929_v44, %v12925_v40  ;;  %v12966_v44 = vld [vmem:[#allocation10 + $0x798] sm:$0xff] }
0x2a8d   : > { %21519 = vmatmul.mubr.msk.f32.vlgmr.msra.gmra.mrb[112].mxu1 %vm2218_vm2, %v11931_v2  ;;  %22560 = vmatpush3.bf16.msra.mxu0 %v22559_v17  ;;  %v22578_v17 = vpack.c.bf16 %v12936_v46, %v12932_v4  ;;  %v12970_v4 = vld [vmem:[#allocation10 + $0x7b8] sm:$0xff] }
0x2a8e   : > { %21527 = vmatpush3.msra.mxu1 %v11222_v6  ;;  %21528 = vmatprep.mubr.msk.f32.mxu1 %vm23803_vm0, %v23801_v0 }
0x2a8f   : > { %22561 = vmatprep.subr.bf16.mxu0 %v23802_v7 }
0x2a91   : > { %21529 = vmatmul.mubr.msk.f32.vlgmr.msra.gmra.mrb[114].mxu1 %vm2218_vm2, %v11933_v12  ;;  %22563 = vmatpush3.bf16.msra.mxu0 %v22562_v11  ;;  %v12931_v11 = vld [vmem:[#allocation10 + $0x680] sm:$0xff] }
0x2a92   : > { %13066 = vmatprep.mubr.f32.mxu1 %v23801_v0  ;;  %22564 = vmatprep.subr.bf16.mxu0 %v23802_v7  ;;  %v22580_v37 = vpack.c.bf16 %v12935_v62, %v12931_v11  ;;  %v12972_v62 = vld [vmem:[#allocation10 + $0x7c8] sm:$0xff] }
0x2a95   : > { %22566 = vmatpush3.bf16.msra.mxu0 %v22565_v49  ;;  %v12933_v49 = vld [vmem:[#allocation10 + $0x690] sm:$0xff] }
0x2a96   : > { %22567 = vmatprep.subr.bf16.mxu0 %v23802_v7 }
0x2a99   : > { %22569 = vmatpush3.bf16.msra.mxu0 %v22568_v48  ;;  %v12940_v48 = vld [vmem:[#allocation10 + $0x6c8] sm:$0xff] }
0x2aa9   : > { %v12003_v15 = vpop.f32.mrb[50].mxu0 }
0x2aaa   : > { %v21495_v18 = vpop.f32.mrb[51].mxu0  ;;  %12518 = vxpose.xlu1.b32.start.end [1/1] (short) (narrow) %v12003_v15, 16 }
0x2aab   : > { %v20092_v18 = vld [vmem:[#allocation8 + $0x3] ss:$0 sm:$0xff] }
0x2b26   : > { %v12149_v20 = vpop.f32.mrb[52].mxu0 }
0x2b27   : > { %12582 = vxpose.xlu1.b32.start.end [1/1] (short) (narrow) %v12149_v20, 16  ;;  %v21505_v23 = vpop.f32.mrb[53].mxu0 }
0x2b2a   : > { %v12534_v14 = vpop.trf.xlu1 }
0x2b2e   : > { %v12295_v3 = vpop.f32.mrb[54].mxu0  ;;  %v12535_v51 = vpop.trf.xlu1 }
0x2b2f   : > { %12646 = vxpose.xlu1.b32.start.end [1/1] (short) (narrow) %v12295_v3, 16  ;;  %v21515_v13 = vpop.f32.mrb[55].mxu0 }
0x2b42   : > { %v12441_v10 = vpop.f32.mrb[56].mxu0 }
0x2b43   : > { %12710 = vxpose.xlu1.b32.start.end [1/1] (short) (narrow) %v12441_v10, 16  ;;  %v21525_v21 = vpop.f32.mrb[57].mxu0  ;;  %v12916_v10 = vld [vmem:[#allocation10 + $0x608] sm:$0xff] }
0x2b44   : > { %v12920_v21 = vld [vmem:[#allocation10 + $0x628] sm:$0xff] }
0x2b48   : > { %12774 = vxpose.xlu1.b32.start [1/16] (narrow) %v12534_v14, 8  ;;  %v12918_v14 = vld [vmem:[#allocation10 + $0x618] sm:$0xff] }
0x2b4c   : > { %12775 = vxpose.xlu1.b32.cont [2/16] (narrow) %v12535_v51, 8  ;;  %v22570_v51 = vpack.c.bf16 %v12920_v21, %v12916_v10  ;;  %v12954_v21 = vld [vmem:[#allocation10 + $0x738] sm:$0xff] }
0x2b4e   : > { %22571 = vmatprep.subr.bf16.mxu1 %v22570_v51 }
0x2b58   : > { %v12076_v25 = vpop.f32.mrb[108].mxu1 }
0x2b59   : > { %12550 = vxpose.xlu0.b32.start.end [1/1] (short) (narrow) %v12076_v25, 16  ;;  %v21500_v16 = vpop.f32.mrb[109].mxu1  ;;  %v12922_v25 = vld [vmem:[#allocation10 + $0x638] sm:$0xff] }
0x2b5a   : > { %v12915_v16 = vld [vmem:[#allocation10 + $0x600] sm:$0xff] }
0x2b5c   : > { %v12222_v22 = vpop.f32.mrb[110].mxu1 }
0x2b5d   : > { %v21510_v26 = vpop.f32.mrb[111].mxu1 }
0x2b5e   : > { %12614 = vxpose.xlu0.b32.start.end [1/1] (short) (narrow) %v12222_v22, 16  ;;  %v12919_v22 = vld [vmem:[#allocation10 + $0x620] sm:$0xff]  ;;  %v22602_v26 = vpack.c.bf16 %v12922_v25, %v12918_v14 }
0x2b5f   : > { %v12947_v14 = vld [vmem:[#allocation10 + $0x700] sm:$0xff] }
0x2b60   : > { %v12368_v19 = vpop.f32.mrb[112].mxu1  ;;  %22603 = vmatprep.subr.bf16.mxu0 %v22602_v26 }
0x2b61   : > { %v21520_v29 = vpop.f32.mrb[113].mxu1 }
0x2b62   : > { %v12917_v29 = vld [vmem:[#allocation10 + $0x610] sm:$0xff] }
0x2b63   : > { %12678 = vxpose.xlu0.b32.start.end [1/1] (short) (narrow) %v12368_v19, 16  ;;  %v22572_v19 = vpack.c.bf16 %v12919_v22, %v12915_v16  ;;  %v12949_v16 = vld [vmem:[#allocation10 + $0x710] sm:$0xff] }
0x2b64   : > { %v12514_v30 = vpop.f32.mrb[114].mxu1  ;;  %v12953_v22 = vld [vmem:[#allocation10 + $0x730] sm:$0xff] }
0x2b65   : > { %v21530_v24 = vpop.f32.mrb[115].mxu1  ;;  %22573 = vmatpush1.bf16.msra.mxu1 %v22572_v19  ;;  %v22620_v26 = vpack.c.bf16 %v12953_v22, %v12949_v16  ;;  %v12956_v19 = vld [vmem:[#allocation10 + $0x748] sm:$0xff]  ;;  %v13200_v22 = vld [vmem:[#allocation13 + $0x798] sm:$0xff] }
0x2b66   : > { %v12924_v24 = vld [vmem:[#allocation10 + $0x648] sm:$0xff] }
0x2b67   : > { %v22574_v31 = vpack.c.bf16 %v12928_v34, %v12924_v24  ;;  %v12955_v34 = vld [vmem:[#allocation10 + $0x740] sm:$0xff]  ;;  %v13199_v16 = vld [vmem:[#allocation13 + $0x790] sm:$0xff] }
0x2b68   : > { %12742 = vxpose.xlu0.b32.start.end [1/1] (short) (narrow) %v12514_v30, 16  ;;  %v12921_v30 = vld [vmem:[#allocation10 + $0x630] sm:$0xff] }
0x2b69   : > { %v22604_v28 = vpack.c.bf16 %v12921_v30, %v12917_v29  ;;  %22575 = vmatprep.subr.bf16.mxu1 %v22574_v31  ;;  %v12960_v29 = vld [vmem:[#allocation10 + $0x768] sm:$0xff]  ;;  %v12958_v30 = vld [vmem:[#allocation10 + $0x758] sm:$0xff]  ;;  %v22592_v31 = vpack.c.bf16 %v12959_v27, %v12955_v34  ;;  %v22670_v27 = vpack.c.bf16 %v13200_v22, %v13199_v16 }
0x2b6a   : > { %22577 = vmatpush1.bf16.msra.mxu1 %v22576_v43  ;;  %v22590_v24 = vpack.c.bf16 %v12960_v29, %v12956_v19  ;;  %v12968_v43 = vld [vmem:[#allocation10 + $0x7a8] sm:$0xff] }
0x2b6b   : > { %22579 = vmatprep.subr.bf16.mxu1 %v22578_v17  ;;  %v22594_v46 = vpack.c.bf16 %v12968_v43, %v12964_v39  ;;  %v12963_v17 = vld [vmem:[#allocation10 + $0x780] sm:$0xff]  ;;  %v13201_v39 = vld [vmem:[#allocation13 + $0x7a0] sm:$0xff] }
0x2b6c   : > { %v22596_v11 = vpack.c.bf16 %v12967_v57, %v12963_v17  ;;  %v13185_v17 = vld [vmem:[#allocation13 + $0x720] sm:$0xff]  ;;  %v13186_v57 = vld [vmem:[#allocation13 + $0x728] sm:$0xff] }
0x2b6e   : > { %22581 = vmatpush1.bf16.msra.mxu1 %v22580_v37 }
0x2ba7   : > { %v12598_v41 = vpop.trf.xlu1 }
0x2bab   : > { %v12599_v54 = vpop.trf.xlu1 }
0x2baf   : > { %v12662_v60 = vpop.trf.xlu1 }
0x2bb3   : > { %v12663_v61 = vpop.trf.xlu1 }
0x2bc3   : > { %v12726_v2 = vpop.trf.xlu1 }
0x2bc7   : > { %v12727_v6 = vpop.trf.xlu1 }
0x2bd9   : > { %v12566_v53 = vpop.trf.xlu0 }
0x2bda   : > { %12776 = vxpose.xlu1.b32.cont [3/16] (narrow) %v12566_v53, 8  ;;  %v12944_v53 = vld [vmem:[#allocation10 + $0x6e8] sm:$0xff] }
0x2bdd   : > { %v12567_v5 = vpop.trf.xlu0 }
0x2bde   : > { %12777 = vxpose.xlu1.b32.cont [4/16] (narrow) %v12567_v5, 8  ;;  %v12942_v5 = vld [vmem:[#allocation10 + $0x6d8] sm:$0xff] }
0x2be1   : > { %v12630_v55 = vpop.trf.xlu0 }
0x2be2   : > { %12778 = vxpose.xlu1.b32.cont [5/16] (narrow) %v12598_v41, 8  ;;  %v22612_v41 = vpack.c.bf16 %v12937_v42, %v12933_v49  ;;  %v12976_v49 = vld [vmem:[#allocation10 + $0x7e8] sm:$0xff] }
0x2be3   : > { %v22598_v37 = vpack.c.bf16 %v12976_v49, %v12972_v62  ;;  %v13204_v62 = vld [vmem:[#allocation13 + $0x7b8] sm:$0xff] }
0x2be5   : > { %v12631_v59 = vpop.trf.xlu0 }
0x2be6   : > { %12779 = vxpose.xlu1.b32.cont [6/16] (narrow) %v12599_v54, 8  ;;  %v22582_v54 = vpack.c.bf16 %v12944_v53, %v12940_v48  ;;  %v12974_v48 = vld [vmem:[#allocation10 + $0x7d8] sm:$0xff] }
0x2be7   : > { %v12978_v53 = vld [vmem:[#allocation10 + $0x7f8] sm:$0xff] }
0x2be8   : > { %22583 = vmatprep.subr.bf16.mxu1 %v22582_v54  ;;  %v12975_v54 = vld [vmem:[#allocation10 + $0x7e0] sm:$0xff] }
0x2be9   : > { %v12694_v1 = vpop.trf.xlu0 }
0x2bea   : > { %12780 = vxpose.xlu1.b32.cont [7/16] (narrow) %v12630_v55, 8  ;;  %v12946_v55 = vld [vmem:[#allocation10 + $0x6f8] sm:$0xff] }
0x2bed   : > { %v12695_v63 = vpop.trf.xlu0 }
0x2bee   : > { %12781 = vxpose.xlu1.b32.cont [8/16] (narrow) %v12631_v59, 8  ;;  %v22614_v59 = vpack.c.bf16 %v12946_v55, %v12942_v5  ;;  %v12971_v5 = vld [vmem:[#allocation10 + $0x7c0] sm:$0xff]  ;;  %v12973_v55 = vld [vmem:[#allocation10 + $0x7d0] sm:$0xff] }
0x2bf1   : > { %v12758_v9 = vpop.trf.xlu0 }
0x2bf2   : > { %12782 = vxpose.xlu1.b32.cont [9/16] (narrow) %v12662_v60, 8 }
0x2bf5   : > { %v12759_v12 = vpop.trf.xlu0 }
0x2bf6   : > { %12783 = vxpose.xlu1.b32.cont [10/16] (narrow) %v12663_v61, 8 }
0x2bfa   : > { %12784 = vxpose.xlu1.b32.cont [11/16] (narrow) %v12694_v1, 8 }
0x2bfe   : > { %12785 = vxpose.xlu1.b32.cont [12/16] (narrow) %v12695_v63, 8 }
0x2c02   : > { %12786 = vxpose.xlu1.b32.cont [13/16] (narrow) %v12726_v2, 8  ;;  %v12939_v2 = vld [vmem:[#allocation10 + $0x6c0] sm:$0xff] }
0x2c06   : > { %12787 = vxpose.xlu1.b32.cont [14/16] (narrow) %v12727_v6, 8  ;;  %v12943_v6 = vld [vmem:[#allocation10 + $0x6e0] sm:$0xff] }
0x2c0a   : > { %12788 = vxpose.xlu1.b32.cont [15/16] (narrow) %v12758_v9, 8  ;;  %v12941_v9 = vld [vmem:[#allocation10 + $0x6d0] sm:$0xff] }
0x2c0e   : > { %12789 = vxpose.xlu1.b32.end [16/16] (narrow) %v12759_v12, 8  ;;  %v22584_v12 = vpack.c.bf16 %v12943_v6, %v12939_v2  ;;  %v13166_v2 = vld [vmem:[#allocation13 + $0x688] sm:$0xff]  ;;  %v13197_v6 = vld [vmem:[#allocation13 + $0x780] sm:$0xff] }
0x2c10   : > { %22585 = vmatpush1.bf16.msra.mxu1 %v22584_v12  ;;  %v13198_v12 = vld [vmem:[#allocation13 + $0x788] sm:$0xff] }
0x2c52   : > { %v12790_v15 = vpop.trf.xlu1 }
0x2c53   : > { %21564 = vmatmul.mubr.f32.vlgmr.msra.gmra.mrb[58].mxu0 %v12790_v15  ;;  %v12945_v15 = vld [vmem:[#allocation10 + $0x6f0] sm:$0xff] }
0x2c54   : > { %13137 = vmatprep.mubr.f32.mxu0 %v23801_v0  ;;  %22605 = vmatpush1.bf16.msra.mxu0 %v22604_v28  ;;  %v12962_v28 = vld [vmem:[#allocation10 + $0x778] sm:$0xff] }
0x2c55   : > { %22607 = vmatprep.subr.bf16.mxu0 %v22606_v38  ;;  %v22622_v36 = vpack.c.bf16 %v12962_v28, %v12958_v30  ;;  %v12957_v38 = vld [vmem:[#allocation10 + $0x750] sm:$0xff]  ;;  %v13151_v30 = vld [vmem:[#allocation13 + $0x610] sm:$0xff] }
0x2c56   : > { %v22624_v40 = vpack.c.bf16 %v12961_v32, %v12957_v38  ;;  %v13169_v38 = vld [vmem:[#allocation13 + $0x6a0] sm:$0xff]  ;;  %v13170_v32 = vld [vmem:[#allocation13 + $0x6a8] sm:$0xff] }
0x2c58   : > { %22609 = vmatpush1.bf16.msra.mxu0 %v22608_v47  ;;  %v22626_v47 = vpack.c.bf16 %v12970_v4, %v12966_v44  ;;  %v13153_v44 = vld [vmem:[#allocation13 + $0x620] sm:$0xff]  ;;  %v13154_v4 = vld [vmem:[#allocation13 + $0x628] sm:$0xff] }
0x2c59   : > { %22611 = vmatprep.subr.bf16.mxu0 %v22610_v56  ;;  %v12969_v56 = vld [vmem:[#allocation10 + $0x7b0] sm:$0xff]  ;;  %v22644_v49 = vpack.c.bf16 %v13154_v4, %v13153_v44  ;;  %v13179_v4 = vld [vmem:[#allocation13 + $0x6f0] sm:$0xff] }
0x2c5a   : > { %v22628_v42 = vpack.c.bf16 %v12969_v56, %v12965_v35  ;;  %v13171_v35 = vld [vmem:[#allocation13 + $0x6b0] sm:$0xff] }
0x2c5b   : > { %v13203_v56 = vld [vmem:[#allocation13 + $0x7b0] sm:$0xff] }
0x2c5c   : > { %22613 = vmatpush1.bf16.msra.mxu0 %v22612_v41  ;;  %v22630_v41 = vpack.c.bf16 %v12978_v53, %v12974_v48  ;;  %v13156_v48 = vld [vmem:[#allocation13 + $0x638] sm:$0xff] }
0x2c5d   : > { %22615 = vmatprep.subr.bf16.mxu0 %v22614_v59  ;;  %v12977_v59 = vld [vmem:[#allocation10 + $0x7f0] sm:$0xff] }
0x2d26   : > { %v12897_v20 = vpop.f32.mrb[58].mxu0 }
0x2d27   : > { %v12898_v23 = vadd.f32 %v20092_v18, %v12897_v20  ;;  %v21565_v3 = vpop.f32.mrb[59].mxu0  ;;  %v22616_v18 = vpack.c.bf16 %v12945_v15, %v12941_v9  ;;  %v12948_v20 = vld [vmem:[#allocation10 + $0x708] sm:$0xff]  ;;  %v22666_v15 = vpack.c.bf16 %v13198_v12, %v13197_v6  ;;  %v13157_v6 = vld [vmem:[#allocation13 + $0x640] sm:$0xff] }
0x2d28   : > { %v12950_v3 = vld [vmem:[#allocation10 + $0x718] sm:$0xff] }
0x2d29   : > { %v12901_v13 = vadd.f32 %v12898_v23, %v24790_v50  ;;  %v12952_v23 = vld [vmem:[#allocation10 + $0x728] sm:$0xff]  ;;  %22617 = vmatpush1.bf16.msra.mxu0 %v22616_v18  ;;  %v22618_v51 = vpack.c.bf16 %v12954_v21, %v12950_v3  ;;  %v13149_v3 = vld [vmem:[#allocation13 + $0x600] sm:$0xff] }
0x2d2a   : > { %v22586_v10 = vpack.c.bf16 %v12952_v23, %v12948_v20  ;;  %v13181_v21 = vld [vmem:[#allocation13 + $0x700] sm:$0xff] }
0x2d2b   : > { %12902 = vadd.xlane.f32.xlu0 %v12901_v13  ;;  %22619 = vmatprep.subr.bf16.mxu0 %v22618_v51 }
0x2d2c   : > { %22587 = vmatprep.subr.bf16.mxu1 %v22586_v10  ;;  %v13150_v10 = vld [vmem:[#allocation13 + $0x608] sm:$0xff] }
0x2d2d   : > { %22621 = vmatpush1.bf16.msra.mxu0 %v22620_v26  ;;  %v22636_v19 = vpack.c.bf16 %v13150_v10, %v13149_v3  ;;  %v13176_v3 = vld [vmem:[#allocation13 + $0x6d8] sm:$0xff]  ;;  %v13207_v10 = vld [vmem:[#allocation13 + $0x7d0] sm:$0xff] }
0x2d2e   : > { %22623 = vmatprep.subr.bf16.mxu0 %v22622_v36  ;;  %v13183_v36 = vld [vmem:[#allocation13 + $0x710] sm:$0xff] }
0x2d31   : > { %22625 = vmatpush1.bf16.msra.mxu0 %v22624_v40  ;;  %v13202_v40 = vld [vmem:[#allocation13 + $0x7a8] sm:$0xff] }
0x2d32   : > { %22627 = vmatprep.subr.bf16.mxu0 %v22626_v47  ;;  %v22674_v47 = vpack.c.bf16 %v13202_v40, %v13201_v39  ;;  %v13162_v39 = vld [vmem:[#allocation13 + $0x668] sm:$0xff]  ;;  %v13193_v40 = vld [vmem:[#allocation13 + $0x760] sm:$0xff] }
0x2d35   : > { %22629 = vmatpush1.bf16.msra.mxu0 %v22628_v42  ;;  %v22676_v42 = vpack.c.bf16 %v13186_v57, %v13185_v17  ;;  %v13212_v57 = vld [vmem:[#allocation13 + $0x7f8] sm:$0xff] }
0x2d36   : > { %22631 = vmatprep.subr.bf16.mxu0 %v22630_v41  ;;  %v13187_v41 = vld [vmem:[#allocation13 + $0x730] sm:$0xff] }
0x2db8   : > { %v12903_v60 = vpop.xlane.xlu0 %12902 }
0x2db9   : > { %v12904_v61 = vmul.f32 0.0078125, %v12903_v60  ;;  %v22600_v60 = vpack.c.bf16 %v12975_v54, %v12971_v5  ;;  %v22678_v5 = vpack.c.bf16 %v13204_v62, %v13203_v56  ;;  %v13188_v54 = vld [vmem:[#allocation13 + $0x738] sm:$0xff] }
0x2dbb   : > { %v24954_v1 = vsub.f32 %v12901_v13, %v12904_v61  ;;  %v12951_v13 = vld [vmem:[#allocation10 + $0x720] sm:$0xff]  ;;  %v22632_v61 = vpack.c.bf16 %v12977_v59, %v12973_v55  ;;  %v13173_v55 = vld [vmem:[#allocation13 + $0x6c0] sm:$0xff] }
0x2dbc   : > { %v22588_v25 = vpack.c.bf16 %v12951_v13, %v12947_v14  ;;  %v13182_v14 = vld [vmem:[#allocation13 + $0x708] sm:$0xff]  ;;  %v13167_v13 = vld [vmem:[#allocation13 + $0x690] sm:$0xff] }
0x2dbd   : > { %v12906_v63 = vmul.f32 %v24954_v1, %v24954_v1  ;;  %22633 = vmatpush1.bf16.msra.mxu0 %v22632_v61  ;;  %v22668_v29 = vpack.c.bf16 %v13182_v14, %v13181_v21  ;;  %v13174_v59 = vld [vmem:[#allocation13 + $0x6c8] sm:$0xff]  ;;  %v13208_v21 = vld [vmem:[#allocation13 + $0x7d8] sm:$0xff] }
0x2dbe   : > { %22589 = vmatpush1.bf16.msra.mxu1 %v22588_v25  ;;  %22667 = vmatprep.subr.bf16.mxu0 %v22666_v15  ;;  %v13168_v25 = vld [vmem:[#allocation13 + $0x698] sm:$0xff]  ;;  %v13206_v61 = vld [vmem:[#allocation13 + $0x7c8] sm:$0xff]  ;;  %v22650_v12 = vpack.c.bf16 %v13174_v59, %v13173_v55  ;;  %v22686_v22 = vpack.c.bf16 %v13208_v21, %v13207_v10  ;;  %v20093_v10 = vld [vmem:[#allocation14 + $0x3] ss:$0 sm:$0xff] }
0x2dbf   : > { %12907 = vadd.xlane.f32.xlu0 %v12906_v63  ;;  %22591 = vmatprep.subr.bf16.mxu1 %v22590_v24  ;;  %v13165_v63 = vld [vmem:[#allocation13 + $0x680] sm:$0xff]  ;;  %v13152_v24 = vld [vmem:[#allocation13 + $0x618] sm:$0xff]  ;;  %v22638_v34 = vpack.c.bf16 %v13168_v25, %v13167_v13 }
0x2dc0   : > { %v22634_v9 = vpack.c.bf16 %v13166_v2, %v13165_v63  ;;  %v22680_v2 = vpack.c.bf16 %v13188_v54, %v13187_v41  ;;  %v13160_v25 = vld [vmem:[#allocation13 + $0x658] sm:$0xff] }
0x2dc2   : > { %22593 = vmatpush1.bf16.msra.mxu1 %v22592_v31  ;;  %v13184_v31 = vld [vmem:[#allocation13 + $0x718] sm:$0xff] }
0x2dc3   : > { %22595 = vmatprep.subr.bf16.mxu1 %v22594_v46  ;;  %v22672_v43 = vpack.c.bf16 %v13184_v31, %v13183_v36  ;;  %v22642_v46 = vpack.c.bf16 %v13170_v32, %v13169_v38  ;;  %v13161_v32 = vld [vmem:[#allocation13 + $0x660] sm:$0xff] }
0x2dc6   : > { %22597 = vmatpush1.bf16.msra.mxu1 %v22596_v11  ;;  %v13172_v11 = vld [vmem:[#allocation13 + $0x6b8] sm:$0xff] }
0x2dc7   : > { %22599 = vmatprep.subr.bf16.mxu1 %v22598_v37  ;;  %v13155_v37 = vld [vmem:[#allocation13 + $0x630] sm:$0xff]  ;;  %v22646_v53 = vpack.c.bf16 %v13172_v11, %v13171_v35  ;;  %v13164_v11 = vld [vmem:[#allocation13 + $0x678] sm:$0xff] }
0x2dc8   : > { %v22648_v63 = vpack.c.bf16 %v13156_v48, %v13155_v37  ;;  %v13163_v35 = vld [vmem:[#allocation13 + $0x670] sm:$0xff] }
0x2dc9   : > { %v22664_v62 = vpack.c.bf16 %v13164_v11, %v13163_v35  ;;  %v12980_v48 = vld [vmem:[#allocation11 + $0xc] sm:$0xf]  ;;  %v13391_v35 = vld [vmem:[#allocation2 + $0x678] sm:$0xff]  ;;  %v13390_v11 = vld [vmem:[#allocation2 + $0x670] sm:$0xff] }
0x2dca   : > { %22601 = vmatpush1.bf16.msra.mxu1 %v22600_v60  ;;  %v13205_v60 = vld [vmem:[#allocation13 + $0x7c0] sm:$0xff]  ;;  %v12989_v41 = vrot.slane %v12980_v48, %v24153_v58  ;;  %v12997_v54 = vrot.slane %v12980_v48, %v24366_v8 }
0x2dcb   : > { %22635 = vmatprep.subr.bf16.mxu1 %v22634_v9  ;;  %v13158_v9 = vld [vmem:[#allocation13 + $0x648] sm:$0xff]  ;;  %v22682_v15 = vpack.c.bf16 %v13206_v61, %v13205_v60 }
0x2dcc   : > { %v22652_v14 = vpack.c.bf16 %v13158_v9, %v13157_v6 }
0x2e4c   : > { %v12908_v18 = vpop.xlane.xlu0 %12907 }
0x2e4d   : > { %v12909_v20 = vmul.f32 0.007874016, %v12908_v18  ;;  %v13189_v18 = vld [vmem:[#allocation13 + $0x740] sm:$0xff] }
0x2e4f   : > { %v12910_v23 = vadd.f32 1e-08, %v12909_v20  ;;  %v13190_v20 = vld [vmem:[#allocation13 + $0x748] sm:$0xff] }
0x2e50   : > { %v22684_v13 = vpack.c.bf16 %v13190_v20, %v13189_v18 }
0x2e51   : > { %23391 = vrsqrt.f32 %v12910_v23  ;;  %v13175_v23 = vld [vmem:[#allocation13 + $0x6d0] sm:$0xff] }
0x2e52   : > { %v22654_v16 = vpack.c.bf16 %v13176_v3, %v13175_v23 }
0x2e5b   : > { %v23392_v51 = vpop.eup %23391 }
0x2e5c   : > { %v12912_v26 = vmul.f32 %v23392_v51, %v24954_v1  ;;  %v22640_v1 = vpack.c.bf16 %v13152_v24, %v13151_v30  ;;  %v13159_v51 = vld [vmem:[#allocation13 + $0x650] sm:$0xff]  ;;  %v13178_v30 = vld [vmem:[#allocation13 + $0x6e8] sm:$0xff]  ;;  %v13209_v24 = vld [vmem:[#allocation13 + $0x7e0] sm:$0xff] }
0x2e5e   : > { %v24960_v28 = vmul.f32 %v12912_v26, %v24356_v33  ;;  %v13191_v26 = vld [vmem:[#allocation13 + $0x750] sm:$0xff] }
0x2e60   : > { %13067 = vmatmul.mubr.f32.vlgmr.msra.gmra.mrb[116].mxu1 %v24960_v28  ;;  %13138 = vmatmul.mubr.f32.vlgmr.msra.gmra.mrb[60].mxu0 %v24960_v28 }
0x2e61   : > { %22637 = vmatpush3.bf16.msra.mxu1 %v22636_v19  ;;  %22669 = vmatpush3.bf16.msra.mxu0 %v22668_v29  ;;  %v13192_v19 = vld [vmem:[#allocation13 + $0x758] sm:$0xff]  ;;  %v13177_v29 = vld [vmem:[#allocation13 + $0x6e0] sm:$0xff] }
0x2e62   : > { %22639 = vmatprep.subr.bf16.mxu1 %v22638_v34  ;;  %22671 = vmatprep.subr.bf16.mxu0 %v22670_v27  ;;  %v13210_v34 = vld [vmem:[#allocation13 + $0x7e8] sm:$0xff]  ;;  %v22656_v27 = vpack.c.bf16 %v13160_v25, %v13159_v51  ;;  %v22688_v36 = vpack.c.bf16 %v13192_v19, %v13191_v26  ;;  %v22658_v31 = vpack.c.bf16 %v13178_v30, %v13177_v29  ;;  %v13377_v26 = vld [vmem:[#allocation2 + $0x608] sm:$0xff]  ;;  %v13380_v19 = vld [vmem:[#allocation2 + $0x620] sm:$0xff] }
0x2e63   : > { %v22690_v38 = vpack.c.bf16 %v13210_v34, %v13209_v24  ;;  %v13376_v29 = vld [vmem:[#allocation2 + $0x600] sm:$0xff]  ;;  %v22698_v30 = vpack.c.bf16 %v13380_v19, %v13377_v26  ;;  %v13379_v24 = vld [vmem:[#allocation2 + $0x618] sm:$0xff]  ;;  %v13378_v34 = vld [vmem:[#allocation2 + $0x610] sm:$0xff] }
0x2e64   : > { %v13411_v26 = vld [vmem:[#allocation2 + $0x718] sm:$0xff]  ;;  %v13413_v19 = vld [vmem:[#allocation2 + $0x728] sm:$0xff] }
0x2e65   : > { %22641 = vmatpush3.bf16.msra.mxu1 %v22640_v1  ;;  %22673 = vmatpush3.bf16.msra.mxu0 %v22672_v43  ;;  %v22660_v1 = vpack.c.bf16 %v13162_v39, %v13161_v32  ;;  %v13194_v43 = vld [vmem:[#allocation13 + $0x768] sm:$0xff]  ;;  %v13386_v32 = vld [vmem:[#allocation2 + $0x650] sm:$0xff] }
0x2e66   : > { %22643 = vmatprep.subr.bf16.mxu1 %v22642_v46  ;;  %22675 = vmatprep.subr.bf16.mxu0 %v22674_v47  ;;  %v22692_v44 = vpack.c.bf16 %v13194_v43, %v13193_v40  ;;  %v13180_v46 = vld [vmem:[#allocation13 + $0x6f8] sm:$0xff]  ;;  %v13211_v47 = vld [vmem:[#allocation13 + $0x7f0] sm:$0xff]  ;;  %v13382_v39 = vld [vmem:[#allocation2 + $0x630] sm:$0xff] }
0x2e67   : > { %v22662_v17 = vpack.c.bf16 %v13180_v46, %v13179_v4  ;;  %v22694_v56 = vpack.c.bf16 %v13212_v57, %v13211_v47  ;;  %v13384_v43 = vld [vmem:[#allocation2 + $0x640] sm:$0xff]  ;;  %v13389_v46 = vld [vmem:[#allocation2 + $0x668] sm:$0xff] }
0x2e68   : > { %v13392_v47 = vld [vmem:[#allocation2 + $0x680] sm:$0xff] }
0x2e69   : > { %22645 = vmatpush3.bf16.msra.mxu1 %v22644_v49  ;;  %22677 = vmatpush3.bf16.msra.mxu0 %v22676_v42  ;;  %v13195_v49 = vld [vmem:[#allocation13 + $0x770] sm:$0xff]  ;;  %v13196_v42 = vld [vmem:[#allocation13 + $0x778] sm:$0xff]  ;;  %v22706_v57 = vpack.c.bf16 %v13392_v47, %v13389_v46 }
0x2e6a   : > { %22647 = vmatprep.subr.bf16.mxu1 %v22646_v53  ;;  %22679 = vmatprep.subr.bf16.mxu0 %v22678_v5  ;;  %v22696_v37 = vpack.c.bf16 %v13196_v42, %v13195_v49  ;;  %v12985_v53 = vrot.slane %v12980_v48, %v24146_v52  ;;  %v12993_v5 = vrot.slane %v12980_v48, %v24260_v45 }
0x2e6d   : > { %22649 = vmatpush3.bf16.msra.mxu1 %v22648_v63  ;;  %22681 = vmatpush3.bf16.msra.mxu0 %v22680_v2 }
0x2e6e   : > { %22651 = vmatprep.subr.bf16.mxu1 %v22650_v12  ;;  %22683 = vmatprep.subr.bf16.mxu0 %v22682_v15 }
0x2e71   : > { %22653 = vmatpush3.bf16.msra.mxu1 %v22652_v14  ;;  %22685 = vmatpush3.bf16.msra.mxu0 %v22684_v13 }
0x2e72   : > { %22655 = vmatprep.subr.bf16.mxu1 %v22654_v16  ;;  %22687 = vmatprep.subr.bf16.mxu0 %v22686_v22 }
0x2e75   : > { %22657 = vmatpush3.bf16.msra.mxu1 %v22656_v27  ;;  %22689 = vmatpush3.bf16.msra.mxu0 %v22688_v36  ;;  %v13381_v27 = vld [vmem:[#allocation2 + $0x628] sm:$0xff]  ;;  %v22700_v36 = vpack.c.bf16 %v13379_v24, %v13376_v29  ;;  %v13416_v29 = vld [vmem:[#allocation2 + $0x740] sm:$0xff] }
0x2e76   : > { %22659 = vmatprep.subr.bf16.mxu1 %v22658_v31  ;;  %22691 = vmatprep.subr.bf16.mxu0 %v22690_v38  ;;  %v22731_v31 = vpack.c.bf16 %v13381_v27, %v13378_v34  ;;  %v13383_v38 = vld [vmem:[#allocation2 + $0x638] sm:$0xff]  ;;  %v22722_v24 = vpack.c.bf16 %v13416_v29, %v13413_v19  ;;  %v13412_v34 = vld [vmem:[#allocation2 + $0x720] sm:$0xff] }
0x2e77   : > { %v22702_v40 = vpack.c.bf16 %v13386_v32, %v13383_v38  ;;  %v13415_v27 = vld [vmem:[#allocation2 + $0x738] sm:$0xff]  ;;  %v13422_v32 = vld [vmem:[#allocation2 + $0x770] sm:$0xff] }
0x2e78   : > { %v13419_v38 = vld [vmem:[#allocation2 + $0x758] sm:$0xff] }
0x2e79   : > { %22661 = vmatpush3.bf16.msra.mxu1 %v22660_v1  ;;  %22693 = vmatpush3.bf16.msra.mxu0 %v22692_v44  ;;  %v13385_v1 = vld [vmem:[#allocation2 + $0x648] sm:$0xff]  ;;  %v13387_v44 = vld [vmem:[#allocation2 + $0x658] sm:$0xff] }
0x2e7a   : > { %22663 = vmatprep.subr.bf16.mxu1 %v22662_v17  ;;  %22695 = vmatprep.subr.bf16.mxu0 %v22694_v56  ;;  %v22734_v4 = vpack.c.bf16 %v13387_v44, %v13384_v43  ;;  %v13388_v17 = vld [vmem:[#allocation2 + $0x660] sm:$0xff]  ;;  %v13393_v56 = vld [vmem:[#allocation2 + $0x688] sm:$0xff]  ;;  %v13418_v43 = vld [vmem:[#allocation2 + $0x750] sm:$0xff] }
0x2e7b   : > { %v22737_v49 = vpack.c.bf16 %v13393_v56, %v13390_v11  ;;  %v13421_v44 = vld [vmem:[#allocation2 + $0x768] sm:$0xff] }
0x2e7c   : > { %v22728_v46 = vpack.c.bf16 %v13421_v44, %v13418_v43 }
0x2e7d   : > { %22665 = vmatpush3.bf16.msra.mxu1 %v22664_v62  ;;  %22697 = vmatpush3.bf16.msra.mxu0 %v22696_v37  ;;  %v22708_v62 = vpack.c.bf16 %v13391_v35, %v13388_v17 }
0x2e7e   : > { %22730 = vmatprep.subr.bf16.mxu0 %v23802_v7  ;;  %22699 = vmatprep.subr.bf16.mxu1 %v22698_v30 }
0x2f33   : > { %v13068_v55 = vpop.f32.mrb[116].mxu1  ;;  %v13139_v59 = vpop.f32.mrb[60].mxu0 }
0x2f34   : > { %v13069_v60 = vadd.f32 %v13068_v55, %v12985_v53  ;;  %v13140_v61 = vadd.f32 %v13139_v59, %v12993_v5  ;;  %v13070_v63 = vpop.f32.mrb[117].mxu1  ;;  %v13141_v2 = vpop.f32.mrb[61].mxu0  ;;  %v13395_v5 = vld [vmem:[#allocation2 + $0x698] sm:$0xff]  ;;  %v13394_v55 = vld [vmem:[#allocation2 + $0x690] sm:$0xff]  ;;  %v13397_v59 = vld [vmem:[#allocation2 + $0x6a8] sm:$0xff] }
0x2f35   : > { %v13071_v6 = vadd.f32 %v13070_v63, %v12989_v41  ;;  %v13142_v9 = vadd.f32 %v13141_v2, %v12997_v54  ;;  %v13398_v41 = vld [vmem:[#allocation2 + $0x6b0] sm:$0xff]  ;;  %v13399_v63 = vld [vmem:[#allocation2 + $0x6b8] sm:$0xff] }
0x2f36   : > { %v13144_v18 = vmax.f32 %v13069_v60, 0.0  ;;  %v13146_v20 = vmax.f32 %v13140_v61, 0.0  ;;  %v22710_v54 = vpack.c.bf16 %v13398_v41, %v13395_v5  ;;  %v13396_v60 = vld [vmem:[#allocation2 + $0x6a0] sm:$0xff]  ;;  %v22712_v61 = vpack.c.bf16 %v13397_v59, %v13394_v55 }
0x2f37   : > { %v13145_v12 = vmax.f32 %v13071_v6, 0.0  ;;  %v13147_v15 = vmax.f32 %v13142_v9, 0.0  ;;  %v22740_v2 = vpack.c.bf16 %v13399_v63, %v13396_v60  ;;  %v13401_v6 = vld [vmem:[#allocation2 + $0x6c8] sm:$0xff]  ;;  %v13404_v9 = vld [vmem:[#allocation2 + $0x6e0] sm:$0xff] }
0x2f39   : > { %13285 = vmatprep.mubr.f32.mxu1 %v13145_v12  ;;  %13355 = vmatprep.mubr.f32.mxu0 %v13147_v15  ;;  %v22714_v12 = vpack.c.bf16 %v13404_v9, %v13401_v6  ;;  %v13400_v15 = vld [vmem:[#allocation2 + $0x6c0] sm:$0xff] }
0x2f3a   : > { %13286 = vmatmul.mubr.f32.vlgmr.msra.gmra.mrb[118].mxu1 %v13144_v18  ;;  %13356 = vmatmul.mubr.f32.vlgmr.msra.gmra.mrb[62].mxu0 %v13146_v20  ;;  %v13403_v18 = vld [vmem:[#allocation2 + $0x6d8] sm:$0xff]  ;;  %v13402_v20 = vld [vmem:[#allocation2 + $0x6d0] sm:$0xff] }
0x2f3b   : > { %13506 = vmatprep.mubr.f32.mxu1 %v23801_v0  ;;  %21598 = vmatprep.mubr.msk.f32.mxu0 %vm23803_vm0, %v23801_v0 }
0x2f3c   : > { %22701 = vmatpush1.bf16.msra.mxu1 %v22700_v36  ;;  %22732 = vmatpush3.bf16.msra.mxu0 %v22731_v31  ;;  %v13414_v36 = vld [vmem:[#allocation2 + $0x730] sm:$0xff]  ;;  %v13417_v31 = vld [vmem:[#allocation2 + $0x748] sm:$0xff] }
0x2f3d   : > { %22703 = vmatprep.subr.bf16.mxu1 %v22702_v40  ;;  %22733 = vmatprep.subr.bf16.mxu0 %v23802_v7  ;;  %v22749_v40 = vpack.c.bf16 %v13417_v31, %v13414_v36 }
0x2f40   : > { %22735 = vmatpush3.bf16.msra.mxu0 %v22734_v4  ;;  %v13423_v4 = vld [vmem:[#allocation2 + $0x778] sm:$0xff] }
0x2f41   : > { %22736 = vmatprep.subr.bf16.mxu0 %v23802_v7 }
0x2f44   : > { %22738 = vmatpush3.bf16.msra.mxu0 %v22737_v49 }
0x2f45   : > { %22739 = vmatprep.subr.bf16.mxu0 %v23802_v7 }
0x2f48   : > { %22741 = vmatpush3.bf16.msra.mxu0 %v22740_v2 }
0x2f49   : > { %22742 = vmatprep.subr.bf16.mxu0 %v23802_v7 }
0x300d   : > { %v20656_v23 = vpop.f32.mrb[118].mxu1  ;;  %v20691_v3 = vpop.f32.mrb[62].mxu0 }
0x300e   : > { %v20657_v21 = vpop.f32.mrb[119].mxu1  ;;  %v20692_v14 = vpop.f32.mrb[63].mxu0 }
0x300f   : > { %v20658_v13 = vadd.f32 %v20657_v21, %v20656_v23  ;;  %v20693_v51 = vadd.f32 %v20692_v14, %v20691_v3  ;;  %v22716_v23 = vpack.c.bf16 %v13403_v18, %v13400_v15  ;;  %v13405_v3 = vld [vmem:[#allocation2 + $0x6e8] sm:$0xff]  ;;  %v13410_v21 = vld [vmem:[#allocation2 + $0x710] sm:$0xff] }
0x3010   : > { %v22743_v14 = vpack.c.bf16 %v13405_v3, %v13402_v20 }
0x3011   : > { %v13288_v25 = vadd.f32 %v20658_v13, %v20093_v10  ;;  %v13407_v10 = vld [vmem:[#allocation2 + $0x6f8] sm:$0xff] }
0x3012   : > { %v22718_v13 = vpack.c.bf16 %v13410_v21, %v13407_v10  ;;  %22744 = vmatpush3.bf16.msra.mxu0 %v22743_v14 }
0x3013   : > { %v13358_v16 = vadd.f32 %v20693_v51, %v13288_v25  ;;  %v13406_v51 = vld [vmem:[#allocation2 + $0x6f0] sm:$0xff]  ;;  %v13409_v25 = vld [vmem:[#allocation2 + $0x708] sm:$0xff]  ;;  %22745 = vmatprep.subr.bf16.mxu0 %v23802_v7 }
0x3015   : > { %v13361_v22 = vadd.f32 %v13358_v16, %v24960_v28  ;;  %v22704_v28 = vpack.c.bf16 %v13385_v1, %v13382_v39  ;;  %v13408_v16 = vld [vmem:[#allocation2 + $0x700] sm:$0xff]  ;;  %v22724_v39 = vpack.c.bf16 %v13415_v27, %v13412_v34  ;;  %v22726_v1 = vpack.c.bf16 %v13422_v32, %v13419_v38 }
0x3016   : > { %v22746_v30 = vpack.c.bf16 %v13411_v26, %v13408_v16 }
0x3017   : > { %13362 = vadd.xlane.f32.xlu0 %v13361_v22  ;;  %22705 = vmatpush1.bf16.msra.mxu1 %v22704_v28  ;;  %v13420_v28 = vld [vmem:[#allocation2 + $0x760] sm:$0xff] }
0x3018   : > { %22707 = vmatprep.subr.bf16.mxu1 %v22706_v57  ;;  %22747 = vmatpush3.bf16.msra.mxu0 %v22746_v30  ;;  %v22752_v47 = vpack.c.bf16 %v13423_v4, %v13420_v28 }
0x3019   : > { %22748 = vmatprep.subr.bf16.mxu0 %v23802_v7 }
0x301b   : > { %22709 = vmatpush1.bf16.msra.mxu1 %v22708_v62 }
0x301c   : > { %22711 = vmatprep.subr.bf16.mxu1 %v22710_v54  ;;  %22750 = vmatpush3.bf16.msra.mxu0 %v22749_v40 }
0x301d   : > { %22751 = vmatprep.subr.bf16.mxu0 %v23802_v7 }
0x301f   : > { %22713 = vmatpush1.bf16.msra.mxu1 %v22712_v61 }
0x3020   : > { %22715 = vmatprep.subr.bf16.mxu1 %v22714_v12  ;;  %22753 = vmatpush3.bf16.msra.mxu0 %v22752_v47 }
0x3021   : > { %21641 = vmatprep.subr.mxu0 %v23801_v0 }
0x3023   : > { %22717 = vmatpush1.bf16.msra.mxu1 %v22716_v23 }
0x3024   : > { %22719 = vmatprep.subr.bf16.mxu1 %v22718_v13 }
0x30a4   : > { %v13363_v42 = vpop.xlane.xlu0 %13362 }
0x30a5   : > { %v13364_v37 = vmul.f32 0.0078125, %v13363_v42  ;;  %v24997_v42 = vld [vmem:[#allocation5 + $0xc] sm:$0x7] }
0x30a7   : > { %v24976_v48 = vsub.f32 %v13361_v22, %v13364_v37  ;;  %v22720_v22 = vpack.c.bf16 %v13409_v25, %v13406_v51  ;;  %v13430_v37 = vrot.slane %v24997_v42, %v24146_v52 }
0x30a9   : > { %v13366_v53 = vmul.f32 %v24976_v48, %v24976_v48  ;;  %22721 = vmatpush1.bf16.msra.mxu1 %v22720_v22 }
0x30aa   : > { %22723 = vmatprep.subr.bf16.mxu1 %v22722_v24 }
0x30ab   : > { %13367 = vadd.xlane.f32.xlu0 %v13366_v53 }
0x30ad   : > { %22725 = vmatpush1.bf16.msra.mxu1 %v22724_v39 }
0x30ae   : > { %22727 = vmatprep.subr.bf16.mxu1 %v22726_v1 }
0x30b1   : > { %22729 = vmatpush1.bf16.msra.mxu1 %v22728_v46 }
0x30b2   : > { %21601 = vmatprep.subr.mxu1 %v23801_v0 }
0x3138   : > { %v13368_v17 = vpop.xlane.xlu0 %13367 }
0x3139   : > { %v13369_v57 = vmul.f32 0.007874016, %v13368_v17 }
0x313b   : > { %v13370_v35 = vadd.f32 1e-08, %v13369_v57 }
0x313d   : > { %23393 = vrsqrt.f32 %v13370_v35 }
0x3147   : > { %v23394_v11 = vpop.eup %23393 }
0x3148   : > { %v13372_v56 = vmul.f32 %v23394_v11, %v24976_v48  ;;  %v13434_v48 = vrot.slane %v24997_v42, %v24153_v58 }
0x314a   : > { %v13373_v62 = vmul.f32 %v13372_v56, %v24356_v33 }
0x314c   : > { %v24989_v49 = vadd.f32 %v13373_v62, %v24790_v50 }
0x314e   : > { %13507 = vmatmul.mubr.f32.vlgmr.msra.gmra.mrb[120].mxu1 %v24989_v49  ;;  %21599 = vmatmul.mubr.f32.vlgmr.msra.gmra.mrb[64].mxu0 %v24989_v49 }
0x314f   : > { %21603 = vmatprep.mubr.msk.f32.mxu1 %vm23803_vm0, %v23801_v0  ;;  %21643 = vmatprep.mubr.msk.f32.mxu0 %vm23803_vm0, %v23801_v0 }
0x3221   : > { %v13508_v50 = vpop.f32.mrb[120].mxu1  ;;  %v25003_v53 = vpop.f32.mrb[64].mxu0 }
0x3222   : > { %v13509_v5 = vadd.f32 %v13508_v50, %v13430_v37  ;;  %v13510_v41 = vpop.f32.mrb[121].mxu1  ;;  %v21600_v54 = vpop.f32.mrb[65].mxu0  ;;  %v23471_v50 = vld [vmem:[%s24235_s22] ss:$0 sm:$0xff] }
0x3223   : > { %v13511_v55 = vadd.f32 %v13510_v41, %v13434_v48 }
0x3224   : > { %13583 = vxpose.xlu1.b32.start.end [1/1] (short) %v13509_v5, 128 }
0x3225   : > { %13615 = vxpose.xlu0.b32.start.end [1/1] (short) %v13511_v55, 128 }
0x32a4   : > { %v13599_v59 = vpop.trf.xlu1 }
0x32a5   : > { %v13631_v60 = vpop.trf.xlu0  ;;  %13679 = vxpose.xlu0.b32.start [1/2] (short) (narrow) %v13599_v59, 8 }
0x32a6   : > { %13935 = vxpose.xlu1.b32.start [1/2] (short) (narrow) %v13631_v60, 8 }
0x32a8   : > { %v13600_v61 = vpop.trf.xlu1 }
0x32a9   : > { %v13632_v63 = vpop.trf.xlu0  ;;  %13680 = vxpose.xlu0.b32.end [2/2] (short) (narrow) %v13600_v61, 8 }
0x32aa   : > { %13936 = vxpose.xlu1.b32.end [2/2] (short) (narrow) %v13632_v63, 8 }
0x32ac   : > { %v13601_v2 = vpop.trf.xlu1 }
0x32ad   : > { %v13633_v6 = vpop.trf.xlu0 }
0x32ae   : > { %13711 = vxpose.xlu1.b32.start [1/2] (short) (narrow) %v13601_v2, 8 }
0x32b0   : > { %v13602_v9 = vpop.trf.xlu1 }
0x32b1   : > { %v13634_v12 = vpop.trf.xlu0 }
0x32b2   : > { %13712 = vxpose.xlu1.b32.end [2/2] (short) (narrow) %v13602_v9, 8 }
0x32b4   : > { %v13603_v15 = vpop.trf.xlu1 }
0x32b5   : > { %v13635_v18 = vpop.trf.xlu0 }
0x32b6   : > { %13967 = vxpose.xlu1.b32.start [1/2] (short) (narrow) %v13633_v6, 8 }
0x32b8   : > { %v13604_v20 = vpop.trf.xlu1 }
0x32b9   : > { %v13636_v23 = vpop.trf.xlu0 }
0x32ba   : > { %13968 = vxpose.xlu1.b32.end [2/2] (short) (narrow) %v13634_v12, 8 }
0x32bc   : > { %v13605_v3 = vpop.trf.xlu1 }
0x32bd   : > { %v13637_v10 = vpop.trf.xlu0  ;;  %13775 = vxpose.xlu0.b32.start [1/2] (short) (narrow) %v13605_v3, 8 }
0x32be   : > { %13743 = vxpose.xlu1.b32.start [1/2] (short) (narrow) %v13603_v15, 8 }
0x32c0   : > { %v13606_v21 = vpop.trf.xlu1 }
0x32c1   : > { %v13638_v14 = vpop.trf.xlu0  ;;  %13776 = vxpose.xlu0.b32.end [2/2] (short) (narrow) %v13606_v21, 8 }
0x32c2   : > { %13744 = vxpose.xlu1.b32.end [2/2] (short) (narrow) %v13604_v20, 8 }
0x32c4   : > { %v13607_v13 = vpop.trf.xlu1 }
0x32c5   : > { %v13639_v51 = vpop.trf.xlu0  ;;  %13807 = vxpose.xlu0.b32.start [1/2] (short) (narrow) %v13607_v13, 8 }
0x32c6   : > { %13999 = vxpose.xlu1.b32.start [1/2] (short) (narrow) %v13635_v18, 8 }
0x32c8   : > { %v13608_v25 = vpop.trf.xlu1 }
0x32c9   : > { %13808 = vxpose.xlu0.b32.end [2/2] (short) (narrow) %v13608_v25, 8  ;;  %v13640_v16 = vpop.trf.xlu0 }
0x32ca   : > { %14000 = vxpose.xlu1.b32.end [2/2] (short) (narrow) %v13636_v23, 8 }
0x32cc   : > { %v13609_v22 = vpop.trf.xlu1 }
0x32cd   : > { %13839 = vxpose.xlu0.b32.start [1/2] (short) (narrow) %v13609_v22, 8  ;;  %v13641_v19 = vpop.trf.xlu0 }
0x32ce   : > { %14031 = vxpose.xlu1.b32.start [1/2] (short) (narrow) %v13637_v10, 8 }
0x32d0   : > { %v13610_v26 = vpop.trf.xlu1 }
0x32d1   : > { %13840 = vxpose.xlu0.b32.end [2/2] (short) (narrow) %v13610_v26, 8  ;;  %v13642_v30 = vpop.trf.xlu0 }
0x32d2   : > { %14032 = vxpose.xlu1.b32.end [2/2] (short) (narrow) %v13638_v14, 8 }
0x32d4   : > { %v13611_v29 = vpop.trf.xlu1 }
0x32d5   : > { %13871 = vxpose.xlu0.b32.start [1/2] (short) (narrow) %v13611_v29, 8  ;;  %v13643_v27 = vpop.trf.xlu0  ;;  %v13438_v29 = vrot.slane %v24997_v42, %v24260_v45 }
0x32d6   : > { %14063 = vxpose.xlu1.b32.start [1/2] (short) (narrow) %v13639_v51, 8 }
0x32d8   : > { %v13612_v24 = vpop.trf.xlu1 }
0x32d9   : > { %13872 = vxpose.xlu0.b32.end [2/2] (short) (narrow) %v13612_v24, 8  ;;  %v13644_v31 = vpop.trf.xlu0 }
0x32da   : > { %14064 = vxpose.xlu1.b32.end [2/2] (short) (narrow) %v13640_v16, 8 }
0x32dc   : > { %v13613_v34 = vpop.trf.xlu1 }
0x32dd   : > { %13903 = vxpose.xlu0.b32.start [1/2] (short) (narrow) %v13613_v34, 8  ;;  %v13645_v38 = vpop.trf.xlu0 }
0x32de   : > { %14095 = vxpose.xlu1.b32.start [1/2] (short) (narrow) %v13641_v19, 8 }
0x32e0   : > { %v13614_v36 = vpop.trf.xlu1 }
0x32e1   : > { %13904 = vxpose.xlu0.b32.end [2/2] (short) (narrow) %v13614_v36, 8  ;;  %v13646_v32 = vpop.trf.xlu0 }
0x32e2   : > { %14096 = vxpose.xlu1.b32.end [2/2] (short) (narrow) %v13642_v30, 8  ;;  %v13580_v30 = vadd.f32 %v25003_v53, %v13438_v29 }
0x32e6   : > { %14127 = vxpose.xlu1.b32.start [1/2] (short) (narrow) %v13643_v27, 8 }
0x32ea   : > { %14128 = vxpose.xlu1.b32.end [2/2] (short) (narrow) %v13644_v31, 8 }
0x32ee   : > { %14159 = vxpose.xlu1.b32.start [1/2] (short) (narrow) %v13645_v38, 8 }
0x32f2   : > { %14160 = vxpose.xlu1.b32.end [2/2] (short) (narrow) %v13646_v32, 8 }
0x3325   : > { %v13695_v40 = vpop.trf.xlu0 }
0x3326   : > { %v13951_v39 = vpop.trf.xlu1 }
0x3327   : > { %21602 = vmatpush3.xpose.msk.msra.mxu1 %vm1609_vm1, %v13951_v39 }
0x3328   : > { %21606 = vmatprep.subr.mxu1 %v23801_v0 }
0x332a   : > { %21604 = vmatmul.mubr.msk.f32.vlgmr.msra.gmra.mrb[122].mxu1 %vm1609_vm1, %v13695_v40 }
0x332b   : > { %21608 = vmatprep.mubr.msk.f32.mxu1 %vm23803_vm0, %v23801_v0 }
0x332e   : > { %v13727_v1 = vpop.trf.xlu1 }
0x3336   : > { %v13983_v43 = vpop.trf.xlu1 }
0x3337   : > { %21607 = vmatpush3.xpose.msk.msra.mxu1 %vm1609_vm1, %v13983_v43 }
0x3338   : > { %21611 = vmatprep.subr.mxu1 %v23801_v0 }
0x333a   : > { %21609 = vmatmul.mubr.msk.f32.vlgmr.msra.gmra.mrb[124].mxu1 %vm1609_vm1, %v13727_v1 }
0x333b   : > { %21613 = vmatprep.mubr.msk.f32.mxu1 %vm23803_vm0, %v23801_v0 }
0x333d   : > { %v13791_v46 = vpop.trf.xlu0 }
0x333e   : > { %v13759_v44 = vpop.trf.xlu1 }
0x3345   : > { %v13823_v17 = vpop.trf.xlu0 }
0x3346   : > { %v14015_v28 = vpop.trf.xlu1 }
0x3347   : > { %21612 = vmatpush3.xpose.msk.msra.mxu1 %vm1609_vm1, %v14015_v28 }
0x3348   : > { %21616 = vmatprep.subr.mxu1 %v23801_v0 }
0x334a   : > { %21614 = vmatmul.mubr.msk.f32.vlgmr.msra.gmra.mrb[126].mxu1 %vm1609_vm1, %v13759_v44 }
0x334b   : > { %21618 = vmatprep.mubr.msk.f32.mxu1 %vm23803_vm0, %v23801_v0 }
0x334d   : > { %v13855_v35 = vpop.trf.xlu0 }
0x334e   : > { %v14047_v4 = vpop.trf.xlu1 }
0x334f   : > { %21617 = vmatpush3.xpose.msk.msra.mxu1 %vm1609_vm1, %v14047_v4 }
0x3350   : > { %21621 = vmatprep.subr.mxu1 %v23801_v0 }
0x3352   : > { %21619 = vmatmul.mubr.msk.f32.vlgmr.msra.gmra.mrb[128].mxu1 %vm1609_vm1, %v13791_v46 }
0x3353   : > { %21623 = vmatprep.mubr.msk.f32.mxu1 %vm23803_vm0, %v23801_v0 }
0x3355   : > { %v13887_v56 = vpop.trf.xlu0 }
0x3356   : > { %v14079_v47 = vpop.trf.xlu1 }
0x3357   : > { %21622 = vmatpush3.xpose.msk.msra.mxu1 %vm1609_vm1, %v14079_v47 }
0x3358   : > { %21626 = vmatprep.subr.mxu1 %v23801_v0 }
0x335a   : > { %21624 = vmatmul.mubr.msk.f32.vlgmr.msra.gmra.mrb[130].mxu1 %vm1609_vm1, %v13823_v17 }
0x335b   : > { %21628 = vmatprep.mubr.msk.f32.mxu1 %vm23803_vm0, %v23801_v0 }
0x335d   : > { %v13919_v37 = vpop.trf.xlu0 }
0x335e   : > { %v14111_v57 = vpop.trf.xlu1 }
0x335f   : > { %21627 = vmatpush3.xpose.msk.msra.mxu1 %vm1609_vm1, %v14111_v57 }
0x3360   : > { %21631 = vmatprep.subr.mxu1 %v23801_v0 }
0x3362   : > { %21629 = vmatmul.mubr.msk.f32.vlgmr.msra.gmra.mrb[132].mxu1 %vm1609_vm1, %v13855_v35 }
0x3363   : > { %21633 = vmatprep.mubr.msk.f32.mxu1 %vm23803_vm0, %v23801_v0 }
0x3366   : > { %v14143_v11 = vpop.trf.xlu1 }
0x3367   : > { %21632 = vmatpush3.xpose.msk.msra.mxu1 %vm1609_vm1, %v14143_v11 }
0x3368   : > { %21636 = vmatprep.subr.mxu1 %v23801_v0 }
0x336a   : > { %21634 = vmatmul.mubr.msk.f32.vlgmr.msra.gmra.mrb[134].mxu1 %vm1609_vm1, %v13887_v56 }
0x336b   : > { %21638 = vmatprep.mubr.msk.f32.mxu1 %vm23803_vm0, %v23801_v0 }
0x336e   : > { %v14175_v62 = vpop.trf.xlu1 }
0x336f   : > { %21637 = vmatpush3.xpose.msk.msra.mxu1 %vm1609_vm1, %v14175_v62 }
0x3370   : > { %21646 = vmatprep.subr.mxu1 %v23801_v0 }
0x3372   : > { %21639 = vmatmul.mubr.msk.f32.vlgmr.msra.gmra.mrb[136].mxu1 %vm1609_vm1, %v13919_v37 }
0x3373   : > { %21648 = vmatprep.mubr.msk.f32.mxu1 %vm23803_vm0, %v23801_v0 }
0x33fd   : > { %v14519_v48 = vpop.f32.mrb[122].mxu1 }
0x33fe   : > { %v14520_v5 = vadd.f32 %v23471_v50, %v14519_v48  ;;  %v21605_v41 = vpop.f32.mrb[123].mxu1 }
0x3400   : > { %v15055_v54 = vsel %vm2218_vm2, %v14520_v5, -inf }
0x3401   : > { %15056 = vmax.xlane.f32.xlu1 %v15055_v54 }
0x340d   : > { %v14595_v55 = vpop.f32.mrb[124].mxu1 }
0x340e   : > { %v21610_v59 = vpop.f32.mrb[125].mxu1  ;;  %v14596_v43 = vadd.f32 %v23471_v50, %v14595_v55 }
0x3410   : > { %v15058_v42 = vsel %vm2218_vm2, %v14596_v43, -inf }
0x341d   : > { %v14671_v60 = vpop.f32.mrb[126].mxu1 }
0x341e   : > { %v25047_v61 = vadd.f32 %v23471_v50, %v14671_v60  ;;  %v21615_v63 = vpop.f32.mrb[127].mxu1 }
0x3420   : > { %v15061_v2 = vsel %vm2218_vm2, %v25047_v61, -inf }
0x3421   : > { %15062 = vmax.xlane.f32.xlu1 %v15061_v2 }
0x3425   : > { %v14747_v6 = vpop.f32.mrb[128].mxu1 }
0x3426   : > { %v25051_v9 = vadd.f32 %v23471_v50, %v14747_v6  ;;  %v21620_v12 = vpop.f32.mrb[129].mxu1 }
0x3428   : > { %v15064_v15 = vsel %vm2218_vm2, %v25051_v9, -inf }
0x3429   : > { %15065 = vmax.xlane.f32.xlu1 %v15064_v15 }
0x342d   : > { %v14823_v18 = vpop.f32.mrb[130].mxu1 }
0x342e   : > { %v25055_v20 = vadd.f32 %v23471_v50, %v14823_v18  ;;  %v21625_v23 = vpop.f32.mrb[131].mxu1 }
0x3430   : > { %v15067_v3 = vsel %vm2218_vm2, %v25055_v20, -inf }
0x3431   : > { %15068 = vmax.xlane.f32.xlu1 %v15067_v3 }
0x3435   : > { %v14899_v10 = vpop.f32.mrb[132].mxu1 }
0x3436   : > { %v25059_v21 = vadd.f32 %v23471_v50, %v14899_v10  ;;  %v21630_v14 = vpop.f32.mrb[133].mxu1 }
0x3438   : > { %v15070_v13 = vsel %vm2218_vm2, %v25059_v21, -inf }
0x3439   : > { %15071 = vmax.xlane.f32.xlu1 %v15070_v13 }
0x343d   : > { %v14975_v51 = vpop.f32.mrb[134].mxu1 }
0x343e   : > { %v21635_v25 = vpop.f32.mrb[135].mxu1  ;;  %v25072_v44 = vadd.f32 %v23471_v50, %v14975_v51 }
0x3440   : > { %v15073_v53 = vsel %vm2218_vm2, %v25072_v44, -inf }
0x3445   : > { %v15051_v16 = vpop.f32.mrb[136].mxu1 }
0x3446   : > { %v25063_v22 = vadd.f32 %v23471_v50, %v15051_v16  ;;  %v21640_v26 = vpop.f32.mrb[137].mxu1 }
0x3448   : > { %v15076_v19 = vsel %vm2218_vm2, %v25063_v22, -inf }
0x3449   : > { %15077 = vmax.xlane.f32.xlu1 %v15076_v19 }
0x347c   : > { %13647 = vxpose.xlu1.b32.start.end [1/1] (short) %v13580_v30, 128 }
0x348e   : > { %v15057_v24 = vpop.xlane.xlu1 %15056 }
0x348f   : > { %v15079_v40 = vsub.f32 %v14520_v5, %v15057_v24 }
0x3491   : > { %v15087_v1 = vmul.f32 1.442695, %v15079_v40 }
0x3493   : > { %23395 = vpow2.f32 %v15087_v1 }
0x349d   : > { %v25077_v28 = vpop.eup %23395 }
0x349e   : > { %v15103_v4 = vsel %vm2218_vm2, %v25077_v28, 0.0 }
0x34ae   : > { %v15063_v34 = vpop.xlane.xlu1 %15062 }
0x34af   : > { %v15081_v54 = vsub.f32 %v25047_v61, %v15063_v34 }
0x34b1   : > { %v15091_v55 = vmul.f32 1.442695, %v15081_v54 }
0x34b3   : > { %23397 = vpow2.f32 %v15091_v55 }
0x34b6   : > { %v15066_v27 = vpop.xlane.xlu1 %15065 }
0x34b7   : > { %v15082_v59 = vsub.f32 %v25051_v9, %v15066_v27 }
0x34b9   : > { %v15093_v60 = vmul.f32 1.442695, %v15082_v59 }
0x34bb   : > { %23399 = vpow2.f32 %v15093_v60 }
0x34bd   : > { %v23398_v15 = vpop.eup %23397 }
0x34be   : > { %v15069_v36 = vpop.xlane.xlu1 %15068  ;;  %v15109_v18 = vsel %vm2218_vm2, %v23398_v15, 0.0 }
0x34bf   : > { %v15083_v63 = vsub.f32 %v25055_v20, %v15069_v36 }
0x34c1   : > { %v15095_v2 = vmul.f32 1.442695, %v15083_v63 }
0x34c3   : > { %23401 = vpow2.f32 %v15095_v2 }
0x34c5   : > { %v25091_v23 = vpop.eup %23399 }
0x34c6   : > { %v15072_v31 = vpop.xlane.xlu1 %15071  ;;  %v15112_v61 = vsel %vm2218_vm2, %v25091_v23, 0.0 }
0x34c7   : > { %v15084_v6 = vsub.f32 %v25059_v21, %v15072_v31 }
0x34c9   : > { %v15097_v12 = vmul.f32 1.442695, %v15084_v6 }
0x34cb   : > { %23403 = vpow2.f32 %v15097_v12 }
0x34cd   : > { %v23402_v9 = vpop.eup %23401 }
0x34ce   : > { %v15115_v20 = vsel %vm2218_vm2, %v23402_v9, 0.0 }
0x34d5   : > { %v25096_v10 = vpop.eup %23403 }
0x34d6   : > { %v25070_v38 = vpop.xlane.xlu1 %15077  ;;  %v15118_v25 = vsel %vm2218_vm2, %v25096_v10, 0.0 }
0x34d7   : > { %v15086_v14 = vsub.f32 %v25063_v22, %v25070_v38 }
0x34d9   : > { %v15101_v26 = vmul.f32 1.442695, %v15086_v14 }
0x34fc   : > { %v13663_v32 = vpop.trf.xlu1 }
0x34fd   : > { %14191 = vxpose.xlu0.b32.start [1/2] (short) (narrow) %v13663_v32, 8 }
0x3500   : > { %v13664_v39 = vpop.trf.xlu1 }
0x3501   : > { %14192 = vxpose.xlu0.b32.end [2/2] (short) (narrow) %v13664_v39, 8 }
0x3504   : > { %v25081_v46 = vpop.trf.xlu1 }
0x3508   : > { %v25083_v47 = vpop.trf.xlu1 }
0x350c   : > { %v13667_v17 = vpop.trf.xlu1 }
0x3510   : > { %v13668_v57 = vpop.trf.xlu1 }
0x3514   : > { %v13669_v35 = vpop.trf.xlu1 }
0x3518   : > { %v13670_v11 = vpop.trf.xlu1 }
0x351c   : > { %v13671_v56 = vpop.trf.xlu1 }
0x3520   : > { %v13672_v62 = vpop.trf.xlu1 }
0x3524   : > { %v13673_v37 = vpop.trf.xlu1 }
0x3528   : > { %v13674_v48 = vpop.trf.xlu1 }
0x352c   : > { %v13675_v5 = vpop.trf.xlu1 }
0x352e   : > { %15059 = vmax.xlane.f32.xlu0 %v15058_v42 }
0x3530   : > { %v13676_v41 = vpop.trf.xlu1 }
0x3532   : > { %15074 = vmax.xlane.f32.xlu0 %v15073_v53 }
0x3534   : > { %v13677_v39 = vpop.trf.xlu1 }
0x3536   : > { %15104 = vadd.xlane.f32.xlu0 %v15103_v4 }
0x3538   : > { %v13678_v40 = vpop.trf.xlu1 }
0x3563   : > { %14255 = vxpose.xlu0.b32.start [1/2] (short) (narrow) %v13667_v17, 8 }
0x3567   : > { %14256 = vxpose.xlu0.b32.end [2/2] (short) (narrow) %v13668_v57, 8 }
0x356b   : > { %14287 = vxpose.xlu0.b32.start [1/2] (short) (narrow) %v13669_v35, 8 }
0x356f   : > { %14288 = vxpose.xlu0.b32.end [2/2] (short) (narrow) %v13670_v11, 8 }
0x3573   : > { %14319 = vxpose.xlu0.b32.start [1/2] (short) (narrow) %v13671_v56, 8 }
0x3577   : > { %14320 = vxpose.xlu0.b32.end [2/2] (short) (narrow) %v13672_v62, 8 }
0x357b   : > { %14351 = vxpose.xlu0.b32.start [1/2] (short) (narrow) %v13673_v37, 8 }
0x357d   : > { %v14207_v50 = vpop.trf.xlu0 }
0x357e   : > { %21642 = vmatpush3.msra.mxu0 %v14207_v50 }
0x357f   : > { %14352 = vxpose.xlu0.b32.end [2/2] (short) (narrow) %v13674_v48, 8  ;;  %21651 = vmatprep.subr.mxu0 %v23801_v0 }
0x3583   : > { %14383 = vxpose.xlu0.b32.start [1/2] (short) (narrow) %v13675_v5, 8 }
0x3587   : > { %14384 = vxpose.xlu0.b32.end [2/2] (short) (narrow) %v13676_v41, 8 }
0x35b4   : > { %15110 = vadd.xlane.f32.xlu0 %v15109_v18 }
0x35b8   : > { %15113 = vadd.xlane.f32.xlu0 %v15112_v61 }
0x35bb   : > { %v15060_v3 = vpop.xlane.xlu0 %15059 }
0x35bc   : > { %v15080_v21 = vsub.f32 %v14596_v43, %v15060_v3  ;;  %15116 = vadd.xlane.f32.xlu0 %v15115_v20 }
0x35be   : > { %v15089_v13 = vmul.f32 1.442695, %v15080_v21 }
0x35bf   : > { %v15075_v51 = vpop.xlane.xlu0 %15074 }
0x35c0   : > { %23405 = vpow2.f32 %v15089_v13  ;;  %v15085_v16 = vsub.f32 %v25072_v44, %v15075_v51  ;;  %15119 = vadd.xlane.f32.xlu0 %v15118_v25 }
0x35c2   : > { %v15099_v19 = vmul.f32 1.442695, %v15085_v16 }
0x35c3   : > { %v15105_v29 = vpop.xlane.xlu0 %15104 }
0x35c4   : > { %23407 = vpow2.f32 %v15099_v19 }
0x35c5   : > { %23409 = vrcp.f32 %v15105_v29 }
0x35c6   : > { %23411 = vpow2.f32 %v15101_v26 }
0x35ca   : > { %v23406_v30 = vpop.eup %23405 }
0x35cb   : > { %v15106_v24 = vsel %vm2218_vm2, %v23406_v30, 0.0 }
0x35cc   : > { %15107 = vadd.xlane.f32.xlu1 %v15106_v24  ;;  %v16017_v24 = vld [vmem:[#allocation7 + $0x208] sm:$0xff] }
0x35ce   : > { %v23408_v22 = vpop.eup %23407 }
0x35cf   : > { %v23410_v34 = vpop.eup %23409  ;;  %v15121_v27 = vsel %vm2218_vm2, %v23408_v22, 0.0 }
0x35d0   : > { %v25105_v36 = vpop.eup %23411  ;;  %15122 = vadd.xlane.f32.xlu0 %v15121_v27  ;;  %v15135_v31 = vmul.f32 %v23410_v34, %v25077_v28  ;;  %v16019_v27 = vld [vmem:[#allocation7 + $0x218] sm:$0xff] }
0x35d1   : > { %v15124_v38 = vsel %vm2218_vm2, %v25105_v36, 0.0 }
0x35d2   : > { %21644 = vmatmul.mubr.msk.f32.vlgmr.msra.gmra.mrb[66].mxu0 %vm2218_vm2, %v15135_v31  ;;  %v16020_v31 = vld [vmem:[#allocation7 + $0x220] sm:$0xff] }
0x35d3   : > { %21653 = vmatprep.mubr.msk.f32.mxu0 %vm23803_vm0, %v23801_v0 }
0x35d4   : > { %15125 = vadd.xlane.f32.xlu0 %v15124_v38  ;;  %v16021_v38 = vld [vmem:[#allocation7 + $0x228] sm:$0xff] }
0x35e3   : > { %v14271_v32 = vpop.trf.xlu0 }
0x35e4   : > { %21652 = vmatpush3.msra.mxu0 %v14271_v32  ;;  %v22761_v32 = vpack.c.bf16 %v16021_v38, %v16020_v31  ;;  %v16132_v31 = vld [vmem:[#allocation10 + $0x840] sm:$0xff] }
0x35e5   : > { %21661 = vmatprep.subr.mxu0 %v23801_v0  ;;  %v16136_v38 = vld [vmem:[#allocation10 + $0x860] sm:$0xff] }
0x35eb   : > { %v14303_v1 = vpop.trf.xlu0 }
0x35f3   : > { %v14335_v43 = vpop.trf.xlu0 }
0x35fb   : > { %v14367_v44 = vpop.trf.xlu0 }
0x35ff   : > { %14223 = vxpose.xlu1.b32.start [1/2] (short) (narrow) %v25081_v46, 8 }
0x3601   : > { %14415 = vxpose.xlu0.b32.start [1/2] (short) (narrow) %v13677_v39, 8  ;;  %v16022_v39 = vld [vmem:[#allocation7 + $0x230] sm:$0xff] }
0x3603   : > { %14224 = vxpose.xlu1.b32.end [2/2] (short) (narrow) %v25083_v47, 8  ;;  %v14399_v42 = vpop.trf.xlu0 }
0x3605   : > { %14416 = vxpose.xlu0.b32.end [2/2] (short) (narrow) %v13678_v40, 8  ;;  %v16023_v40 = vld [vmem:[#allocation7 + $0x238] sm:$0xff] }
0x3641   : > { %v15111_v53 = vpop.xlane.xlu0 %15110 }
0x3642   : > { %23413 = vrcp.f32 %v15111_v53  ;;  %v16026_v53 = vld [vmem:[#allocation7 + $0x250] sm:$0xff] }
0x3645   : > { %v15114_v28 = vpop.xlane.xlu0 %15113 }
0x3649   : > { %v15117_v4 = vpop.xlane.xlu0 %15116 }
0x364a   : > { %23415 = vrcp.f32 %v15117_v4 }
0x364c   : > { %v23414_v17 = vpop.eup %23413 }
0x364d   : > { %v15137_v57 = vmul.f32 %v23414_v17, %v23398_v15  ;;  %v15120_v35 = vpop.xlane.xlu0 %15119  ;;  %v16028_v17 = vld [vmem:[#allocation7 + $0x260] sm:$0xff] }
0x364f   : > { %21654 = vmatmul.mubr.msk.f32.vlgmr.msra.gmra.mrb[68].mxu0 %vm2218_vm2, %v15137_v57  ;;  %v16029_v57 = vld [vmem:[#allocation7 + $0x268] sm:$0xff] }
0x3650   : > { %21662 = vmatpush3.msra.mxu0 %v14335_v43  ;;  %21663 = vmatprep.mubr.msk.f32.mxu0 %vm23803_vm0, %v23801_v0  ;;  %v16024_v43 = vld [vmem:[#allocation7 + $0x240] sm:$0xff] }
0x3651   : > { %21671 = vmatprep.subr.mxu0 %v23801_v0 }
0x3654   : > { %v23416_v46 = vpop.eup %23415 }
0x3655   : > { %v15139_v47 = vmul.f32 %v23416_v46, %v23402_v9  ;;  %v22773_v46 = vpack.c.bf16 %v16029_v57, %v16028_v17  ;;  %v16144_v57 = vld [vmem:[#allocation10 + $0x8a0] sm:$0xff] }
0x3657   : > { %21664 = vmatmul.mubr.msk.f32.vlgmr.msra.gmra.mrb[70].mxu0 %vm2218_vm2, %v15139_v47  ;;  %v16030_v47 = vld [vmem:[#allocation7 + $0x270] sm:$0xff] }
0x3658   : > { %21672 = vmatpush3.msra.mxu0 %v14399_v42  ;;  %21673 = vmatprep.mubr.msk.f32.mxu0 %vm23803_vm0, %v23801_v0 }
0x3659   : > { %22754 = vmatprep.subr.bf16.mxu0 %v23802_v7  ;;  %v15108_v37 = vpop.xlane.xlu1 %15107 }
0x365d   : > { %v15123_v11 = vpop.xlane.xlu0 %15122 }
0x365e   : > { %23417 = vrcp.f32 %v15123_v11 }
0x365f   : > { %23419 = vrcp.f32 %v15108_v37 }
0x3660   : > { %23421 = vrcp.f32 %v15114_v28  ;;  %v16027_v28 = vld [vmem:[#allocation7 + $0x258] sm:$0xff] }
0x3661   : > { %23423 = vrcp.f32 %v15120_v35  ;;  %v15126_v48 = vpop.xlane.xlu0 %15125  ;;  %v22770_v4 = vpack.c.bf16 %v16027_v28, %v16026_v53  ;;  %v16031_v35 = vld [vmem:[#allocation7 + $0x278] sm:$0xff] }
0x3662   : > { %23425 = vrcp.f32 %v15126_v48  ;;  %v22776_v11 = vpack.c.bf16 %v16031_v35, %v16030_v47  ;;  %v16143_v53 = vld [vmem:[#allocation10 + $0x898] sm:$0xff]  ;;  %v16146_v47 = vld [vmem:[#allocation10 + $0x8b0] sm:$0xff] }
0x3663   : > { %v16147_v28 = vld [vmem:[#allocation10 + $0x8b8] sm:$0xff] }
0x3664   : > { %v22818_v17 = vpack.c.bf16 %v16147_v28, %v16143_v53  ;;  %v16176_v53 = vld [vmem:[#allocation10 + $0x9a0] sm:$0xff]  ;;  %v16174_v28 = vld [vmem:[#allocation10 + $0x990] sm:$0xff] }
0x3668   : > { %v23418_v56 = vpop.eup %23417 }
0x3669   : > { %v15141_v62 = vmul.f32 %v23418_v56, %v23408_v22  ;;  %v23420_v50 = vpop.eup %23419  ;;  %v16018_v22 = vld [vmem:[#allocation7 + $0x210] sm:$0xff] }
0x366a   : > { %v15136_v5 = vmul.f32 %v23420_v50, %v23406_v30  ;;  %v23422_v54 = vpop.eup %23421  ;;  %v16016_v30 = vld [vmem:[#allocation7 + $0x200] sm:$0xff] }
0x366b   : > { %21674 = vmatmul.mubr.msk.f32.vlgmr.msra.gmra.mrb[72].mxu0 %vm2218_vm2, %v15141_v62  ;;  %v15138_v55 = vmul.f32 %v23422_v54, %v25091_v23  ;;  %v23424_v59 = vpop.eup %23423  ;;  %v22755_v34 = vpack.c.bf16 %v16017_v24, %v16016_v30  ;;  %v16137_v24 = vld [vmem:[#allocation10 + $0x868] sm:$0xff] }
0x366c   : > { %21713 = vmatprep.mubr.msk.f32.mxu0 %vm23803_vm0, %v23801_v0  ;;  %v15140_v60 = vmul.f32 %v23424_v59, %v25096_v10  ;;  %v23426_v2 = vpop.eup %23425 }
0x366d   : > { %v15142_v6 = vmul.f32 %v23426_v2, %v25105_v36  ;;  %22756 = vmatpush3.bf16.msra.mxu0 %v22755_v34  ;;  %v22758_v36 = vpack.c.bf16 %v16019_v27, %v16018_v22  ;;  %v16135_v22 = vld [vmem:[#allocation10 + $0x858] sm:$0xff] }
0x366e   : > { %22757 = vmatprep.subr.bf16.mxu0 %v23802_v7  ;;  %v16139_v34 = vld [vmem:[#allocation10 + $0x878] sm:$0xff] }
0x3671   : > { %22759 = vmatpush3.bf16.msra.mxu0 %v22758_v36  ;;  %v22814_v36 = vpack.c.bf16 %v16139_v34, %v16135_v22  ;;  %v16168_v22 = vld [vmem:[#allocation10 + $0x960] sm:$0xff] }
0x3672   : > { %22760 = vmatprep.subr.bf16.mxu0 %v23802_v7 }
0x3675   : > { %22762 = vmatpush3.bf16.msra.mxu0 %v22761_v32  ;;  %v16134_v32 = vld [vmem:[#allocation10 + $0x850] sm:$0xff] }
0x3676   : > { %22763 = vmatprep.subr.bf16.mxu0 %v23802_v7 }
0x367f   : > { %v14239_v41 = vpop.trf.xlu1 }
0x3680   : > { %21647 = vmatpush3.msra.mxu1 %v14239_v41 }
0x3681   : > { %21649 = vmatmul.mubr.msk.f32.vlgmr.msra.gmra.mrb[138].mxu1 %vm2218_vm2, %v15136_v5  ;;  %21656 = vmatprep.subr.mxu1 %v23801_v0  ;;  %v14431_v63 = vpop.trf.xlu0 }
0x3682   : > { %21657 = vmatpush3.msra.mxu1 %v14303_v1  ;;  %21658 = vmatprep.mubr.msk.f32.mxu1 %vm23803_vm0, %v23801_v0  ;;  %v22764_v1 = vpack.c.bf16 %v16023_v40, %v16022_v39  ;;  %v22784_v39 = vpack.c.bf16 %v16136_v38, %v16132_v31  ;;  %v16138_v40 = vld [vmem:[#allocation10 + $0x870] sm:$0xff]  ;;  %v16173_v38 = vld [vmem:[#allocation10 + $0x988] sm:$0xff] }
0x3683   : > { %21666 = vmatprep.subr.mxu1 %v23801_v0  ;;  %v16170_v31 = vld [vmem:[#allocation10 + $0x970] sm:$0xff] }
0x3684   : > { %22765 = vmatpush3.bf16.msra.mxu0 %v22764_v1  ;;  %v16141_v1 = vld [vmem:[#allocation10 + $0x888] sm:$0xff] }
0x3685   : > { %21659 = vmatmul.mubr.msk.f32.vlgmr.msra.gmra.mrb[140].mxu1 %vm2218_vm2, %v15138_v55  ;;  %22766 = vmatprep.subr.bf16.mxu0 %v23802_v7 }
0x3686   : > { %21667 = vmatpush3.msra.mxu1 %v14367_v44  ;;  %21668 = vmatprep.mubr.msk.f32.mxu1 %vm23803_vm0, %v23801_v0  ;;  %v16025_v44 = vld [vmem:[#allocation7 + $0x248] sm:$0xff] }
0x3687   : > { %21676 = vmatprep.subr.mxu1 %v23801_v0  ;;  %v22767_v42 = vpack.c.bf16 %v16025_v44, %v16024_v43  ;;  %v16145_v43 = vld [vmem:[#allocation10 + $0x8a8] sm:$0xff]  ;;  %v22816_v44 = vpack.c.bf16 %v16138_v40, %v16134_v32  ;;  %v16175_v40 = vld [vmem:[#allocation10 + $0x998] sm:$0xff] }
0x3689   : > { %21669 = vmatmul.mubr.msk.f32.vlgmr.msra.gmra.mrb[142].mxu1 %vm2218_vm2, %v15140_v60  ;;  %22768 = vmatpush3.bf16.msra.mxu0 %v22767_v42  ;;  %v22786_v42 = vpack.c.bf16 %v16145_v43, %v16141_v1  ;;  %v16179_v1 = vld [vmem:[#allocation10 + $0x9b8] sm:$0xff] }
0x368a   : > { %21677 = vmatpush3.msra.mxu1 %v14431_v63  ;;  %21678 = vmatprep.mubr.msk.f32.mxu1 %vm23803_vm0, %v23801_v0 }
0x368b   : > { %22769 = vmatprep.subr.bf16.mxu0 %v23802_v7 }
0x368d   : > { %21679 = vmatmul.mubr.msk.f32.vlgmr.msra.gmra.mrb[144].mxu1 %vm2218_vm2, %v15142_v6  ;;  %22771 = vmatpush3.bf16.msra.mxu0 %v22770_v4  ;;  %v16140_v4 = vld [vmem:[#allocation10 + $0x880] sm:$0xff] }
0x368e   : > { %16275 = vmatprep.mubr.f32.mxu1 %v23801_v0  ;;  %22772 = vmatprep.subr.bf16.mxu0 %v23802_v7  ;;  %v22788_v35 = vpack.c.bf16 %v16144_v57, %v16140_v4  ;;  %v16181_v57 = vld [vmem:[#allocation10 + $0x9c8] sm:$0xff] }
0x3691   : > { %22774 = vmatpush3.bf16.msra.mxu0 %v22773_v46  ;;  %v16142_v46 = vld [vmem:[#allocation10 + $0x890] sm:$0xff] }
0x3692   : > { %22775 = vmatprep.subr.bf16.mxu0 %v23802_v7 }
0x3695   : > { %22777 = vmatpush3.bf16.msra.mxu0 %v22776_v11  ;;  %v16149_v11 = vld [vmem:[#allocation10 + $0x8c8] sm:$0xff] }
0x36a5   : > { %v15212_v12 = vpop.f32.mrb[66].mxu0 }
0x36a6   : > { %v21645_v15 = vpop.f32.mrb[67].mxu0  ;;  %15727 = vxpose.xlu1.b32.start.end [1/1] (short) (narrow) %v15212_v12, 16 }
0x36a7   : > { %v20118_v15 = vld [vmem:[#allocation8 + $0x4] ss:$0 sm:$0xff] }
0x3722   : > { %v15358_v18 = vpop.f32.mrb[68].mxu0 }
0x3723   : > { %15791 = vxpose.xlu1.b32.start.end [1/1] (short) (narrow) %v15358_v18, 16  ;;  %v21655_v23 = vpop.f32.mrb[69].mxu0 }
0x3726   : > { %v15743_v10 = vpop.trf.xlu1 }
0x372a   : > { %v15504_v61 = vpop.f32.mrb[70].mxu0  ;;  %v15744_v21 = vpop.trf.xlu1 }
0x372b   : > { %15855 = vxpose.xlu1.b32.start.end [1/1] (short) (narrow) %v15504_v61, 16  ;;  %v21665_v9 = vpop.f32.mrb[71].mxu0 }
0x373e   : > { %v15650_v3 = vpop.f32.mrb[72].mxu0 }
0x373f   : > { %15919 = vxpose.xlu1.b32.start.end [1/1] (short) (narrow) %v15650_v3, 16  ;;  %v21675_v20 = vpop.f32.mrb[73].mxu0  ;;  %v16125_v3 = vld [vmem:[#allocation10 + $0x808] sm:$0xff] }
0x3740   : > { %v16129_v20 = vld [vmem:[#allocation10 + $0x828] sm:$0xff] }
0x3744   : > { %15983 = vxpose.xlu1.b32.start [1/16] (narrow) %v15743_v10, 8  ;;  %v16127_v10 = vld [vmem:[#allocation10 + $0x818] sm:$0xff] }
0x3748   : > { %15984 = vxpose.xlu1.b32.cont [2/16] (narrow) %v15744_v21, 8  ;;  %v22778_v21 = vpack.c.bf16 %v16129_v20, %v16125_v3  ;;  %v16163_v20 = vld [vmem:[#allocation10 + $0x938] sm:$0xff] }
0x374a   : > { %22779 = vmatprep.subr.bf16.mxu1 %v22778_v21 }
0x3754   : > { %v15285_v14 = vpop.f32.mrb[138].mxu1 }
0x3755   : > { %15759 = vxpose.xlu0.b32.start.end [1/1] (short) (narrow) %v15285_v14, 16  ;;  %v21650_v13 = vpop.f32.mrb[139].mxu1  ;;  %v16131_v14 = vld [vmem:[#allocation10 + $0x838] sm:$0xff] }
0x3756   : > { %v16124_v13 = vld [vmem:[#allocation10 + $0x800] sm:$0xff] }
0x3758   : > { %v15431_v51 = vpop.f32.mrb[140].mxu1 }
0x3759   : > { %v21660_v25 = vpop.f32.mrb[141].mxu1 }
0x375a   : > { %15823 = vxpose.xlu0.b32.start.end [1/1] (short) (narrow) %v15431_v51, 16  ;;  %v16128_v51 = vld [vmem:[#allocation10 + $0x820] sm:$0xff]  ;;  %v22810_v25 = vpack.c.bf16 %v16131_v14, %v16127_v10 }
0x375b   : > { %v16156_v10 = vld [vmem:[#allocation10 + $0x900] sm:$0xff] }
0x375c   : > { %v15577_v16 = vpop.f32.mrb[142].mxu1  ;;  %22811 = vmatprep.subr.bf16.mxu0 %v22810_v25 }
0x375d   : > { %v21670_v26 = vpop.f32.mrb[143].mxu1 }
0x375e   : > { %v16126_v26 = vld [vmem:[#allocation10 + $0x810] sm:$0xff] }
0x375f   : > { %15887 = vxpose.xlu0.b32.start.end [1/1] (short) (narrow) %v15577_v16, 16  ;;  %v22780_v16 = vpack.c.bf16 %v16128_v51, %v16124_v13  ;;  %v16158_v13 = vld [vmem:[#allocation10 + $0x910] sm:$0xff] }
0x3760   : > { %v15723_v19 = vpop.f32.mrb[144].mxu1  ;;  %v16162_v51 = vld [vmem:[#allocation10 + $0x930] sm:$0xff] }
0x3761   : > { %v21680_v29 = vpop.f32.mrb[145].mxu1  ;;  %22781 = vmatpush1.bf16.msra.mxu1 %v22780_v16  ;;  %v22828_v25 = vpack.c.bf16 %v16162_v51, %v16158_v13  ;;  %v16165_v16 = vld [vmem:[#allocation10 + $0x948] sm:$0xff]  ;;  %v16409_v51 = vld [vmem:[#allocation13 + $0x998] sm:$0xff] }
0x3762   : > { %v16133_v29 = vld [vmem:[#allocation10 + $0x848] sm:$0xff] }
0x3763   : > { %v22782_v27 = vpack.c.bf16 %v16137_v24, %v16133_v29  ;;  %v16164_v24 = vld [vmem:[#allocation10 + $0x940] sm:$0xff]  ;;  %v16408_v13 = vld [vmem:[#allocation13 + $0x990] sm:$0xff] }
0x3764   : > { %15951 = vxpose.xlu0.b32.start.end [1/1] (short) (narrow) %v15723_v19, 16  ;;  %v16130_v19 = vld [vmem:[#allocation10 + $0x830] sm:$0xff] }
0x3765   : > { %v22812_v30 = vpack.c.bf16 %v16130_v19, %v16126_v26  ;;  %22783 = vmatprep.subr.bf16.mxu1 %v22782_v27  ;;  %v16169_v26 = vld [vmem:[#allocation10 + $0x968] sm:$0xff]  ;;  %v16167_v19 = vld [vmem:[#allocation10 + $0x958] sm:$0xff]  ;;  %v22800_v27 = vpack.c.bf16 %v16168_v22, %v16164_v24  ;;  %v22878_v22 = vpack.c.bf16 %v16409_v51, %v16408_v13 }
0x3766   : > { %22785 = vmatpush1.bf16.msra.mxu1 %v22784_v39  ;;  %v22798_v29 = vpack.c.bf16 %v16169_v26, %v16165_v16  ;;  %v16177_v39 = vld [vmem:[#allocation10 + $0x9a8] sm:$0xff] }
0x3767   : > { %22787 = vmatprep.subr.bf16.mxu1 %v22786_v42  ;;  %v22802_v43 = vpack.c.bf16 %v16177_v39, %v16173_v38  ;;  %v16172_v42 = vld [vmem:[#allocation10 + $0x980] sm:$0xff]  ;;  %v16410_v38 = vld [vmem:[#allocation13 + $0x9a0] sm:$0xff] }
0x3768   : > { %v22804_v4 = vpack.c.bf16 %v16176_v53, %v16172_v42  ;;  %v16394_v42 = vld [vmem:[#allocation13 + $0x920] sm:$0xff]  ;;  %v16395_v53 = vld [vmem:[#allocation13 + $0x928] sm:$0xff] }
0x376a   : > { %22789 = vmatpush1.bf16.msra.mxu1 %v22788_v35 }
0x37a3   : > { %v15807_v37 = vpop.trf.xlu1 }
0x37a7   : > { %v15808_v48 = vpop.trf.xlu1 }
0x37ab   : > { %v15871_v41 = vpop.trf.xlu1 }
0x37af   : > { %v15872_v54 = vpop.trf.xlu1 }
0x37bf   : > { %v15935_v60 = vpop.trf.xlu1 }
0x37c3   : > { %v15936_v63 = vpop.trf.xlu1 }
0x37d5   : > { %v15775_v56 = vpop.trf.xlu0 }
0x37d6   : > { %15985 = vxpose.xlu1.b32.cont [3/16] (narrow) %v15775_v56, 8  ;;  %v16153_v56 = vld [vmem:[#allocation10 + $0x8e8] sm:$0xff] }
0x37d9   : > { %v15776_v62 = vpop.trf.xlu0 }
0x37da   : > { %15986 = vxpose.xlu1.b32.cont [4/16] (narrow) %v15776_v62, 8  ;;  %v16151_v62 = vld [vmem:[#allocation10 + $0x8d8] sm:$0xff] }
0x37dd   : > { %v15839_v50 = vpop.trf.xlu0 }
0x37de   : > { %15987 = vxpose.xlu1.b32.cont [5/16] (narrow) %v15807_v37, 8  ;;  %v22820_v37 = vpack.c.bf16 %v16146_v47, %v16142_v46  ;;  %v16185_v46 = vld [vmem:[#allocation10 + $0x9e8] sm:$0xff] }
0x37df   : > { %v22806_v35 = vpack.c.bf16 %v16185_v46, %v16181_v57  ;;  %v16413_v57 = vld [vmem:[#allocation13 + $0x9b8] sm:$0xff] }
0x37e1   : > { %v15840_v5 = vpop.trf.xlu0 }
0x37e2   : > { %15988 = vxpose.xlu1.b32.cont [6/16] (narrow) %v15808_v48, 8  ;;  %v22790_v48 = vpack.c.bf16 %v16153_v56, %v16149_v11  ;;  %v16183_v11 = vld [vmem:[#allocation10 + $0x9d8] sm:$0xff] }
0x37e3   : > { %v16187_v56 = vld [vmem:[#allocation10 + $0x9f8] sm:$0xff] }
0x37e4   : > { %22791 = vmatprep.subr.bf16.mxu1 %v22790_v48  ;;  %v16184_v48 = vld [vmem:[#allocation10 + $0x9e0] sm:$0xff] }
0x37e5   : > { %v15903_v55 = vpop.trf.xlu0 }
0x37e6   : > { %15989 = vxpose.xlu1.b32.cont [7/16] (narrow) %v15839_v50, 8  ;;  %v16155_v50 = vld [vmem:[#allocation10 + $0x8f8] sm:$0xff] }
0x37e9   : > { %v15904_v59 = vpop.trf.xlu0 }
0x37ea   : > { %15990 = vxpose.xlu1.b32.cont [8/16] (narrow) %v15840_v5, 8  ;;  %v22822_v5 = vpack.c.bf16 %v16155_v50, %v16151_v62  ;;  %v16180_v62 = vld [vmem:[#allocation10 + $0x9c0] sm:$0xff]  ;;  %v16182_v50 = vld [vmem:[#allocation10 + $0x9d0] sm:$0xff] }
0x37ed   : > { %v15967_v2 = vpop.trf.xlu0 }
0x37ee   : > { %15991 = vxpose.xlu1.b32.cont [9/16] (narrow) %v15871_v41, 8 }
0x37f1   : > { %v15968_v6 = vpop.trf.xlu0 }
0x37f2   : > { %15992 = vxpose.xlu1.b32.cont [10/16] (narrow) %v15872_v54, 8 }
0x37f6   : > { %15993 = vxpose.xlu1.b32.cont [11/16] (narrow) %v15903_v55, 8 }
0x37fa   : > { %15994 = vxpose.xlu1.b32.cont [12/16] (narrow) %v15904_v59, 8 }
0x37fe   : > { %15995 = vxpose.xlu1.b32.cont [13/16] (narrow) %v15935_v60, 8  ;;  %v16148_v60 = vld [vmem:[#allocation10 + $0x8c0] sm:$0xff] }
0x3802   : > { %15996 = vxpose.xlu1.b32.cont [14/16] (narrow) %v15936_v63, 8  ;;  %v16152_v63 = vld [vmem:[#allocation10 + $0x8e0] sm:$0xff] }
0x3806   : > { %15997 = vxpose.xlu1.b32.cont [15/16] (narrow) %v15967_v2, 8  ;;  %v16150_v2 = vld [vmem:[#allocation10 + $0x8d0] sm:$0xff] }
0x380a   : > { %15998 = vxpose.xlu1.b32.end [16/16] (narrow) %v15968_v6, 8  ;;  %v22792_v6 = vpack.c.bf16 %v16152_v63, %v16148_v60  ;;  %v16375_v60 = vld [vmem:[#allocation13 + $0x888] sm:$0xff]  ;;  %v16406_v63 = vld [vmem:[#allocation13 + $0x980] sm:$0xff] }
0x380c   : > { %22793 = vmatpush1.bf16.msra.mxu1 %v22792_v6  ;;  %v16407_v6 = vld [vmem:[#allocation13 + $0x988] sm:$0xff] }
0x384e   : > { %v15999_v12 = vpop.trf.xlu1 }
0x384f   : > { %21714 = vmatmul.mubr.f32.vlgmr.msra.gmra.mrb[74].mxu0 %v15999_v12  ;;  %v16154_v12 = vld [vmem:[#allocation10 + $0x8f0] sm:$0xff] }
0x3850   : > { %16346 = vmatprep.mubr.f32.mxu0 %v23801_v0  ;;  %22813 = vmatpush1.bf16.msra.mxu0 %v22812_v30  ;;  %v16171_v30 = vld [vmem:[#allocation10 + $0x978] sm:$0xff] }
0x3851   : > { %22815 = vmatprep.subr.bf16.mxu0 %v22814_v36  ;;  %v22830_v34 = vpack.c.bf16 %v16171_v30, %v16167_v19  ;;  %v16166_v36 = vld [vmem:[#allocation10 + $0x950] sm:$0xff]  ;;  %v16360_v19 = vld [vmem:[#allocation13 + $0x810] sm:$0xff] }
0x3852   : > { %v22832_v32 = vpack.c.bf16 %v16170_v31, %v16166_v36  ;;  %v16378_v36 = vld [vmem:[#allocation13 + $0x8a0] sm:$0xff]  ;;  %v16379_v31 = vld [vmem:[#allocation13 + $0x8a8] sm:$0xff] }
0x3854   : > { %22817 = vmatpush1.bf16.msra.mxu0 %v22816_v44  ;;  %v22834_v44 = vpack.c.bf16 %v16179_v1, %v16175_v40  ;;  %v16362_v40 = vld [vmem:[#allocation13 + $0x820] sm:$0xff]  ;;  %v16363_v1 = vld [vmem:[#allocation13 + $0x828] sm:$0xff] }
0x3855   : > { %22819 = vmatprep.subr.bf16.mxu0 %v22818_v17  ;;  %v16178_v17 = vld [vmem:[#allocation10 + $0x9b0] sm:$0xff]  ;;  %v22852_v46 = vpack.c.bf16 %v16363_v1, %v16362_v40  ;;  %v16388_v1 = vld [vmem:[#allocation13 + $0x8f0] sm:$0xff] }
0x3856   : > { %v22836_v47 = vpack.c.bf16 %v16178_v17, %v16174_v28  ;;  %v16380_v28 = vld [vmem:[#allocation13 + $0x8b0] sm:$0xff] }
0x3857   : > { %v16412_v17 = vld [vmem:[#allocation13 + $0x9b0] sm:$0xff] }
0x3858   : > { %22821 = vmatpush1.bf16.msra.mxu0 %v22820_v37  ;;  %v22838_v37 = vpack.c.bf16 %v16187_v56, %v16183_v11  ;;  %v16365_v11 = vld [vmem:[#allocation13 + $0x838] sm:$0xff] }
0x3859   : > { %22823 = vmatprep.subr.bf16.mxu0 %v22822_v5  ;;  %v16186_v5 = vld [vmem:[#allocation10 + $0x9f0] sm:$0xff] }
0x3922   : > { %v16106_v18 = vpop.f32.mrb[74].mxu0 }
0x3923   : > { %v16107_v23 = vadd.f32 %v20118_v15, %v16106_v18  ;;  %v21715_v61 = vpop.f32.mrb[75].mxu0  ;;  %v22824_v15 = vpack.c.bf16 %v16154_v12, %v16150_v2  ;;  %v16157_v18 = vld [vmem:[#allocation10 + $0x908] sm:$0xff]  ;;  %v22874_v12 = vpack.c.bf16 %v16407_v6, %v16406_v63  ;;  %v16366_v63 = vld [vmem:[#allocation13 + $0x840] sm:$0xff] }
0x3924   : > { %v16159_v61 = vld [vmem:[#allocation10 + $0x918] sm:$0xff] }
0x3925   : > { %v16110_v9 = vadd.f32 %v16107_v23, %v24989_v49  ;;  %v16161_v23 = vld [vmem:[#allocation10 + $0x928] sm:$0xff]  ;;  %22825 = vmatpush1.bf16.msra.mxu0 %v22824_v15  ;;  %v22826_v21 = vpack.c.bf16 %v16163_v20, %v16159_v61  ;;  %v16358_v61 = vld [vmem:[#allocation13 + $0x800] sm:$0xff] }
0x3926   : > { %v22794_v3 = vpack.c.bf16 %v16161_v23, %v16157_v18  ;;  %v16390_v20 = vld [vmem:[#allocation13 + $0x900] sm:$0xff] }
0x3927   : > { %16111 = vadd.xlane.f32.xlu0 %v16110_v9  ;;  %22827 = vmatprep.subr.bf16.mxu0 %v22826_v21 }
0x3928   : > { %22795 = vmatprep.subr.bf16.mxu1 %v22794_v3  ;;  %v16359_v3 = vld [vmem:[#allocation13 + $0x808] sm:$0xff] }
0x3929   : > { %22829 = vmatpush1.bf16.msra.mxu0 %v22828_v25  ;;  %v22844_v16 = vpack.c.bf16 %v16359_v3, %v16358_v61  ;;  %v16385_v61 = vld [vmem:[#allocation13 + $0x8d8] sm:$0xff]  ;;  %v16416_v3 = vld [vmem:[#allocation13 + $0x9d0] sm:$0xff] }
0x392a   : > { %22831 = vmatprep.subr.bf16.mxu0 %v22830_v34  ;;  %v16392_v34 = vld [vmem:[#allocation13 + $0x910] sm:$0xff] }
0x392d   : > { %22833 = vmatpush1.bf16.msra.mxu0 %v22832_v32  ;;  %v16411_v32 = vld [vmem:[#allocation13 + $0x9a8] sm:$0xff] }
0x392e   : > { %22835 = vmatprep.subr.bf16.mxu0 %v22834_v44  ;;  %v22882_v44 = vpack.c.bf16 %v16411_v32, %v16410_v38  ;;  %v16371_v38 = vld [vmem:[#allocation13 + $0x868] sm:$0xff]  ;;  %v16402_v32 = vld [vmem:[#allocation13 + $0x960] sm:$0xff] }
0x3931   : > { %22837 = vmatpush1.bf16.msra.mxu0 %v22836_v47  ;;  %v22884_v47 = vpack.c.bf16 %v16395_v53, %v16394_v42  ;;  %v16421_v53 = vld [vmem:[#allocation13 + $0x9f8] sm:$0xff] }
0x3932   : > { %22839 = vmatprep.subr.bf16.mxu0 %v22838_v37  ;;  %v16396_v37 = vld [vmem:[#allocation13 + $0x930] sm:$0xff] }
0x39b4   : > { %v16112_v41 = vpop.xlane.xlu0 %16111 }
0x39b5   : > { %v16113_v54 = vmul.f32 0.0078125, %v16112_v41  ;;  %v22808_v41 = vpack.c.bf16 %v16184_v48, %v16180_v62  ;;  %v22886_v62 = vpack.c.bf16 %v16413_v57, %v16412_v17  ;;  %v16397_v48 = vld [vmem:[#allocation13 + $0x938] sm:$0xff] }
0x39b7   : > { %v25153_v55 = vsub.f32 %v16110_v9, %v16113_v54  ;;  %v16160_v9 = vld [vmem:[#allocation10 + $0x920] sm:$0xff]  ;;  %v22840_v54 = vpack.c.bf16 %v16186_v5, %v16182_v50  ;;  %v16382_v50 = vld [vmem:[#allocation13 + $0x8c0] sm:$0xff] }
0x39b8   : > { %v22796_v14 = vpack.c.bf16 %v16160_v9, %v16156_v10  ;;  %v16391_v10 = vld [vmem:[#allocation13 + $0x908] sm:$0xff]  ;;  %v16376_v9 = vld [vmem:[#allocation13 + $0x890] sm:$0xff] }
0x39b9   : > { %v16115_v59 = vmul.f32 %v25153_v55, %v25153_v55  ;;  %22841 = vmatpush1.bf16.msra.mxu0 %v22840_v54  ;;  %v22876_v26 = vpack.c.bf16 %v16391_v10, %v16390_v20  ;;  %v16383_v5 = vld [vmem:[#allocation13 + $0x8c8] sm:$0xff]  ;;  %v16417_v20 = vld [vmem:[#allocation13 + $0x9d8] sm:$0xff] }
0x39ba   : > { %22797 = vmatpush1.bf16.msra.mxu1 %v22796_v14  ;;  %22875 = vmatprep.subr.bf16.mxu0 %v22874_v12  ;;  %v16377_v14 = vld [vmem:[#allocation13 + $0x898] sm:$0xff]  ;;  %v16415_v54 = vld [vmem:[#allocation13 + $0x9c8] sm:$0xff]  ;;  %v22858_v6 = vpack.c.bf16 %v16383_v5, %v16382_v50  ;;  %v22894_v51 = vpack.c.bf16 %v16417_v20, %v16416_v3  ;;  %v20119_v3 = vld [vmem:[#allocation14 + $0x4] ss:$0 sm:$0xff] }
0x39bb   : > { %16116 = vadd.xlane.f32.xlu0 %v16115_v59  ;;  %22799 = vmatprep.subr.bf16.mxu1 %v22798_v29  ;;  %v16374_v59 = vld [vmem:[#allocation13 + $0x880] sm:$0xff]  ;;  %v16361_v29 = vld [vmem:[#allocation13 + $0x818] sm:$0xff]  ;;  %v22846_v24 = vpack.c.bf16 %v16377_v14, %v16376_v9 }
0x39bc   : > { %v22842_v2 = vpack.c.bf16 %v16375_v60, %v16374_v59  ;;  %v22888_v60 = vpack.c.bf16 %v16397_v48, %v16396_v37  ;;  %v16369_v14 = vld [vmem:[#allocation13 + $0x858] sm:$0xff] }
0x39be   : > { %22801 = vmatpush1.bf16.msra.mxu1 %v22800_v27  ;;  %v16393_v27 = vld [vmem:[#allocation13 + $0x918] sm:$0xff] }
0x39bf   : > { %22803 = vmatprep.subr.bf16.mxu1 %v22802_v43  ;;  %v22880_v39 = vpack.c.bf16 %v16393_v27, %v16392_v34  ;;  %v22850_v43 = vpack.c.bf16 %v16379_v31, %v16378_v36  ;;  %v16370_v31 = vld [vmem:[#allocation13 + $0x860] sm:$0xff] }
0x39c2   : > { %22805 = vmatpush1.bf16.msra.mxu1 %v22804_v4  ;;  %v16381_v4 = vld [vmem:[#allocation13 + $0x8b8] sm:$0xff] }
0x39c3   : > { %22807 = vmatprep.subr.bf16.mxu1 %v22806_v35  ;;  %v16364_v35 = vld [vmem:[#allocation13 + $0x830] sm:$0xff]  ;;  %v22854_v56 = vpack.c.bf16 %v16381_v4, %v16380_v28  ;;  %v16373_v4 = vld [vmem:[#allocation13 + $0x878] sm:$0xff] }
0x39c4   : > { %v22856_v59 = vpack.c.bf16 %v16365_v11, %v16364_v35  ;;  %v16372_v28 = vld [vmem:[#allocation13 + $0x870] sm:$0xff]  ;;  %v16189_v11 = vld [vmem:[#allocation11 + $0x10] sm:$0xf] }
0x39c5   : > { %v22872_v57 = vpack.c.bf16 %v16373_v4, %v16372_v28  ;;  %v16198_v37 = vrot.slane %v16189_v11, %v24153_v58  ;;  %v16206_v48 = vrot.slane %v16189_v11, %v24366_v8  ;;  %v16600_v28 = vld [vmem:[#allocation2 + $0x7f8] sm:$0xff]  ;;  %v16599_v4 = vld [vmem:[#allocation2 + $0x7f0] sm:$0xff] }
0x39c6   : > { %22809 = vmatpush1.bf16.msra.mxu1 %v22808_v41  ;;  %v16414_v41 = vld [vmem:[#allocation13 + $0x9c0] sm:$0xff] }
0x39c7   : > { %22843 = vmatprep.subr.bf16.mxu1 %v22842_v2  ;;  %v16367_v2 = vld [vmem:[#allocation13 + $0x848] sm:$0xff]  ;;  %v22890_v12 = vpack.c.bf16 %v16415_v54, %v16414_v41 }
0x39c8   : > { %v22860_v10 = vpack.c.bf16 %v16367_v2, %v16366_v63 }
0x3a48   : > { %v16117_v15 = vpop.xlane.xlu0 %16116 }
0x3a49   : > { %v16118_v18 = vmul.f32 0.007874016, %v16117_v15  ;;  %v16398_v15 = vld [vmem:[#allocation13 + $0x940] sm:$0xff] }
0x3a4b   : > { %v16119_v23 = vadd.f32 1e-08, %v16118_v18  ;;  %v16399_v18 = vld [vmem:[#allocation13 + $0x948] sm:$0xff] }
0x3a4c   : > { %v22892_v9 = vpack.c.bf16 %v16399_v18, %v16398_v15 }
0x3a4d   : > { %23427 = vrsqrt.f32 %v16119_v23  ;;  %v16384_v23 = vld [vmem:[#allocation13 + $0x8d0] sm:$0xff] }
0x3a4e   : > { %v22862_v13 = vpack.c.bf16 %v16385_v61, %v16384_v23 }
0x3a57   : > { %v23428_v21 = vpop.eup %23427 }
0x3a58   : > { %v16121_v25 = vmul.f32 %v23428_v21, %v25153_v55  ;;  %v22848_v55 = vpack.c.bf16 %v16361_v29, %v16360_v19  ;;  %v16368_v21 = vld [vmem:[#allocation13 + $0x850] sm:$0xff]  ;;  %v16387_v19 = vld [vmem:[#allocation13 + $0x8e8] sm:$0xff]  ;;  %v16418_v29 = vld [vmem:[#allocation13 + $0x9e0] sm:$0xff] }
0x3a5a   : > { %v25159_v30 = vmul.f32 %v16121_v25, %v24356_v33  ;;  %v16400_v25 = vld [vmem:[#allocation13 + $0x950] sm:$0xff] }
0x3a5c   : > { %16276 = vmatmul.mubr.f32.vlgmr.msra.gmra.mrb[146].mxu1 %v25159_v30  ;;  %16347 = vmatmul.mubr.f32.vlgmr.msra.gmra.mrb[76].mxu0 %v25159_v30 }
0x3a5d   : > { %22845 = vmatpush3.bf16.msra.mxu1 %v22844_v16  ;;  %22877 = vmatpush3.bf16.msra.mxu0 %v22876_v26  ;;  %v16401_v16 = vld [vmem:[#allocation13 + $0x958] sm:$0xff]  ;;  %v16386_v26 = vld [vmem:[#allocation13 + $0x8e0] sm:$0xff] }
0x3a5e   : > { %22847 = vmatprep.subr.bf16.mxu1 %v22846_v24  ;;  %22879 = vmatprep.subr.bf16.mxu0 %v22878_v22  ;;  %v16419_v24 = vld [vmem:[#allocation13 + $0x9e8] sm:$0xff]  ;;  %v22864_v22 = vpack.c.bf16 %v16369_v14, %v16368_v21  ;;  %v22896_v34 = vpack.c.bf16 %v16401_v16, %v16400_v25  ;;  %v22866_v27 = vpack.c.bf16 %v16387_v19, %v16386_v26  ;;  %v16586_v25 = vld [vmem:[#allocation2 + $0x788] sm:$0xff]  ;;  %v16589_v16 = vld [vmem:[#allocation2 + $0x7a0] sm:$0xff] }
0x3a5f   : > { %v22898_v36 = vpack.c.bf16 %v16419_v24, %v16418_v29  ;;  %v16585_v26 = vld [vmem:[#allocation2 + $0x780] sm:$0xff]  ;;  %v22906_v19 = vpack.c.bf16 %v16589_v16, %v16586_v25  ;;  %v16588_v29 = vld [vmem:[#allocation2 + $0x798] sm:$0xff]  ;;  %v16587_v24 = vld [vmem:[#allocation2 + $0x790] sm:$0xff] }
0x3a60   : > { %v16620_v25 = vld [vmem:[#allocation2 + $0x898] sm:$0xff]  ;;  %v16622_v16 = vld [vmem:[#allocation2 + $0x8a8] sm:$0xff] }
0x3a61   : > { %22849 = vmatpush3.bf16.msra.mxu1 %v22848_v55  ;;  %22881 = vmatpush3.bf16.msra.mxu0 %v22880_v39  ;;  %v22868_v55 = vpack.c.bf16 %v16371_v38, %v16370_v31  ;;  %v16403_v39 = vld [vmem:[#allocation13 + $0x968] sm:$0xff]  ;;  %v16595_v31 = vld [vmem:[#allocation2 + $0x7d0] sm:$0xff] }
0x3a62   : > { %22851 = vmatprep.subr.bf16.mxu1 %v22850_v43  ;;  %22883 = vmatprep.subr.bf16.mxu0 %v22882_v44  ;;  %v22900_v40 = vpack.c.bf16 %v16403_v39, %v16402_v32  ;;  %v16389_v43 = vld [vmem:[#allocation13 + $0x8f8] sm:$0xff]  ;;  %v16420_v44 = vld [vmem:[#allocation13 + $0x9f0] sm:$0xff]  ;;  %v16591_v38 = vld [vmem:[#allocation2 + $0x7b0] sm:$0xff] }
0x3a63   : > { %v22870_v42 = vpack.c.bf16 %v16389_v43, %v16388_v1  ;;  %v22902_v17 = vpack.c.bf16 %v16421_v53, %v16420_v44  ;;  %v16593_v39 = vld [vmem:[#allocation2 + $0x7c0] sm:$0xff]  ;;  %v16598_v43 = vld [vmem:[#allocation2 + $0x7e8] sm:$0xff] }
0x3a64   : > { %v16601_v44 = vld [vmem:[#allocation2 + $0x800] sm:$0xff] }
0x3a65   : > { %22853 = vmatpush3.bf16.msra.mxu1 %v22852_v46  ;;  %22885 = vmatpush3.bf16.msra.mxu0 %v22884_v47  ;;  %v16404_v46 = vld [vmem:[#allocation13 + $0x970] sm:$0xff]  ;;  %v16405_v47 = vld [vmem:[#allocation13 + $0x978] sm:$0xff]  ;;  %v22914_v53 = vpack.c.bf16 %v16601_v44, %v16598_v43 }
0x3a66   : > { %22855 = vmatprep.subr.bf16.mxu1 %v22854_v56  ;;  %22887 = vmatprep.subr.bf16.mxu0 %v22886_v62  ;;  %v22904_v35 = vpack.c.bf16 %v16405_v47, %v16404_v46  ;;  %v16194_v56 = vrot.slane %v16189_v11, %v24146_v52  ;;  %v16202_v62 = vrot.slane %v16189_v11, %v24260_v45 }
0x3a69   : > { %22857 = vmatpush3.bf16.msra.mxu1 %v22856_v59  ;;  %22889 = vmatpush3.bf16.msra.mxu0 %v22888_v60 }
0x3a6a   : > { %22859 = vmatprep.subr.bf16.mxu1 %v22858_v6  ;;  %22891 = vmatprep.subr.bf16.mxu0 %v22890_v12 }
0x3a6d   : > { %22861 = vmatpush3.bf16.msra.mxu1 %v22860_v10  ;;  %22893 = vmatpush3.bf16.msra.mxu0 %v22892_v9 }
0x3a6e   : > { %22863 = vmatprep.subr.bf16.mxu1 %v22862_v13  ;;  %22895 = vmatprep.subr.bf16.mxu0 %v22894_v51 }
0x3a71   : > { %22865 = vmatpush3.bf16.msra.mxu1 %v22864_v22  ;;  %22897 = vmatpush3.bf16.msra.mxu0 %v22896_v34  ;;  %v16590_v22 = vld [vmem:[#allocation2 + $0x7a8] sm:$0xff]  ;;  %v22908_v34 = vpack.c.bf16 %v16588_v29, %v16585_v26  ;;  %v16625_v26 = vld [vmem:[#allocation2 + $0x8c0] sm:$0xff] }
0x3a72   : > { %22867 = vmatprep.subr.bf16.mxu1 %v22866_v27  ;;  %22899 = vmatprep.subr.bf16.mxu0 %v22898_v36  ;;  %v22939_v27 = vpack.c.bf16 %v16590_v22, %v16587_v24  ;;  %v16592_v36 = vld [vmem:[#allocation2 + $0x7b8] sm:$0xff]  ;;  %v22930_v29 = vpack.c.bf16 %v16625_v26, %v16622_v16  ;;  %v16621_v24 = vld [vmem:[#allocation2 + $0x8a0] sm:$0xff] }
0x3a73   : > { %v22910_v32 = vpack.c.bf16 %v16595_v31, %v16592_v36  ;;  %v16624_v22 = vld [vmem:[#allocation2 + $0x8b8] sm:$0xff]  ;;  %v16631_v31 = vld [vmem:[#allocation2 + $0x8f0] sm:$0xff] }
0x3a74   : > { %v16628_v36 = vld [vmem:[#allocation2 + $0x8d8] sm:$0xff] }
0x3a75   : > { %22869 = vmatpush3.bf16.msra.mxu1 %v22868_v55  ;;  %22901 = vmatpush3.bf16.msra.mxu0 %v22900_v40  ;;  %v16594_v55 = vld [vmem:[#allocation2 + $0x7c8] sm:$0xff]  ;;  %v16596_v40 = vld [vmem:[#allocation2 + $0x7d8] sm:$0xff] }
0x3a76   : > { %22871 = vmatprep.subr.bf16.mxu1 %v22870_v42  ;;  %22903 = vmatprep.subr.bf16.mxu0 %v22902_v17  ;;  %v22942_v1 = vpack.c.bf16 %v16596_v40, %v16593_v39  ;;  %v16597_v42 = vld [vmem:[#allocation2 + $0x7e0] sm:$0xff]  ;;  %v16602_v17 = vld [vmem:[#allocation2 + $0x808] sm:$0xff]  ;;  %v16627_v39 = vld [vmem:[#allocation2 + $0x8d0] sm:$0xff] }
0x3a77   : > { %v22945_v46 = vpack.c.bf16 %v16602_v17, %v16599_v4  ;;  %v16630_v40 = vld [vmem:[#allocation2 + $0x8e8] sm:$0xff] }
0x3a78   : > { %v22936_v43 = vpack.c.bf16 %v16630_v40, %v16627_v39 }
0x3a79   : > { %22873 = vmatpush3.bf16.msra.mxu1 %v22872_v57  ;;  %22905 = vmatpush3.bf16.msra.mxu0 %v22904_v35  ;;  %v22916_v57 = vpack.c.bf16 %v16600_v28, %v16597_v42 }
0x3a7a   : > { %22938 = vmatprep.subr.bf16.mxu0 %v23802_v7  ;;  %22907 = vmatprep.subr.bf16.mxu1 %v22906_v19 }
0x3b2f   : > { %v16277_v50 = vpop.f32.mrb[146].mxu1  ;;  %v16348_v5 = vpop.f32.mrb[76].mxu0 }
0x3b30   : > { %v16278_v41 = vadd.f32 %v16277_v50, %v16194_v56  ;;  %v16349_v54 = vadd.f32 %v16348_v5, %v16202_v62  ;;  %v16279_v59 = vpop.f32.mrb[147].mxu1  ;;  %v16350_v60 = vpop.f32.mrb[77].mxu0  ;;  %v16604_v62 = vld [vmem:[#allocation2 + $0x818] sm:$0xff]  ;;  %v16603_v50 = vld [vmem:[#allocation2 + $0x810] sm:$0xff]  ;;  %v16606_v5 = vld [vmem:[#allocation2 + $0x828] sm:$0xff] }
0x3b31   : > { %v16280_v63 = vadd.f32 %v16279_v59, %v16198_v37  ;;  %v16351_v2 = vadd.f32 %v16350_v60, %v16206_v48  ;;  %v16607_v37 = vld [vmem:[#allocation2 + $0x830] sm:$0xff]  ;;  %v16608_v59 = vld [vmem:[#allocation2 + $0x838] sm:$0xff] }
0x3b32   : > { %v16353_v15 = vmax.f32 %v16278_v41, 0.0  ;;  %v16355_v18 = vmax.f32 %v16349_v54, 0.0  ;;  %v22918_v48 = vpack.c.bf16 %v16607_v37, %v16604_v62  ;;  %v16605_v41 = vld [vmem:[#allocation2 + $0x820] sm:$0xff]  ;;  %v22920_v54 = vpack.c.bf16 %v16606_v5, %v16603_v50 }
0x3b33   : > { %v16354_v6 = vmax.f32 %v16280_v63, 0.0  ;;  %v16356_v12 = vmax.f32 %v16351_v2, 0.0  ;;  %v22948_v60 = vpack.c.bf16 %v16608_v59, %v16605_v41  ;;  %v16610_v63 = vld [vmem:[#allocation2 + $0x848] sm:$0xff]  ;;  %v16613_v2 = vld [vmem:[#allocation2 + $0x860] sm:$0xff] }
0x3b35   : > { %16494 = vmatprep.mubr.f32.mxu1 %v16354_v6  ;;  %16564 = vmatprep.mubr.f32.mxu0 %v16356_v12  ;;  %v22922_v6 = vpack.c.bf16 %v16613_v2, %v16610_v63  ;;  %v16609_v12 = vld [vmem:[#allocation2 + $0x840] sm:$0xff] }
0x3b36   : > { %16495 = vmatmul.mubr.f32.vlgmr.msra.gmra.mrb[148].mxu1 %v16353_v15  ;;  %16565 = vmatmul.mubr.f32.vlgmr.msra.gmra.mrb[78].mxu0 %v16355_v18  ;;  %v16612_v15 = vld [vmem:[#allocation2 + $0x858] sm:$0xff]  ;;  %v16611_v18 = vld [vmem:[#allocation2 + $0x850] sm:$0xff] }
0x3b37   : > { %16715 = vmatprep.mubr.f32.mxu1 %v23801_v0  ;;  %21748 = vmatprep.mubr.msk.f32.mxu0 %vm23803_vm0, %v23801_v0 }
0x3b38   : > { %22909 = vmatpush1.bf16.msra.mxu1 %v22908_v34  ;;  %22940 = vmatpush3.bf16.msra.mxu0 %v22939_v27  ;;  %v16623_v34 = vld [vmem:[#allocation2 + $0x8b0] sm:$0xff]  ;;  %v16626_v27 = vld [vmem:[#allocation2 + $0x8c8] sm:$0xff] }
0x3b39   : > { %22911 = vmatprep.subr.bf16.mxu1 %v22910_v32  ;;  %22941 = vmatprep.subr.bf16.mxu0 %v23802_v7  ;;  %v22957_v32 = vpack.c.bf16 %v16626_v27, %v16623_v34 }
0x3b3c   : > { %22943 = vmatpush3.bf16.msra.mxu0 %v22942_v1  ;;  %v16632_v1 = vld [vmem:[#allocation2 + $0x8f8] sm:$0xff] }
0x3b3d   : > { %22944 = vmatprep.subr.bf16.mxu0 %v23802_v7 }
0x3b40   : > { %22946 = vmatpush3.bf16.msra.mxu0 %v22945_v46 }
0x3b41   : > { %22947 = vmatprep.subr.bf16.mxu0 %v23802_v7 }
0x3b44   : > { %22949 = vmatpush3.bf16.msra.mxu0 %v22948_v60 }
0x3b45   : > { %22950 = vmatprep.subr.bf16.mxu0 %v23802_v7 }
0x3c09   : > { %v20792_v23 = vpop.f32.mrb[148].mxu1  ;;  %v20827_v61 = vpop.f32.mrb[78].mxu0 }
0x3c0a   : > { %v20793_v20 = vpop.f32.mrb[149].mxu1  ;;  %v20828_v10 = vpop.f32.mrb[79].mxu0 }
0x3c0b   : > { %v20794_v9 = vadd.f32 %v20793_v20, %v20792_v23  ;;  %v20829_v21 = vadd.f32 %v20828_v10, %v20827_v61  ;;  %v22924_v23 = vpack.c.bf16 %v16612_v15, %v16609_v12  ;;  %v16614_v61 = vld [vmem:[#allocation2 + $0x868] sm:$0xff]  ;;  %v16619_v20 = vld [vmem:[#allocation2 + $0x890] sm:$0xff] }
0x3c0c   : > { %v22951_v10 = vpack.c.bf16 %v16614_v61, %v16611_v18 }
0x3c0d   : > { %v16497_v14 = vadd.f32 %v20794_v9, %v20119_v3  ;;  %v16616_v3 = vld [vmem:[#allocation2 + $0x878] sm:$0xff] }
0x3c0e   : > { %v22926_v9 = vpack.c.bf16 %v16619_v20, %v16616_v3  ;;  %22952 = vmatpush3.bf16.msra.mxu0 %v22951_v10 }
0x3c0f   : > { %v16567_v13 = vadd.f32 %v20829_v21, %v16497_v14  ;;  %v16615_v21 = vld [vmem:[#allocation2 + $0x870] sm:$0xff]  ;;  %v16618_v14 = vld [vmem:[#allocation2 + $0x888] sm:$0xff]  ;;  %22953 = vmatprep.subr.bf16.mxu0 %v23802_v7 }
0x3c11   : > { %v16570_v51 = vadd.f32 %v16567_v13, %v25159_v30  ;;  %v22912_v30 = vpack.c.bf16 %v16594_v55, %v16591_v38  ;;  %v16617_v13 = vld [vmem:[#allocation2 + $0x880] sm:$0xff]  ;;  %v22932_v38 = vpack.c.bf16 %v16624_v22, %v16621_v24  ;;  %v22934_v55 = vpack.c.bf16 %v16631_v31, %v16628_v36 }
0x3c12   : > { %v22954_v19 = vpack.c.bf16 %v16620_v25, %v16617_v13 }
0x3c13   : > { %16571 = vadd.xlane.f32.xlu0 %v16570_v51  ;;  %22913 = vmatpush1.bf16.msra.mxu1 %v22912_v30  ;;  %v16629_v30 = vld [vmem:[#allocation2 + $0x8e0] sm:$0xff] }
0x3c14   : > { %22915 = vmatprep.subr.bf16.mxu1 %v22914_v53  ;;  %22955 = vmatpush3.bf16.msra.mxu0 %v22954_v19  ;;  %v22960_v44 = vpack.c.bf16 %v16632_v1, %v16629_v30 }
0x3c15   : > { %22956 = vmatprep.subr.bf16.mxu0 %v23802_v7 }
0x3c17   : > { %22917 = vmatpush1.bf16.msra.mxu1 %v22916_v57 }
0x3c18   : > { %22919 = vmatprep.subr.bf16.mxu1 %v22918_v48  ;;  %22958 = vmatpush3.bf16.msra.mxu0 %v22957_v32 }
0x3c19   : > { %22959 = vmatprep.subr.bf16.mxu0 %v23802_v7 }
0x3c1b   : > { %22921 = vmatpush1.bf16.msra.mxu1 %v22920_v54 }
0x3c1c   : > { %22923 = vmatprep.subr.bf16.mxu1 %v22922_v6  ;;  %22961 = vmatpush3.bf16.msra.mxu0 %v22960_v44 }
0x3c1d   : > { %21791 = vmatprep.subr.mxu0 %v23801_v0 }
0x3c1f   : > { %22925 = vmatpush1.bf16.msra.mxu1 %v22924_v23 }
0x3c20   : > { %22927 = vmatprep.subr.bf16.mxu1 %v22926_v9 }
0x3ca0   : > { %v16572_v47 = vpop.xlane.xlu0 %16571 }
0x3ca1   : > { %v16573_v35 = vmul.f32 0.0078125, %v16572_v47  ;;  %v25196_v47 = vld [vmem:[#allocation5 + $0xf] sm:$0x7] }
0x3ca3   : > { %v25175_v11 = vsub.f32 %v16570_v51, %v16573_v35  ;;  %v22928_v51 = vpack.c.bf16 %v16618_v14, %v16615_v21  ;;  %v16639_v35 = vrot.slane %v25196_v47, %v24146_v52 }
0x3ca5   : > { %v16575_v56 = vmul.f32 %v25175_v11, %v25175_v11  ;;  %22929 = vmatpush1.bf16.msra.mxu1 %v22928_v51 }
0x3ca6   : > { %22931 = vmatprep.subr.bf16.mxu1 %v22930_v29 }
0x3ca7   : > { %16576 = vadd.xlane.f32.xlu0 %v16575_v56 }
0x3ca9   : > { %22933 = vmatpush1.bf16.msra.mxu1 %v22932_v38 }
0x3caa   : > { %22935 = vmatprep.subr.bf16.mxu1 %v22934_v55 }
0x3cad   : > { %22937 = vmatpush1.bf16.msra.mxu1 %v22936_v43 }
0x3cae   : > { %21751 = vmatprep.subr.mxu1 %v23801_v0 }
0x3d34   : > { %v16577_v42 = vpop.xlane.xlu0 %16576 }
0x3d35   : > { %v16578_v53 = vmul.f32 0.007874016, %v16577_v42 }
0x3d37   : > { %v16579_v28 = vadd.f32 1e-08, %v16578_v53 }
0x3d39   : > { %23429 = vrsqrt.f32 %v16579_v28 }
0x3d43   : > { %v23430_v4 = vpop.eup %23429 }
0x3d44   : > { %v16581_v17 = vmul.f32 %v23430_v4, %v25175_v11  ;;  %v16643_v11 = vrot.slane %v25196_v47, %v24153_v58 }
0x3d46   : > { %v16582_v57 = vmul.f32 %v16581_v17, %v24356_v33 }
0x3d48   : > { %v25188_v46 = vadd.f32 %v16582_v57, %v24989_v49 }
0x3d4a   : > { %16716 = vmatmul.mubr.f32.vlgmr.msra.gmra.mrb[150].mxu1 %v25188_v46  ;;  %21749 = vmatmul.mubr.f32.vlgmr.msra.gmra.mrb[80].mxu0 %v25188_v46 }
0x3d4b   : > { %21753 = vmatprep.mubr.msk.f32.mxu1 %vm23803_vm0, %v23801_v0  ;;  %21793 = vmatprep.mubr.msk.f32.mxu0 %vm23803_vm0, %v23801_v0 }
0x3e1d   : > { %v16717_v49 = vpop.f32.mrb[150].mxu1  ;;  %v25202_v56 = vpop.f32.mrb[80].mxu0 }
0x3e1e   : > { %v16718_v62 = vadd.f32 %v16717_v49, %v16639_v35  ;;  %v16719_v37 = vpop.f32.mrb[151].mxu1  ;;  %v21750_v48 = vpop.f32.mrb[81].mxu0  ;;  %v23472_v49 = vld [vmem:[%s24235_s22] ss:$0 sm:$0xff] }
0x3e1f   : > { %v16720_v50 = vadd.f32 %v16719_v37, %v16643_v11 }
0x3e20   : > { %16792 = vxpose.xlu1.b32.start.end [1/1] (short) %v16718_v62, 128 }
0x3e21   : > { %16824 = vxpose.xlu0.b32.start.end [1/1] (short) %v16720_v50, 128 }
0x3ea0   : > { %v16808_v5 = vpop.trf.xlu1 }
0x3ea1   : > { %v16840_v41 = vpop.trf.xlu0  ;;  %16888 = vxpose.xlu0.b32.start [1/2] (short) (narrow) %v16808_v5, 8 }
0x3ea2   : > { %17144 = vxpose.xlu1.b32.start [1/2] (short) (narrow) %v16840_v41, 8 }
0x3ea4   : > { %v16809_v54 = vpop.trf.xlu1 }
0x3ea5   : > { %v16841_v59 = vpop.trf.xlu0  ;;  %16889 = vxpose.xlu0.b32.end [2/2] (short) (narrow) %v16809_v54, 8 }
0x3ea6   : > { %17145 = vxpose.xlu1.b32.end [2/2] (short) (narrow) %v16841_v59, 8 }
0x3ea8   : > { %v16810_v60 = vpop.trf.xlu1 }
0x3ea9   : > { %v16842_v63 = vpop.trf.xlu0 }
0x3eaa   : > { %16920 = vxpose.xlu1.b32.start [1/2] (short) (narrow) %v16810_v60, 8 }
0x3eac   : > { %v16811_v2 = vpop.trf.xlu1 }
0x3ead   : > { %v16843_v6 = vpop.trf.xlu0 }
0x3eae   : > { %16921 = vxpose.xlu1.b32.end [2/2] (short) (narrow) %v16811_v2, 8 }
0x3eb0   : > { %v16812_v12 = vpop.trf.xlu1 }
0x3eb1   : > { %v16844_v15 = vpop.trf.xlu0 }
0x3eb2   : > { %17176 = vxpose.xlu1.b32.start [1/2] (short) (narrow) %v16842_v63, 8 }
0x3eb4   : > { %v16813_v18 = vpop.trf.xlu1 }
0x3eb5   : > { %v16845_v23 = vpop.trf.xlu0 }
0x3eb6   : > { %17177 = vxpose.xlu1.b32.end [2/2] (short) (narrow) %v16843_v6, 8 }
0x3eb8   : > { %v16814_v61 = vpop.trf.xlu1 }
0x3eb9   : > { %v16846_v3 = vpop.trf.xlu0  ;;  %16984 = vxpose.xlu0.b32.start [1/2] (short) (narrow) %v16814_v61, 8 }
0x3eba   : > { %16952 = vxpose.xlu1.b32.start [1/2] (short) (narrow) %v16812_v12, 8 }
0x3ebc   : > { %v16815_v20 = vpop.trf.xlu1 }
0x3ebd   : > { %v16847_v10 = vpop.trf.xlu0  ;;  %16985 = vxpose.xlu0.b32.end [2/2] (short) (narrow) %v16815_v20, 8 }
0x3ebe   : > { %16953 = vxpose.xlu1.b32.end [2/2] (short) (narrow) %v16813_v18, 8 }
0x3ec0   : > { %v16816_v9 = vpop.trf.xlu1 }
0x3ec1   : > { %v16848_v21 = vpop.trf.xlu0  ;;  %17016 = vxpose.xlu0.b32.start [1/2] (short) (narrow) %v16816_v9, 8 }
0x3ec2   : > { %17208 = vxpose.xlu1.b32.start [1/2] (short) (narrow) %v16844_v15, 8 }
0x3ec4   : > { %v16817_v14 = vpop.trf.xlu1 }
0x3ec5   : > { %17017 = vxpose.xlu0.b32.end [2/2] (short) (narrow) %v16817_v14, 8  ;;  %v16849_v13 = vpop.trf.xlu0 }
0x3ec6   : > { %17209 = vxpose.xlu1.b32.end [2/2] (short) (narrow) %v16845_v23, 8 }
0x3ec8   : > { %v16818_v51 = vpop.trf.xlu1 }
0x3ec9   : > { %17048 = vxpose.xlu0.b32.start [1/2] (short) (narrow) %v16818_v51, 8  ;;  %v16850_v16 = vpop.trf.xlu0 }
0x3eca   : > { %17240 = vxpose.xlu1.b32.start [1/2] (short) (narrow) %v16846_v3, 8 }
0x3ecc   : > { %v16819_v25 = vpop.trf.xlu1 }
0x3ecd   : > { %17049 = vxpose.xlu0.b32.end [2/2] (short) (narrow) %v16819_v25, 8  ;;  %v16851_v19 = vpop.trf.xlu0 }
0x3ece   : > { %17241 = vxpose.xlu1.b32.end [2/2] (short) (narrow) %v16847_v10, 8 }
0x3ed0   : > { %v16820_v26 = vpop.trf.xlu1 }
0x3ed1   : > { %17080 = vxpose.xlu0.b32.start [1/2] (short) (narrow) %v16820_v26, 8  ;;  %v16852_v22 = vpop.trf.xlu0  ;;  %v16647_v26 = vrot.slane %v25196_v47, %v24260_v45 }
0x3ed2   : > { %17272 = vxpose.xlu1.b32.start [1/2] (short) (narrow) %v16848_v21, 8 }
0x3ed4   : > { %v16821_v29 = vpop.trf.xlu1 }
0x3ed5   : > { %17081 = vxpose.xlu0.b32.end [2/2] (short) (narrow) %v16821_v29, 8  ;;  %v16853_v27 = vpop.trf.xlu0 }
0x3ed6   : > { %17273 = vxpose.xlu1.b32.end [2/2] (short) (narrow) %v16849_v13, 8 }
0x3ed8   : > { %v16822_v24 = vpop.trf.xlu1 }
0x3ed9   : > { %17112 = vxpose.xlu0.b32.start [1/2] (short) (narrow) %v16822_v24, 8  ;;  %v16854_v36 = vpop.trf.xlu0 }
0x3eda   : > { %17304 = vxpose.xlu1.b32.start [1/2] (short) (narrow) %v16850_v16, 8 }
0x3edc   : > { %v16823_v34 = vpop.trf.xlu1 }
0x3edd   : > { %17113 = vxpose.xlu0.b32.end [2/2] (short) (narrow) %v16823_v34, 8  ;;  %v16855_v31 = vpop.trf.xlu0 }
0x3ede   : > { %17305 = vxpose.xlu1.b32.end [2/2] (short) (narrow) %v16851_v19, 8  ;;  %v16789_v19 = vadd.f32 %v25202_v56, %v16647_v26 }
0x3ee2   : > { %17336 = vxpose.xlu1.b32.start [1/2] (short) (narrow) %v16852_v22, 8 }
0x3ee6   : > { %17337 = vxpose.xlu1.b32.end [2/2] (short) (narrow) %v16853_v27, 8 }
0x3eea   : > { %17368 = vxpose.xlu1.b32.start [1/2] (short) (narrow) %v16854_v36, 8 }
0x3eee   : > { %17369 = vxpose.xlu1.b32.end [2/2] (short) (narrow) %v16855_v31, 8 }
0x3f21   : > { %v16904_v32 = vpop.trf.xlu0 }
0x3f22   : > { %v17160_v38 = vpop.trf.xlu1 }
0x3f23   : > { %21752 = vmatpush3.xpose.msk.msra.mxu1 %vm1609_vm1, %v17160_v38 }
0x3f24   : > { %21756 = vmatprep.subr.mxu1 %v23801_v0 }
0x3f26   : > { %21754 = vmatmul.mubr.msk.f32.vlgmr.msra.gmra.mrb[152].mxu1 %vm1609_vm1, %v16904_v32 }
0x3f27   : > { %21758 = vmatprep.mubr.msk.f32.mxu1 %vm23803_vm0, %v23801_v0 }
0x3f2a   : > { %v16936_v55 = vpop.trf.xlu1 }
0x3f32   : > { %v17192_v39 = vpop.trf.xlu1 }
0x3f33   : > { %21757 = vmatpush3.xpose.msk.msra.mxu1 %vm1609_vm1, %v17192_v39 }
0x3f34   : > { %21761 = vmatprep.subr.mxu1 %v23801_v0 }
0x3f36   : > { %21759 = vmatmul.mubr.msk.f32.vlgmr.msra.gmra.mrb[154].mxu1 %vm1609_vm1, %v16936_v55 }
0x3f37   : > { %21763 = vmatprep.mubr.msk.f32.mxu1 %vm23803_vm0, %v23801_v0 }
0x3f39   : > { %v17000_v43 = vpop.trf.xlu0 }
0x3f3a   : > { %v16968_v40 = vpop.trf.xlu1 }
0x3f41   : > { %v17032_v42 = vpop.trf.xlu0 }
0x3f42   : > { %v17224_v30 = vpop.trf.xlu1 }
0x3f43   : > { %21762 = vmatpush3.xpose.msk.msra.mxu1 %vm1609_vm1, %v17224_v30 }
0x3f44   : > { %21766 = vmatprep.subr.mxu1 %v23801_v0 }
0x3f46   : > { %21764 = vmatmul.mubr.msk.f32.vlgmr.msra.gmra.mrb[156].mxu1 %vm1609_vm1, %v16968_v40 }
0x3f47   : > { %21768 = vmatprep.mubr.msk.f32.mxu1 %vm23803_vm0, %v23801_v0 }
0x3f49   : > { %v17064_v28 = vpop.trf.xlu0 }
0x3f4a   : > { %v17256_v1 = vpop.trf.xlu1 }
0x3f4b   : > { %21767 = vmatpush3.xpose.msk.msra.mxu1 %vm1609_vm1, %v17256_v1 }
0x3f4c   : > { %21771 = vmatprep.subr.mxu1 %v23801_v0 }
0x3f4e   : > { %21769 = vmatmul.mubr.msk.f32.vlgmr.msra.gmra.mrb[158].mxu1 %vm1609_vm1, %v17000_v43 }
0x3f4f   : > { %21773 = vmatprep.mubr.msk.f32.mxu1 %vm23803_vm0, %v23801_v0 }
0x3f51   : > { %v17096_v17 = vpop.trf.xlu0 }
0x3f52   : > { %v17288_v44 = vpop.trf.xlu1 }
0x3f53   : > { %21772 = vmatpush3.xpose.msk.msra.mxu1 %vm1609_vm1, %v17288_v44 }
0x3f54   : > { %21776 = vmatprep.subr.mxu1 %v23801_v0 }
0x3f56   : > { %21774 = vmatmul.mubr.msk.f32.vlgmr.msra.gmra.mrb[160].mxu1 %vm1609_vm1, %v17032_v42 }
0x3f57   : > { %21778 = vmatprep.mubr.msk.f32.mxu1 %vm23803_vm0, %v23801_v0 }
0x3f59   : > { %v17128_v35 = vpop.trf.xlu0 }
0x3f5a   : > { %v17320_v53 = vpop.trf.xlu1 }
0x3f5b   : > { %21777 = vmatpush3.xpose.msk.msra.mxu1 %vm1609_vm1, %v17320_v53 }
0x3f5c   : > { %21781 = vmatprep.subr.mxu1 %v23801_v0 }
0x3f5e   : > { %21779 = vmatmul.mubr.msk.f32.vlgmr.msra.gmra.mrb[162].mxu1 %vm1609_vm1, %v17064_v28 }
0x3f5f   : > { %21783 = vmatprep.mubr.msk.f32.mxu1 %vm23803_vm0, %v23801_v0 }
0x3f62   : > { %v17352_v4 = vpop.trf.xlu1 }
0x3f63   : > { %21782 = vmatpush3.xpose.msk.msra.mxu1 %vm1609_vm1, %v17352_v4 }
0x3f64   : > { %21786 = vmatprep.subr.mxu1 %v23801_v0 }
0x3f66   : > { %21784 = vmatmul.mubr.msk.f32.vlgmr.msra.gmra.mrb[164].mxu1 %vm1609_vm1, %v17096_v17 }
0x3f67   : > { %21788 = vmatprep.mubr.msk.f32.mxu1 %vm23803_vm0, %v23801_v0 }
0x3f6a   : > { %v17384_v57 = vpop.trf.xlu1 }
0x3f6b   : > { %21787 = vmatpush3.xpose.msk.msra.mxu1 %vm1609_vm1, %v17384_v57 }
0x3f6c   : > { %21796 = vmatprep.subr.mxu1 %v23801_v0 }
0x3f6e   : > { %21789 = vmatmul.mubr.msk.f32.vlgmr.msra.gmra.mrb[166].mxu1 %vm1609_vm1, %v17128_v35 }
0x3f6f   : > { %21798 = vmatprep.mubr.msk.f32.mxu1 %vm23803_vm0, %v23801_v0 }
0x3ff9   : > { %v17728_v11 = vpop.f32.mrb[152].mxu1 }
0x3ffa   : > { %v17729_v62 = vadd.f32 %v23472_v49, %v17728_v11  ;;  %v21755_v37 = vpop.f32.mrb[153].mxu1 }
0x3ffc   : > { %v18264_v48 = vsel %vm2218_vm2, %v17729_v62, -inf }
0x3ffd   : > { %18265 = vmax.xlane.f32.xlu1 %v18264_v48 }
0x4009   : > { %v17804_v50 = vpop.f32.mrb[154].mxu1 }
0x400a   : > { %v21760_v5 = vpop.f32.mrb[155].mxu1  ;;  %v17805_v39 = vadd.f32 %v23472_v49, %v17804_v50 }
0x400c   : > { %v18267_v47 = vsel %vm2218_vm2, %v17805_v39, -inf }
0x4019   : > { %v17880_v41 = vpop.f32.mrb[156].mxu1 }
0x401a   : > { %v25246_v54 = vadd.f32 %v23472_v49, %v17880_v41  ;;  %v21765_v59 = vpop.f32.mrb[157].mxu1 }
0x401c   : > { %v18270_v60 = vsel %vm2218_vm2, %v25246_v54, -inf }
0x401d   : > { %18271 = vmax.xlane.f32.xlu1 %v18270_v60 }
0x4021   : > { %v17956_v63 = vpop.f32.mrb[158].mxu1 }
0x4022   : > { %v25250_v2 = vadd.f32 %v23472_v49, %v17956_v63  ;;  %v21770_v6 = vpop.f32.mrb[159].mxu1 }
0x4024   : > { %v18273_v12 = vsel %vm2218_vm2, %v25250_v2, -inf }
0x4025   : > { %18274 = vmax.xlane.f32.xlu1 %v18273_v12 }
0x4029   : > { %v18032_v15 = vpop.f32.mrb[160].mxu1 }
0x402a   : > { %v25254_v18 = vadd.f32 %v23472_v49, %v18032_v15  ;;  %v21775_v23 = vpop.f32.mrb[161].mxu1 }
0x402c   : > { %v18276_v61 = vsel %vm2218_vm2, %v25254_v18, -inf }
0x402d   : > { %18277 = vmax.xlane.f32.xlu1 %v18276_v61 }
0x4031   : > { %v18108_v3 = vpop.f32.mrb[162].mxu1 }
0x4032   : > { %v25258_v20 = vadd.f32 %v23472_v49, %v18108_v3  ;;  %v21780_v10 = vpop.f32.mrb[163].mxu1 }
0x4034   : > { %v18279_v9 = vsel %vm2218_vm2, %v25258_v20, -inf }
0x4035   : > { %18280 = vmax.xlane.f32.xlu1 %v18279_v9 }
0x4039   : > { %v18184_v21 = vpop.f32.mrb[164].mxu1 }
0x403a   : > { %v21785_v14 = vpop.f32.mrb[165].mxu1  ;;  %v25271_v40 = vadd.f32 %v23472_v49, %v18184_v21 }
0x403c   : > { %v18282_v56 = vsel %vm2218_vm2, %v25271_v40, -inf }
0x4041   : > { %v18260_v13 = vpop.f32.mrb[166].mxu1 }
0x4042   : > { %v25262_v51 = vadd.f32 %v23472_v49, %v18260_v13  ;;  %v21790_v25 = vpop.f32.mrb[167].mxu1 }
0x4044   : > { %v18285_v16 = vsel %vm2218_vm2, %v25262_v51, -inf }
0x4045   : > { %18286 = vmax.xlane.f32.xlu1 %v18285_v16 }
0x4078   : > { %16856 = vxpose.xlu1.b32.start.end [1/1] (short) %v16789_v19, 128 }
0x408a   : > { %v18266_v29 = vpop.xlane.xlu1 %18265 }
0x408b   : > { %v18288_v32 = vsub.f32 %v17729_v62, %v18266_v29 }
0x408d   : > { %v18296_v55 = vmul.f32 1.442695, %v18288_v32 }
0x408f   : > { %23431 = vpow2.f32 %v18296_v55 }
0x4099   : > { %v25276_v30 = vpop.eup %23431 }
0x409a   : > { %v18312_v1 = vsel %vm2218_vm2, %v25276_v30, 0.0 }
0x40aa   : > { %v18272_v24 = vpop.xlane.xlu1 %18271 }
0x40ab   : > { %v18290_v48 = vsub.f32 %v25246_v54, %v18272_v24 }
0x40ad   : > { %v18300_v50 = vmul.f32 1.442695, %v18290_v48 }
0x40af   : > { %23433 = vpow2.f32 %v18300_v50 }
0x40b2   : > { %v18275_v22 = vpop.xlane.xlu1 %18274 }
0x40b3   : > { %v18291_v5 = vsub.f32 %v25250_v2, %v18275_v22 }
0x40b5   : > { %v18302_v41 = vmul.f32 1.442695, %v18291_v5 }
0x40b7   : > { %23435 = vpow2.f32 %v18302_v41 }
0x40b9   : > { %v23434_v12 = vpop.eup %23433 }
0x40ba   : > { %v18278_v34 = vpop.xlane.xlu1 %18277  ;;  %v18318_v15 = vsel %vm2218_vm2, %v23434_v12, 0.0 }
0x40bb   : > { %v18292_v59 = vsub.f32 %v25254_v18, %v18278_v34 }
0x40bd   : > { %v18304_v60 = vmul.f32 1.442695, %v18292_v59 }
0x40bf   : > { %23437 = vpow2.f32 %v18304_v60 }
0x40c1   : > { %v25290_v23 = vpop.eup %23435 }
0x40c2   : > { %v18281_v27 = vpop.xlane.xlu1 %18280  ;;  %v18321_v54 = vsel %vm2218_vm2, %v25290_v23, 0.0 }
0x40c3   : > { %v18293_v63 = vsub.f32 %v25258_v20, %v18281_v27 }
0x40c5   : > { %v18306_v6 = vmul.f32 1.442695, %v18293_v63 }
0x40c7   : > { %23439 = vpow2.f32 %v18306_v6 }
0x40c9   : > { %v23438_v2 = vpop.eup %23437 }
0x40ca   : > { %v18324_v18 = vsel %vm2218_vm2, %v23438_v2, 0.0 }
0x40d1   : > { %v25295_v3 = vpop.eup %23439 }
0x40d2   : > { %v25269_v36 = vpop.xlane.xlu1 %18286  ;;  %v18327_v14 = vsel %vm2218_vm2, %v25295_v3, 0.0 }
0x40d3   : > { %v18295_v10 = vsub.f32 %v25262_v51, %v25269_v36 }
0x40d5   : > { %v18310_v25 = vmul.f32 1.442695, %v18295_v10 }
0x40f8   : > { %v16872_v31 = vpop.trf.xlu1 }
0x40f9   : > { %17400 = vxpose.xlu0.b32.start [1/2] (short) (narrow) %v16872_v31, 8 }
0x40fc   : > { %v16873_v38 = vpop.trf.xlu1 }
0x40fd   : > { %17401 = vxpose.xlu0.b32.end [2/2] (short) (narrow) %v16873_v38, 8 }
0x4100   : > { %v25280_v43 = vpop.trf.xlu1 }
0x4104   : > { %v25282_v44 = vpop.trf.xlu1 }
0x4108   : > { %v16876_v42 = vpop.trf.xlu1 }
0x410c   : > { %v16877_v53 = vpop.trf.xlu1 }
0x4110   : > { %v16878_v28 = vpop.trf.xlu1 }
0x4114   : > { %v16879_v4 = vpop.trf.xlu1 }
0x4118   : > { %v16880_v17 = vpop.trf.xlu1 }
0x411c   : > { %v16881_v57 = vpop.trf.xlu1 }
0x4120   : > { %v16882_v35 = vpop.trf.xlu1 }
0x4124   : > { %v16883_v11 = vpop.trf.xlu1 }
0x4128   : > { %v16884_v62 = vpop.trf.xlu1 }
0x412a   : > { %18268 = vmax.xlane.f32.xlu0 %v18267_v47 }
0x412c   : > { %v16885_v37 = vpop.trf.xlu1 }
0x412e   : > { %18283 = vmax.xlane.f32.xlu0 %v18282_v56 }
0x4130   : > { %v16886_v38 = vpop.trf.xlu1 }
0x4132   : > { %18313 = vadd.xlane.f32.xlu0 %v18312_v1 }
0x4134   : > { %v16887_v32 = vpop.trf.xlu1 }
0x415f   : > { %17464 = vxpose.xlu0.b32.start [1/2] (short) (narrow) %v16876_v42, 8 }
0x4163   : > { %17465 = vxpose.xlu0.b32.end [2/2] (short) (narrow) %v16877_v53, 8 }
0x4167   : > { %17496 = vxpose.xlu0.b32.start [1/2] (short) (narrow) %v16878_v28, 8 }
0x416b   : > { %17497 = vxpose.xlu0.b32.end [2/2] (short) (narrow) %v16879_v4, 8 }
0x416f   : > { %17528 = vxpose.xlu0.b32.start [1/2] (short) (narrow) %v16880_v17, 8 }
0x4173   : > { %17529 = vxpose.xlu0.b32.end [2/2] (short) (narrow) %v16881_v57, 8 }
0x4177   : > { %17560 = vxpose.xlu0.b32.start [1/2] (short) (narrow) %v16882_v35, 8 }
0x4179   : > { %v17416_v49 = vpop.trf.xlu0 }
0x417a   : > { %21792 = vmatpush3.msra.mxu0 %v17416_v49 }
0x417b   : > { %17561 = vxpose.xlu0.b32.end [2/2] (short) (narrow) %v16883_v11, 8  ;;  %21801 = vmatprep.subr.mxu0 %v23801_v0 }
0x417f   : > { %17592 = vxpose.xlu0.b32.start [1/2] (short) (narrow) %v16884_v62, 8 }
0x4183   : > { %17593 = vxpose.xlu0.b32.end [2/2] (short) (narrow) %v16885_v37, 8 }
0x41b0   : > { %18319 = vadd.xlane.f32.xlu0 %v18318_v15 }
0x41b4   : > { %18322 = vadd.xlane.f32.xlu0 %v18321_v54 }
0x41b7   : > { %v18269_v61 = vpop.xlane.xlu0 %18268 }
0x41b8   : > { %v18289_v20 = vsub.f32 %v17805_v39, %v18269_v61  ;;  %18325 = vadd.xlane.f32.xlu0 %v18324_v18 }
0x41ba   : > { %v18298_v9 = vmul.f32 1.442695, %v18289_v20 }
0x41bb   : > { %v18284_v21 = vpop.xlane.xlu0 %18283 }
0x41bc   : > { %23441 = vpow2.f32 %v18298_v9  ;;  %v18294_v13 = vsub.f32 %v25271_v40, %v18284_v21  ;;  %18328 = vadd.xlane.f32.xlu0 %v18327_v14 }
0x41be   : > { %v18308_v16 = vmul.f32 1.442695, %v18294_v13 }
0x41bf   : > { %v18314_v26 = vpop.xlane.xlu0 %18313 }
0x41c0   : > { %23443 = vpow2.f32 %v18308_v16 }
0x41c1   : > { %23445 = vrcp.f32 %v18314_v26 }
0x41c2   : > { %23447 = vpow2.f32 %v18310_v25 }
0x41c6   : > { %v23442_v19 = vpop.eup %23441 }
0x41c7   : > { %v18315_v29 = vsel %vm2218_vm2, %v23442_v19, 0.0 }
0x41c8   : > { %18316 = vadd.xlane.f32.xlu1 %v18315_v29  ;;  %v19226_v29 = vld [vmem:[#allocation7 + $0x288] sm:$0xff] }
0x41ca   : > { %v23444_v51 = vpop.eup %23443 }
0x41cb   : > { %v23446_v24 = vpop.eup %23445  ;;  %v18330_v22 = vsel %vm2218_vm2, %v23444_v51, 0.0 }
0x41cc   : > { %v25304_v34 = vpop.eup %23447  ;;  %v18344_v27 = vmul.f32 %v23446_v24, %v25276_v30  ;;  %18331 = vadd.xlane.f32.xlu0 %v18330_v22  ;;  %v19228_v22 = vld [vmem:[#allocation7 + $0x298] sm:$0xff] }
0x41cd   : > { %v18333_v36 = vsel %vm2218_vm2, %v25304_v34, 0.0 }
0x41ce   : > { %21794 = vmatmul.mubr.msk.f32.vlgmr.msra.gmra.mrb[82].mxu0 %vm2218_vm2, %v18344_v27  ;;  %v19229_v27 = vld [vmem:[#allocation7 + $0x2a0] sm:$0xff] }
0x41cf   : > { %21803 = vmatprep.mubr.msk.f32.mxu0 %vm23803_vm0, %v23801_v0 }
0x41d0   : > { %18334 = vadd.xlane.f32.xlu0 %v18333_v36  ;;  %v19230_v36 = vld [vmem:[#allocation7 + $0x2a8] sm:$0xff] }
0x41df   : > { %v17480_v31 = vpop.trf.xlu0 }
0x41e0   : > { %21802 = vmatpush3.msra.mxu0 %v17480_v31  ;;  %v22969_v31 = vpack.c.bf16 %v19230_v36, %v19229_v27  ;;  %v19347_v36 = vld [vmem:[#allocation10 + $0xa70] sm:$0xff] }
0x41e1   : > { %21811 = vmatprep.subr.mxu0 %v23801_v0 }
0x41e7   : > { %v17512_v55 = vpop.trf.xlu0 }
0x41ef   : > { %v17544_v39 = vpop.trf.xlu0 }
0x41f7   : > { %v17576_v40 = vpop.trf.xlu0 }
0x41fb   : > { %17432 = vxpose.xlu1.b32.start [1/2] (short) (narrow) %v25280_v43, 8 }
0x41fd   : > { %17624 = vxpose.xlu0.b32.start [1/2] (short) (narrow) %v16886_v38, 8  ;;  %v19231_v38 = vld [vmem:[#allocation7 + $0x2b0] sm:$0xff] }
0x41ff   : > { %17433 = vxpose.xlu1.b32.end [2/2] (short) (narrow) %v25282_v44, 8  ;;  %v17608_v47 = vpop.trf.xlu0 }
0x4201   : > { %17625 = vxpose.xlu0.b32.end [2/2] (short) (narrow) %v16887_v32, 8  ;;  %v19232_v32 = vld [vmem:[#allocation7 + $0x2b8] sm:$0xff] }
0x423d   : > { %v18320_v56 = vpop.xlane.xlu0 %18319 }
0x423e   : > { %23449 = vrcp.f32 %v18320_v56  ;;  %v19235_v56 = vld [vmem:[#allocation7 + $0x2d0] sm:$0xff] }
0x4241   : > { %v18323_v30 = vpop.xlane.xlu0 %18322 }
0x4245   : > { %v18326_v1 = vpop.xlane.xlu0 %18325 }
0x4246   : > { %23451 = vrcp.f32 %v18326_v1 }
0x4248   : > { %v23450_v42 = vpop.eup %23449 }
0x4249   : > { %v18346_v53 = vmul.f32 %v23450_v42, %v23434_v12  ;;  %v18329_v28 = vpop.xlane.xlu0 %18328  ;;  %v19237_v42 = vld [vmem:[#allocation7 + $0x2e0] sm:$0xff] }
0x424b   : > { %21804 = vmatmul.mubr.msk.f32.vlgmr.msra.gmra.mrb[84].mxu0 %vm2218_vm2, %v18346_v53  ;;  %v19238_v53 = vld [vmem:[#allocation7 + $0x2e8] sm:$0xff] }
0x424c   : > { %21812 = vmatpush3.msra.mxu0 %v17544_v39  ;;  %21813 = vmatprep.mubr.msk.f32.mxu0 %vm23803_vm0, %v23801_v0  ;;  %v19233_v39 = vld [vmem:[#allocation7 + $0x2c0] sm:$0xff] }
0x424d   : > { %21821 = vmatprep.subr.mxu0 %v23801_v0 }
0x4250   : > { %v23452_v43 = vpop.eup %23451 }
0x4251   : > { %v18348_v44 = vmul.f32 %v23452_v43, %v23438_v2  ;;  %v22981_v43 = vpack.c.bf16 %v19238_v53, %v19237_v42  ;;  %v19355_v42 = vld [vmem:[#allocation10 + $0xab0] sm:$0xff] }
0x4253   : > { %21814 = vmatmul.mubr.msk.f32.vlgmr.msra.gmra.mrb[86].mxu0 %vm2218_vm2, %v18348_v44  ;;  %v19239_v44 = vld [vmem:[#allocation7 + $0x2f0] sm:$0xff] }
0x4254   : > { %21822 = vmatpush3.msra.mxu0 %v17608_v47  ;;  %21823 = vmatprep.mubr.msk.f32.mxu0 %vm23803_vm0, %v23801_v0 }
0x4255   : > { %22962 = vmatprep.subr.bf16.mxu0 %v23802_v7  ;;  %v18317_v35 = vpop.xlane.xlu1 %18316 }
0x4259   : > { %v18332_v4 = vpop.xlane.xlu0 %18331 }
0x425a   : > { %23453 = vrcp.f32 %v18332_v4 }
0x425b   : > { %23455 = vrcp.f32 %v18317_v35 }
0x425c   : > { %23457 = vrcp.f32 %v18323_v30  ;;  %v19236_v30 = vld [vmem:[#allocation7 + $0x2d8] sm:$0xff] }
0x425d   : > { %23459 = vrcp.f32 %v18329_v28  ;;  %v18335_v11 = vpop.xlane.xlu0 %18334  ;;  %v22978_v1 = vpack.c.bf16 %v19236_v30, %v19235_v56  ;;  %v19240_v28 = vld [vmem:[#allocation7 + $0x2f8] sm:$0xff]  ;;  %v19353_v30 = vld [vmem:[#allocation10 + $0xaa0] sm:$0xff] }
0x425e   : > { %23461 = vrcp.f32 %v18335_v11  ;;  %v22984_v4 = vpack.c.bf16 %v19240_v28, %v19239_v44  ;;  %v19362_v44 = vld [vmem:[#allocation10 + $0xae8] sm:$0xff]  ;;  %v19360_v28 = vld [vmem:[#allocation10 + $0xad8] sm:$0xff] }
0x4264   : > { %v23454_v17 = vpop.eup %23453 }
0x4265   : > { %v18350_v57 = vmul.f32 %v23454_v17, %v23444_v51  ;;  %v23456_v49 = vpop.eup %23455  ;;  %v19227_v51 = vld [vmem:[#allocation7 + $0x290] sm:$0xff] }
0x4266   : > { %v18345_v62 = vmul.f32 %v23456_v49, %v23442_v19  ;;  %v23458_v48 = vpop.eup %23457  ;;  %v19225_v19 = vld [vmem:[#allocation7 + $0x280] sm:$0xff] }
0x4267   : > { %21824 = vmatmul.mubr.msk.f32.vlgmr.msra.gmra.mrb[88].mxu0 %vm2218_vm2, %v18350_v57  ;;  %v18347_v50 = vmul.f32 %v23458_v48, %v25290_v23  ;;  %v23460_v5 = vpop.eup %23459  ;;  %v22963_v24 = vpack.c.bf16 %v19226_v29, %v19225_v19  ;;  %v19344_v19 = vld [vmem:[#allocation10 + $0xa58] sm:$0xff] }
0x4268   : > { %21863 = vmatprep.mubr.msk.f32.mxu0 %vm23803_vm0, %v23801_v0  ;;  %v18349_v41 = vmul.f32 %v23460_v5, %v25295_v3  ;;  %v23462_v60 = vpop.eup %23461  ;;  %v19348_v29 = vld [vmem:[#allocation10 + $0xa78] sm:$0xff] }
0x4269   : > { %v18351_v63 = vmul.f32 %v23462_v60, %v25304_v34  ;;  %22964 = vmatpush3.bf16.msra.mxu0 %v22963_v24  ;;  %v22966_v34 = vpack.c.bf16 %v19228_v22, %v19227_v51  ;;  %v23022_v51 = vpack.c.bf16 %v19348_v29, %v19344_v19  ;;  %v19341_v24 = vld [vmem:[#allocation10 + $0xa40] sm:$0xff]  ;;  %v19375_v19 = vld [vmem:[#allocation10 + $0xb50] sm:$0xff] }
0x426a   : > { %22965 = vmatprep.subr.bf16.mxu0 %v23802_v7  ;;  %v19345_v22 = vld [vmem:[#allocation10 + $0xa60] sm:$0xff]  ;;  %v19379_v29 = vld [vmem:[#allocation10 + $0xb70] sm:$0xff] }
0x426b   : > { %v22992_v27 = vpack.c.bf16 %v19345_v22, %v19341_v24  ;;  %v19386_v24 = vld [vmem:[#allocation10 + $0xba8] sm:$0xff]  ;;  %v19384_v22 = vld [vmem:[#allocation10 + $0xb98] sm:$0xff] }
0x426d   : > { %22967 = vmatpush3.bf16.msra.mxu0 %v22966_v34  ;;  %v19343_v34 = vld [vmem:[#allocation10 + $0xa50] sm:$0xff] }
0x426e   : > { %22968 = vmatprep.subr.bf16.mxu0 %v23802_v7 }
0x4271   : > { %22970 = vmatpush3.bf16.msra.mxu0 %v22969_v31  ;;  %v19350_v31 = vld [vmem:[#allocation10 + $0xa88] sm:$0xff] }
0x4272   : > { %22971 = vmatprep.subr.bf16.mxu0 %v23802_v7 }
0x427b   : > { %v17448_v37 = vpop.trf.xlu1 }
0x427c   : > { %21797 = vmatpush3.msra.mxu1 %v17448_v37 }
0x427d   : > { %21799 = vmatmul.mubr.msk.f32.vlgmr.msra.gmra.mrb[168].mxu1 %vm2218_vm2, %v18345_v62  ;;  %21806 = vmatprep.subr.mxu1 %v23801_v0  ;;  %v17640_v59 = vpop.trf.xlu0 }
0x427e   : > { %21807 = vmatpush3.msra.mxu1 %v17512_v55  ;;  %21808 = vmatprep.mubr.msk.f32.mxu1 %vm23803_vm0, %v23801_v0  ;;  %v22972_v55 = vpack.c.bf16 %v19232_v32, %v19231_v38  ;;  %v19354_v38 = vld [vmem:[#allocation10 + $0xaa8] sm:$0xff]  ;;  %v23024_v32 = vpack.c.bf16 %v19347_v36, %v19343_v34  ;;  %v19388_v34 = vld [vmem:[#allocation10 + $0xbb8] sm:$0xff] }
0x427f   : > { %21816 = vmatprep.subr.mxu1 %v23801_v0  ;;  %v23042_v36 = vpack.c.bf16 %v19388_v34, %v19384_v22  ;;  %v19603_v34 = vld [vmem:[#allocation13 + $0xb20] sm:$0xff] }
0x4280   : > { %22973 = vmatpush3.bf16.msra.mxu0 %v22972_v55  ;;  %v22994_v55 = vpack.c.bf16 %v19354_v38, %v19350_v31  ;;  %v19381_v31 = vld [vmem:[#allocation10 + $0xb80] sm:$0xff] }
0x4281   : > { %21809 = vmatmul.mubr.msk.f32.vlgmr.msra.gmra.mrb[170].mxu1 %vm2218_vm2, %v18347_v50  ;;  %22974 = vmatprep.subr.bf16.mxu0 %v23802_v7  ;;  %v19385_v38 = vld [vmem:[#allocation10 + $0xba0] sm:$0xff] }
0x4282   : > { %21817 = vmatpush3.msra.mxu1 %v17576_v40  ;;  %21818 = vmatprep.mubr.msk.f32.mxu1 %vm23803_vm0, %v23801_v0  ;;  %v19234_v40 = vld [vmem:[#allocation7 + $0x2c8] sm:$0xff] }
0x4283   : > { %21826 = vmatprep.subr.mxu1 %v23801_v0  ;;  %v22975_v47 = vpack.c.bf16 %v19234_v40, %v19233_v39  ;;  %v19352_v39 = vld [vmem:[#allocation10 + $0xa98] sm:$0xff] }
0x4284   : > { %v19356_v40 = vld [vmem:[#allocation10 + $0xab8] sm:$0xff] }
0x4285   : > { %21819 = vmatmul.mubr.msk.f32.vlgmr.msra.gmra.mrb[172].mxu1 %vm2218_vm2, %v18349_v41  ;;  %22976 = vmatpush3.bf16.msra.mxu0 %v22975_v47  ;;  %v19349_v47 = vld [vmem:[#allocation10 + $0xa80] sm:$0xff]  ;;  %v23026_v56 = vpack.c.bf16 %v19356_v40, %v19352_v39  ;;  %v19387_v39 = vld [vmem:[#allocation10 + $0xbb0] sm:$0xff]  ;;  %v19390_v40 = vld [vmem:[#allocation10 + $0xbc8] sm:$0xff] }
0x4286   : > { %21827 = vmatpush3.msra.mxu1 %v17640_v59  ;;  %21828 = vmatprep.mubr.msk.f32.mxu1 %vm23803_vm0, %v23801_v0  ;;  %v22996_v53 = vpack.c.bf16 %v19353_v30, %v19349_v47  ;;  %v19394_v47 = vld [vmem:[#allocation10 + $0xbe8] sm:$0xff] }
0x4287   : > { %22977 = vmatprep.subr.bf16.mxu0 %v23802_v7  ;;  %v23014_v30 = vpack.c.bf16 %v19394_v47, %v19390_v40  ;;  %v19573_v40 = vld [vmem:[#allocation13 + $0xa30] sm:$0xff]  ;;  %v19574_v47 = vld [vmem:[#allocation13 + $0xa38] sm:$0xff] }
0x4289   : > { %21829 = vmatmul.mubr.msk.f32.vlgmr.msra.gmra.mrb[174].mxu1 %vm2218_vm2, %v18351_v63  ;;  %22979 = vmatpush3.bf16.msra.mxu0 %v22978_v1  ;;  %v19351_v1 = vld [vmem:[#allocation10 + $0xa90] sm:$0xff] }
0x428a   : > { %19484 = vmatprep.mubr.f32.mxu1 %v23801_v0  ;;  %22980 = vmatprep.subr.bf16.mxu0 %v23802_v7 }
0x428d   : > { %22982 = vmatpush3.bf16.msra.mxu0 %v22981_v43  ;;  %v19358_v43 = vld [vmem:[#allocation10 + $0xac8] sm:$0xff] }
0x428e   : > { %22983 = vmatprep.subr.bf16.mxu0 %v23802_v7 }
0x4291   : > { %22985 = vmatpush3.bf16.msra.mxu0 %v22984_v4  ;;  %v23028_v4 = vpack.c.bf16 %v19355_v42, %v19351_v1  ;;  %v19392_v1 = vld [vmem:[#allocation10 + $0xbd8] sm:$0xff] }
0x4292   : > { %v19396_v42 = vld [vmem:[#allocation10 + $0xbf8] sm:$0xff] }
0x42a1   : > { %v18421_v6 = vpop.f32.mrb[82].mxu0 }
0x42a2   : > { %v21795_v12 = vpop.f32.mrb[83].mxu0  ;;  %18936 = vxpose.xlu1.b32.start.end [1/1] (short) (narrow) %v18421_v6, 16  ;;  %v20144_v6 = vld [vmem:[#allocation8 + $0x5] ss:$0 sm:$0xff] }
0x431e   : > { %v18567_v15 = vpop.f32.mrb[84].mxu0 }
0x431f   : > { %19000 = vxpose.xlu1.b32.start.end [1/1] (short) (narrow) %v18567_v15, 16  ;;  %v21805_v23 = vpop.f32.mrb[85].mxu0 }
0x4322   : > { %v18952_v3 = vpop.trf.xlu1 }
0x4326   : > { %v18713_v54 = vpop.f32.mrb[86].mxu0  ;;  %v18953_v20 = vpop.trf.xlu1 }
0x4327   : > { %19064 = vxpose.xlu1.b32.start.end [1/1] (short) (narrow) %v18713_v54, 16  ;;  %v21815_v2 = vpop.f32.mrb[87].mxu0 }
0x4328   : > { %v19334_v2 = vld [vmem:[#allocation10 + $0xa08] sm:$0xff] }
0x433a   : > { %v18859_v61 = vpop.f32.mrb[88].mxu0 }
0x433b   : > { %19128 = vxpose.xlu1.b32.start.end [1/1] (short) (narrow) %v18859_v61, 16  ;;  %v21825_v18 = vpop.f32.mrb[89].mxu0  ;;  %v19338_v61 = vld [vmem:[#allocation10 + $0xa28] sm:$0xff] }
0x433c   : > { %v19336_v18 = vld [vmem:[#allocation10 + $0xa18] sm:$0xff] }
0x4340   : > { %19192 = vxpose.xlu1.b32.start [1/16] (narrow) %v18952_v3, 8  ;;  %v22986_v3 = vpack.c.bf16 %v19338_v61, %v19334_v2 }
0x4342   : > { %22987 = vmatprep.subr.bf16.mxu1 %v22986_v3  ;;  %v19371_v3 = vld [vmem:[#allocation10 + $0xb30] sm:$0xff] }
0x4344   : > { %19193 = vxpose.xlu1.b32.cont [2/16] (narrow) %v18953_v20, 8  ;;  %v19340_v20 = vld [vmem:[#allocation10 + $0xa38] sm:$0xff] }
0x4350   : > { %v18494_v10 = vpop.f32.mrb[168].mxu1 }
0x4351   : > { %18968 = vxpose.xlu0.b32.start.end [1/1] (short) (narrow) %v18494_v10, 16  ;;  %v21800_v9 = vpop.f32.mrb[169].mxu1  ;;  %v19333_v10 = vld [vmem:[#allocation10 + $0xa00] sm:$0xff] }
0x4352   : > { %v19337_v9 = vld [vmem:[#allocation10 + $0xa20] sm:$0xff] }
0x4354   : > { %v18640_v21 = vpop.f32.mrb[170].mxu1 }
0x4355   : > { %v21810_v14 = vpop.f32.mrb[171].mxu1 }
0x4356   : > { %19032 = vxpose.xlu0.b32.start.end [1/1] (short) (narrow) %v18640_v21, 16  ;;  %v23018_v21 = vpack.c.bf16 %v19340_v20, %v19336_v18  ;;  %v22988_v14 = vpack.c.bf16 %v19337_v9, %v19333_v10  ;;  %v19367_v18 = vld [vmem:[#allocation10 + $0xb10] sm:$0xff]  ;;  %v19374_v10 = vld [vmem:[#allocation10 + $0xb48] sm:$0xff] }
0x4357   : > { %v23036_v20 = vpack.c.bf16 %v19371_v3, %v19367_v18  ;;  %v19378_v9 = vld [vmem:[#allocation10 + $0xb68] sm:$0xff] }
0x4358   : > { %v18786_v13 = vpop.f32.mrb[172].mxu1  ;;  %23019 = vmatprep.subr.bf16.mxu0 %v23018_v21  ;;  %22989 = vmatpush1.bf16.msra.mxu1 %v22988_v14  ;;  %v19376_v21 = vld [vmem:[#allocation10 + $0xb58] sm:$0xff]  ;;  %v23006_v14 = vpack.c.bf16 %v19378_v9, %v19374_v10  ;;  %v19570_v10 = vld [vmem:[#allocation13 + $0xa18] sm:$0xff] }
0x4359   : > { %v21820_v25 = vpop.f32.mrb[173].mxu1 }
0x435a   : > { %v19339_v25 = vld [vmem:[#allocation10 + $0xa30] sm:$0xff] }
0x435b   : > { %19096 = vxpose.xlu0.b32.start.end [1/1] (short) (narrow) %v18786_v13, 16  ;;  %v19335_v13 = vld [vmem:[#allocation10 + $0xa10] sm:$0xff] }
0x435c   : > { %v18932_v16 = vpop.f32.mrb[174].mxu1 }
0x435d   : > { %v21830_v26 = vpop.f32.mrb[175].mxu1 }
0x435e   : > { %v19346_v26 = vld [vmem:[#allocation10 + $0xa68] sm:$0xff] }
0x4360   : > { %19160 = vxpose.xlu0.b32.start.end [1/1] (short) (narrow) %v18932_v16, 16  ;;  %v19342_v16 = vld [vmem:[#allocation10 + $0xa48] sm:$0xff] }
0x439f   : > { %v19016_v35 = vpop.trf.xlu1 }
0x43a3   : > { %v19017_v11 = vpop.trf.xlu1 }
0x43a7   : > { %v19080_v37 = vpop.trf.xlu1 }
0x43ab   : > { %v19081_v48 = vpop.trf.xlu1 }
0x43bb   : > { %v19144_v5 = vpop.trf.xlu1 }
0x43bf   : > { %v19145_v41 = vpop.trf.xlu1 }
0x43d1   : > { %v18984_v17 = vpop.trf.xlu0 }
0x43d2   : > { %19194 = vxpose.xlu1.b32.cont [3/16] (narrow) %v18984_v17, 8  ;;  %v22998_v17 = vpack.c.bf16 %v19362_v44, %v19358_v43  ;;  %v23046_v43 = vpack.c.bf16 %v19396_v42, %v19392_v1  ;;  %v19393_v44 = vld [vmem:[#allocation10 + $0xbe0] sm:$0xff]  ;;  %v19605_v1 = vld [vmem:[#allocation13 + $0xb30] sm:$0xff]  ;;  %v19606_v42 = vld [vmem:[#allocation13 + $0xb38] sm:$0xff] }
0x43d5   : > { %v18985_v57 = vpop.trf.xlu0 }
0x43d6   : > { %19195 = vxpose.xlu1.b32.cont [4/16] (narrow) %v18985_v57, 8  ;;  %v19364_v57 = vld [vmem:[#allocation10 + $0xaf8] sm:$0xff] }
0x43d9   : > { %v19048_v49 = vpop.trf.xlu0 }
0x43da   : > { %19196 = vxpose.xlu1.b32.cont [5/16] (narrow) %v19016_v35, 8  ;;  %v23030_v35 = vpack.c.bf16 %v19364_v57, %v19360_v28  ;;  %v19391_v28 = vld [vmem:[#allocation10 + $0xbd0] sm:$0xff] }
0x43dd   : > { %v19049_v62 = vpop.trf.xlu0 }
0x43de   : > { %19197 = vxpose.xlu1.b32.cont [6/16] (narrow) %v19017_v11, 8 }
0x43e1   : > { %v19112_v50 = vpop.trf.xlu0 }
0x43e2   : > { %19198 = vxpose.xlu1.b32.cont [7/16] (narrow) %v19048_v49, 8 }
0x43e5   : > { %v19113_v7 = vpop.trf.xlu0 }
0x43e6   : > { %19199 = vxpose.xlu1.b32.cont [8/16] (narrow) %v19049_v62, 8 }
0x43e9   : > { %v19176_v59 = vpop.trf.xlu0 }
0x43ea   : > { %19200 = vxpose.xlu1.b32.cont [9/16] (narrow) %v19080_v37, 8 }
0x43ed   : > { %v19177_v60 = vpop.trf.xlu0 }
0x43ee   : > { %19201 = vxpose.xlu1.b32.cont [10/16] (narrow) %v19081_v48, 8  ;;  %v19357_v48 = vld [vmem:[#allocation10 + $0xac0] sm:$0xff] }
0x43f2   : > { %19202 = vxpose.xlu1.b32.cont [11/16] (narrow) %v19112_v50, 8  ;;  %v19361_v50 = vld [vmem:[#allocation10 + $0xae0] sm:$0xff] }
0x43f6   : > { %19203 = vxpose.xlu1.b32.cont [12/16] (narrow) %v19113_v7, 8  ;;  %v19359_v7 = vld [vmem:[#allocation10 + $0xad0] sm:$0xff] }
0x43fa   : > { %19204 = vxpose.xlu1.b32.cont [13/16] (narrow) %v19144_v5, 8  ;;  %v23000_v5 = vpack.c.bf16 %v19361_v50, %v19357_v48  ;;  %v19616_v48 = vld [vmem:[#allocation13 + $0xb88] sm:$0xff] }
0x43fe   : > { %19205 = vxpose.xlu1.b32.cont [14/16] (narrow) %v19145_v41, 8  ;;  %v19363_v41 = vld [vmem:[#allocation10 + $0xaf0] sm:$0xff] }
0x4402   : > { %19206 = vxpose.xlu1.b32.cont [15/16] (narrow) %v19176_v59, 8  ;;  %v23032_v59 = vpack.c.bf16 %v19363_v41, %v19359_v7 }
0x4406   : > { %19207 = vxpose.xlu1.b32.end [16/16] (narrow) %v19177_v60, 8  ;;  %v19366_v60 = vld [vmem:[#allocation10 + $0xb08] sm:$0xff] }
0x444a   : > { %v19208_v63 = vpop.trf.xlu1 }
0x444b   : > { %21864 = vmatmul.mubr.f32.vlgmr.msra.gmra.mrb[90].mxu0 %v19208_v63  ;;  %v19370_v63 = vld [vmem:[#allocation10 + $0xb28] sm:$0xff] }
0x444c   : > { %19555 = vmatprep.mubr.f32.mxu0 %v23801_v0  ;;  %v23020_v0 = vpack.c.bf16 %v19339_v25, %v19335_v13  ;;  %v19380_v13 = vld [vmem:[#allocation10 + $0xb78] sm:$0xff]  ;;  %v19373_v25 = vld [vmem:[#allocation10 + $0xb40] sm:$0xff] }
0x444e   : > { %23021 = vmatpush1.bf16.msra.mxu0 %v23020_v0  ;;  %v23038_v0 = vpack.c.bf16 %v19380_v13, %v19376_v21  ;;  %v19601_v13 = vld [vmem:[#allocation13 + $0xb10] sm:$0xff] }
0x444f   : > { %23023 = vmatprep.subr.bf16.mxu0 %v23022_v51  ;;  %v23040_v51 = vpack.c.bf16 %v19379_v29, %v19375_v19  ;;  %v19620_v19 = vld [vmem:[#allocation13 + $0xba8] sm:$0xff] }
0x4452   : > { %23025 = vmatpush1.bf16.msra.mxu0 %v23024_v32  ;;  %v19383_v32 = vld [vmem:[#allocation10 + $0xb90] sm:$0xff] }
0x4453   : > { %23027 = vmatprep.subr.bf16.mxu0 %v23026_v56  ;;  %v23044_v56 = vpack.c.bf16 %v19387_v39, %v19383_v32  ;;  %v19622_v32 = vld [vmem:[#allocation13 + $0xbb8] sm:$0xff] }
0x4456   : > { %23029 = vmatpush1.bf16.msra.mxu0 %v23028_v4  ;;  %v19395_v4 = vld [vmem:[#allocation10 + $0xbf0] sm:$0xff] }
0x4457   : > { %23031 = vmatprep.subr.bf16.mxu0 %v23030_v35  ;;  %v23048_v57 = vpack.c.bf16 %v19395_v4, %v19391_v28  ;;  %v19583_v35 = vld [vmem:[#allocation13 + $0xa80] sm:$0xff]  ;;  %v19624_v28 = vld [vmem:[#allocation13 + $0xbc8] sm:$0xff]  ;;  %v23064_v4 = vpack.c.bf16 %v19574_v47, %v19573_v40 }
0x445a   : > { %23033 = vmatpush1.bf16.msra.mxu0 %v23032_v59  ;;  %v19567_v59 = vld [vmem:[#allocation13 + $0xa00] sm:$0xff] }
0x451e   : > { %v19315_v12 = vpop.f32.mrb[90].mxu0 }
0x451f   : > { %v19316_v15 = vadd.f32 %v20144_v6, %v19315_v12  ;;  %v21865_v23 = vpop.f32.mrb[91].mxu0  ;;  %v19368_v6 = vld [vmem:[#allocation10 + $0xb18] sm:$0xff]  ;;  %v23002_v12 = vpack.c.bf16 %v19370_v63, %v19366_v60  ;;  %v19568_v60 = vld [vmem:[#allocation13 + $0xa08] sm:$0xff] }
0x4520   : > { %v19365_v23 = vld [vmem:[#allocation10 + $0xb00] sm:$0xff]  ;;  %v19599_v63 = vld [vmem:[#allocation13 + $0xb00] sm:$0xff]  ;;  %v23052_v18 = vpack.c.bf16 %v19568_v60, %v19567_v59 }
0x4521   : > { %v19319_v54 = vadd.f32 %v19316_v15, %v25188_v46  ;;  %v22990_v46 = vpack.c.bf16 %v19346_v26, %v19342_v16  ;;  %v19372_v15 = vld [vmem:[#allocation10 + $0xb38] sm:$0xff]  ;;  %v19377_v16 = vld [vmem:[#allocation10 + $0xb60] sm:$0xff] }
0x4522   : > { %v23034_v2 = vpack.c.bf16 %v19372_v15, %v19368_v6  ;;  %v23008_v26 = vpack.c.bf16 %v19377_v16, %v19373_v25  ;;  %v19600_v6 = vld [vmem:[#allocation13 + $0xb08] sm:$0xff]  ;;  %v19602_v25 = vld [vmem:[#allocation13 + $0xb18] sm:$0xff]  ;;  %v19587_v16 = vld [vmem:[#allocation13 + $0xaa0] sm:$0xff] }
0x4523   : > { %19320 = vadd.xlane.f32.xlu0 %v19319_v54  ;;  %22991 = vmatprep.subr.bf16.mxu1 %v22990_v46  ;;  %v19382_v46 = vld [vmem:[#allocation10 + $0xb88] sm:$0xff]  ;;  %v23084_v3 = vpack.c.bf16 %v19600_v6, %v19599_v63  ;;  %v23088_v29 = vpack.c.bf16 %v19602_v25, %v19601_v13  ;;  %v19578_v6 = vld [vmem:[#allocation13 + $0xa58] sm:$0xff]  ;;  %v19579_v13 = vld [vmem:[#allocation13 + $0xa60] sm:$0xff] }
0x4524   : > { %22993 = vmatpush1.bf16.msra.mxu1 %v22992_v27  ;;  %23035 = vmatprep.subr.bf16.mxu0 %v23034_v2  ;;  %v23010_v27 = vpack.c.bf16 %v19386_v24, %v19382_v46  ;;  %v19618_v2 = vld [vmem:[#allocation13 + $0xb98] sm:$0xff]  ;;  %v19571_v46 = vld [vmem:[#allocation13 + $0xa20] sm:$0xff]  ;;  %v19577_v63 = vld [vmem:[#allocation13 + $0xa50] sm:$0xff] }
0x4525   : > { %22995 = vmatprep.subr.bf16.mxu1 %v22994_v55  ;;  %23037 = vmatpush1.bf16.msra.mxu0 %v23036_v20  ;;  %v23012_v55 = vpack.c.bf16 %v19385_v38, %v19381_v31  ;;  %v19569_v20 = vld [vmem:[#allocation13 + $0xa10] sm:$0xff]  ;;  %v19590_v31 = vld [vmem:[#allocation13 + $0xab8] sm:$0xff]  ;;  %v19580_v25 = vld [vmem:[#allocation13 + $0xa68] sm:$0xff] }
0x4526   : > { %23039 = vmatprep.subr.bf16.mxu0 %v23038_v0  ;;  %v19588_v0 = vld [vmem:[#allocation13 + $0xaa8] sm:$0xff]  ;;  %v19621_v38 = vld [vmem:[#allocation13 + $0xbb0] sm:$0xff] }
0x4527   : > { %v23058_v24 = vpack.c.bf16 %v19588_v0, %v19587_v16  ;;  %v19611_v16 = vld [vmem:[#allocation13 + $0xb60] sm:$0xff]  ;;  %v23076_v0 = vpack.c.bf16 %v19580_v25, %v19579_v13 }
0x4528   : > { %22997 = vmatpush1.bf16.msra.mxu1 %v22996_v53  ;;  %v19389_v53 = vld [vmem:[#allocation10 + $0xbc0] sm:$0xff] }
0x4529   : > { %22999 = vmatprep.subr.bf16.mxu1 %v22998_v17  ;;  %23041 = vmatpush1.bf16.msra.mxu0 %v23040_v51  ;;  %v23016_v17 = vpack.c.bf16 %v19393_v44, %v19389_v53  ;;  %v19572_v51 = vld [vmem:[#allocation13 + $0xa28] sm:$0xff]  ;;  %v19591_v53 = vld [vmem:[#allocation13 + $0xac0] sm:$0xff] }
0x452a   : > { %23043 = vmatprep.subr.bf16.mxu0 %v23042_v36  ;;  %v19589_v36 = vld [vmem:[#allocation13 + $0xab0] sm:$0xff]  ;;  %v19623_v44 = vld [vmem:[#allocation13 + $0xbc0] sm:$0xff] }
0x452c   : > { %23001 = vmatpush1.bf16.msra.mxu1 %v23000_v5 }
0x452d   : > { %23003 = vmatprep.subr.bf16.mxu1 %v23002_v12  ;;  %23045 = vmatpush1.bf16.msra.mxu0 %v23044_v56  ;;  %v19585_v12 = vld [vmem:[#allocation13 + $0xa90] sm:$0xff]  ;;  %v23062_v56 = vpack.c.bf16 %v19590_v31, %v19589_v36 }
0x452e   : > { %23047 = vmatprep.subr.bf16.mxu0 %v23046_v43  ;;  %v19592_v43 = vld [vmem:[#allocation13 + $0xac8] sm:$0xff]  ;;  %v19613_v31 = vld [vmem:[#allocation13 + $0xb70] sm:$0xff] }
0x4531   : > { %23049 = vmatpush1.bf16.msra.mxu0 %v23048_v57  ;;  %v19575_v57 = vld [vmem:[#allocation13 + $0xa40] sm:$0xff] }
0x45b0   : > { %v19321_v11 = vpop.xlane.xlu0 %19320 }
0x45b1   : > { %v19322_v49 = vmul.f32 0.0078125, %v19321_v11  ;;  %v19584_v11 = vld [vmem:[#allocation13 + $0xa88] sm:$0xff] }
0x45b3   : > { %v25352_v62 = vsub.f32 %v19319_v54, %v19322_v49  ;;  %v19369_v54 = vld [vmem:[#allocation10 + $0xb20] sm:$0xff]  ;;  %v19615_v49 = vld [vmem:[#allocation13 + $0xb80] sm:$0xff] }
0x45b4   : > { %v23004_v61 = vpack.c.bf16 %v19369_v54, %v19365_v23  ;;  %v23082_v50 = vpack.c.bf16 %v19616_v48, %v19615_v49  ;;  %v19586_v23 = vld [vmem:[#allocation13 + $0xa98] sm:$0xff]  ;;  %v19617_v54 = vld [vmem:[#allocation13 + $0xb90] sm:$0xff]  ;;  %v23098_v49 = vpack.c.bf16 %v19624_v28, %v19623_v44  ;;  %v19608_v48 = vld [vmem:[#allocation13 + $0xb48] sm:$0xff] }
0x45b5   : > { %v19324_v37 = vmul.f32 %v25352_v62, %v25352_v62  ;;  %v23054_v21 = vpack.c.bf16 %v19586_v23, %v19585_v12  ;;  %v19609_v23 = vld [vmem:[#allocation13 + $0xb50] sm:$0xff] }
0x45b6   : > { %23005 = vmatpush1.bf16.msra.mxu1 %v23004_v61  ;;  %23083 = vmatprep.subr.bf16.mxu0 %v23082_v50  ;;  %v19593_v50 = vld [vmem:[#allocation13 + $0xad0] sm:$0xff] }
0x45b7   : > { %19325 = vadd.xlane.f32.xlu0 %v19324_v37  ;;  %23007 = vmatprep.subr.bf16.mxu1 %v23006_v14  ;;  %v23050_v37 = vpack.c.bf16 %v19584_v11, %v19583_v35  ;;  %v23086_v14 = vpack.c.bf16 %v19618_v2, %v19617_v54  ;;  %v19576_v35 = vld [vmem:[#allocation13 + $0xa48] sm:$0xff]  ;;  %v23066_v11 = vpack.c.bf16 %v19592_v43, %v19591_v53  ;;  %v19610_v54 = vld [vmem:[#allocation13 + $0xb58] sm:$0xff]  ;;  %v19595_v2 = vld [vmem:[#allocation13 + $0xae0] sm:$0xff] }
0x45b8   : > { %v23068_v59 = vpack.c.bf16 %v19576_v35, %v19575_v57 }
0x45ba   : > { %23009 = vmatpush1.bf16.msra.mxu1 %v23008_v26  ;;  %v19619_v26 = vld [vmem:[#allocation13 + $0xba0] sm:$0xff] }
0x45bb   : > { %23011 = vmatprep.subr.bf16.mxu1 %v23010_v27  ;;  %v23090_v22 = vpack.c.bf16 %v19620_v19, %v19619_v26  ;;  %v19604_v27 = vld [vmem:[#allocation13 + $0xb28] sm:$0xff] }
0x45bc   : > { %v23092_v39 = vpack.c.bf16 %v19604_v27, %v19603_v34  ;;  %v19612_v26 = vld [vmem:[#allocation13 + $0xb68] sm:$0xff]  ;;  %v19582_v34 = vld [vmem:[#allocation13 + $0xa78] sm:$0xff] }
0x45bd   : > { %v23108_v19 = vpack.c.bf16 %v19612_v26, %v19611_v16 }
0x45be   : > { %23013 = vmatpush1.bf16.msra.mxu1 %v23012_v55  ;;  %v23060_v55 = vpack.c.bf16 %v19572_v51, %v19571_v46  ;;  %v19629_v46 = vld [vmem:[#allocation13 + $0xbf0] sm:$0xff] }
0x45bf   : > { %23015 = vmatprep.subr.bf16.mxu1 %v23014_v30  ;;  %v23094_v30 = vpack.c.bf16 %v19622_v32, %v19621_v38  ;;  %v19614_v38 = vld [vmem:[#allocation13 + $0xb78] sm:$0xff] }
0x45c0   : > { %v23112_v32 = vpack.c.bf16 %v19614_v38, %v19613_v31 }
0x45c2   : > { %23017 = vmatpush1.bf16.msra.mxu1 %v23016_v17  ;;  %v23096_v17 = vpack.c.bf16 %v19606_v42, %v19605_v1 }
0x45c3   : > { %23051 = vmatprep.subr.bf16.mxu1 %v23050_v37  ;;  %v19607_v37 = vld [vmem:[#allocation13 + $0xb40] sm:$0xff] }
0x45c4   : > { %v23100_v60 = vpack.c.bf16 %v19608_v48, %v19607_v37 }
0x4644   : > { %v19326_v7 = vpop.xlane.xlu0 %19325 }
0x4645   : > { %v19327_v5 = vmul.f32 0.007874016, %v19326_v7  ;;  %v19594_v7 = vld [vmem:[#allocation13 + $0xad8] sm:$0xff] }
0x4646   : > { %v23070_v12 = vpack.c.bf16 %v19594_v7, %v19593_v50 }
0x4647   : > { %v19328_v41 = vadd.f32 1e-08, %v19327_v5  ;;  %v19625_v5 = vld [vmem:[#allocation13 + $0xbd0] sm:$0xff] }
0x4649   : > { %23463 = vrsqrt.f32 %v19328_v41  ;;  %v19626_v41 = vld [vmem:[#allocation13 + $0xbd8] sm:$0xff] }
0x4653   : > { %v23464_v15 = vpop.eup %23463 }
0x4654   : > { %v19330_v61 = vmul.f32 %v23464_v15, %v25352_v62  ;;  %v23056_v62 = vpack.c.bf16 %v19570_v10, %v19569_v20  ;;  %v23102_v15 = vpack.c.bf16 %v19626_v41, %v19625_v5  ;;  %v23072_v20 = vpack.c.bf16 %v19578_v6, %v19577_v63 }
0x4655   : > { %v23104_v10 = vpack.c.bf16 %v19610_v54, %v19609_v23 }
0x4656   : > { %v25358_v9 = vmul.f32 %v19330_v61, %v24356_v33  ;;  %v19596_v61 = vld [vmem:[#allocation13 + $0xae8] sm:$0xff] }
0x4658   : > { %19485 = vmatmul.mubr.f32.vlgmr.msra.gmra.mrb[176].mxu1 %v25358_v9  ;;  %19556 = vmatmul.mubr.f32.vlgmr.msra.gmra.mrb[92].mxu0 %v25358_v9 }
0x4659   : > { %23053 = vmatpush3.bf16.msra.mxu1 %v23052_v18  ;;  %23085 = vmatpush3.bf16.msra.mxu0 %v23084_v3  ;;  %v19627_v18 = vld [vmem:[#allocation13 + $0xbe0] sm:$0xff]  ;;  %v19628_v3 = vld [vmem:[#allocation13 + $0xbe8] sm:$0xff] }
0x465a   : > { %23055 = vmatprep.subr.bf16.mxu1 %v23054_v21  ;;  %23087 = vmatprep.subr.bf16.mxu0 %v23086_v14  ;;  %v23074_v21 = vpack.c.bf16 %v19596_v61, %v19595_v2  ;;  %v23106_v14 = vpack.c.bf16 %v19628_v3, %v19627_v18 }
0x465d   : > { %23057 = vmatpush3.bf16.msra.mxu1 %v23056_v62  ;;  %23089 = vmatpush3.bf16.msra.mxu0 %v23088_v29  ;;  %v19597_v62 = vld [vmem:[#allocation13 + $0xaf0] sm:$0xff]  ;;  %v19598_v29 = vld [vmem:[#allocation13 + $0xaf8] sm:$0xff] }
0x465e   : > { %23059 = vmatprep.subr.bf16.mxu1 %v23058_v24  ;;  %23091 = vmatprep.subr.bf16.mxu0 %v23090_v22  ;;  %v23078_v51 = vpack.c.bf16 %v19598_v29, %v19597_v62  ;;  %v19630_v24 = vld [vmem:[#allocation13 + $0xbf8] sm:$0xff]  ;;  %v19581_v22 = vld [vmem:[#allocation13 + $0xa70] sm:$0xff] }
0x465f   : > { %v23110_v27 = vpack.c.bf16 %v19630_v24, %v19629_v46  ;;  %v23080_v36 = vpack.c.bf16 %v19582_v34, %v19581_v22 }
0x4661   : > { %23061 = vmatpush3.bf16.msra.mxu1 %v23060_v55  ;;  %23093 = vmatpush3.bf16.msra.mxu0 %v23092_v39  ;;  %v19398_v55 = vld [vmem:[#allocation11 + $0x14] sm:$0xf] }
0x4662   : > { %23063 = vmatprep.subr.bf16.mxu1 %v23062_v56  ;;  %23095 = vmatprep.subr.bf16.mxu0 %v23094_v30  ;;  %v19403_v39 = vrot.slane %v19398_v55, %v24146_v52  ;;  %v19411_v40 = vrot.slane %v19398_v55, %v24260_v45  ;;  %v19407_v47 = vrot.slane %v19398_v55, %v24153_v58  ;;  %v20145_v45 = vld [vmem:[#allocation14 + $0x5] ss:$0 sm:$0xff] }
0x4663   : > { %v19415_v56 = vrot.slane %v19398_v55, %v24366_v8 }
0x4665   : > { %23065 = vmatpush3.bf16.msra.mxu1 %v23064_v4  ;;  %23097 = vmatpush3.bf16.msra.mxu0 %v23096_v17 }
0x4666   : > { %23067 = vmatprep.subr.bf16.mxu1 %v23066_v11  ;;  %23099 = vmatprep.subr.bf16.mxu0 %v23098_v49 }
0x4669   : > { %23069 = vmatpush3.bf16.msra.mxu1 %v23068_v59  ;;  %23101 = vmatpush3.bf16.msra.mxu0 %v23100_v60 }
0x466a   : > { %23071 = vmatprep.subr.bf16.mxu1 %v23070_v12  ;;  %23103 = vmatprep.subr.bf16.mxu0 %v23102_v15 }
0x466d   : > { %23073 = vmatpush3.bf16.msra.mxu1 %v23072_v20  ;;  %23105 = vmatpush3.bf16.msra.mxu0 %v23104_v10 }
0x466e   : > { %23075 = vmatprep.subr.bf16.mxu1 %v23074_v21  ;;  %23107 = vmatprep.subr.bf16.mxu0 %v23106_v14 }
0x4671   : > { %23077 = vmatpush3.bf16.msra.mxu1 %v23076_v0  ;;  %23109 = vmatpush3.bf16.msra.mxu0 %v23108_v19 }
0x4672   : > { %23079 = vmatprep.subr.bf16.mxu1 %v23078_v51  ;;  %23111 = vmatprep.subr.bf16.mxu0 %v23110_v27 }
0x4675   : > { %23081 = vmatpush3.bf16.msra.mxu1 %v23080_v36  ;;  %23113 = vmatpush3.bf16.msra.mxu0 %v23112_v32 }
0x472b   : > { %v19486_v30 = vpop.f32.mrb[176].mxu1  ;;  %v19557_v1 = vpop.f32.mrb[92].mxu0 }
0x472c   : > { %v19487_v42 = vadd.f32 %v19486_v30, %v19403_v39  ;;  %v19558_v53 = vadd.f32 %v19557_v1, %v19411_v40  ;;  %v19488_v43 = vpop.f32.mrb[177].mxu1  ;;  %v19559_v44 = vpop.f32.mrb[93].mxu0 }
0x472d   : > { %v19489_v28 = vadd.f32 %v19488_v43, %v19407_v47  ;;  %v19560_v4 = vadd.f32 %v19559_v44, %v19415_v56 }
0x472e   : > { %v19562_v35 = vmax.f32 %v19487_v42, 0.0  ;;  %v19564_v11 = vmax.f32 %v19558_v53, 0.0 }
0x472f   : > { %v19563_v17 = vmax.f32 %v19489_v28, 0.0  ;;  %v19565_v57 = vmax.f32 %v19560_v4, 0.0 }
0x4731   : > { %19703 = vmatprep.mubr.f32.mxu1 %v19563_v17  ;;  %19773 = vmatprep.mubr.f32.mxu0 %v19565_v57 }
0x4732   : > { %19704 = vmatmul.mubr.f32.vlgmr.msra.gmra.mrb[178].mxu1 %v19562_v35  ;;  %19774 = vmatmul.mubr.f32.vlgmr.msra.gmra.mrb[94].mxu0 %v19564_v11 }
0x4805   : > { %v20928_v52 = vpop.f32.mrb[178].mxu1  ;;  %v20963_v58 = vpop.f32.mrb[94].mxu0 }
0x4806   : > { %v20929_v8 = vpop.f32.mrb[179].mxu1  ;;  %v20964_v49 = vpop.f32.mrb[95].mxu0 }
0x4807   : > { %v20930_v37 = vadd.f32 %v20929_v8, %v20928_v52  ;;  %v20965_v48 = vadd.f32 %v20964_v49, %v20963_v58 }
0x4809   : > { %v19706_v50 = vadd.f32 %v20930_v37, %v20145_v45 }
0x480b   : > { %v19776_v7 = vadd.f32 %v20965_v48, %v19706_v50 }
0x480d   : > { %v19779_v5 = vadd.f32 %v19776_v7, %v25358_v9 }
0x480f   : > { %19780 = vadd.xlane.f32.xlu0 %v19779_v5 }
0x489c   : > { %v19781_v41 = vpop.xlane.xlu0 %19780 }
0x489d   : > { %v19782_v59 = vmul.f32 0.0078125, %v19781_v41 }
0x489f   : > { %v19783_v60 = vsub.f32 %v19779_v5, %v19782_v59 }
0x48a1   : > { %v19784_v63 = vmul.f32 %v19783_v60, %v19783_v60 }
0x48a3   : > { %19785 = vadd.xlane.f32.xlu0 %v19784_v63 }
0x4930   : > { %v19786_v6 = vpop.xlane.xlu0 %19785 }
0x4931   : > { %v19787_v12 = vmul.f32 0.007874016, %v19786_v6 }
0x4933   : > { %v19788_v15 = vadd.f32 1e-08, %v19787_v12 }
0x4935   : > { %23465 = vrsqrt.f32 %v19788_v15 }
0x493f   : > { %v23466_v23 = vpop.eup %23465 }
0x4940   : > { %v19790_v54 = vmul.f32 %v23466_v23, %v19783_v60 }
0x4942   : > { %v19791_v9 = vmul.f32 %v19790_v54, %v24356_v33 }
0x4944   : > { %19792 = vst [vmem:[%s518_s23] sm:$0xff] %v19791_v9 }
0x4945   : > { %23710 = shalt.err (!%p23707_p10)
}
0x4946   : > { %s23711_s12 = scalar_lea.hbm %s25373_s13, 128  ;;  %s23715_s26 = scalar_lea.hbm %s25426_s11, 256 }
0x4947   : > { %p23712_p12 = scmp.ne.s32.totalorder %s25373_s13, %s23711_s12  ;;  %p23716_p3 = scmp.lt.u32.totalorder %s25373_s13, %s25426_s11 }
0x4948   : > { %p23717_p4 = scmp.lt.u32.totalorder %s23715_s26, %s23711_s12  ;;  %p23719_p8 = scmp.lt.u32.totalorder %s23711_s12, %s25373_s13 }
0x4949   : > { %p23713_p1 = pnand %p23712_p12, %p25468_p11 }
0x494a   : > { %p23718_p7 = por %p23717_p4, %p23716_p3 }
0x494b   : > { %p23714_p2 = pneg %p23713_p1 }
0x494c   : > { %p23720_p13 = por %p23719_p8, %p23718_p7 }
0x494e   : > { %p23721_p0 = pnand %p23720_p13, %p23714_p2 }
0x4950   : > { %23724 = shalt.err (!%p23721_p0)
}
0x4951   : > { %23146 = dma.vmem_to_hbm [thread:$0]  (%p25468_p11), %s25375_s28, 128, %s25373_s13, %s19794_s30  }
0x4952 PF: > { %s25469_s16 = sld [smem:[#allocation25_spill]]  ;;  %s25470_s17 = sld [smem:[#allocation23_spill]] }
0x4953   : > { %s25471_s23 = sld [smem:[#allocation28_spill]] }
0x4958   : > { %p23193_p5 = scmp.ge.s32.totalorder %s25469_s16, 2  ;;  %s19819_s20 = sand.u32 1, %s25470_s17  }
0x4959   : > { %p25472_p6 = scmp.ne.s32.totalorder %s25471_s23, 0  ;;  %s19820_s29 = scalar_lea.sflag [#allocation4], %s19819_s20 }
0x495b   : > { %p23174_p9 = pnand %p23193_p5, %p25472_p6 }
0x495d   : > { %23762 = dma.done.wait (!%p23174_p9), %s19820_s29, 128  }
0x495e   : > { %23764 = vsyncadd (!%p23174_p9), %s19820_s29, 4294967168  ;;  %s25473_s20 = sld [smem:[#allocation26_spill]]  ;;  %s25474_s15 = sld [smem:[#allocation24_spill]] }
0x495f   : > { %s25475_s19 = sld [smem:[#allocation27_spill]]  ;;  %s25476_s17 = smov %s23771_s18 }
0x4964   : > { %p26_p10 = scmp.ge.s32.totalorder %s25473_s20, 4   ;;  %s25477_s18 = smov %s25474_s15 }
0x4966   :  { %28 = sbr.rel (!%p26_p10) target bundleno = 10 (0xa), region = 178 }
0x496d   :  { %19825 = vsyncpa [#allocation3], 1 }
0x496e   :  { %19827 = vsyncpa [#allocation3 + $0x1], 1 }
0x496f   :  { %19828 = vsyncpa [#allocation6], 1 }
0x4970   :  { %19829 = vsyncpa [#allocation9], 1 }
0x4971   :  { %19830 = vsyncpa [#allocation12], 1 }
0x4972   :  { %19831 = vsyncpa [#allocation15], 1 }
0x4973   :  { %19832 = vsyncpa [#allocation4], 1 }
0x4974   :  { %19834 = vsyncpa [#allocation4 + $0x1], 1 }

</bundles_post_ra>
